<compile_context>
chip_gen: v5e
topology: v5e:2x2
jax: 0.10.0
libtpu: 0.0.40
codegen_flags: <defaults>
</compile_context>

<pallas_src>
import jax
import jax.numpy as jnp
import numpy as np
from jax import lax
from jax.experimental import pallas as pl
from jax.experimental.pallas import tpu as pltpu

K = 3  # kernel_sizes = [3, 3, ...]


def _tree_sum(parts):
    """Pairwise (tree) sum of a list of same-shaped arrays."""
    while len(parts) > 1:
        nxt = [parts[i] + parts[i + 1] for i in range(0, len(parts) - 1, 2)]
        if len(parts) % 2:
            nxt.append(parts[-1])
        parts = nxt
    return parts[0]


def _conv3x3_bn_relu(x, w_taps, scale, bias):
    """3x3 valid conv + folded BatchNorm(eval) + ReLU, channel contraction on MXU.

    x:      (H, W, Cin)  activation (channels-last -> channels on lanes)
    w_taps: (9, Cout, Cin) pre-transposed tap weights, tap t = dy*3 + dx
    scale:  (1, Cout)   bias: (1, Cout)
    returns (H-2, W-2, Cout)
    """
    H, W, Cin = x.shape
    Cout = w_taps.shape[1]
    Ho, Wo = H - K + 1, W - K + 1
    parts = []
    for dy in range(K):
        for dx in range(K):
            t = dy * K + dx
            win = x[dy:dy + Ho, dx:dx + Wo, :]                       # (Ho, Wo, Cin)
            wt = jnp.broadcast_to(w_taps[t], (Ho, Cout, Cin))        # (Ho, Cout, Cin)
            # Batched MXU matmul, contracting the channel axis.
            parts.append(jnp.einsum('hwc,hkc->hwk', win, wt,
                                    preferred_element_type=jnp.float32))
    y = _tree_sum(parts)                                             # (Ho, Wo, Cout)
    return jnp.maximum(y * scale + bias, 0.0)


def dqn_kernel(img_ref, extra_ref,
               w1_ref, s1_ref, b1_ref,
               w2_ref, s2_ref, b2_ref,
               fwa_ref, fwb_ref, fb1_ref,
               fw2_ref, fb2_ref, fw3_ref, fb3_ref,
               out_ref):
    # One sample per grid step (batch dim squeezed by the BlockSpec).
    x = img_ref[...]                                                 # (H, W, C0)

    y1 = _conv3x3_bn_relu(x, w1_ref[...], s1_ref[...], b1_ref[...])   # (H1, W1, C1)
    y2 = _conv3x3_bn_relu(y1, w2_ref[...], s2_ref[...], b2_ref[...])  # (H2, W2, C2)

    # AdaptiveAvgPool2d(1): plain sum here; the 1/(H2*W2) factor is folded into fwa.
    pooled = jnp.sum(jnp.sum(y2, axis=0), axis=0, keepdims=True)      # (1, C2)

    # cat((pooled, extra)) @ fc1  ==  pooled@fwa + extra@fwb  (lane-padded to 128)
    extra = extra_ref[...]                                            # (1, EXTRA)
    h1 = jnp.maximum(
        jnp.dot(pooled, fwa_ref[...], preferred_element_type=jnp.float32)
        + jnp.dot(extra, fwb_ref[...], preferred_element_type=jnp.float32)
        + fb1_ref[...], 0.0)
    h2 = jnp.maximum(
        jnp.dot(h1, fw2_ref[...], preferred_element_type=jnp.float32)
        + fb2_ref[...], 0.0)
    out_ref[...] = (jnp.dot(h2, fw3_ref[...], preferred_element_type=jnp.float32)
                    + fb3_ref[...])                                   # (1, AP) lane-dense


def dqn_forward(x_img_nchw, x_extra, kp):
    # layout glue: NCHW (torch) -> NHWC (channels on TPU lanes).
    img = jnp.transpose(x_img_nchw, (0, 2, 3, 1)).astype(jnp.float32)
    N, H, W, C0 = img.shape
    H2, W2 = H - 2 * (K - 1), W - 2 * (K - 1)
    extra = x_extra.astype(jnp.float32)[:, None, :]                   # (N, 1, EXTRA)
    EXTRA = extra.shape[-1]

    C1 = kp['w1_taps_t'].shape[1]
    C2 = kp['w2_taps_t'].shape[1]
    A = kp['fw3'].shape[1]
    HP = kp['fw2_pad'].shape[0]
    AP = kp['fw3_pad'].shape[1]

    # Fold the AdaptiveAvgPool 1/(H2*W2) scale into the first FC weight (host glue).
    fwa = kp['fwa_pad'] * (1.0 / float(H2 * W2))

    def full(shape):
        return pl.BlockSpec(shape, lambda n: (0,) * len(shape))

    grid_spec = pltpu.PrefetchScalarGridSpec(
        num_scalar_prefetch=0,
        grid=(N,),
        in_specs=[
            pl.BlockSpec((None, H, W, C0), lambda n: (n, 0, 0, 0)),   # image (per sample)
            pl.BlockSpec((None, 1, EXTRA), lambda n: (n, 0, 0)),      # extra state
            full((K * K, C1, C0)),                                    # conv1 taps (Cout, Cin)
            full((1, C1)), full((1, C1)),                             # BN1 scale / bias
            full((K * K, C2, C1)),                                    # conv2 taps
            full((1, C2)), full((1, C2)),                             # BN2 scale / bias
            full((C2, HP)), full((EXTRA, HP)), full((1, HP)),         # fc1 (split + bias)
            full((HP, HP)), full((1, HP)),                            # fc2
            full((HP, AP)), full((1, AP)),                            # fc3
        ],
        out_specs=pl.BlockSpec((None, 1, AP), lambda n: (n, 0, 0)),
    )

    out = pl.pallas_call(
        dqn_kernel,
        out_shape=jax.ShapeDtypeStruct((N, 1, AP), jnp.float32),
        grid_spec=grid_spec,
        compiler_params=pltpu.CompilerParams(
            dimension_semantics=("parallel",)),
    )(img, extra,
      kp['w1_taps_t'], kp['s1'], kp['b1'],
      kp['w2_taps_t'], kp['s2'], kp['b2'],
      fwa, kp['fwb_pad'], kp['fb1_pad'],
      kp['fw2_pad'], kp['fb2_pad'],
      kp['fw3_pad'], kp['fb3_pad'])
    return out[:, 0, :A]


def init_params(key, action_size):
    # Deterministic in-script init mirroring the module's __init__ shapes.
    EXTRA = 2
    h = 2 * action_size
    C0, C1, C2 = 3, 16, 64
    HP, AP = 128, 128               # lane-padded hidden / action widths (zero-padded)
    eps = 1e-5
    ks = jax.random.split(key, 10)

    def u(k, shape, fan_in):
        b = 1.0 / np.sqrt(fan_in)
        return jax.random.uniform(k, shape, jnp.float32, -b, b)

    w1 = u(ks[0], (K, K, C0, C1), C0 * K * K)        # HWIO
    cb1 = u(ks[1], (C1,), C0 * K * K)
    w2 = u(ks[2], (K, K, C1, C2), C1 * K * K)        # HWIO
    cb2 = u(ks[3], (C2,), C1 * K * K)

    # TODO(synk): BatchNorm implemented in eval mode (folded per-channel affine with
    # default running stats); training-mode batch statistics not reproduced.
    g1, be1, mu1, v1 = jnp.ones(C1), jnp.zeros(C1), jnp.zeros(C1), jnp.ones(C1)
    g2, be2, mu2, v2 = jnp.ones(C2), jnp.zeros(C2), jnp.zeros(C2), jnp.ones(C2)
    s1 = g1 / jnp.sqrt(v1 + eps)
    b1 = (cb1 - mu1) * s1 + be1
    s2 = g2 / jnp.sqrt(v2 + eps)
    b2 = (cb2 - mu2) * s2 + be2

    fw1 = u(ks[4], (C2 + EXTRA, h), C2 + EXTRA)
    fb1 = u(ks[5], (h,), C2 + EXTRA)
    fw2 = u(ks[6], (h, h), h)
    fb2 = u(ks[7], (h,), h)
    fw3 = u(ks[8], (h, action_size), h)
    fb3 = u(ks[9], (action_size,), h)

    def pad2(a, rows, cols):
        z = jnp.zeros((rows, cols), jnp.float32)
        return z.at[:a.shape[0], :a.shape[1]].set(a)

    return {
        # reference (unpadded) parameters
        'w1': w1, 'w2': w2,
        's1': s1.reshape(1, C1), 'b1': b1.reshape(1, C1),
        's2': s2.reshape(1, C2), 'b2': b2.reshape(1, C2),
        'fw1': fw1, 'fb1': fb1.reshape(1, h),
        'fw2': fw2, 'fb2': fb2.reshape(1, h),
        'fw3': fw3, 'fb3': fb3.reshape(1, action_size),
        # kernel-layout parameters
        'w1_taps_t': w1.reshape(K * K, C0, C1).transpose(0, 2, 1),   # (9, Cout, Cin)
        'w2_taps_t': w2.reshape(K * K, C1, C2).transpose(0, 2, 1),
        'fwa_pad': pad2(fw1[:C2], C2, HP),
        'fwb_pad': pad2(fw1[C2:], EXTRA, HP),
        'fb1_pad': pad2(fb1.reshape(1, h), 1, HP),
        'fw2_pad': pad2(fw2, HP, HP),
        'fb2_pad': pad2(fb2.reshape(1, h), 1, HP),
        'fw3_pad': pad2(fw3, HP, AP),
        'fb3_pad': pad2(fb3.reshape(1, action_size), 1, AP),
    }


def reference(img_nhwc, extra, p):
    # Pure-JAX reference of the PyTorch forward (eval-mode BN), for validation.
    dn = ('NHWC', 'HWIO', 'NHWC')
    y = lax.conv_general_dilated(img_nhwc, p['w1'], (1, 1), 'VALID',
                                 dimension_numbers=dn)
    y = jnp.maximum(y * p['s1'] + p['b1'], 0.0)
    y = lax.conv_general_dilated(y, p['w2'], (1, 1), 'VALID',
                                 dimension_numbers=dn)
    y = jnp.maximum(y * p['s2'] + p['b2'], 0.0)
    pooled = jnp.mean(y, axis=(1, 2))
    feat = jnp.concatenate([pooled, extra], axis=1)
    h1 = jnp.maximum(feat @ p['fw1'] + p['fb1'], 0.0)
    h2 = jnp.maximum(h1 @ p['fw2'] + p['fb2'], 0.0)
    return h2 @ p['fw3'] + p['fb3']


if __name__ == "__main__":
    key = jax.random.PRNGKey(0)
    action_size = 4                     # -> hidden h = 8
    N, H, W = 2, 16, 16
    k_img, k_ex, k_p = jax.random.split(key, 3)

    x_img = jax.random.normal(k_img, (N, 3, H, W), jnp.float32)   # NCHW, like torch x[0]
    x_extra = jax.random.normal(k_ex, (N, 2), jnp.float32)        # torch x[1]
    params = init_params(k_p, action_size)

    out = dqn_forward(x_img, x_extra, params)
    out = jax.block_until_ready(out)

    ref = reference(jnp.transpose(x_img, (0, 2, 3, 1)), x_extra, params)
    assert out.shape == (N, action_size)
    np.testing.assert_allclose(np.asarray(out), np.asarray(ref), rtol=1e-4, atol=1e-4)
    print("KERNEL_OK")
</pallas_src>

<mosaic_0001>
module attributes {stable_mosaic.version = 11 : i64} {
  func.func @dqn_kernel(%arg0: i32, %arg1: memref<1x16x16x3xf32, #tpu.memory_space<vmem>>, %arg2: memref<1x1x2xf32, #tpu.memory_space<vmem>>, %arg3: memref<9x16x3xf32, #tpu.memory_space<vmem>>, %arg4: memref<1x16xf32, #tpu.memory_space<vmem>>, %arg5: memref<1x16xf32, #tpu.memory_space<vmem>>, %arg6: memref<9x64x16xf32, #tpu.memory_space<vmem>>, %arg7: memref<1x64xf32, #tpu.memory_space<vmem>>, %arg8: memref<1x64xf32, #tpu.memory_space<vmem>>, %arg9: memref<64x128xf32, #tpu.memory_space<vmem>>, %arg10: memref<2x128xf32, #tpu.memory_space<vmem>>, %arg11: memref<1x128xf32, #tpu.memory_space<vmem>>, %arg12: memref<128x128xf32, #tpu.memory_space<vmem>>, %arg13: memref<1x128xf32, #tpu.memory_space<vmem>>, %arg14: memref<128x128xf32, #tpu.memory_space<vmem>>, %arg15: memref<1x128xf32, #tpu.memory_space<vmem>>, %arg16: memref<1x1x128xf32, #tpu.memory_space<vmem>>) attributes {dimension_semantics = [#tpu.dimension_semantics<parallel>], iteration_bounds = array<i64: 2>, scalar_prefetch = 0 : i64, scratch_operands = 0 : i64, tpu.core_type = #tpu.core_type<tc>, window_params = [{transform_indices = @transform_0, window_bounds = array<i64: 1, 16, 16, 3>}, {transform_indices = @transform_1, window_bounds = array<i64: 1, 1, 2>}, {pipeline_mode = #tpu.pipeline_mode<synchronous>, transform_indices = @transform_2, window_bounds = array<i64: 9, 16, 3>}, {pipeline_mode = #tpu.pipeline_mode<synchronous>, transform_indices = @transform_3, window_bounds = array<i64: 1, 16>}, {pipeline_mode = #tpu.pipeline_mode<synchronous>, transform_indices = @transform_4, window_bounds = array<i64: 1, 16>}, {pipeline_mode = #tpu.pipeline_mode<synchronous>, transform_indices = @transform_5, window_bounds = array<i64: 9, 64, 16>}, {pipeline_mode = #tpu.pipeline_mode<synchronous>, transform_indices = @transform_6, window_bounds = array<i64: 1, 64>}, {pipeline_mode = #tpu.pipeline_mode<synchronous>, transform_indices = @transform_7, window_bounds = array<i64: 1, 64>}, {pipeline_mode = #tpu.pipeline_mode<synchronous>, transform_indices = @transform_8, window_bounds = array<i64: 64, 128>}, {pipeline_mode = #tpu.pipeline_mode<synchronous>, transform_indices = @transform_9, window_bounds = array<i64: 2, 128>}, {pipeline_mode = #tpu.pipeline_mode<synchronous>, transform_indices = @transform_10, window_bounds = array<i64: 1, 128>}, {pipeline_mode = #tpu.pipeline_mode<synchronous>, transform_indices = @transform_11, window_bounds = array<i64: 128, 128>}, {pipeline_mode = #tpu.pipeline_mode<synchronous>, transform_indices = @transform_12, window_bounds = array<i64: 1, 128>}, {pipeline_mode = #tpu.pipeline_mode<synchronous>, transform_indices = @transform_13, window_bounds = array<i64: 128, 128>}, {pipeline_mode = #tpu.pipeline_mode<synchronous>, transform_indices = @transform_14, window_bounds = array<i64: 1, 128>}, {transform_indices = @transform_15, window_bounds = array<i64: 1, 1, 128>}]} {
    %c0 = arith.constant 0 : index
    %c0_0 = arith.constant 0 : index
    %c0_1 = arith.constant 0 : index
    %c0_2 = arith.constant 0 : index
    %0 = vector.load %arg1[%c0, %c0_0, %c0_1, %c0_2] : memref<1x16x16x3xf32, #tpu.memory_space<vmem>>, vector<1x16x16x3xf32>
    %1 = vector.shape_cast %0 : vector<1x16x16x3xf32> to vector<16x16x3xf32>
    %c0_3 = arith.constant 0 : index
    %c0_4 = arith.constant 0 : index
    %c0_5 = arith.constant 0 : index
    %2 = vector.load %arg3[%c0_3, %c0_4, %c0_5] : memref<9x16x3xf32, #tpu.memory_space<vmem>>, vector<9x16x3xf32>
    %c0_6 = arith.constant 0 : index
    %c0_7 = arith.constant 0 : index
    %3 = vector.load %arg4[%c0_6, %c0_7] : memref<1x16xf32, #tpu.memory_space<vmem>>, vector<1x16xf32>
    %c0_8 = arith.constant 0 : index
    %c0_9 = arith.constant 0 : index
    %4 = vector.load %arg5[%c0_8, %c0_9] : memref<1x16xf32, #tpu.memory_space<vmem>>, vector<1x16xf32>
    %5 = vector.extract_strided_slice %1 {offsets = [0, 0, 0], sizes = [14, 14, 3], strides = [1, 1, 1]} : vector<16x16x3xf32> to vector<14x14x3xf32>
    %6 = vector.extract_strided_slice %2 {offsets = [0, 0, 0], sizes = [1, 16, 3], strides = [1, 1, 1]} : vector<9x16x3xf32> to vector<1x16x3xf32>
    %7 = vector.shape_cast %6 : vector<1x16x3xf32> to vector<16x3xf32>
    %8 = vector.shape_cast %7 : vector<16x3xf32> to vector<1x16x3xf32>
    %9 = vector.broadcast %8 : vector<1x16x3xf32> to vector<14x16x3xf32>
    "tpu.trace_start"() <{level = 10 : i32, message = "hwc,hkc->hwk"}> : () -> ()
    %cst = arith.constant dense<0.000000e+00> : vector<14x14x16xf32>
    %10 = tpu.matmul %5, %9, %cst {dimension_numbers = #tpu.dot_dimension_numbers<[2], [2], [1], [1], [0, 0, 0, 1, 1, 1], [0], [0]>} : vector<14x14x3xf32>, vector<14x16x3xf32>, vector<14x14x16xf32> -> vector<14x14x16xf32>
    "tpu.trace_stop"() : () -> ()
    %11 = vector.extract_strided_slice %1 {offsets = [0, 1, 0], sizes = [14, 14, 3], strides = [1, 1, 1]} : vector<16x16x3xf32> to vector<14x14x3xf32>
    %12 = vector.extract_strided_slice %2 {offsets = [1, 0, 0], sizes = [1, 16, 3], strides = [1, 1, 1]} : vector<9x16x3xf32> to vector<1x16x3xf32>
    %13 = vector.shape_cast %12 : vector<1x16x3xf32> to vector<16x3xf32>
    %14 = vector.shape_cast %13 : vector<16x3xf32> to vector<1x16x3xf32>
    %15 = vector.broadcast %14 : vector<1x16x3xf32> to vector<14x16x3xf32>
    "tpu.trace_start"() <{level = 10 : i32, message = "hwc,hkc->hwk"}> : () -> ()
    %cst_10 = arith.constant dense<0.000000e+00> : vector<14x14x16xf32>
    %16 = tpu.matmul %11, %15, %cst_10 {dimension_numbers = #tpu.dot_dimension_numbers<[2], [2], [1], [1], [0, 0, 0, 1, 1, 1], [0], [0]>} : vector<14x14x3xf32>, vector<14x16x3xf32>, vector<14x14x16xf32> -> vector<14x14x16xf32>
    "tpu.trace_stop"() : () -> ()
    %17 = vector.extract_strided_slice %1 {offsets = [0, 2, 0], sizes = [14, 14, 3], strides = [1, 1, 1]} : vector<16x16x3xf32> to vector<14x14x3xf32>
    %18 = vector.extract_strided_slice %2 {offsets = [2, 0, 0], sizes = [1, 16, 3], strides = [1, 1, 1]} : vector<9x16x3xf32> to vector<1x16x3xf32>
    %19 = vector.shape_cast %18 : vector<1x16x3xf32> to vector<16x3xf32>
    %20 = vector.shape_cast %19 : vector<16x3xf32> to vector<1x16x3xf32>
    %21 = vector.broadcast %20 : vector<1x16x3xf32> to vector<14x16x3xf32>
    "tpu.trace_start"() <{level = 10 : i32, message = "hwc,hkc->hwk"}> : () -> ()
    %cst_11 = arith.constant dense<0.000000e+00> : vector<14x14x16xf32>
    %22 = tpu.matmul %17, %21, %cst_11 {dimension_numbers = #tpu.dot_dimension_numbers<[2], [2], [1], [1], [0, 0, 0, 1, 1, 1], [0], [0]>} : vector<14x14x3xf32>, vector<14x16x3xf32>, vector<14x14x16xf32> -> vector<14x14x16xf32>
    "tpu.trace_stop"() : () -> ()
    %23 = vector.extract_strided_slice %1 {offsets = [1, 0, 0], sizes = [14, 14, 3], strides = [1, 1, 1]} : vector<16x16x3xf32> to vector<14x14x3xf32>
    %24 = vector.extract_strided_slice %2 {offsets = [3, 0, 0], sizes = [1, 16, 3], strides = [1, 1, 1]} : vector<9x16x3xf32> to vector<1x16x3xf32>
    %25 = vector.shape_cast %24 : vector<1x16x3xf32> to vector<16x3xf32>
    %26 = vector.shape_cast %25 : vector<16x3xf32> to vector<1x16x3xf32>
    %27 = vector.broadcast %26 : vector<1x16x3xf32> to vector<14x16x3xf32>
    "tpu.trace_start"() <{level = 10 : i32, message = "hwc,hkc->hwk"}> : () -> ()
    %cst_12 = arith.constant dense<0.000000e+00> : vector<14x14x16xf32>
    %28 = tpu.matmul %23, %27, %cst_12 {dimension_numbers = #tpu.dot_dimension_numbers<[2], [2], [1], [1], [0, 0, 0, 1, 1, 1], [0], [0]>} : vector<14x14x3xf32>, vector<14x16x3xf32>, vector<14x14x16xf32> -> vector<14x14x16xf32>
    "tpu.trace_stop"() : () -> ()
    %29 = vector.extract_strided_slice %1 {offsets = [1, 1, 0], sizes = [14, 14, 3], strides = [1, 1, 1]} : vector<16x16x3xf32> to vector<14x14x3xf32>
    %30 = vector.extract_strided_slice %2 {offsets = [4, 0, 0], sizes = [1, 16, 3], strides = [1, 1, 1]} : vector<9x16x3xf32> to vector<1x16x3xf32>
    %31 = vector.shape_cast %30 : vector<1x16x3xf32> to vector<16x3xf32>
    %32 = vector.shape_cast %31 : vector<16x3xf32> to vector<1x16x3xf32>
    %33 = vector.broadcast %32 : vector<1x16x3xf32> to vector<14x16x3xf32>
    "tpu.trace_start"() <{level = 10 : i32, message = "hwc,hkc->hwk"}> : () -> ()
    %cst_13 = arith.constant dense<0.000000e+00> : vector<14x14x16xf32>
    %34 = tpu.matmul %29, %33, %cst_13 {dimension_numbers = #tpu.dot_dimension_numbers<[2], [2], [1], [1], [0, 0, 0, 1, 1, 1], [0], [0]>} : vector<14x14x3xf32>, vector<14x16x3xf32>, vector<14x14x16xf32> -> vector<14x14x16xf32>
    "tpu.trace_stop"() : () -> ()
    %35 = vector.extract_strided_slice %1 {offsets = [1, 2, 0], sizes = [14, 14, 3], strides = [1, 1, 1]} : vector<16x16x3xf32> to vector<14x14x3xf32>
    %36 = vector.extract_strided_slice %2 {offsets = [5, 0, 0], sizes = [1, 16, 3], strides = [1, 1, 1]} : vector<9x16x3xf32> to vector<1x16x3xf32>
    %37 = vector.shape_cast %36 : vector<1x16x3xf32> to vector<16x3xf32>
    %38 = vector.shape_cast %37 : vector<16x3xf32> to vector<1x16x3xf32>
    %39 = vector.broadcast %38 : vector<1x16x3xf32> to vector<14x16x3xf32>
    "tpu.trace_start"() <{level = 10 : i32, message = "hwc,hkc->hwk"}> : () -> ()
    %cst_14 = arith.constant dense<0.000000e+00> : vector<14x14x16xf32>
    %40 = tpu.matmul %35, %39, %cst_14 {dimension_numbers = #tpu.dot_dimension_numbers<[2], [2], [1], [1], [0, 0, 0, 1, 1, 1], [0], [0]>} : vector<14x14x3xf32>, vector<14x16x3xf32>, vector<14x14x16xf32> -> vector<14x14x16xf32>
    "tpu.trace_stop"() : () -> ()
    %41 = vector.extract_strided_slice %1 {offsets = [2, 0, 0], sizes = [14, 14, 3], strides = [1, 1, 1]} : vector<16x16x3xf32> to vector<14x14x3xf32>
    %42 = vector.extract_strided_slice %2 {offsets = [6, 0, 0], sizes = [1, 16, 3], strides = [1, 1, 1]} : vector<9x16x3xf32> to vector<1x16x3xf32>
    %43 = vector.shape_cast %42 : vector<1x16x3xf32> to vector<16x3xf32>
    %44 = vector.shape_cast %43 : vector<16x3xf32> to vector<1x16x3xf32>
    %45 = vector.broadcast %44 : vector<1x16x3xf32> to vector<14x16x3xf32>
    "tpu.trace_start"() <{level = 10 : i32, message = "hwc,hkc->hwk"}> : () -> ()
    %cst_15 = arith.constant dense<0.000000e+00> : vector<14x14x16xf32>
    %46 = tpu.matmul %41, %45, %cst_15 {dimension_numbers = #tpu.dot_dimension_numbers<[2], [2], [1], [1], [0, 0, 0, 1, 1, 1], [0], [0]>} : vector<14x14x3xf32>, vector<14x16x3xf32>, vector<14x14x16xf32> -> vector<14x14x16xf32>
    "tpu.trace_stop"() : () -> ()
    %47 = vector.extract_strided_slice %1 {offsets = [2, 1, 0], sizes = [14, 14, 3], strides = [1, 1, 1]} : vector<16x16x3xf32> to vector<14x14x3xf32>
    %48 = vector.extract_strided_slice %2 {offsets = [7, 0, 0], sizes = [1, 16, 3], strides = [1, 1, 1]} : vector<9x16x3xf32> to vector<1x16x3xf32>
    %49 = vector.shape_cast %48 : vector<1x16x3xf32> to vector<16x3xf32>
    %50 = vector.shape_cast %49 : vector<16x3xf32> to vector<1x16x3xf32>
    %51 = vector.broadcast %50 : vector<1x16x3xf32> to vector<14x16x3xf32>
    "tpu.trace_start"() <{level = 10 : i32, message = "hwc,hkc->hwk"}> : () -> ()
    %cst_16 = arith.constant dense<0.000000e+00> : vector<14x14x16xf32>
    %52 = tpu.matmul %47, %51, %cst_16 {dimension_numbers = #tpu.dot_dimension_numbers<[2], [2], [1], [1], [0, 0, 0, 1, 1, 1], [0], [0]>} : vector<14x14x3xf32>, vector<14x16x3xf32>, vector<14x14x16xf32> -> vector<14x14x16xf32>
    "tpu.trace_stop"() : () -> ()
    %53 = vector.extract_strided_slice %1 {offsets = [2, 2, 0], sizes = [14, 14, 3], strides = [1, 1, 1]} : vector<16x16x3xf32> to vector<14x14x3xf32>
    %54 = vector.extract_strided_slice %2 {offsets = [8, 0, 0], sizes = [1, 16, 3], strides = [1, 1, 1]} : vector<9x16x3xf32> to vector<1x16x3xf32>
    %55 = vector.shape_cast %54 : vector<1x16x3xf32> to vector<16x3xf32>
    %56 = vector.shape_cast %55 : vector<16x3xf32> to vector<1x16x3xf32>
    %57 = vector.broadcast %56 : vector<1x16x3xf32> to vector<14x16x3xf32>
    "tpu.trace_start"() <{level = 10 : i32, message = "hwc,hkc->hwk"}> : () -> ()
    %cst_17 = arith.constant dense<0.000000e+00> : vector<14x14x16xf32>
    %58 = tpu.matmul %53, %57, %cst_17 {dimension_numbers = #tpu.dot_dimension_numbers<[2], [2], [1], [1], [0, 0, 0, 1, 1, 1], [0], [0]>} : vector<14x14x3xf32>, vector<14x16x3xf32>, vector<14x14x16xf32> -> vector<14x14x16xf32>
    "tpu.trace_stop"() : () -> ()
    %59 = arith.addf %10, %16 : vector<14x14x16xf32>
    %60 = arith.addf %22, %28 : vector<14x14x16xf32>
    %61 = arith.addf %34, %40 : vector<14x14x16xf32>
    %62 = arith.addf %46, %52 : vector<14x14x16xf32>
    %63 = arith.addf %59, %60 : vector<14x14x16xf32>
    %64 = arith.addf %61, %62 : vector<14x14x16xf32>
    %65 = arith.addf %63, %64 : vector<14x14x16xf32>
    %66 = arith.addf %65, %58 : vector<14x14x16xf32>
    %67 = vector.shape_cast %3 : vector<1x16xf32> to vector<1x1x16xf32>
    %68 = vector.broadcast %67 : vector<1x1x16xf32> to vector<14x14x16xf32>
    %69 = arith.mulf %66, %68 : vector<14x14x16xf32>
    %70 = vector.shape_cast %4 : vector<1x16xf32> to vector<1x1x16xf32>
    %71 = vector.broadcast %70 : vector<1x1x16xf32> to vector<14x14x16xf32>
    %72 = arith.addf %69, %71 : vector<14x14x16xf32>
    %cst_18 = arith.constant 0.000000e+00 : f32
    %73 = vector.broadcast %cst_18 : f32 to vector<14x14x16xf32>
    %74 = arith.maximumf %72, %73 : vector<14x14x16xf32>
    %c0_19 = arith.constant 0 : index
    %c0_20 = arith.constant 0 : index
    %c0_21 = arith.constant 0 : index
    %75 = vector.load %arg6[%c0_19, %c0_20, %c0_21] : memref<9x64x16xf32, #tpu.memory_space<vmem>>, vector<9x64x16xf32>
    %c0_22 = arith.constant 0 : index
    %c0_23 = arith.constant 0 : index
    %76 = vector.load %arg7[%c0_22, %c0_23] : memref<1x64xf32, #tpu.memory_space<vmem>>, vector<1x64xf32>
    %c0_24 = arith.constant 0 : index
    %c0_25 = arith.constant 0 : index
    %77 = vector.load %arg8[%c0_24, %c0_25] : memref<1x64xf32, #tpu.memory_space<vmem>>, vector<1x64xf32>
    %78 = vector.extract_strided_slice %74 {offsets = [0, 0, 0], sizes = [12, 12, 16], strides = [1, 1, 1]} : vector<14x14x16xf32> to vector<12x12x16xf32>
    %79 = vector.extract_strided_slice %75 {offsets = [0, 0, 0], sizes = [1, 64, 16], strides = [1, 1, 1]} : vector<9x64x16xf32> to vector<1x64x16xf32>
    %80 = vector.shape_cast %79 : vector<1x64x16xf32> to vector<64x16xf32>
    %81 = vector.shape_cast %80 : vector<64x16xf32> to vector<1x64x16xf32>
    %82 = vector.broadcast %81 : vector<1x64x16xf32> to vector<12x64x16xf32>
    "tpu.trace_start"() <{level = 10 : i32, message = "hwc,hkc->hwk"}> : () -> ()
    %cst_26 = arith.constant dense<0.000000e+00> : vector<12x12x64xf32>
    %83 = tpu.matmul %78, %82, %cst_26 {dimension_numbers = #tpu.dot_dimension_numbers<[2], [2], [1], [1], [0, 0, 0, 1, 1, 1], [0], [0]>} : vector<12x12x16xf32>, vector<12x64x16xf32>, vector<12x12x64xf32> -> vector<12x12x64xf32>
    "tpu.trace_stop"() : () -> ()
    %84 = vector.extract_strided_slice %74 {offsets = [0, 1, 0], sizes = [12, 12, 16], strides = [1, 1, 1]} : vector<14x14x16xf32> to vector<12x12x16xf32>
    %85 = vector.extract_strided_slice %75 {offsets = [1, 0, 0], sizes = [1, 64, 16], strides = [1, 1, 1]} : vector<9x64x16xf32> to vector<1x64x16xf32>
    %86 = vector.shape_cast %85 : vector<1x64x16xf32> to vector<64x16xf32>
    %87 = vector.shape_cast %86 : vector<64x16xf32> to vector<1x64x16xf32>
    %88 = vector.broadcast %87 : vector<1x64x16xf32> to vector<12x64x16xf32>
    "tpu.trace_start"() <{level = 10 : i32, message = "hwc,hkc->hwk"}> : () -> ()
    %cst_27 = arith.constant dense<0.000000e+00> : vector<12x12x64xf32>
    %89 = tpu.matmul %84, %88, %cst_27 {dimension_numbers = #tpu.dot_dimension_numbers<[2], [2], [1], [1], [0, 0, 0, 1, 1, 1], [0], [0]>} : vector<12x12x16xf32>, vector<12x64x16xf32>, vector<12x12x64xf32> -> vector<12x12x64xf32>
    "tpu.trace_stop"() : () -> ()
    %90 = vector.extract_strided_slice %74 {offsets = [0, 2, 0], sizes = [12, 12, 16], strides = [1, 1, 1]} : vector<14x14x16xf32> to vector<12x12x16xf32>
    %91 = vector.extract_strided_slice %75 {offsets = [2, 0, 0], sizes = [1, 64, 16], strides = [1, 1, 1]} : vector<9x64x16xf32> to vector<1x64x16xf32>
    %92 = vector.shape_cast %91 : vector<1x64x16xf32> to vector<64x16xf32>
    %93 = vector.shape_cast %92 : vector<64x16xf32> to vector<1x64x16xf32>
    %94 = vector.broadcast %93 : vector<1x64x16xf32> to vector<12x64x16xf32>
    "tpu.trace_start"() <{level = 10 : i32, message = "hwc,hkc->hwk"}> : () -> ()
    %cst_28 = arith.constant dense<0.000000e+00> : vector<12x12x64xf32>
    %95 = tpu.matmul %90, %94, %cst_28 {dimension_numbers = #tpu.dot_dimension_numbers<[2], [2], [1], [1], [0, 0, 0, 1, 1, 1], [0], [0]>} : vector<12x12x16xf32>, vector<12x64x16xf32>, vector<12x12x64xf32> -> vector<12x12x64xf32>
    "tpu.trace_stop"() : () -> ()
    %96 = vector.extract_strided_slice %74 {offsets = [1, 0, 0], sizes = [12, 12, 16], strides = [1, 1, 1]} : vector<14x14x16xf32> to vector<12x12x16xf32>
    %97 = vector.extract_strided_slice %75 {offsets = [3, 0, 0], sizes = [1, 64, 16], strides = [1, 1, 1]} : vector<9x64x16xf32> to vector<1x64x16xf32>
    %98 = vector.shape_cast %97 : vector<1x64x16xf32> to vector<64x16xf32>
    %99 = vector.shape_cast %98 : vector<64x16xf32> to vector<1x64x16xf32>
    %100 = vector.broadcast %99 : vector<1x64x16xf32> to vector<12x64x16xf32>
    "tpu.trace_start"() <{level = 10 : i32, message = "hwc,hkc->hwk"}> : () -> ()
    %cst_29 = arith.constant dense<0.000000e+00> : vector<12x12x64xf32>
    %101 = tpu.matmul %96, %100, %cst_29 {dimension_numbers = #tpu.dot_dimension_numbers<[2], [2], [1], [1], [0, 0, 0, 1, 1, 1], [0], [0]>} : vector<12x12x16xf32>, vector<12x64x16xf32>, vector<12x12x64xf32> -> vector<12x12x64xf32>
    "tpu.trace_stop"() : () -> ()
    %102 = vector.extract_strided_slice %74 {offsets = [1, 1, 0], sizes = [12, 12, 16], strides = [1, 1, 1]} : vector<14x14x16xf32> to vector<12x12x16xf32>
    %103 = vector.extract_strided_slice %75 {offsets = [4, 0, 0], sizes = [1, 64, 16], strides = [1, 1, 1]} : vector<9x64x16xf32> to vector<1x64x16xf32>
    %104 = vector.shape_cast %103 : vector<1x64x16xf32> to vector<64x16xf32>
    %105 = vector.shape_cast %104 : vector<64x16xf32> to vector<1x64x16xf32>
    %106 = vector.broadcast %105 : vector<1x64x16xf32> to vector<12x64x16xf32>
    "tpu.trace_start"() <{level = 10 : i32, message = "hwc,hkc->hwk"}> : () -> ()
    %cst_30 = arith.constant dense<0.000000e+00> : vector<12x12x64xf32>
    %107 = tpu.matmul %102, %106, %cst_30 {dimension_numbers = #tpu.dot_dimension_numbers<[2], [2], [1], [1], [0, 0, 0, 1, 1, 1], [0], [0]>} : vector<12x12x16xf32>, vector<12x64x16xf32>, vector<12x12x64xf32> -> vector<12x12x64xf32>
    "tpu.trace_stop"() : () -> ()
    %108 = vector.extract_strided_slice %74 {offsets = [1, 2, 0], sizes = [12, 12, 16], strides = [1, 1, 1]} : vector<14x14x16xf32> to vector<12x12x16xf32>
    %109 = vector.extract_strided_slice %75 {offsets = [5, 0, 0], sizes = [1, 64, 16], strides = [1, 1, 1]} : vector<9x64x16xf32> to vector<1x64x16xf32>
    %110 = vector.shape_cast %109 : vector<1x64x16xf32> to vector<64x16xf32>
    %111 = vector.shape_cast %110 : vector<64x16xf32> to vector<1x64x16xf32>
    %112 = vector.broadcast %111 : vector<1x64x16xf32> to vector<12x64x16xf32>
    "tpu.trace_start"() <{level = 10 : i32, message = "hwc,hkc->hwk"}> : () -> ()
    %cst_31 = arith.constant dense<0.000000e+00> : vector<12x12x64xf32>
    %113 = tpu.matmul %108, %112, %cst_31 {dimension_numbers = #tpu.dot_dimension_numbers<[2], [2], [1], [1], [0, 0, 0, 1, 1, 1], [0], [0]>} : vector<12x12x16xf32>, vector<12x64x16xf32>, vector<12x12x64xf32> -> vector<12x12x64xf32>
    "tpu.trace_stop"() : () -> ()
    %114 = vector.extract_strided_slice %74 {offsets = [2, 0, 0], sizes = [12, 12, 16], strides = [1, 1, 1]} : vector<14x14x16xf32> to vector<12x12x16xf32>
    %115 = vector.extract_strided_slice %75 {offsets = [6, 0, 0], sizes = [1, 64, 16], strides = [1, 1, 1]} : vector<9x64x16xf32> to vector<1x64x16xf32>
    %116 = vector.shape_cast %115 : vector<1x64x16xf32> to vector<64x16xf32>
    %117 = vector.shape_cast %116 : vector<64x16xf32> to vector<1x64x16xf32>
    %118 = vector.broadcast %117 : vector<1x64x16xf32> to vector<12x64x16xf32>
    "tpu.trace_start"() <{level = 10 : i32, message = "hwc,hkc->hwk"}> : () -> ()
    %cst_32 = arith.constant dense<0.000000e+00> : vector<12x12x64xf32>
    %119 = tpu.matmul %114, %118, %cst_32 {dimension_numbers = #tpu.dot_dimension_numbers<[2], [2], [1], [1], [0, 0, 0, 1, 1, 1], [0], [0]>} : vector<12x12x16xf32>, vector<12x64x16xf32>, vector<12x12x64xf32> -> vector<12x12x64xf32>
    "tpu.trace_stop"() : () -> ()
    %120 = vector.extract_strided_slice %74 {offsets = [2, 1, 0], sizes = [12, 12, 16], strides = [1, 1, 1]} : vector<14x14x16xf32> to vector<12x12x16xf32>
    %121 = vector.extract_strided_slice %75 {offsets = [7, 0, 0], sizes = [1, 64, 16], strides = [1, 1, 1]} : vector<9x64x16xf32> to vector<1x64x16xf32>
    %122 = vector.shape_cast %121 : vector<1x64x16xf32> to vector<64x16xf32>
    %123 = vector.shape_cast %122 : vector<64x16xf32> to vector<1x64x16xf32>
    %124 = vector.broadcast %123 : vector<1x64x16xf32> to vector<12x64x16xf32>
    "tpu.trace_start"() <{level = 10 : i32, message = "hwc,hkc->hwk"}> : () -> ()
    %cst_33 = arith.constant dense<0.000000e+00> : vector<12x12x64xf32>
    %125 = tpu.matmul %120, %124, %cst_33 {dimension_numbers = #tpu.dot_dimension_numbers<[2], [2], [1], [1], [0, 0, 0, 1, 1, 1], [0], [0]>} : vector<12x12x16xf32>, vector<12x64x16xf32>, vector<12x12x64xf32> -> vector<12x12x64xf32>
    "tpu.trace_stop"() : () -> ()
    %126 = vector.extract_strided_slice %74 {offsets = [2, 2, 0], sizes = [12, 12, 16], strides = [1, 1, 1]} : vector<14x14x16xf32> to vector<12x12x16xf32>
    %127 = vector.extract_strided_slice %75 {offsets = [8, 0, 0], sizes = [1, 64, 16], strides = [1, 1, 1]} : vector<9x64x16xf32> to vector<1x64x16xf32>
    %128 = vector.shape_cast %127 : vector<1x64x16xf32> to vector<64x16xf32>
    %129 = vector.shape_cast %128 : vector<64x16xf32> to vector<1x64x16xf32>
    %130 = vector.broadcast %129 : vector<1x64x16xf32> to vector<12x64x16xf32>
    "tpu.trace_start"() <{level = 10 : i32, message = "hwc,hkc->hwk"}> : () -> ()
    %cst_34 = arith.constant dense<0.000000e+00> : vector<12x12x64xf32>
    %131 = tpu.matmul %126, %130, %cst_34 {dimension_numbers = #tpu.dot_dimension_numbers<[2], [2], [1], [1], [0, 0, 0, 1, 1, 1], [0], [0]>} : vector<12x12x16xf32>, vector<12x64x16xf32>, vector<12x12x64xf32> -> vector<12x12x64xf32>
    "tpu.trace_stop"() : () -> ()
    %132 = arith.addf %83, %89 : vector<12x12x64xf32>
    %133 = arith.addf %95, %101 : vector<12x12x64xf32>
    %134 = arith.addf %107, %113 : vector<12x12x64xf32>
    %135 = arith.addf %119, %125 : vector<12x12x64xf32>
    %136 = arith.addf %132, %133 : vector<12x12x64xf32>
    %137 = arith.addf %134, %135 : vector<12x12x64xf32>
    %138 = arith.addf %136, %137 : vector<12x12x64xf32>
    %139 = arith.addf %138, %131 : vector<12x12x64xf32>
    %140 = vector.shape_cast %76 : vector<1x64xf32> to vector<1x1x64xf32>
    %141 = vector.broadcast %140 : vector<1x1x64xf32> to vector<12x12x64xf32>
    %142 = arith.mulf %139, %141 : vector<12x12x64xf32>
    %143 = vector.shape_cast %77 : vector<1x64xf32> to vector<1x1x64xf32>
    %144 = vector.broadcast %143 : vector<1x1x64xf32> to vector<12x12x64xf32>
    %145 = arith.addf %142, %144 : vector<12x12x64xf32>
    %cst_35 = arith.constant 0.000000e+00 : f32
    %146 = vector.broadcast %cst_35 : f32 to vector<12x12x64xf32>
    %147 = arith.maximumf %145, %146 : vector<12x12x64xf32>
    %cst_36 = arith.constant dense<0.000000e+00> : vector<12x64xf32>
    %148 = vector.multi_reduction <add>, %147, %cst_36 [0] : vector<12x12x64xf32> to vector<12x64xf32>
    %cst_37 = arith.constant dense<0.000000e+00> : vector<64xf32>
    %149 = vector.multi_reduction <add>, %148, %cst_37 [0] : vector<12x64xf32> to vector<64xf32>
    %150 = vector.shape_cast %149 : vector<64xf32> to vector<1x64xf32>
    %c0_38 = arith.constant 0 : index
    %c0_39 = arith.constant 0 : index
    %c0_40 = arith.constant 0 : index
    %151 = vector.load %arg2[%c0_38, %c0_39, %c0_40] : memref<1x1x2xf32, #tpu.memory_space<vmem>>, vector<1x1x2xf32>
    %152 = vector.shape_cast %151 : vector<1x1x2xf32> to vector<1x2xf32>
    %c0_41 = arith.constant 0 : index
    %c0_42 = arith.constant 0 : index
    %153 = vector.load %arg9[%c0_41, %c0_42] : memref<64x128xf32, #tpu.memory_space<vmem>>, vector<64x128xf32>
    %cst_43 = arith.constant dense<0.000000e+00> : vector<1x128xf32>
    %154 = tpu.matmul %150, %153, %cst_43 {dimension_numbers = #tpu.dot_dimension_numbers<[1], [0], [0], [1], [0, 0, 1, 1], [], []>} : vector<1x64xf32>, vector<64x128xf32>, vector<1x128xf32> -> vector<1x128xf32>
    %c0_44 = arith.constant 0 : index
    %c0_45 = arith.constant 0 : index
    %155 = vector.load %arg10[%c0_44, %c0_45] : memref<2x128xf32, #tpu.memory_space<vmem>>, vector<2x128xf32>
    %cst_46 = arith.constant dense<0.000000e+00> : vector<1x128xf32>
    %156 = tpu.matmul %152, %155, %cst_46 {dimension_numbers = #tpu.dot_dimension_numbers<[1], [0], [0], [1], [0, 0, 1, 1], [], []>} : vector<1x2xf32>, vector<2x128xf32>, vector<1x128xf32> -> vector<1x128xf32>
    %157 = arith.addf %154, %156 : vector<1x128xf32>
    %c0_47 = arith.constant 0 : index
    %c0_48 = arith.constant 0 : index
    %158 = vector.load %arg11[%c0_47, %c0_48] : memref<1x128xf32, #tpu.memory_space<vmem>>, vector<1x128xf32>
    %159 = arith.addf %157, %158 : vector<1x128xf32>
    %cst_49 = arith.constant 0.000000e+00 : f32
    %160 = vector.broadcast %cst_49 : f32 to vector<1x128xf32>
    %161 = arith.maximumf %159, %160 : vector<1x128xf32>
    %c0_50 = arith.constant 0 : index
    %c0_51 = arith.constant 0 : index
    %162 = vector.load %arg12[%c0_50, %c0_51] : memref<128x128xf32, #tpu.memory_space<vmem>>, vector<128x128xf32>
    %cst_52 = arith.constant dense<0.000000e+00> : vector<1x128xf32>
    %163 = tpu.matmul %161, %162, %cst_52 {dimension_numbers = #tpu.dot_dimension_numbers<[1], [0], [0], [1], [0, 0, 1, 1], [], []>} : vector<1x128xf32>, vector<128x128xf32>, vector<1x128xf32> -> vector<1x128xf32>
    %c0_53 = arith.constant 0 : index
    %c0_54 = arith.constant 0 : index
    %164 = vector.load %arg13[%c0_53, %c0_54] : memref<1x128xf32, #tpu.memory_space<vmem>>, vector<1x128xf32>
    %165 = arith.addf %163, %164 : vector<1x128xf32>
    %cst_55 = arith.constant 0.000000e+00 : f32
    %166 = vector.broadcast %cst_55 : f32 to vector<1x128xf32>
    %167 = arith.maximumf %165, %166 : vector<1x128xf32>
    %c0_56 = arith.constant 0 : index
    %c0_57 = arith.constant 0 : index
    %168 = vector.load %arg14[%c0_56, %c0_57] : memref<128x128xf32, #tpu.memory_space<vmem>>, vector<128x128xf32>
    %cst_58 = arith.constant dense<0.000000e+00> : vector<1x128xf32>
    %169 = tpu.matmul %167, %168, %cst_58 {dimension_numbers = #tpu.dot_dimension_numbers<[1], [0], [0], [1], [0, 0, 1, 1], [], []>} : vector<1x128xf32>, vector<128x128xf32>, vector<1x128xf32> -> vector<1x128xf32>
    %c0_59 = arith.constant 0 : index
    %c0_60 = arith.constant 0 : index
    %170 = vector.load %arg15[%c0_59, %c0_60] : memref<1x128xf32, #tpu.memory_space<vmem>>, vector<1x128xf32>
    %171 = arith.addf %169, %170 : vector<1x128xf32>
    %c0_61 = arith.constant 0 : index
    %c0_62 = arith.constant 0 : index
    %c0_63 = arith.constant 0 : index
    %172 = vector.load %arg16[%c0_61, %c0_62, %c0_63] : memref<1x1x128xf32, #tpu.memory_space<vmem>>, vector<1x1x128xf32>
    %173 = vector.shape_cast %172 : vector<1x1x128xf32> to vector<1x128xf32>
    %174 = vector.shape_cast %171 : vector<1x128xf32> to vector<1x1x128xf32>
    tpu.vector_store %arg16[%c0_61, %c0_62, %c0_63], %174 {strides = array<i32>} : memref<1x1x128xf32, #tpu.memory_space<vmem>>, vector<1x1x128xf32>,
    return
  }
  func.func @transform_0(%arg0: i32) -> (i32, i32, i32, i32) {
    %c0_i32 = arith.constant 0 : i32
    %c0_i32_0 = arith.constant 0 : i32
    %c0_i32_1 = arith.constant 0 : i32
    %c0_i32_2 = arith.constant 0 : i32
    return %arg0, %c0_i32, %c0_i32_0, %c0_i32_1 : i32, i32, i32, i32
  }
  func.func @transform_1(%arg0: i32) -> (i32, i32, i32) {
    %c0_i32 = arith.constant 0 : i32
    %c0_i32_0 = arith.constant 0 : i32
    %c0_i32_1 = arith.constant 0 : i32
    return %arg0, %c0_i32, %c0_i32_0 : i32, i32, i32
  }
  func.func @transform_2(%arg0: i32) -> (i32, i32, i32) {
    %c0_i32 = arith.constant 0 : i32
    %c0_i32_0 = arith.constant 0 : i32
    %c0_i32_1 = arith.constant 0 : i32
    %c0_i32_2 = arith.constant 0 : i32
    return %c0_i32, %c0_i32_0, %c0_i32_1 : i32, i32, i32
  }
  func.func @transform_3(%arg0: i32) -> (i32, i32) {
    %c0_i32 = arith.constant 0 : i32
    %c0_i32_0 = arith.constant 0 : i32
    %c0_i32_1 = arith.constant 0 : i32
    return %c0_i32, %c0_i32_0 : i32, i32
  }
  func.func @transform_4(%arg0: i32) -> (i32, i32) {
    %c0_i32 = arith.constant 0 : i32
    %c0_i32_0 = arith.constant 0 : i32
    %c0_i32_1 = arith.constant 0 : i32
    return %c0_i32, %c0_i32_0 : i32, i32
  }
  func.func @transform_5(%arg0: i32) -> (i32, i32, i32) {
    %c0_i32 = arith.constant 0 : i32
    %c0_i32_0 = arith.constant 0 : i32
    %c0_i32_1 = arith.constant 0 : i32
    %c0_i32_2 = arith.constant 0 : i32
    return %c0_i32, %c0_i32_0, %c0_i32_1 : i32, i32, i32
  }
  func.func @transform_6(%arg0: i32) -> (i32, i32) {
    %c0_i32 = arith.constant 0 : i32
    %c0_i32_0 = arith.constant 0 : i32
    %c0_i32_1 = arith.constant 0 : i32
    return %c0_i32, %c0_i32_0 : i32, i32
  }
  func.func @transform_7(%arg0: i32) -> (i32, i32) {
    %c0_i32 = arith.constant 0 : i32
    %c0_i32_0 = arith.constant 0 : i32
    %c0_i32_1 = arith.constant 0 : i32
    return %c0_i32, %c0_i32_0 : i32, i32
  }
  func.func @transform_8(%arg0: i32) -> (i32, i32) {
    %c0_i32 = arith.constant 0 : i32
    %c0_i32_0 = arith.constant 0 : i32
    %c0_i32_1 = arith.constant 0 : i32
    return %c0_i32, %c0_i32_0 : i32, i32
  }
  func.func @transform_9(%arg0: i32) -> (i32, i32) {
    %c0_i32 = arith.constant 0 : i32
    %c0_i32_0 = arith.constant 0 : i32
    %c0_i32_1 = arith.constant 0 : i32
    return %c0_i32, %c0_i32_0 : i32, i32
  }
  func.func @transform_10(%arg0: i32) -> (i32, i32) {
    %c0_i32 = arith.constant 0 : i32
    %c0_i32_0 = arith.constant 0 : i32
    %c0_i32_1 = arith.constant 0 : i32
    return %c0_i32, %c0_i32_0 : i32, i32
  }
  func.func @transform_11(%arg0: i32) -> (i32, i32) {
    %c0_i32 = arith.constant 0 : i32
    %c0_i32_0 = arith.constant 0 : i32
    %c0_i32_1 = arith.constant 0 : i32
    return %c0_i32, %c0_i32_0 : i32, i32
  }
  func.func @transform_12(%arg0: i32) -> (i32, i32) {
    %c0_i32 = arith.constant 0 : i32
    %c0_i32_0 = arith.constant 0 : i32
    %c0_i32_1 = arith.constant 0 : i32
    return %c0_i32, %c0_i32_0 : i32, i32
  }
  func.func @transform_13(%arg0: i32) -> (i32, i32) {
    %c0_i32 = arith.constant 0 : i32
    %c0_i32_0 = arith.constant 0 : i32
    %c0_i32_1 = arith.constant 0 : i32
    return %c0_i32, %c0_i32_0 : i32, i32
  }
  func.func @transform_14(%arg0: i32) -> (i32, i32) {
    %c0_i32 = arith.constant 0 : i32
    %c0_i32_0 = arith.constant 0 : i32
    %c0_i32_1 = arith.constant 0 : i32
    return %c0_i32, %c0_i32_0 : i32, i32
  }
  func.func @transform_15(%arg0: i32) -> (i32, i32, i32) {
    %c0_i32 = arith.constant 0 : i32
    %c0_i32_0 = arith.constant 0 : i32
    %c0_i32_1 = arith.constant 0 : i32
    return %arg0, %c0_i32, %c0_i32_0 : i32, i32, i32
  }
}

</mosaic_0001>

<bundles_post_ra>
// kernel: tpu_custom_call.1
= control target key start
LH: loop header
LB: loop body
LE: loop exit
PB: predicated region body
PF: predicated region fallthrough
CT: control target
= control target key end

     0   :  { %s15217_s0 = inlined_call_operand.vmem [shape: f32[2,16,16,3], index: 0, kind: input, shape index: {}]   ;;  %s15218_s1 = inlined_call_operand.vmem [shape: f32[2,1,2], index: 1, kind: input, shape index: {}]   ;;  %s15219_s2 = inlined_call_operand.vmem [shape: f32[9,16,3], index: 2, kind: input, shape index: {}]   ;;  %s15220_s3 = inlined_call_operand.vmem [shape: f32[1,16], index: 3, kind: input, shape index: {}]   ;;  %s15221_s4 = inlined_call_operand.vmem [shape: f32[1,16], index: 4, kind: input, shape index: {}]   ;;  %s15222_s5 = inlined_call_operand.vmem [shape: f32[9,64,16], index: 5, kind: input, shape index: {}]   ;;  %s15223_s6 = inlined_call_operand.vmem [shape: f32[1,64], index: 6, kind: input, shape index: {}]   ;;  %s15224_s7 = inlined_call_operand.vmem [shape: f32[1,64], index: 7, kind: input, shape index: {}]   ;;  %s15225_s8 = inlined_call_operand.vmem [shape: f32[64,128], index: 8, kind: input, shape index: {}]   ;;  %s15226_s9 = inlined_call_operand.vmem [shape: f32[2,128], index: 9, kind: input, shape index: {}]   ;;  %s15227_s10 = inlined_call_operand.vmem [shape: f32[1,128], index: 10, kind: input, shape index: {}]   ;;  %s15228_s11 = inlined_call_operand.vmem [shape: f32[128,128], index: 11, kind: input, shape index: {}]   ;;  %s15229_s12 = inlined_call_operand.vmem [shape: f32[1,128], index: 12, kind: input, shape index: {}]   ;;  %s15230_s13 = inlined_call_operand.vmem [shape: f32[128,128], index: 13, kind: input, shape index: {}]   ;;  %s15231_s14 = inlined_call_operand.vmem [shape: f32[1,128], index: 14, kind: input, shape index: {}]   ;;  %s15232_s15 = inlined_call_operand.hbm [shape: f32[2,1,128], index: 15, kind: output, shape index: {}]  }
   0x1   :  { %15336 = sst [smem:[#allocation186_spill]] %s15217_s0 }
   0x2   :  { %15337 = sst [smem:[#allocation187_spill]] %s15218_s1 }
   0x3   :  { %15338 = sst [smem:[#allocation188_spill]] %s15219_s2 }
   0x4   :  { %15339 = sst [smem:[#allocation189_spill]] %s15220_s3 }
   0x5   :  { %15340 = sst [smem:[#allocation190_spill]] %s15221_s4 }
   0x6   :  { %20 = vsyncpa [#allocation3], 0 }
   0x7   :  { %22 = vsyncpa [#allocation3 + $0x1], 0  ;;  %s9353_s18 = smov 0   ;;  %s9355_s19 = smov 0  }
   0x8   :  { %s9357_s20 = smov 0   ;;  %s9359_s21 = smov 0  }
   0x9 LB: > { %s9374_s22 = sadd.s32 4294967295, %s9271_s21   ;;  %s7538_s23 = sadd.s32 4294967294, %s9271_s21   ;;  %s9271_s21 = sphi %s9359_s21, %s16083_s21   ;;  %s9267_s20 = sphi %s9357_s20, %s16082_s20   ;;  %s9263_s19 = sphi %s9355_s19, %s16081_s19   ;;  %s9259_s18 = sphi %s9353_s18, %s16080_s18  }
   0xa   : > { %s9378_s24 = sadd.s32 1, %s9271_s21   ;;  %s360_s25 = sadd.s32 1, %s9267_s20 }
   0xb   : > { %s357_s26 = ssub.s32 %s9271_s21, %s9378_s24  ;;  %p370_p0 = scmp.ne.s32.totalorder %s9267_s20, %s9263_s19 }
   0xc   : > { %p358_p1 = scmp.eq.s32.totalorder %s357_s26, 0  ;;  %p371_p2 = scmp.eq.s32.totalorder %s9374_s22, 1 }
   0xd   : > { %p376_p3 = scmp.ne.s32.totalorder %s9263_s19, %s9259_s18  ;;  %p377_p4 = scmp.eq.s32.totalorder %s7538_s23, 1 }
   0xe   : > { %s9389_s27 = scalar_select %p358_p1, %s9267_s20, %s360_s25  }
   0xf   : > { %p9391_p5 = por %p371_p2, %p370_p0  ;;  %p9395_p6 = por %p377_p4, %p376_p3 }
  0x10   : > { %15341 = sst [smem:[#allocation5_spill]] %s9389_s27  ;;  %p7541_p7 = scmp.ge.s32.totalorder %s9271_s21, 1 }
  0x11   : > { %p448_p8 = scmp.lt.s32.totalorder %s9271_s21, 3 }
  0x13   : > { %p449_p9 = pnand %p7541_p7, %p448_p8 }
  0x15   : > { %452 = sbr.rel (%p449_p9) target bundleno = 2032 (0x7f0), region = 80 }
  0x1a   : > { %s15344_s2 = sld [smem:[#allocation188_spill]]  ;;  %vm564_vm0 = vcmask 23552   ;;  %p498_p10 = scmp.lt.s32.totalorder %s9374_s22, 1  ;;  %vm560_vm1 = vcmask 1046528   ;;  %vm1400_vm2 = vcmask 1045504   ;;  %vm4114_vm3 = vcmask 130048  }
  0x1b   : > { %s15345_s0 = sld [smem:[#allocation186_spill]]  ;;  %vm7264_vm4 = vcmask 523264   ;;  %vm7288_vm5 = vcmask 519168   ;;  %vm7335_vm6 = vcmask 1041408   ;;  %vm7331_vm7 = vcmask 15360   ;;  %s7470_s17 = scalar_lea.hbm %s15232_s15, %s9374_s22 }
  0x1c   : > { %s9421_s25 = scalar_select %p498_p10, %s9374_s22, 1 }
  0x1d   : > { %s15580_s3 = sld [smem:[#allocation189_spill]]  ;;  %s9229_s16 = scalar_lea.hbm %s15232_s15, 2 }
  0x1e   : > { %s9133_s26 = sshll.u32 %s9421_s25, 8  ;;  %s15585_s4 = sld [smem:[#allocation190_spill]] }
  0x1f   : > { %s16068_s1 = sld [smem:[#allocation187_spill]] }
  0x20   : > { %v9404_v0 = vld [vmem:[%s15344_s2 + $0x18] sm:$0xff]  ;;  %v9418_v1 = vld [vmem:[%s15344_s2 + $0x10] sm:$0xff] }
  0x21   : > { %7544 = vmatpush.xpose.msk.msra.mxu2 %vm564_vm0, %v9404_v0  ;;  %7548 = vmatpush.xpose.msk.msra.mxu3 %vm564_vm0, %v9404_v0  ;;  %s9431_s27 = scalar_lea.vmem %s15345_s0, %s9133_s26  ;;  %v9589_v42 = vld [vmem:[%s15344_s2 + $0x38] sm:$0xff]  ;;  %v9608_v43 = vld [vmem:[%s15344_s2 + $0x30] sm:$0xff] }
  0x22   : > { %7560 = vmatpush.xpose.msk.msra.mxu0 %vm564_vm0, %v9404_v0  ;;  %7564 = vmatpush.xpose.msk.msra.mxu1 %vm564_vm0, %v9404_v0  ;;  %v506_v2 = vld [vmem:[%s9431_s27] sm:$0xff]  ;;  %v507_v3 = vld [vmem:[%s9431_s27 + $0x8] sm:$0xff]  ;;  %v9440_v4 = vld [vmem:[%s9431_s27 + $0x10] sm:$0xff] }
  0x23   : > { %v561_v5 = vrot.slane %v506_v2, 1  ;;  %v562_v6 = vrot.slane %v507_v3, 1  ;;  %v9443_v7 = vld [vmem:[%s9431_s27 + $0x18] sm:$0xff]  ;;  %v9446_v8 = vld [vmem:[%s9431_s27 + $0x40] sm:$0xff]  ;;  %v600_v9 = vrot.slane %v9440_v4, 1  ;;  %v9457_v11 = vld [vmem:[%s9431_s27 + $0x48] sm:$0xff] }
  0x24   : > { %v9454_v10 = vrot.slane %v9443_v7, 1  ;;  %v696_v12 = vrot.slane %v9446_v8, 1  ;;  %v9461_v13 = vld [vmem:[%s9431_s27 + $0x50] sm:$0xff]  ;;  %v9464_v14 = vld [vmem:[%s9431_s27 + $0x58] sm:$0xff]  ;;  %v9472_v16 = vrot.slane %v9457_v11, 1  ;;  %v9512_v22 = vld [vmem:[%s9431_s27 + $0x20] sm:$0xff] }
  0x25   : > { %7545 = vmatpush.xpose.msk.msra.mxu2 %vm564_vm0, %v9418_v1  ;;  %7549 = vmatpush.xpose.msk.msra.mxu3 %vm564_vm0, %v9418_v1  ;;  %v563_v15 = vsel %vm560_vm1, %v561_v5, %v562_v6  ;;  %v728_v17 = vrot.slane %v9461_v13, 1  ;;  %v9476_v18 = vrot.slane %v9464_v14, 1  ;;  %v9515_v23 = vld [vmem:[%s9431_s27 + $0x28] sm:$0xff]  ;;  %v9520_v24 = vld [vmem:[%s9431_s27 + $0x30] sm:$0xff]  ;;  %v9523_v25 = vld [vmem:[%s9431_s27 + $0x38] sm:$0xff]  ;;  %v632_v30 = vrot.slane %v9512_v22, 1  ;;  %s505_s26 = scalar_lea.vmem %s16068_s1, %s9421_s25 }
  0x26   : > { %7561 = vmatpush.xpose.msk.msra.mxu0 %vm564_vm0, %v9418_v1  ;;  %7565 = vmatpush.xpose.msk.msra.mxu1 %vm564_vm0, %v9418_v1  ;;  %15346 = vst [vmem:[#allocation6_spill] sm:$0xff] %v9454_v10  ;;  %v9481_v19 = vsel %vm560_vm1, %v600_v9, %v9454_v10  ;;  %v9487_v20 = vsel %vm560_vm1, %v696_v12, %v9472_v16  ;;  %v9526_v26 = vld [vmem:[%s9431_s27 + $0x80] sm:$0xff]  ;;  %v9530_v27 = vld [vmem:[%s9431_s27 + $0x88] sm:$0xff]  ;;  %v9533_v28 = vld [vmem:[%s9431_s27 + $0x90] sm:$0xff]  ;;  %v9542_v31 = vrot.slane %v9515_v23, 1  ;;  %v664_v32 = vrot.slane %v9520_v24, 1 }
  0x27   : > { %15347 = vst [vmem:[#allocation7_spill] sm:$0xff] %v9481_v19  ;;  %v9491_v21 = vsel %vm560_vm1, %v728_v17, %v9476_v18  ;;  %v9536_v29 = vld [vmem:[%s9431_s27 + $0x98] sm:$0xff]  ;;  %v9552_v33 = vrot.slane %v9523_v25, 1  ;;  %v824_v34 = vrot.slane %v9526_v26, 1  ;;  %v9556_v35 = vrot.slane %v9530_v27, 1  ;;  %v9613_v44 = vld [vmem:[%s9431_s27 + $0x60] sm:$0xff] }
  0x28   : > { %7546 = vmatmul.msk.f32.vlgmr.msra.gmra.mxu2 %vm564_vm0, %v563_v15  ;;  %7550 = vmatmul.msk.f32.vlgmr.msra.gmra.mxu3 %vm564_vm0, %v9481_v19  ;;  %15348 = vst [vmem:[#allocation8_spill] sm:$0xff] %v9515_v23  ;;  %v856_v36 = vrot.slane %v9533_v28, 1  ;;  %v9560_v37 = vrot.slane %v9536_v29, 1  ;;  %v9570_v38 = vsel %vm560_vm1, %v632_v30, %v9542_v31  ;;  %v9616_v45 = vld [vmem:[%s9431_s27 + $0x68] sm:$0xff]  ;;  %v9619_v46 = vld [vmem:[%s9431_s27 + $0x70] sm:$0xff]  ;;  %v9622_v47 = vld [vmem:[%s9431_s27 + $0x78] sm:$0xff] }
  0x29   : > { %7552 = vmatpush.xpose.msk.msrb.mxu2 %vm564_vm0, %v9404_v0  ;;  %7556 = vmatpush.xpose.msk.msrb.mxu3 %vm564_vm0, %v9404_v0  ;;  %15349 = vst [vmem:[#allocation9_spill] sm:$0xff] %v9523_v25  ;;  %v9574_v39 = vsel %vm560_vm1, %v664_v32, %v9552_v33  ;;  %v9578_v40 = vsel %vm560_vm1, %v824_v34, %v9556_v35  ;;  %v9625_v48 = vld [vmem:[%s9431_s27 + $0xc0] sm:$0xff]  ;;  %v9634_v49 = vld [vmem:[%s9431_s27 + $0xc8] sm:$0xff]  ;;  %v9637_v50 = vld [vmem:[%s9431_s27 + $0xd0] sm:$0xff]  ;;  %v760_v52 = vrot.slane %v9613_v44, 1  ;;  %v9648_v53 = vrot.slane %v9616_v45, 1 }
  0x2a   : > { %7576 = vmatpush.xpose.msk.msrb.mxu0 %vm564_vm0, %v9404_v0  ;;  %7580 = vmatpush.xpose.msk.msrb.mxu1 %vm564_vm0, %v9404_v0  ;;  %v9582_v41 = vsel %vm560_vm1, %v856_v36, %v9560_v37  ;;  %15350 = vst [vmem:[#allocation10_spill] sm:$0xff] %v9613_v44  ;;  %v9640_v51 = vld [vmem:[%s9431_s27 + $0xd8] sm:$0xff]  ;;  %v792_v54 = vrot.slane %v9619_v46, 1  ;;  %v9656_v55 = vrot.slane %v9622_v47, 1  ;;  %v952_v56 = vrot.slane %v9625_v48, 1  ;;  %v9707_v2 = vld [vmem:[%s9431_s27 + $0xb0] sm:$0xff] }
  0x2b   : > { %7562 = vmatmul.msk.f32.vlgmr.msra.gmra.mxu0 %vm564_vm0, %v9487_v20  ;;  %7566 = vmatmul.msk.f32.vlgmr.msra.gmra.mxu1 %vm564_vm0, %v9491_v21  ;;  %15351 = vst [vmem:[#allocation11_spill] sm:$0xff] %v9616_v45  ;;  %v9660_v57 = vrot.slane %v9634_v49, 1  ;;  %v984_v58 = vrot.slane %v9637_v50, 1  ;;  %v9664_v59 = vrot.slane %v9640_v51, 1  ;;  %v9668_v60 = vsel %vm560_vm1, %v760_v52, %v9648_v53  ;;  %v9710_v3 = vld [vmem:[%s9431_s27 + $0xb8] sm:$0xff]  ;;  %v9798_v32 = vld [vmem:[%s15344_s2 + $0x50] sm:$0xff] }
  0x2c   : > { %15352 = vst [vmem:[#allocation12_spill] sm:$0xff] %v9619_v46  ;;  %v9672_v61 = vsel %vm560_vm1, %v792_v54, %v9656_v55  ;;  %v920_v9 = vrot.slane %v9707_v2, 1  ;;  %v9732_v12 = vrot.slane %v9710_v3, 1  ;;  %v9779_v30 = vld [vmem:[%s15344_s2 + $0x58] sm:$0xff]  ;;  %v1401_v34 = vrot.slane %v9440_v4, 2  ;;  %s7474_s1 = sshll.u32 %s7470_s17, 4  ;;  %s7475_s1 = int_to_ptr.hbm [resolvable:$true] %s7474_s1 }
  0x2d   : > { %7553 = vmatpush.xpose.msk.msrb.mxu2 %vm564_vm0, %v9418_v1  ;;  %7557 = vmatpush.xpose.msk.msrb.mxu3 %vm564_vm0, %v9418_v1  ;;  %15353 = vst [vmem:[#allocation13_spill] sm:$0xff] %v9622_v47  ;;  %v9676_v62 = vsel %vm560_vm1, %v952_v56, %v9660_v57  ;;  %v9680_v63 = vsel %vm560_vm1, %v984_v58, %v9664_v59  ;;  %v9850_v36 = vrot.slane %v9443_v7, 2  ;;  %v1557_v56 = vrot.slane %v9613_v44, 2  ;;  %s9223_s23 = sshra.s32 %s7475_s1, 4  ;;  %s9224_s23 = int_to_ptr.hbm [resolvable:$true] %s9223_s23 }
  0x2e   : > { %7577 = vmatpush.xpose.msk.msrb.mxu0 %vm564_vm0, %v9418_v1  ;;  %7581 = vmatpush.xpose.msk.msrb.mxu1 %vm564_vm0, %v9418_v1  ;;  %15354 = vst [vmem:[#allocation14_spill] sm:$0xff] %v9637_v50  ;;  %v9740_v17 = vsel %vm560_vm1, %v920_v9, %v9732_v12  ;;  %v9902_v58 = vrot.slane %v9616_v45, 2  ;;  %v9960_v19 = vrot.slane %v9536_v29, 2  ;;  %p9230_p0 = scmp.lt.s32.totalorder %s9224_s23, %s15232_s15 }
  0x2f   : > { %15355 = vst [vmem:[#allocation15_spill] sm:$0xff] %v9664_v59  ;;  %v9858_v52 = vsel %vm1400_vm2, %v1401_v34, %v9850_v36 }
  0x30   : > { %7547 = vmatmul.msk.f32.gmra.mxu2 %vm564_vm0, %v562_v6  ;;  %7551 = vmatmul.msk.f32.gmra.mxu3 %vm564_vm0, %v9454_v10  ;;  %15356 = vst [vmem:[#allocation16_spill] sm:$0xff] %v9680_v63  ;;  %v9913_v34 = vsel %vm1400_vm2, %v1557_v56, %v9902_v58  ;;  %v9956_v56 = vrot.slane %v9457_v11, 2  ;;  %v1647_v10 = vrot.slane %v9533_v28, 2 }
  0x31   : > { %7568 = vmatpush.xpose.msk.msra.mxu2 %vm564_vm0, %v9404_v0  ;;  %7572 = vmatpush.xpose.msk.msra.mxu3 %vm564_vm0, %v9404_v0  ;;  %15359 = vst [vmem:[#allocation19_spill] sm:$0xff] %v9707_v2 }
  0x32   : > { %7592 = vmatpush.xpose.msk.msra.mxu0 %vm564_vm0, %v9404_v0  ;;  %7596 = vmatpush.xpose.msk.msra.mxu1 %vm564_vm0, %v9404_v0  ;;  %15360 = vst [vmem:[#allocation20_spill] sm:$0xff] %v9710_v3 }
  0x33   : > { %7563 = vmatmul.msk.f32.gmra.mxu0 %vm564_vm0, %v9472_v16  ;;  %7567 = vmatmul.msk.f32.gmra.mxu1 %vm564_vm0, %v9476_v18  ;;  %15361 = vst [vmem:[#allocation21_spill] sm:$0xff] %v9850_v36 }
  0x34   : > { %15362 = vst [vmem:[#allocation22_spill] sm:$0xff] %v9858_v52 }
  0x35   : > { %7569 = vmatpush.xpose.msk.msra.mxu2 %vm564_vm0, %v9418_v1  ;;  %7573 = vmatpush.xpose.msk.msra.mxu3 %vm564_vm0, %v9418_v1 }
  0x36   : > { %7593 = vmatpush.xpose.msk.msra.mxu0 %vm564_vm0, %v9418_v1  ;;  %7597 = vmatpush.xpose.msk.msra.mxu1 %vm564_vm0, %v9418_v1 }
  0x38   : > { %7554 = vmatmul.msk.f32.vlgmr.msrb.gmra.mxu2 %vm564_vm0, %v9570_v38  ;;  %7558 = vmatmul.msk.f32.vlgmr.msrb.gmra.mxu3 %vm564_vm0, %v9574_v39 }
  0x39   : > { %7584 = vmatpush.xpose.msk.msrb.mxu2 %vm564_vm0, %v9404_v0  ;;  %7588 = vmatpush.xpose.msk.msrb.mxu3 %vm564_vm0, %v9404_v0  ;;  %v9701_v0 = vld [vmem:[%s9431_s27 + $0xa0] sm:$0xff] }
  0x3a   : > { %15357 = vst [vmem:[#allocation17_spill] sm:$0xff] %v9701_v0  ;;  %v888_v5 = vrot.slane %v9701_v0, 1 }
  0x3b   : > { %7578 = vmatmul.msk.f32.vlgmr.msrb.gmra.mxu0 %vm564_vm0, %v9578_v40  ;;  %7582 = vmatmul.msk.f32.vlgmr.msrb.gmra.mxu1 %vm564_vm0, %v9582_v41 }
  0x3c   : > { %7608 = vmatpush.xpose.msk.msrb.mxu0 %vm564_vm0, %v9589_v42  ;;  %7612 = vmatpush.xpose.msk.msrb.mxu1 %vm564_vm0, %v9589_v42 }
  0x3d   : > { %7585 = vmatpush.xpose.msk.msrb.mxu2 %vm564_vm0, %v9418_v1  ;;  %7589 = vmatpush.xpose.msk.msrb.mxu3 %vm564_vm0, %v9418_v1  ;;  %v9704_v1 = vld [vmem:[%s9431_s27 + $0xa8] sm:$0xff] }
  0x3e   : > { %15358 = vst [vmem:[#allocation18_spill] sm:$0xff] %v9704_v1  ;;  %v9724_v6 = vrot.slane %v9704_v1, 1 }
  0x40   : > { %7609 = vmatpush.xpose.msk.msrb.mxu0 %vm564_vm0, %v9608_v43  ;;  %7555 = vmatmul.msk.f32.gmra.mxu2 %vm564_vm0, %v9542_v31  ;;  %v9736_v15 = vsel %vm560_vm1, %v888_v5, %v9724_v6  ;;  %v9905_v5 = vld [vmem:[%s9431_s27 + $0xe0] sm:$0xff] }
  0x41   : > { %7613 = vmatpush.xpose.msk.msrb.mxu1 %vm564_vm0, %v9608_v43  ;;  %7559 = vmatmul.msk.f32.gmra.mxu3 %vm564_vm0, %v9552_v33 }
  0x43   : > { %7579 = vmatmul.msk.f32.gmra.mxu0 %vm564_vm0, %v9556_v35  ;;  %7583 = vmatmul.msk.f32.gmra.mxu1 %vm564_vm0, %v9560_v37 }
  0x48   : > { %7570 = vmatmul.msk.f32.vlgmr.msra.gmra.mxu2 %vm564_vm0, %v9668_v60 }
  0x49   : > { %7574 = vmatmul.msk.f32.vlgmr.msra.gmra.mxu3 %vm564_vm0, %v9672_v61  ;;  %7600 = vmatpush.xpose.msk.msra.mxu2 %vm564_vm0, %v9589_v42 }
  0x4a   : > { %7604 = vmatpush.xpose.msk.msra.mxu3 %vm564_vm0, %v9589_v42 }
  0x4b   : > { %7594 = vmatmul.msk.f32.vlgmr.msra.gmra.mxu0 %vm564_vm0, %v9676_v62  ;;  %7598 = vmatmul.msk.f32.vlgmr.msra.gmra.mxu1 %vm564_vm0, %v9680_v63 }
  0x4c   : > { %7624 = vmatpush.xpose.msk.msra.mxu0 %vm564_vm0, %v9589_v42  ;;  %7628 = vmatpush.xpose.msk.msra.mxu1 %vm564_vm0, %v9589_v42 }
  0x4d   : > { %7601 = vmatpush.xpose.msk.msra.mxu2 %vm564_vm0, %v9608_v43 }
  0x4e   : > { %7605 = vmatpush.xpose.msk.msra.mxu3 %vm564_vm0, %v9608_v43 }
  0x50   : > { %7625 = vmatpush.xpose.msk.msra.mxu0 %vm564_vm0, %v9608_v43  ;;  %7571 = vmatmul.msk.f32.gmra.mxu2 %vm564_vm0, %v9648_v53 }
  0x51   : > { %7629 = vmatpush.xpose.msk.msra.mxu1 %vm564_vm0, %v9608_v43  ;;  %7575 = vmatmul.msk.f32.gmra.mxu3 %vm564_vm0, %v9656_v55 }
  0x53   : > { %7595 = vmatmul.msk.f32.gmra.mxu0 %vm564_vm0, %v9660_v57  ;;  %7599 = vmatmul.msk.f32.gmra.mxu1 %vm564_vm0, %v9664_v59 }
  0x58   : > { %7586 = vmatmul.msk.f32.vlgmr.msrb.gmra.mxu2 %vm564_vm0, %v9736_v15 }
  0x59   : > { %7590 = vmatmul.msk.f32.vlgmr.msrb.gmra.mxu3 %vm564_vm0, %v9740_v17  ;;  %7616 = vmatpush.xpose.msk.msrb.mxu2 %vm564_vm0, %v9589_v42 }
  0x5a   : > { %7620 = vmatpush.xpose.msk.msrb.mxu3 %vm564_vm0, %v9589_v42 }
  0x5b   : > { %7610 = vmatmul.msk.f32.vlgmr.msrb.gmra.mxu0 %vm564_vm0, %v9520_v24  ;;  %7614 = vmatmul.msk.f32.vlgmr.msrb.gmra.mxu1 %vm564_vm0, %v9446_v8 }
  0x5c   : > { %7640 = vmatpush.xpose.msk.msrb.mxu0 %vm564_vm0, %v9589_v42  ;;  %7644 = vmatpush.xpose.msk.msrb.mxu1 %vm564_vm0, %v9589_v42 }
  0x5d   : > { %7617 = vmatpush.xpose.msk.msrb.mxu2 %vm564_vm0, %v9608_v43 }
  0x5e   : > { %7621 = vmatpush.xpose.msk.msrb.mxu3 %vm564_vm0, %v9608_v43 }
  0x60   : > { %7641 = vmatpush.xpose.msk.msrb.mxu0 %vm564_vm0, %v9608_v43  ;;  %7587 = vmatmul.msk.f32.gmra.mxu2 %vm564_vm0, %v9724_v6 }
  0x61   : > { %7645 = vmatpush.xpose.msk.msrb.mxu1 %vm564_vm0, %v9608_v43  ;;  %7591 = vmatmul.msk.f32.gmra.mxu3 %vm564_vm0, %v9732_v12 }
  0x63   : > { %7611 = vmatmul.msk.f32.gmra.mxu0 %vm564_vm0, %v9523_v25  ;;  %7615 = vmatmul.msk.f32.gmra.mxu1 %vm564_vm0, %v9457_v11 }
  0x68   : > { %7602 = vmatmul.msk.f32.vlgmr.msra.gmra.mxu2 %vm564_vm0, %v9440_v4  ;;  %v1527_v4 = vrot.slane %v9461_v13, 2 }
  0x69   : > { %7606 = vmatmul.msk.f32.vlgmr.msra.gmra.mxu3 %vm564_vm0, %v9512_v22  ;;  %7632 = vmatpush.xpose.msk.msra.mxu2 %vm564_vm0, %v9589_v42 }
  0x6a   : > { %7636 = vmatpush.xpose.msk.msra.mxu3 %vm564_vm0, %v9589_v42 }
  0x6b   : > { %7626 = vmatmul.msk.f32.vlgmr.msra.gmra.mxu0 %vm564_vm0, %v9619_v46  ;;  %7630 = vmatmul.msk.f32.vlgmr.msra.gmra.mxu1 %vm564_vm0, %v9526_v26 }
  0x6c   : > { %7656 = vmatpush.xpose.msk.msra.mxu0 %vm564_vm0, %v9779_v30  ;;  %7660 = vmatpush.xpose.msk.msra.mxu1 %vm564_vm0, %v9779_v30 }
  0x6d   : > { %7633 = vmatpush.xpose.msk.msra.mxu2 %vm564_vm0, %v9608_v43 }
  0x6e   : > { %7637 = vmatpush.xpose.msk.msra.mxu3 %vm564_vm0, %v9608_v43 }
  0x70   : > { %7657 = vmatpush.xpose.msk.msra.mxu0 %vm564_vm0, %v9798_v32  ;;  %7603 = vmatmul.msk.f32.gmra.mxu2 %vm564_vm0, %v9443_v7  ;;  %v9898_v7 = vrot.slane %v9464_v14, 2 }
  0x71   : > { %7661 = vmatpush.xpose.msk.msra.mxu1 %vm564_vm0, %v9798_v32  ;;  %7607 = vmatmul.msk.f32.gmra.mxu3 %vm564_vm0, %v9515_v23 }
  0x72   : > { %v9909_v9 = vsel %vm1400_vm2, %v1527_v4, %v9898_v7  ;;  %v1497_v4 = vrot.slane %v9446_v8, 2 }
  0x73   : > { %7627 = vmatmul.msk.f32.gmra.mxu0 %vm564_vm0, %v9622_v47  ;;  %7631 = vmatmul.msk.f32.gmra.mxu1 %vm564_vm0, %v9530_v27 }
  0x74   : > { %v9972_v8 = vsel %vm1400_vm2, %v1497_v4, %v9956_v56  ;;  %v10014_v4 = vld [vmem:[%s15344_s2 + $0x70] sm:$0xff] }
  0x78   : > { %7618 = vmatmul.msk.f32.vlgmr.msrb.gmra.mxu2 %vm564_vm0, %v9461_v13  ;;  %v9934_v13 = vld [vmem:[%s9431_s27 + $0xe8] sm:$0xff] }
  0x79   : > { %7622 = vmatmul.msk.f32.vlgmr.msrb.gmra.mxu3 %vm564_vm0, %v9613_v44  ;;  %7648 = vmatpush.xpose.msk.msrb.mxu2 %vm564_vm0, %v9589_v42 }
  0x7a   : > { %7652 = vmatpush.xpose.msk.msrb.mxu3 %vm564_vm0, %v9589_v42  ;;  %v1437_v42 = vrot.slane %v9512_v22, 2 }
  0x7b   : > { %7642 = vmatmul.msk.f32.vlgmr.msrb.gmra.mxu0 %vm564_vm0, %v9707_v2  ;;  %7646 = vmatmul.msk.f32.vlgmr.msrb.gmra.mxu1 %vm564_vm0, %v9625_v48 }
  0x7c   : > { %7672 = vmatpush.xpose.msk.msrb.mxu0 %vm564_vm0, %v9779_v30  ;;  %7676 = vmatpush.xpose.msk.msrb.mxu1 %vm564_vm0, %v9779_v30 }
  0x7d   : > { %7649 = vmatpush.xpose.msk.msrb.mxu2 %vm564_vm0, %v9608_v43 }
  0x7e   : > { %7653 = vmatpush.xpose.msk.msrb.mxu3 %vm564_vm0, %v9608_v43  ;;  %v9854_v43 = vrot.slane %v9515_v23, 2 }
  0x80   : > { %7673 = vmatpush.xpose.msk.msrb.mxu0 %vm564_vm0, %v9798_v32  ;;  %7619 = vmatmul.msk.f32.gmra.mxu2 %vm564_vm0, %v9464_v14  ;;  %v9862_v54 = vsel %vm1400_vm2, %v1437_v42, %v9854_v43  ;;  %v1467_v14 = vrot.slane %v9520_v24, 2  ;;  %v9948_v42 = vrot.slane %v9523_v25, 2 }
  0x81   : > { %7677 = vmatpush.xpose.msk.msrb.mxu1 %vm564_vm0, %v9798_v32  ;;  %7623 = vmatmul.msk.f32.gmra.mxu3 %vm564_vm0, %v9616_v45 }
  0x82   : > { %v9968_v45 = vsel %vm1400_vm2, %v1467_v14, %v9948_v42  ;;  %v9991_v14 = vld [vmem:[%s15344_s2 + $0x78] sm:$0xff] }
  0x83   : > { %7643 = vmatmul.msk.f32.gmra.mxu0 %vm564_vm0, %v9710_v3  ;;  %7647 = vmatmul.msk.f32.gmra.mxu1 %vm564_vm0, %v9634_v49 }
  0x88   : > { %7634 = vmatmul.msk.f32.vlgmr.msra.gmra.mxu2 %vm564_vm0, %v9533_v28  ;;  %v9980_v28 = vsel %vm1400_vm2, %v1647_v10, %v9960_v19 }
  0x89   : > { %7638 = vmatmul.msk.f32.vlgmr.msra.gmra.mxu3 %vm564_vm0, %v9701_v0  ;;  %7664 = vmatpush.xpose.msk.msra.mxu2 %vm564_vm0, %v9779_v30 }
  0x8a   : > { %7668 = vmatpush.xpose.msk.msra.mxu3 %vm564_vm0, %v9779_v30 }
  0x8b   : > { %7658 = vmatmul.msk.f32.vlgmr.msra.gmra.mxu0 %vm564_vm0, %v9858_v52  ;;  %7662 = vmatmul.msk.f32.vlgmr.msra.gmra.mxu1 %vm564_vm0, %v9862_v54  ;;  %v9964_v52 = vrot.slane %v9704_v1, 2 }
  0x8c   : > { %7688 = vmatpush.xpose.msk.msra.mxu0 %vm564_vm0, %v9779_v30  ;;  %7692 = vmatpush.xpose.msk.msra.mxu1 %vm564_vm0, %v9779_v30 }
  0x8d   : > { %7665 = vmatpush.xpose.msk.msra.mxu2 %vm564_vm0, %v9798_v32 }
  0x8e   : > { %7669 = vmatpush.xpose.msk.msra.mxu3 %vm564_vm0, %v9798_v32 }
  0x90   : > { %7689 = vmatpush.xpose.msk.msra.mxu0 %vm564_vm0, %v9798_v32  ;;  %7635 = vmatmul.msk.f32.gmra.mxu2 %vm564_vm0, %v9536_v29 }
  0x91   : > { %7693 = vmatpush.xpose.msk.msra.mxu1 %vm564_vm0, %v9798_v32  ;;  %7639 = vmatmul.msk.f32.gmra.mxu3 %vm564_vm0, %v9704_v1 }
  0x93   : > { %7659 = vmatmul.msk.f32.gmra.mxu0 %vm564_vm0, %v9850_v36  ;;  %7663 = vmatmul.msk.f32.gmra.mxu1 %vm564_vm0, %v9854_v43  ;;  %v1677_v36 = vrot.slane %v9701_v0, 2  ;;  %v1767_v0 = vrot.slane %v9637_v50, 2 }
  0x95   : > { %v9984_v29 = vsel %vm1400_vm2, %v1677_v36, %v9964_v52 }
  0x98   : > { %7650 = vmatmul.msk.f32.vlgmr.msrb.gmra.mxu2 %vm564_vm0, %v9637_v50 }
  0x99   : > { %7654 = vmatmul.msk.f32.vlgmr.msrb.gmra.mxu3 %vm564_vm0, %v9905_v5  ;;  %7680 = vmatpush.xpose.msk.msrb.mxu2 %vm564_vm0, %v9779_v30 }
  0x9a   : > { %7684 = vmatpush.xpose.msk.msrb.mxu3 %vm564_vm0, %v9779_v30 }
  0x9b   : > { %7674 = vmatmul.msk.f32.vlgmr.msrb.gmra.mxu0 %vm564_vm0, %v9909_v9  ;;  %7678 = vmatmul.msk.f32.vlgmr.msrb.gmra.mxu1 %vm564_vm0, %v9913_v34 }
  0x9c   : > { %7704 = vmatpush.xpose.msk.msrb.mxu0 %vm564_vm0, %v9779_v30  ;;  %7708 = vmatpush.xpose.msk.msrb.mxu1 %vm564_vm0, %v9779_v30 }
  0x9d   : > { %7681 = vmatpush.xpose.msk.msrb.mxu2 %vm564_vm0, %v9798_v32 }
  0x9e   : > { %7685 = vmatpush.xpose.msk.msrb.mxu3 %vm564_vm0, %v9798_v32 }
  0xa0   : > { %7705 = vmatpush.xpose.msk.msrb.mxu0 %vm564_vm0, %v9798_v32  ;;  %7651 = vmatmul.msk.f32.gmra.mxu2 %vm564_vm0, %v9640_v51 }
  0xa1   : > { %7709 = vmatpush.xpose.msk.msrb.mxu1 %vm564_vm0, %v9798_v32  ;;  %7655 = vmatmul.msk.f32.gmra.mxu3 %vm564_vm0, %v9934_v13 }
  0xa3   : > { %7675 = vmatmul.msk.f32.gmra.mxu0 %vm564_vm0, %v9898_v7  ;;  %7679 = vmatmul.msk.f32.gmra.mxu1 %vm564_vm0, %v9902_v58 }
  0xa8   : > { %v9974_v11 = vpop.f32.mrf.mxu0  ;;  %v9976_v44 = vpop.f32.mrf.mxu1  ;;  %7666 = vmatmul.msk.f32.vlgmr.msra.gmra.mxu2 %vm564_vm0, %v9968_v45 }
  0xa9   : > { %15363 = vst [vmem:[#allocation23_spill] sm:$0xff] %v9974_v11  ;;  %7670 = vmatmul.msk.f32.vlgmr.msra.gmra.mxu3 %vm564_vm0, %v9972_v8  ;;  %7696 = vmatpush.xpose.msk.msra.mxu2 %vm564_vm0, %v9779_v30 }
  0xaa   : > { %15364 = vst [vmem:[#allocation24_spill] sm:$0xff] %v9976_v44  ;;  %7700 = vmatpush.xpose.msk.msra.mxu3 %vm564_vm0, %v9779_v30  ;;  %v1587_v30 = vrot.slane %v9619_v46, 2 }
  0xab   : > { %7690 = vmatmul.msk.f32.vlgmr.msra.gmra.mxu0 %vm564_vm0, %v9980_v28  ;;  %7694 = vmatmul.msk.f32.vlgmr.msra.gmra.mxu1 %vm564_vm0, %v9984_v29  ;;  %v10001_v10 = vpop.f32.mrf.mxu2  ;;  %v10007_v36 = vpop.f32.mrf.mxu3 }
  0xac   : > { %15365 = vst [vmem:[#allocation25_spill] sm:$0xff] %v10001_v10  ;;  %7720 = vmatpush.xpose.msk.msra.mxu0 %vm564_vm0, %v9991_v14  ;;  %7724 = vmatpush.xpose.msk.msra.mxu1 %vm564_vm0, %v9991_v14  ;;  %v10046_v10 = vrot.slane %v9934_v13, 2 }
  0xad   : > { %15366 = vst [vmem:[#allocation26_spill] sm:$0xff] %v10007_v36  ;;  %7697 = vmatpush.xpose.msk.msra.mxu2 %vm564_vm0, %v9798_v32  ;;  %v1797_v36 = vrot.slane %v9905_v5, 2 }
  0xae   : > { %7701 = vmatpush.xpose.msk.msra.mxu3 %vm564_vm0, %v9798_v32  ;;  %v1617_v32 = vrot.slane %v9526_v26, 2 }
  0xb0   : > { %v10018_v44 = vpop.f32.mrf.mxu0  ;;  %v10020_v11 = vpop.f32.mrf.mxu1  ;;  %7721 = vmatpush.xpose.msk.msra.mxu0 %vm564_vm0, %v10014_v4  ;;  %7667 = vmatmul.msk.f32.gmra.mxu2 %vm564_vm0, %v9948_v42 }
  0xb1   : > { %15367 = vst [vmem:[#allocation27_spill] sm:$0xff] %v10018_v44  ;;  %7725 = vmatpush.xpose.msk.msra.mxu1 %vm564_vm0, %v10014_v4  ;;  %7671 = vmatmul.msk.f32.gmra.mxu3 %vm564_vm0, %v9956_v56  ;;  %v10034_v44 = vrot.slane %v9622_v47, 2  ;;  %v10052_v47 = vrot.slane %v9640_v51, 2  ;;  %v10074_v51 = vsel %vm1400_vm2, %v1797_v36, %v10046_v10 }
  0xb2   : > { %15368 = vst [vmem:[#allocation28_spill] sm:$0xff] %v10020_v11  ;;  %v10042_v11 = vrot.slane %v9530_v27, 2 }
  0xb3   : > { %7691 = vmatmul.msk.f32.gmra.mxu0 %vm564_vm0, %v9960_v19  ;;  %7695 = vmatmul.msk.f32.gmra.mxu1 %vm564_vm0, %v9964_v52  ;;  %v10048_v1 = vpop.f32.mrf.mxu2  ;;  %v10054_v46 = vpop.f32.mrf.mxu3  ;;  %v10058_v26 = vsel %vm1400_vm2, %v1587_v30, %v10034_v44 }
  0xb4   : > { %15369 = vst [vmem:[#allocation29_spill] sm:$0xff] %v10048_v1  ;;  %v10062_v27 = vsel %vm1400_vm2, %v1617_v32, %v10042_v11  ;;  %v10070_v1 = vsel %vm1400_vm2, %v1767_v0, %v10052_v47 }
  0xb5   : > { %15370 = vst [vmem:[#allocation30_spill] sm:$0xff] %v10054_v46 }
  0xb8   : > { %v10064_v25 = vpop.f32.mrf.mxu0  ;;  %v10066_v23 = vpop.f32.mrf.mxu1  ;;  %7682 = vmatmul.msk.f32.vlgmr.msrb.gmra.mxu2 %vm564_vm0, %v10058_v26 }
  0xb9   : > { %15371 = vst [vmem:[#allocation31_spill] sm:$0xff] %v10064_v25  ;;  %7686 = vmatmul.msk.f32.vlgmr.msrb.gmra.mxu3 %vm564_vm0, %v10062_v27  ;;  %7712 = vmatpush.xpose.msk.msrb.mxu2 %vm564_vm0, %v9991_v14  ;;  %v10122_v25 = vrot.slane %v9634_v49, 2 }
  0xba   : > { %15372 = vst [vmem:[#allocation32_spill] sm:$0xff] %v10066_v23  ;;  %7716 = vmatpush.xpose.msk.msrb.mxu3 %vm564_vm0, %v9991_v14  ;;  %v1707_v23 = vrot.slane %v9707_v2, 2 }
  0xbb   : > { %7706 = vmatmul.msk.f32.vlgmr.msrb.gmra.mxu0 %vm564_vm0, %v10070_v1  ;;  %7710 = vmatmul.msk.f32.vlgmr.msrb.gmra.mxu1 %vm564_vm0, %v10074_v51  ;;  %v10086_v0 = vpop.f32.mrf.mxu2  ;;  %v10092_v36 = vpop.f32.mrf.mxu3 }
  0xbc   : > { %15373 = vst [vmem:[#allocation33_spill] sm:$0xff] %v10086_v0  ;;  %7736 = vmatpush.xpose.msk.msrb.mxu0 %vm564_vm0, %v9991_v14  ;;  %7740 = vmatpush.xpose.msk.msrb.mxu1 %vm564_vm0, %v9991_v14 }
  0xbd   : > { %15374 = vst [vmem:[#allocation34_spill] sm:$0xff] %v10092_v36  ;;  %7713 = vmatpush.xpose.msk.msrb.mxu2 %vm564_vm0, %v10014_v4 }
  0xbe   : > { %7717 = vmatpush.xpose.msk.msrb.mxu3 %vm564_vm0, %v10014_v4 }
  0xc0   : > { %v10098_v30 = vpop.f32.mrf.mxu0  ;;  %v10100_v32 = vpop.f32.mrf.mxu1  ;;  %7737 = vmatpush.xpose.msk.msrb.mxu0 %vm564_vm0, %v10014_v4  ;;  %7683 = vmatmul.msk.f32.gmra.mxu2 %vm564_vm0, %v10034_v44 }
  0xc1   : > { %15375 = vst [vmem:[#allocation35_spill] sm:$0xff] %v10098_v30  ;;  %7741 = vmatpush.xpose.msk.msrb.mxu1 %vm564_vm0, %v10014_v4  ;;  %7687 = vmatmul.msk.f32.gmra.mxu3 %vm564_vm0, %v10042_v11  ;;  %v10114_v30 = vrot.slane %v9710_v3, 2 }
  0xc2   : > { %15376 = vst [vmem:[#allocation36_spill] sm:$0xff] %v10100_v32  ;;  %v1737_v32 = vrot.slane %v9625_v48, 2 }
  0xc3   : > { %7707 = vmatmul.msk.f32.gmra.mxu0 %vm564_vm0, %v10052_v47  ;;  %7711 = vmatmul.msk.f32.gmra.mxu1 %vm564_vm0, %v10046_v10  ;;  %v10124_v36 = vpop.f32.mrf.mxu2  ;;  %v10130_v46 = vsel %vm1400_vm2, %v1707_v23, %v10114_v30 }
  0xc4   : > { %15377 = vst [vmem:[#allocation37_spill] sm:$0xff] %v10124_v36  ;;  %v10126_v0 = vpop.f32.mrf.mxu3  ;;  %v10134_v50 = vsel %vm1400_vm2, %v1737_v32, %v10122_v25 }
  0xc5   : > { %15378 = vst [vmem:[#allocation38_spill] sm:$0xff] %v10126_v0 }
  0xc8   : > { %v10136_v3 = vpop.f32.mrf.mxu0  ;;  %v10138_v2 = vpop.f32.mrf.mxu1  ;;  %7698 = vmatmul.msk.f32.vlgmr.msra.gmra.mxu2 %vm564_vm0, %v10130_v46 }
  0xc9   : > { %15379 = vst [vmem:[#allocation39_spill] sm:$0xff] %v10136_v3  ;;  %7702 = vmatmul.msk.f32.vlgmr.msra.gmra.mxu3 %vm564_vm0, %v10134_v50  ;;  %7728 = vmatpush.xpose.msk.msra.mxu2 %vm564_vm0, %v9991_v14 }
  0xca   : > { %15380 = vst [vmem:[#allocation40_spill] sm:$0xff] %v10138_v2  ;;  %7732 = vmatpush.xpose.msk.msra.mxu3 %vm564_vm0, %v9991_v14 }
  0xcb   : > { %7722 = vmatmul.msk.f32.vlgmr.msra.gmra.mxu0 %vm564_vm0, %v9487_v20  ;;  %7726 = vmatmul.msk.f32.vlgmr.msra.gmra.mxu1 %vm564_vm0, %v9491_v21  ;;  %v10150_v23 = vpop.f32.mrf.mxu2 }
  0xcc   : > { %15381 = vst [vmem:[#allocation41_spill] sm:$0xff] %v10150_v23  ;;  %7752 = vmatpush.xpose.msk.msra.mxu0 %vm564_vm0, %v9991_v14  ;;  %v10156_v48 = vpop.f32.mrf.mxu3  ;;  %7756 = vmatpush.xpose.msk.msra.mxu1 %vm564_vm0, %v9991_v14 }
  0xcd   : > { %15382 = vst [vmem:[#allocation42_spill] sm:$0xff] %v10156_v48  ;;  %7729 = vmatpush.xpose.msk.msra.mxu2 %vm564_vm0, %v10014_v4  ;;  %v10193_v48 = vld [vmem:[%s15344_s2 + $0x88] sm:$0xff] }
  0xce   : > { %7733 = vmatpush.xpose.msk.msra.mxu3 %vm564_vm0, %v10014_v4 }
  0xd0   : > { %v10162_v49 = vpop.f32.mrf.mxu0  ;;  %v10164_v32 = vpop.f32.mrf.mxu1  ;;  %7753 = vmatpush.xpose.msk.msra.mxu0 %vm564_vm0, %v10014_v4  ;;  %7699 = vmatmul.msk.f32.gmra.mxu2 %vm564_vm0, %v10114_v30 }
  0xd1   : > { %15383 = vst [vmem:[#allocation43_spill] sm:$0xff] %v10162_v49  ;;  %7757 = vmatpush.xpose.msk.msra.mxu1 %vm564_vm0, %v10014_v4  ;;  %7703 = vmatmul.msk.f32.gmra.mxu3 %vm564_vm0, %v10122_v25 }
  0xd2   : > { %15384 = vst [vmem:[#allocation44_spill] sm:$0xff] %v10164_v32 }
  0xd3   : > { %7723 = vmatmul.msk.f32.gmra.mxu0 %vm564_vm0, %v9472_v16  ;;  %7727 = vmatmul.msk.f32.gmra.mxu1 %vm564_vm0, %v9476_v18  ;;  %v10180_v2 = vpop.f32.mrf.mxu2 }
  0xd4   : > { %15385 = vst [vmem:[#allocation45_spill] sm:$0xff] %v10180_v2  ;;  %v10182_v32 = vpop.f32.mrf.mxu3 }
  0xd5   : > { %15386 = vst [vmem:[#allocation46_spill] sm:$0xff] %v10182_v32 }
  0xd8   : > { %v10184_v49 = vpop.f32.mrf.mxu0  ;;  %v10186_v3 = vpop.f32.mrf.mxu1  ;;  %7714 = vmatmul.msk.f32.vlgmr.msrb.gmra.mxu2 %vm564_vm0, %v9570_v38 }
  0xd9   : > { %15387 = vst [vmem:[#allocation47_spill] sm:$0xff] %v10184_v49  ;;  %7718 = vmatmul.msk.f32.vlgmr.msrb.gmra.mxu3 %vm564_vm0, %v9574_v39  ;;  %7744 = vmatpush.xpose.msk.msrb.mxu2 %vm564_vm0, %v9991_v14 }
  0xda   : > { %15388 = vst [vmem:[#allocation48_spill] sm:$0xff] %v10186_v3  ;;  %7748 = vmatpush.xpose.msk.msrb.mxu3 %vm564_vm0, %v9991_v14  ;;  %v10216_v3 = vld [vmem:[%s15344_s2 + $0x80] sm:$0xff] }
  0xdb   : > { %7738 = vmatmul.msk.f32.vlgmr.msrb.gmra.mxu0 %vm564_vm0, %v9578_v40  ;;  %7742 = vmatmul.msk.f32.vlgmr.msrb.gmra.mxu1 %vm564_vm0, %v9582_v41  ;;  %v10203_v32 = vpop.f32.mrf.mxu2 }
  0xdc   : > { %15389 = vst [vmem:[#allocation49_spill] sm:$0xff] %v10203_v32  ;;  %7768 = vmatpush.xpose.msk.msrb.mxu0 %vm564_vm0, %v10193_v48  ;;  %v10209_v2 = vpop.f32.mrf.mxu3  ;;  %7772 = vmatpush.xpose.msk.msrb.mxu1 %vm564_vm0, %v10193_v48 }
  0xdd   : > { %15390 = vst [vmem:[#allocation50_spill] sm:$0xff] %v10209_v2  ;;  %7745 = vmatpush.xpose.msk.msrb.mxu2 %vm564_vm0, %v10014_v4 }
  0xde   : > { %7749 = vmatpush.xpose.msk.msrb.mxu3 %vm564_vm0, %v10014_v4 }
  0xe0   : > { %v10220_v32 = vpop.f32.mrf.mxu0  ;;  %v10222_v49 = vpop.f32.mrf.mxu1  ;;  %7769 = vmatpush.xpose.msk.msrb.mxu0 %vm564_vm0, %v10216_v3  ;;  %7715 = vmatmul.msk.f32.gmra.mxu2 %vm564_vm0, %v9542_v31 }
  0xe1   : > { %15391 = vst [vmem:[#allocation51_spill] sm:$0xff] %v10220_v32  ;;  %7773 = vmatpush.xpose.msk.msrb.mxu1 %vm564_vm0, %v10216_v3  ;;  %7719 = vmatmul.msk.f32.gmra.mxu3 %vm564_vm0, %v9552_v33 }
  0xe2   : > { %15392 = vst [vmem:[#allocation52_spill] sm:$0xff] %v10222_v49 }
  0xe3   : > { %7739 = vmatmul.msk.f32.gmra.mxu0 %vm564_vm0, %v9556_v35  ;;  %7743 = vmatmul.msk.f32.gmra.mxu1 %vm564_vm0, %v9560_v37  ;;  %v10238_v2 = vpop.f32.mrf.mxu2 }
  0xe4   : > { %15393 = vst [vmem:[#allocation53_spill] sm:$0xff] %v10238_v2  ;;  %v10240_v49 = vpop.f32.mrf.mxu3 }
  0xe5   : > { %15394 = vst [vmem:[#allocation54_spill] sm:$0xff] %v10240_v49 }
  0xe8   : > { %v10242_v32 = vpop.f32.mrf.mxu0  ;;  %v10244_v23 = vpop.f32.mrf.mxu1  ;;  %7730 = vmatmul.msk.f32.vlgmr.msra.gmra.mxu2 %vm564_vm0, %v9668_v60 }
  0xe9   : > { %15395 = vst [vmem:[#allocation55_spill] sm:$0xff] %v10242_v32  ;;  %7734 = vmatmul.msk.f32.vlgmr.msra.gmra.mxu3 %vm564_vm0, %v9672_v61  ;;  %7760 = vmatpush.xpose.msk.msra.mxu2 %vm564_vm0, %v9991_v14 }
  0xea   : > { %15396 = vst [vmem:[#allocation56_spill] sm:$0xff] %v10244_v23  ;;  %7764 = vmatpush.xpose.msk.msra.mxu3 %vm564_vm0, %v9991_v14 }
  0xeb   : > { %7754 = vmatmul.msk.f32.vlgmr.msra.gmra.mxu0 %vm564_vm0, %v9676_v62  ;;  %7758 = vmatmul.msk.f32.vlgmr.msra.gmra.mxu1 %vm564_vm0, %v9680_v63  ;;  %v10256_v49 = vpop.f32.mrf.mxu2 }
  0xec   : > { %15397 = vst [vmem:[#allocation57_spill] sm:$0xff] %v10256_v49  ;;  %7784 = vmatpush.xpose.msk.msra.mxu0 %vm564_vm0, %v10193_v48  ;;  %v10262_v2 = vpop.f32.mrf.mxu3  ;;  %7788 = vmatpush.xpose.msk.msra.mxu1 %vm564_vm0, %v10193_v48 }
  0xed   : > { %15398 = vst [vmem:[#allocation58_spill] sm:$0xff] %v10262_v2  ;;  %7761 = vmatpush.xpose.msk.msra.mxu2 %vm564_vm0, %v10014_v4 }
  0xee   : > { %7765 = vmatpush.xpose.msk.msra.mxu3 %vm564_vm0, %v10014_v4 }
  0xf0   : > { %v10268_v23 = vpop.f32.mrf.mxu0  ;;  %v10270_v32 = vpop.f32.mrf.mxu1  ;;  %7785 = vmatpush.xpose.msk.msra.mxu0 %vm564_vm0, %v10216_v3  ;;  %7731 = vmatmul.msk.f32.gmra.mxu2 %vm564_vm0, %v9648_v53 }
  0xf1   : > { %15399 = vst [vmem:[#allocation59_spill] sm:$0xff] %v10268_v23  ;;  %7789 = vmatpush.xpose.msk.msra.mxu1 %vm564_vm0, %v10216_v3  ;;  %7735 = vmatmul.msk.f32.gmra.mxu3 %vm564_vm0, %v9656_v55 }
  0xf2   : > { %15400 = vst [vmem:[#allocation60_spill] sm:$0xff] %v10270_v32 }
  0xf3   : > { %7755 = vmatmul.msk.f32.gmra.mxu0 %vm564_vm0, %v9660_v57  ;;  %7759 = vmatmul.msk.f32.gmra.mxu1 %vm564_vm0, %v9664_v59  ;;  %v10286_v14 = vpop.f32.mrf.mxu2 }
  0xf4   : > { %15401 = vst [vmem:[#allocation61_spill] sm:$0xff] %v10286_v14  ;;  %v10288_v4 = vpop.f32.mrf.mxu3 }
  0xf5   : > { %15402 = vst [vmem:[#allocation62_spill] sm:$0xff] %v10288_v4  ;;  %v10321_v4 = vld [vmem:[%s9431_s27 + $0xf0] sm:$0xff] }
  0xf6   : > { %15409 = vst [vmem:[#allocation69_spill] sm:$0xff] %v10321_v4 }
  0xf8   : > { %v10290_v32 = vpop.f32.mrf.mxu0  ;;  %v10292_v23 = vpop.f32.mrf.mxu1  ;;  %7746 = vmatmul.msk.f32.vlgmr.msrb.gmra.mxu2 %vm564_vm0, %v9736_v15 }
  0xf9   : > { %15403 = vst [vmem:[#allocation63_spill] sm:$0xff] %v10290_v32  ;;  %7750 = vmatmul.msk.f32.vlgmr.msrb.gmra.mxu3 %vm564_vm0, %v9740_v17  ;;  %7776 = vmatpush.xpose.msk.msrb.mxu2 %vm564_vm0, %v10193_v48 }
  0xfa   : > { %15404 = vst [vmem:[#allocation64_spill] sm:$0xff] %v10292_v23  ;;  %7780 = vmatpush.xpose.msk.msrb.mxu3 %vm564_vm0, %v10193_v48 }
  0xfb   : > { %7770 = vmatmul.msk.f32.vlgmr.msrb.gmra.mxu0 %vm564_vm0, %v9862_v54  ;;  %7774 = vmatmul.msk.f32.vlgmr.msrb.gmra.mxu1 %vm564_vm0, %v9968_v45  ;;  %v10304_v0 = vpop.f32.mrf.mxu2 }
  0xfc   : > { %15405 = vst [vmem:[#allocation65_spill] sm:$0xff] %v10304_v0  ;;  %7800 = vmatpush.xpose.msk.msrb.mxu0 %vm564_vm0, %v10193_v48  ;;  %v10310_v23 = vpop.f32.mrf.mxu3  ;;  %7804 = vmatpush.xpose.msk.msrb.mxu1 %vm564_vm0, %v10193_v48  ;;  %v10324_v0 = vld [vmem:[%s9431_s27 + $0xf8] sm:$0xff] }
  0xfd   : > { %15406 = vst [vmem:[#allocation66_spill] sm:$0xff] %v10310_v23  ;;  %7777 = vmatpush.xpose.msk.msrb.mxu2 %vm564_vm0, %v10216_v3  ;;  %v2141_v23 = vrot.slane %v10321_v4, 1  ;;  %v2142_v14 = vrot.slane %v10324_v0, 1 }
  0xfe   : > { %15410 = vst [vmem:[#allocation70_spill] sm:$0xff] %v10324_v0  ;;  %7781 = vmatpush.xpose.msk.msrb.mxu3 %vm564_vm0, %v10216_v3 }
 0x100   : > { %v10316_v32 = vpop.f32.mrf.mxu0  ;;  %v10318_v36 = vpop.f32.mrf.mxu1  ;;  %7801 = vmatpush.xpose.msk.msrb.mxu0 %vm564_vm0, %v10216_v3  ;;  %7747 = vmatmul.msk.f32.gmra.mxu2 %vm564_vm0, %v9724_v6 }
 0x101   : > { %15407 = vst [vmem:[#allocation67_spill] sm:$0xff] %v10316_v32  ;;  %7805 = vmatpush.xpose.msk.msrb.mxu1 %vm564_vm0, %v10216_v3  ;;  %v2109_v32 = vrot.slane %v9905_v5, 1  ;;  %7751 = vmatmul.msk.f32.gmra.mxu3 %vm564_vm0, %v9732_v12 }
 0x102   : > { %15408 = vst [vmem:[#allocation68_spill] sm:$0xff] %v10318_v36  ;;  %v10336_v36 = vrot.slane %v9934_v13, 1  ;;  %v2143_v13 = vsel %vm560_vm1, %v2141_v23, %v2142_v14 }
 0x103   : > { %7771 = vmatmul.msk.f32.gmra.mxu0 %vm564_vm0, %v9854_v43  ;;  %7775 = vmatmul.msk.f32.gmra.mxu1 %vm564_vm0, %v9948_v42  ;;  %v10346_v2 = vpop.f32.mrf.mxu2 }
 0x104   : > { %15411 = vst [vmem:[#allocation71_spill] sm:$0xff] %v10346_v2  ;;  %v10348_v49 = vpop.f32.mrf.mxu3  ;;  %v10352_v5 = vsel %vm560_vm1, %v2109_v32, %v10336_v36 }
 0x105   : > { %15412 = vst [vmem:[#allocation72_spill] sm:$0xff] %v10348_v49 }
 0x108   : > { %v10355_v59 = vpop.f32.mrf.mxu0  ;;  %v10357_v63 = vpop.f32.mrf.mxu1  ;;  %7762 = vmatmul.msk.f32.vlgmr.msra.gmra.mxu2 %vm564_vm0, %v10352_v5 }
 0x109   : > { %15413 = vst [vmem:[#allocation73_spill] sm:$0xff] %v10355_v59  ;;  %7766 = vmatmul.msk.f32.vlgmr.msra.gmra.mxu3 %vm564_vm0, %v2143_v13  ;;  %7792 = vmatpush.xpose.msk.msra.mxu2 %vm564_vm0, %v10193_v48  ;;  %v10622_v59 = vld [vmem:[%s9431_s27 + $0x40] sm:$0xff] }
 0x10a   : > { %15414 = vst [vmem:[#allocation74_spill] sm:$0xff] %v10357_v63  ;;  %7796 = vmatpush.xpose.msk.msra.mxu3 %vm564_vm0, %v10193_v48 }
 0x10b   : > { %7786 = vmatmul.msk.f32.vlgmr.msra.gmra.mxu0 %vm564_vm0, %v9913_v34  ;;  %7790 = vmatmul.msk.f32.vlgmr.msra.gmra.mxu1 %vm564_vm0, %v10058_v26  ;;  %v10368_v32 = vpop.f32.mrf.mxu2 }
 0x10c   : > { %15415 = vst [vmem:[#allocation75_spill] sm:$0xff] %v10368_v32  ;;  %7816 = vmatpush.xpose.msk.msra.mxu0 %vm564_vm0, %v10193_v48  ;;  %v10374_v23 = vpop.f32.mrf.mxu3  ;;  %7820 = vmatpush.xpose.msk.msra.mxu1 %vm564_vm0, %v10193_v48 }
 0x10d   : > { %15416 = vst [vmem:[#allocation76_spill] sm:$0xff] %v10374_v23  ;;  %7793 = vmatpush.xpose.msk.msra.mxu2 %vm564_vm0, %v10216_v3 }
 0x10e   : > { %7797 = vmatpush.xpose.msk.msra.mxu3 %vm564_vm0, %v10216_v3 }
 0x110   : > { %v10380_v13 = vpop.f32.mrf.mxu0  ;;  %v10382_v49 = vpop.f32.mrf.mxu1  ;;  %7817 = vmatpush.xpose.msk.msra.mxu0 %vm564_vm0, %v10216_v3  ;;  %7763 = vmatmul.msk.f32.gmra.mxu2 %vm564_vm0, %v10336_v36 }
 0x111   : > { %15417 = vst [vmem:[#allocation77_spill] sm:$0xff] %v10380_v13  ;;  %7821 = vmatpush.xpose.msk.msra.mxu1 %vm564_vm0, %v10216_v3  ;;  %7767 = vmatmul.msk.f32.gmra.mxu3 %vm564_vm0, %v2142_v14  ;;  %v10410_v14 = vld [vmem:[%s15344_s2 + $0x8] sm:$0xff] }
 0x112   : > { %15418 = vst [vmem:[#allocation78_spill] sm:$0xff] %v10382_v49 }
 0x113   : > { %7787 = vmatmul.msk.f32.gmra.mxu0 %vm564_vm0, %v9902_v58  ;;  %7791 = vmatmul.msk.f32.gmra.mxu1 %vm564_vm0, %v10034_v44  ;;  %v10397_v23 = vpop.f32.mrf.mxu2 }
 0x114   : > { %15419 = vst [vmem:[#allocation79_spill] sm:$0xff] %v10397_v23  ;;  %v10399_v32 = vpop.f32.mrf.mxu3 }
 0x115   : > { %15420 = vst [vmem:[#allocation80_spill] sm:$0xff] %v10399_v32 }
 0x118   : > { %v10401_v2 = vpop.f32.mrf.mxu0  ;;  %v10403_v49 = vpop.f32.mrf.mxu1  ;;  %7778 = vmatmul.msk.f32.vlgmr.msrb.gmra.mxu2 %vm564_vm0, %v9972_v8 }
 0x119   : > { %15421 = vst [vmem:[#allocation81_spill] sm:$0xff] %v10401_v2  ;;  %7782 = vmatmul.msk.f32.vlgmr.msrb.gmra.mxu3 %vm564_vm0, %v9909_v9  ;;  %7808 = vmatpush.xpose.msk.msrb.mxu2 %vm564_vm0, %v10193_v48 }
 0x11a   : > { %15422 = vst [vmem:[#allocation82_spill] sm:$0xff] %v10403_v49  ;;  %7812 = vmatpush.xpose.msk.msrb.mxu3 %vm564_vm0, %v10193_v48  ;;  %v10433_v49 = vld [vmem:[%s15344_s2] sm:$0xff] }
 0x11b   : > { %7802 = vmatmul.msk.f32.vlgmr.msrb.gmra.mxu0 %vm564_vm0, %v9984_v29  ;;  %7806 = vmatmul.msk.f32.vlgmr.msrb.gmra.mxu1 %vm564_vm0, %v10130_v46  ;;  %v10420_v32 = vpop.f32.mrf.mxu2 }
 0x11c   : > { %15423 = vst [vmem:[#allocation83_spill] sm:$0xff] %v10420_v32  ;;  %7832 = vmatpush.xpose.msk.msrb.mxu0 %vm564_vm0, %v10410_v14  ;;  %v10426_v23 = vpop.f32.mrf.mxu3  ;;  %7836 = vmatpush.xpose.msk.msrb.mxu1 %vm564_vm0, %v10410_v14 }
 0x11d   : > { %15424 = vst [vmem:[#allocation84_spill] sm:$0xff] %v10426_v23  ;;  %7809 = vmatpush.xpose.msk.msrb.mxu2 %vm564_vm0, %v10216_v3  ;;  %v2477_v23 = vrot.slane %v10324_v0, 2 }
 0x11e   : > { %7813 = vmatpush.xpose.msk.msrb.mxu3 %vm564_vm0, %v10216_v3  ;;  %v2476_v3 = vrot.slane %v10321_v4, 2 }
 0x120   : > { %v10437_v32 = vpop.f32.mrf.mxu0  ;;  %v10439_v2 = vpop.f32.mrf.mxu1  ;;  %7833 = vmatpush.xpose.msk.msrb.mxu0 %vm564_vm0, %v10433_v49  ;;  %7779 = vmatmul.msk.f32.gmra.mxu2 %vm564_vm0, %v9956_v56  ;;  %v2478_v63 = vsel %vm1400_vm2, %v2476_v3, %v2477_v23 }
 0x121   : > { %15425 = vst [vmem:[#allocation85_spill] sm:$0xff] %v10437_v32  ;;  %7837 = vmatpush.xpose.msk.msrb.mxu1 %vm564_vm0, %v10433_v49  ;;  %7783 = vmatmul.msk.f32.gmra.mxu3 %vm564_vm0, %v9898_v7 }
 0x122   : > { %15426 = vst [vmem:[#allocation86_spill] sm:$0xff] %v10439_v2 }
 0x123   : > { %7803 = vmatmul.msk.f32.gmra.mxu0 %vm564_vm0, %v9964_v52  ;;  %7807 = vmatmul.msk.f32.gmra.mxu1 %vm564_vm0, %v10114_v30  ;;  %v10455_v48 = vpop.f32.mrf.mxu2 }
 0x124   : > { %15427 = vst [vmem:[#allocation87_spill] sm:$0xff] %v10455_v48  ;;  %v10459_v2 = vpop.f32.mrf.mxu3 }
 0x125   : > { %15428 = vst [vmem:[#allocation88_spill] sm:$0xff] %v10459_v2 }
 0x128   : > { %v10461_v32 = vpop.f32.mrf.mxu0  ;;  %v10463_v13 = vpop.f32.mrf.mxu1  ;;  %7794 = vmatmul.msk.f32.vlgmr.msra.gmra.mxu2 %vm564_vm0, %v10062_v27 }
 0x129   : > { %15429 = vst [vmem:[#allocation89_spill] sm:$0xff] %v10461_v32  ;;  %7798 = vmatmul.msk.f32.vlgmr.msra.gmra.mxu3 %vm564_vm0, %v9980_v28  ;;  %7824 = vmatpush.xpose.msk.msra.mxu2 %vm564_vm0, %v10410_v14 }
 0x12a   : > { %15430 = vst [vmem:[#allocation90_spill] sm:$0xff] %v10463_v13  ;;  %7828 = vmatpush.xpose.msk.msra.mxu3 %vm564_vm0, %v10410_v14 }
 0x12b   : > { %7818 = vmatmul.msk.f32.vlgmr.msra.gmra.mxu0 %vm564_vm0, %v10074_v51  ;;  %7822 = vmatmul.msk.f32.vlgmr.msra.gmra.mxu1 %vm564_vm0, %v2478_v63  ;;  %v10475_v2 = vpop.f32.mrf.mxu2 }
 0x12c   : > { %15431 = vst [vmem:[#allocation91_spill] sm:$0xff] %v10475_v2  ;;  %7848 = vmatpush.xpose.msk.msra.mxu0 %vm564_vm0, %v10410_v14  ;;  %v10481_v3 = vpop.f32.mrf.mxu3  ;;  %7852 = vmatpush.xpose.msk.msra.mxu1 %vm564_vm0, %v10410_v14 }
 0x12d   : > { %15432 = vst [vmem:[#allocation92_spill] sm:$0xff] %v10481_v3  ;;  %7825 = vmatpush.xpose.msk.msra.mxu2 %vm564_vm0, %v10433_v49 }
 0x12e   : > { %7829 = vmatpush.xpose.msk.msra.mxu3 %vm564_vm0, %v10433_v49 }
 0x130   : > { %v10487_v48 = vpop.f32.mrf.mxu0  ;;  %v10489_v51 = vpop.f32.mrf.mxu1  ;;  %7849 = vmatpush.xpose.msk.msra.mxu0 %vm564_vm0, %v10433_v49  ;;  %7795 = vmatmul.msk.f32.gmra.mxu2 %vm564_vm0, %v10042_v11 }
 0x131   : > { %15433 = vst [vmem:[#allocation93_spill] sm:$0xff] %v10487_v48  ;;  %7853 = vmatpush.xpose.msk.msra.mxu1 %vm564_vm0, %v10433_v49  ;;  %7799 = vmatmul.msk.f32.gmra.mxu3 %vm564_vm0, %v9960_v19 }
 0x132   : > { %15434 = vst [vmem:[#allocation94_spill] sm:$0xff] %v10489_v51 }
 0x133   : > { %7819 = vmatmul.msk.f32.gmra.mxu0 %vm564_vm0, %v10046_v10  ;;  %7823 = vmatmul.msk.f32.gmra.mxu1 %vm564_vm0, %v2477_v23  ;;  %v10504_v63 = vpop.f32.mrf.mxu2 }
 0x134   : > { %15435 = vst [vmem:[#allocation95_spill] sm:$0xff] %v10504_v63  ;;  %v10506_v51 = vpop.f32.mrf.mxu3  ;;  %v10565_v63 = vld [vmem:[%s15344_s2 + $0x28] sm:$0xff] }
 0x135   : > { %15436 = vst [vmem:[#allocation96_spill] sm:$0xff] %v10506_v51  ;;  %v9177_v51 = vld [vmem:[%s9431_s27] sm:$0xff] }
 0x138   : > { %v10508_v48 = vpop.f32.mrf.mxu0  ;;  %v10510_v3 = vpop.f32.mrf.mxu1  ;;  %7810 = vmatmul.msk.f32.vlgmr.msrb.gmra.mxu2 %vm564_vm0, %v10134_v50 }
 0x139   : > { %15437 = vst [vmem:[#allocation97_spill] sm:$0xff] %v10508_v48  ;;  %7814 = vmatmul.msk.f32.vlgmr.msrb.gmra.mxu3 %vm564_vm0, %v10070_v1  ;;  %7840 = vmatpush.xpose.msk.msrb.mxu2 %vm564_vm0, %v10410_v14 }
 0x13a   : > { %15438 = vst [vmem:[#allocation98_spill] sm:$0xff] %v10510_v3  ;;  %7844 = vmatpush.xpose.msk.msrb.mxu3 %vm564_vm0, %v10410_v14  ;;  %v15443_v3 = vld [vmem:[#allocation8_spill] sm:$0xff] }
 0x13b   : > { %7834 = vmatmul.msk.f32.vlgmr.msrb.gmra.mxu0 %vm564_vm0, %v9512_v22  ;;  %7838 = vmatmul.msk.f32.vlgmr.msrb.gmra.mxu1 %vm564_vm0, %v9520_v24  ;;  %v10522_v10 = vpop.f32.mrf.mxu2 }
 0x13c   : > { %15439 = vst [vmem:[#allocation99_spill] sm:$0xff] %v10522_v10  ;;  %7864 = vmatpush.xpose.msk.msrb.mxu0 %vm564_vm0, %v10410_v14  ;;  %v10528_v23 = vpop.f32.mrf.mxu3  ;;  %7868 = vmatpush.xpose.msk.msrb.mxu1 %vm564_vm0, %v10410_v14 }
 0x13d   : > { %15440 = vst [vmem:[#allocation100_spill] sm:$0xff] %v10528_v23  ;;  %7841 = vmatpush.xpose.msk.msrb.mxu2 %vm564_vm0, %v10433_v49 }
 0x13e   : > { %7845 = vmatpush.xpose.msk.msrb.mxu3 %vm564_vm0, %v10433_v49 }
 0x140   : > { %v10534_v22 = vpop.f32.mrf.mxu0  ;;  %v10536_v24 = vpop.f32.mrf.mxu1  ;;  %7865 = vmatpush.xpose.msk.msrb.mxu0 %vm564_vm0, %v10433_v49  ;;  %7811 = vmatmul.msk.f32.gmra.mxu2 %vm564_vm0, %v10122_v25 }
 0x141   : > { %15441 = vst [vmem:[#allocation101_spill] sm:$0xff] %v10534_v22  ;;  %7869 = vmatpush.xpose.msk.msrb.mxu1 %vm564_vm0, %v10433_v49  ;;  %7815 = vmatmul.msk.f32.gmra.mxu3 %vm564_vm0, %v10052_v47  ;;  %v15444_v22 = vld [vmem:[#allocation9_spill] sm:$0xff] }
 0x142   : > { %15442 = vst [vmem:[#allocation102_spill] sm:$0xff] %v10536_v24 }
 0x143   : > { %7835 = vmatmul.msk.f32.gmra.mxu0 %vm564_vm0, %v15443_v3  ;;  %7839 = vmatmul.msk.f32.gmra.mxu1 %vm564_vm0, %v15444_v22  ;;  %v10552_v24 = vpop.f32.mrf.mxu2  ;;  %v9178_v3 = vld [vmem:[%s9431_s27 + $0x10] sm:$0xff]  ;;  %v15449_v22 = vld [vmem:[#allocation10_spill] sm:$0xff] }
 0x144   : > { %15445 = vst [vmem:[#allocation8_spill] sm:$0xff] %v10552_v24  ;;  %v10554_v48 = vpop.f32.mrf.mxu3 }
 0x145   : > { %15446 = vst [vmem:[#allocation9_spill] sm:$0xff] %v10554_v48  ;;  %v15450_v48 = vld [vmem:[#allocation12_spill] sm:$0xff] }
 0x148   : > { %v10556_v23 = vpop.f32.mrf.mxu0  ;;  %v10558_v10 = vpop.f32.mrf.mxu1  ;;  %7826 = vmatmul.msk.f32.vlgmr.msra.gmra.mxu2 %vm564_vm0, %v9177_v51 }
 0x149   : > { %15447 = vst [vmem:[#allocation103_spill] sm:$0xff] %v10556_v23  ;;  %7830 = vmatmul.msk.f32.vlgmr.msra.gmra.mxu3 %vm564_vm0, %v9178_v3  ;;  %7856 = vmatpush.xpose.msk.msra.mxu2 %vm564_vm0, %v10410_v14  ;;  %v10588_v3 = vld [vmem:[%s15344_s2 + $0x20] sm:$0xff] }
 0x14a   : > { %15448 = vst [vmem:[#allocation104_spill] sm:$0xff] %v10558_v10  ;;  %7860 = vmatpush.xpose.msk.msra.mxu3 %vm564_vm0, %v10410_v14 }
 0x14b   : > { %7850 = vmatmul.msk.f32.vlgmr.msra.gmra.mxu0 %vm564_vm0, %v15449_v22  ;;  %7854 = vmatmul.msk.f32.vlgmr.msra.gmra.mxu1 %vm564_vm0, %v15450_v48  ;;  %v10575_v24 = vpop.f32.mrf.mxu2 }
 0x14c   : > { %15451 = vst [vmem:[#allocation10_spill] sm:$0xff] %v10575_v24  ;;  %7880 = vmatpush.xpose.msk.msra.mxu0 %vm564_vm0, %v10565_v63  ;;  %v10581_v10 = vpop.f32.mrf.mxu3  ;;  %7884 = vmatpush.xpose.msk.msra.mxu1 %vm564_vm0, %v10565_v63  ;;  %v9180_v24 = vld [vmem:[%s9431_s27 + $0x18] sm:$0xff] }
 0x14d   : > { %15452 = vst [vmem:[#allocation12_spill] sm:$0xff] %v10581_v10  ;;  %7857 = vmatpush.xpose.msk.msra.mxu2 %vm564_vm0, %v10433_v49  ;;  %v10601_v10 = vld [vmem:[%s9431_s27 + $0x8] sm:$0xff] }
 0x14e   : > { %7861 = vmatpush.xpose.msk.msra.mxu3 %vm564_vm0, %v10433_v49 }
 0x150   : > { %v10592_v48 = vpop.f32.mrf.mxu0  ;;  %v10594_v22 = vpop.f32.mrf.mxu1  ;;  %7881 = vmatpush.xpose.msk.msra.mxu0 %vm564_vm0, %v10588_v3  ;;  %7827 = vmatmul.msk.f32.gmra.mxu2 %vm564_vm0, %v10601_v10 }
 0x151   : > { %15453 = vst [vmem:[#allocation105_spill] sm:$0xff] %v10592_v48  ;;  %7885 = vmatpush.xpose.msk.msra.mxu1 %vm564_vm0, %v10588_v3  ;;  %7831 = vmatmul.msk.f32.gmra.mxu3 %vm564_vm0, %v9180_v24  ;;  %v15455_v48 = vld [vmem:[#allocation11_spill] sm:$0xff] }
 0x152   : > { %15454 = vst [vmem:[#allocation106_spill] sm:$0xff] %v10594_v22  ;;  %v15456_v22 = vld [vmem:[#allocation13_spill] sm:$0xff]  ;;  %v10627_v24 = vld [vmem:[%s9431_s27 + $0x50] sm:$0xff] }
 0x153   : > { %7851 = vmatmul.msk.f32.gmra.mxu0 %vm564_vm0, %v15455_v48  ;;  %7855 = vmatmul.msk.f32.gmra.mxu1 %vm564_vm0, %v15456_v22  ;;  %v10613_v23 = vpop.f32.mrf.mxu2  ;;  %v15461_v48 = vld [vmem:[#allocation17_spill] sm:$0xff]  ;;  %v15462_v22 = vld [vmem:[#allocation19_spill] sm:$0xff] }
 0x154   : > { %15457 = vst [vmem:[#allocation11_spill] sm:$0xff] %v10613_v23  ;;  %v10615_v2 = vpop.f32.mrf.mxu3 }
 0x155   : > { %15458 = vst [vmem:[#allocation13_spill] sm:$0xff] %v10615_v2 }
 0x158   : > { %v10617_v13 = vpop.f32.mrf.mxu0  ;;  %v10619_v32 = vpop.f32.mrf.mxu1  ;;  %7842 = vmatmul.msk.f32.vlgmr.msrb.gmra.mxu2 %vm564_vm0, %v10622_v59 }
 0x159   : > { %15459 = vst [vmem:[#allocation107_spill] sm:$0xff] %v10617_v13  ;;  %7846 = vmatmul.msk.f32.vlgmr.msrb.gmra.mxu3 %vm564_vm0, %v10627_v24  ;;  %7872 = vmatpush.xpose.msk.msrb.mxu2 %vm564_vm0, %v10410_v14  ;;  %v2839_v13 = vrot.slane %v10601_v10, 2 }
 0x15a   : > { %15460 = vst [vmem:[#allocation108_spill] sm:$0xff] %v10619_v32  ;;  %7876 = vmatpush.xpose.msk.msrb.mxu3 %vm564_vm0, %v10410_v14  ;;  %v10658_v14 = vld [vmem:[%s9431_s27 + $0x48] sm:$0xff] }
 0x15b   : > { %7866 = vmatmul.msk.f32.vlgmr.msrb.gmra.mxu0 %vm564_vm0, %v15461_v48  ;;  %7870 = vmatmul.msk.f32.vlgmr.msrb.gmra.mxu1 %vm564_vm0, %v15462_v22  ;;  %v10637_v2 = vpop.f32.mrf.mxu2  ;;  %15467 = vst [vmem:[#allocation111_spill] sm:$0xff] %v10658_v14  ;;  %v10665_v22 = vld [vmem:[%s9431_s27 + $0x58] sm:$0xff] }
 0x15c   : > { %15463 = vst [vmem:[#allocation17_spill] sm:$0xff] %v10637_v2  ;;  %7896 = vmatpush.xpose.msk.msrb.mxu0 %vm564_vm0, %v10565_v63  ;;  %v10643_v23 = vpop.f32.mrf.mxu3  ;;  %7900 = vmatpush.xpose.msk.msrb.mxu1 %vm564_vm0, %v10565_v63 }
 0x15d   : > { %15464 = vst [vmem:[#allocation19_spill] sm:$0xff] %v10643_v23  ;;  %7873 = vmatpush.xpose.msk.msrb.mxu2 %vm564_vm0, %v10433_v49 }
 0x15e   : > { %7877 = vmatpush.xpose.msk.msrb.mxu3 %vm564_vm0, %v10433_v49  ;;  %15468 = vst [vmem:[#allocation112_spill] sm:$0xff] %v10665_v22  ;;  %v15470_v49 = vld [vmem:[#allocation20_spill] sm:$0xff] }
 0x160   : > { %v10649_v48 = vpop.f32.mrf.mxu0  ;;  %v10651_v32 = vpop.f32.mrf.mxu1  ;;  %7897 = vmatpush.xpose.msk.msrb.mxu0 %vm564_vm0, %v10588_v3  ;;  %7843 = vmatmul.msk.f32.gmra.mxu2 %vm564_vm0, %v10658_v14 }
 0x161   : > { %15465 = vst [vmem:[#allocation109_spill] sm:$0xff] %v10649_v48  ;;  %7901 = vmatpush.xpose.msk.msrb.mxu1 %vm564_vm0, %v10588_v3  ;;  %7847 = vmatmul.msk.f32.gmra.mxu3 %vm564_vm0, %v10665_v22  ;;  %v2838_v48 = vrot.slane %v9177_v51, 2  ;;  %v10684_v22 = vld [vmem:[%s9431_s27 + $0x80] sm:$0xff] }
 0x162   : > { %15466 = vst [vmem:[#allocation110_spill] sm:$0xff] %v10651_v32  ;;  %v15469_v32 = vld [vmem:[#allocation18_spill] sm:$0xff] }
 0x163   : > { %7867 = vmatmul.msk.f32.gmra.mxu0 %vm564_vm0, %v15469_v32  ;;  %7871 = vmatmul.msk.f32.gmra.mxu1 %vm564_vm0, %v15470_v49  ;;  %v10674_v23 = vpop.f32.mrf.mxu2  ;;  %v2840_v14 = vsel %vm1400_vm2, %v2838_v48, %v2839_v13  ;;  %v10689_v32 = vld [vmem:[%s9431_s27 + $0x90] sm:$0xff]  ;;  %v15475_v51 = vld [vmem:[#allocation22_spill] sm:$0xff] }
 0x164   : > { %15471 = vst [vmem:[#allocation18_spill] sm:$0xff] %v10674_v23  ;;  %v10676_v2 = vpop.f32.mrf.mxu3  ;;  %v15483_v23 = vld [vmem:[#allocation14_spill] sm:$0xff] }
 0x165   : > { %15472 = vst [vmem:[#allocation20_spill] sm:$0xff] %v10676_v2  ;;  %v10742_v2 = vld [vmem:[%s9431_s27 + $0xc0] sm:$0xff] }
 0x168   : > { %v10678_v0 = vpop.f32.mrf.mxu0  ;;  %v10680_v4 = vpop.f32.mrf.mxu1  ;;  %7858 = vmatmul.msk.f32.vlgmr.msra.gmra.mxu2 %vm564_vm0, %v10684_v22 }
 0x169   : > { %15473 = vst [vmem:[#allocation113_spill] sm:$0xff] %v10678_v0  ;;  %7862 = vmatmul.msk.f32.vlgmr.msra.gmra.mxu3 %vm564_vm0, %v10689_v32  ;;  %7888 = vmatpush.xpose.msk.msra.mxu2 %vm564_vm0, %v10565_v63 }
 0x16a   : > { %15474 = vst [vmem:[#allocation114_spill] sm:$0xff] %v10680_v4  ;;  %7892 = vmatpush.xpose.msk.msra.mxu3 %vm564_vm0, %v10565_v63  ;;  %v10726_v4 = vld [vmem:[%s9431_s27 + $0x98] sm:$0xff] }
 0x16b   : > { %7882 = vmatmul.msk.f32.vlgmr.msra.gmra.mxu0 %vm564_vm0, %v2840_v14  ;;  %7886 = vmatmul.msk.f32.vlgmr.msra.gmra.mxu1 %vm564_vm0, %v15475_v51  ;;  %v10698_v10 = vpop.f32.mrf.mxu2  ;;  %v10719_v51 = vld [vmem:[%s9431_s27 + $0x88] sm:$0xff] }
 0x16c   : > { %15476 = vst [vmem:[#allocation22_spill] sm:$0xff] %v10698_v10  ;;  %7912 = vmatpush.xpose.msk.msra.mxu0 %vm564_vm0, %v10565_v63  ;;  %v10704_v48 = vpop.f32.mrf.mxu3  ;;  %7916 = vmatpush.xpose.msk.msra.mxu1 %vm564_vm0, %v10565_v63 }
 0x16d   : > { %15477 = vst [vmem:[#allocation115_spill] sm:$0xff] %v10704_v48  ;;  %7889 = vmatpush.xpose.msk.msra.mxu2 %vm564_vm0, %v10588_v3 }
 0x16e   : > { %7893 = vmatpush.xpose.msk.msra.mxu3 %vm564_vm0, %v10588_v3 }
 0x170   : > { %v10710_v14 = vpop.f32.mrf.mxu0  ;;  %v10712_v49 = vpop.f32.mrf.mxu1  ;;  %7913 = vmatpush.xpose.msk.msra.mxu0 %vm564_vm0, %v10588_v3  ;;  %7859 = vmatmul.msk.f32.gmra.mxu2 %vm564_vm0, %v10719_v51 }
 0x171   : > { %15478 = vst [vmem:[#allocation116_spill] sm:$0xff] %v10710_v14  ;;  %7917 = vmatpush.xpose.msk.msra.mxu1 %vm564_vm0, %v10588_v3  ;;  %7863 = vmatmul.msk.f32.gmra.mxu3 %vm564_vm0, %v10726_v4 }
 0x172   : > { %15479 = vst [vmem:[#allocation117_spill] sm:$0xff] %v10712_v49  ;;  %v15480_v49 = vld [vmem:[#allocation21_spill] sm:$0xff] }
 0x173   : > { %7883 = vmatmul.msk.f32.gmra.mxu0 %vm564_vm0, %v2839_v13  ;;  %7887 = vmatmul.msk.f32.gmra.mxu1 %vm564_vm0, %v15480_v49  ;;  %v10733_v14 = vpop.f32.mrf.mxu2 }
 0x174   : > { %15481 = vst [vmem:[#allocation21_spill] sm:$0xff] %v10733_v14  ;;  %v10735_v0 = vpop.f32.mrf.mxu3 }
 0x175   : > { %15482 = vst [vmem:[#allocation118_spill] sm:$0xff] %v10735_v0 }
 0x178   : > { %v10737_v48 = vpop.f32.mrf.mxu0  ;;  %v10739_v10 = vpop.f32.mrf.mxu1  ;;  %7874 = vmatmul.msk.f32.vlgmr.msrb.gmra.mxu2 %vm564_vm0, %v10742_v2 }
 0x179   : > { %7878 = vmatmul.msk.f32.vlgmr.msrb.gmra.mxu3 %vm564_vm0, %v15483_v23  ;;  %7904 = vmatpush.xpose.msk.msrb.mxu2 %vm564_vm0, %v10565_v63 }
 0x17a   : > { %7908 = vmatpush.xpose.msk.msrb.mxu3 %vm564_vm0, %v10565_v63 }
 0x17b   : > { %7898 = vmatmul.msk.f32.vlgmr.msrb.gmra.mxu0 %vm564_vm0, %v9972_v8  ;;  %7902 = vmatmul.msk.f32.vlgmr.msrb.gmra.mxu1 %vm564_vm0, %v9909_v9  ;;  %v10754_v13 = vpop.f32.mrf.mxu2  ;;  %v10775_v9 = vld [vmem:[%s9431_s27 + $0xc8] sm:$0xff] }
 0x17c   : > { %15484 = vst [vmem:[#allocation14_spill] sm:$0xff] %v10754_v13  ;;  %7928 = vmatpush.xpose.msk.msrb.mxu0 %vm564_vm0, %v10565_v63  ;;  %v10760_v49 = vpop.f32.mrf.mxu3  ;;  %7932 = vmatpush.xpose.msk.msrb.mxu1 %vm564_vm0, %v10565_v63 }
 0x17d   : > { %15485 = vst [vmem:[#allocation119_spill] sm:$0xff] %v10760_v49  ;;  %7905 = vmatpush.xpose.msk.msrb.mxu2 %vm564_vm0, %v10588_v3  ;;  %v10782_v49 = vld [vmem:[%s9431_s27 + $0xd8] sm:$0xff] }
 0x17e   : > { %7909 = vmatpush.xpose.msk.msrb.mxu3 %vm564_vm0, %v10588_v3 }
 0x180   : > { %v10766_v8 = vpop.f32.mrf.mxu0  ;;  %v10768_v23 = vpop.f32.mrf.mxu1  ;;  %7929 = vmatpush.xpose.msk.msrb.mxu0 %vm564_vm0, %v10588_v3  ;;  %7875 = vmatmul.msk.f32.gmra.mxu2 %vm564_vm0, %v10775_v9 }
 0x181   : > { %15486 = vst [vmem:[#allocation120_spill] sm:$0xff] %v10766_v8  ;;  %7933 = vmatpush.xpose.msk.msrb.mxu1 %vm564_vm0, %v10588_v3  ;;  %7879 = vmatmul.msk.f32.gmra.mxu3 %vm564_vm0, %v10782_v49  ;;  %v10803_v8 = vld [vmem:[%s15344_s2 + $0x48] sm:$0xff] }
 0x182   : > { %15487 = vst [vmem:[#allocation121_spill] sm:$0xff] %v10768_v23 }
 0x183   : > { %7899 = vmatmul.msk.f32.gmra.mxu0 %vm564_vm0, %v9956_v56  ;;  %7903 = vmatmul.msk.f32.gmra.mxu1 %vm564_vm0, %v9898_v7  ;;  %v10790_v13 = vpop.f32.mrf.mxu2 }
 0x184   : > { %15488 = vst [vmem:[#allocation122_spill] sm:$0xff] %v10790_v13  ;;  %v10792_v0 = vpop.f32.mrf.mxu3 }
 0x185   : > { %15489 = vst [vmem:[#allocation123_spill] sm:$0xff] %v10792_v0 }
 0x188   : > { %v10794_v14 = vpop.f32.mrf.mxu0  ;;  %v10796_v23 = vpop.f32.mrf.mxu1  ;;  %7890 = vmatmul.msk.f32.vlgmr.msra.gmra.mxu2 %vm564_vm0, %v9862_v54 }
 0x189   : > { %7894 = vmatmul.msk.f32.vlgmr.msra.gmra.mxu3 %vm564_vm0, %v9968_v45  ;;  %7920 = vmatpush.xpose.msk.msra.mxu2 %vm564_vm0, %v10565_v63  ;;  %v10826_v45 = vld [vmem:[%s15344_s2 + $0x40] sm:$0xff] }
 0x18a   : > { %7924 = vmatpush.xpose.msk.msra.mxu3 %vm564_vm0, %v10565_v63 }
 0x18b   : > { %7914 = vmatmul.msk.f32.vlgmr.msra.gmra.mxu0 %vm564_vm0, %v10062_v27  ;;  %7918 = vmatmul.msk.f32.vlgmr.msra.gmra.mxu1 %vm564_vm0, %v9980_v28  ;;  %v10813_v7 = vpop.f32.mrf.mxu2 }
 0x18c   : > { %15490 = vst [vmem:[#allocation124_spill] sm:$0xff] %v10813_v7  ;;  %7944 = vmatpush.xpose.msk.msra.mxu0 %vm564_vm0, %v10803_v8  ;;  %v10819_v54 = vpop.f32.mrf.mxu3  ;;  %7948 = vmatpush.xpose.msk.msra.mxu1 %vm564_vm0, %v10803_v8  ;;  %v9198_v7 = vld [vmem:[%s9431_s27 + $0x68] sm:$0xff] }
 0x18d   : > { %15491 = vst [vmem:[#allocation125_spill] sm:$0xff] %v10819_v54  ;;  %7921 = vmatpush.xpose.msk.msra.mxu2 %vm564_vm0, %v10588_v3 }
 0x18e   : > { %7925 = vmatpush.xpose.msk.msra.mxu3 %vm564_vm0, %v10588_v3 }
 0x190   : > { %v10830_v56 = vpop.f32.mrf.mxu0  ;;  %v10832_v28 = vpop.f32.mrf.mxu1  ;;  %7945 = vmatpush.xpose.msk.msra.mxu0 %vm564_vm0, %v10826_v45  ;;  %7891 = vmatmul.msk.f32.gmra.mxu2 %vm564_vm0, %v9854_v43 }
 0x191   : > { %15492 = vst [vmem:[#allocation126_spill] sm:$0xff] %v10832_v28  ;;  %7949 = vmatpush.xpose.msk.msra.mxu1 %vm564_vm0, %v10826_v45  ;;  %7895 = vmatmul.msk.f32.gmra.mxu3 %vm564_vm0, %v9948_v42 }
 0x193   : > { %7915 = vmatmul.msk.f32.gmra.mxu0 %vm564_vm0, %v10042_v11  ;;  %7919 = vmatmul.msk.f32.gmra.mxu1 %vm564_vm0, %v9960_v19  ;;  %v10848_v27 = vpop.f32.mrf.mxu2 }
 0x194   : > { %15493 = vst [vmem:[#allocation127_spill] sm:$0xff] %v10848_v27  ;;  %v10850_v63 = vpop.f32.mrf.mxu3  ;;  %v15523_v27 = vld [vmem:[#allocation16_spill] sm:$0xff] }
 0x195   : > { %15494 = vst [vmem:[#allocation128_spill] sm:$0xff] %v10850_v63 }
 0x198   : > { %v10852_v3 = vpop.f32.mrf.mxu0  ;;  %v10854_v54 = vpop.f32.mrf.mxu1  ;;  %7906 = vmatmul.msk.f32.vlgmr.msrb.gmra.mxu2 %vm564_vm0, %v9913_v34 }
 0x199   : > { %15495 = vst [vmem:[#allocation129_spill] sm:$0xff] %v10852_v3  ;;  %7910 = vmatmul.msk.f32.vlgmr.msrb.gmra.mxu3 %vm564_vm0, %v10058_v26  ;;  %7936 = vmatpush.xpose.msk.msrb.mxu2 %vm564_vm0, %v10803_v8  ;;  %v15573_v3 = vld [vmem:[#allocation74_spill] sm:$0xff] }
 0x19a   : > { %15496 = vst [vmem:[#allocation130_spill] sm:$0xff] %v10854_v54  ;;  %7940 = vmatpush.xpose.msk.msrb.mxu3 %vm564_vm0, %v10803_v8 }
 0x19b   : > { %7930 = vmatmul.msk.f32.vlgmr.msrb.gmra.mxu0 %vm564_vm0, %v10134_v50  ;;  %7934 = vmatmul.msk.f32.vlgmr.msrb.gmra.mxu1 %vm564_vm0, %v10070_v1  ;;  %v10866_v19 = vpop.f32.mrf.mxu2 }
 0x19c   : > { %15497 = vst [vmem:[#allocation131_spill] sm:$0xff] %v10866_v19  ;;  %7960 = vmatpush.xpose.msk.msrb.mxu0 %vm564_vm0, %v10803_v8  ;;  %v10872_v43 = vpop.f32.mrf.mxu3  ;;  %7964 = vmatpush.xpose.msk.msrb.mxu1 %vm564_vm0, %v10803_v8 }
 0x19d   : > { %15498 = vst [vmem:[#allocation132_spill] sm:$0xff] %v10872_v43  ;;  %7937 = vmatpush.xpose.msk.msrb.mxu2 %vm564_vm0, %v10826_v45 }
 0x19e   : > { %7941 = vmatpush.xpose.msk.msrb.mxu3 %vm564_vm0, %v10826_v45 }
 0x1a0   : > { %v10878_v50 = vpop.f32.mrf.mxu0  ;;  %v10880_v34 = vpop.f32.mrf.mxu1  ;;  %7961 = vmatpush.xpose.msk.msrb.mxu0 %vm564_vm0, %v10826_v45  ;;  %7907 = vmatmul.msk.f32.gmra.mxu2 %vm564_vm0, %v9902_v58 }
 0x1a1   : > { %15499 = vst [vmem:[#allocation133_spill] sm:$0xff] %v10878_v50  ;;  %7965 = vmatpush.xpose.msk.msrb.mxu1 %vm564_vm0, %v10826_v45  ;;  %7911 = vmatmul.msk.f32.gmra.mxu3 %vm564_vm0, %v10034_v44 }
 0x1a2   : > { %15500 = vst [vmem:[#allocation134_spill] sm:$0xff] %v10880_v34 }
 0x1a3   : > { %7931 = vmatmul.msk.f32.gmra.mxu0 %vm564_vm0, %v10122_v25  ;;  %7935 = vmatmul.msk.f32.gmra.mxu1 %vm564_vm0, %v10052_v47  ;;  %v10896_v1 = vpop.f32.mrf.mxu2 }
 0x1a4   : > { %15501 = vst [vmem:[#allocation135_spill] sm:$0xff] %v10896_v1  ;;  %v10898_v42 = vpop.f32.mrf.mxu3 }
 0x1a5   : > { %15502 = vst [vmem:[#allocation136_spill] sm:$0xff] %v10898_v42 }
 0x1a8   : > { %v10900_v11 = vpop.f32.mrf.mxu0  ;;  %v10902_v26 = vpop.f32.mrf.mxu1  ;;  %7922 = vmatmul.msk.f32.vlgmr.msra.gmra.mxu2 %vm564_vm0, %v9984_v29 }
 0x1a9   : > { %15503 = vst [vmem:[#allocation137_spill] sm:$0xff] %v10900_v11  ;;  %7926 = vmatmul.msk.f32.vlgmr.msra.gmra.mxu3 %vm564_vm0, %v10130_v46  ;;  %7952 = vmatpush.xpose.msk.msra.mxu2 %vm564_vm0, %v10803_v8 }
 0x1aa   : > { %15504 = vst [vmem:[#allocation138_spill] sm:$0xff] %v10902_v26  ;;  %7956 = vmatpush.xpose.msk.msra.mxu3 %vm564_vm0, %v10803_v8 }
 0x1ab   : > { %7946 = vmatmul.msk.f32.vlgmr.msra.gmra.mxu0 %vm564_vm0, %v9574_v39  ;;  %7950 = vmatmul.msk.f32.vlgmr.msra.gmra.mxu1 %vm564_vm0, %v9487_v20  ;;  %v10914_v25 = vpop.f32.mrf.mxu2 }
 0x1ac   : > { %15505 = vst [vmem:[#allocation139_spill] sm:$0xff] %v10914_v25  ;;  %7976 = vmatpush.xpose.msk.msra.mxu0 %vm564_vm0, %v10803_v8  ;;  %v10920_v44 = vpop.f32.mrf.mxu3  ;;  %7980 = vmatpush.xpose.msk.msra.mxu1 %vm564_vm0, %v10803_v8 }
 0x1ad   : > { %15506 = vst [vmem:[#allocation140_spill] sm:$0xff] %v10920_v44  ;;  %7953 = vmatpush.xpose.msk.msra.mxu2 %vm564_vm0, %v10826_v45 }
 0x1ae   : > { %7957 = vmatpush.xpose.msk.msra.mxu3 %vm564_vm0, %v10826_v45 }
 0x1b0   : > { %v10926_v39 = vpop.f32.mrf.mxu0  ;;  %v10928_v46 = vpop.f32.mrf.mxu1  ;;  %7977 = vmatpush.xpose.msk.msra.mxu0 %vm564_vm0, %v10826_v45  ;;  %7923 = vmatmul.msk.f32.gmra.mxu2 %vm564_vm0, %v9964_v52  ;;  %v15511_v52 = vld [vmem:[#allocation7_spill] sm:$0xff] }
 0x1b1   : > { %15507 = vst [vmem:[#allocation141_spill] sm:$0xff] %v10926_v39  ;;  %7981 = vmatpush.xpose.msk.msra.mxu1 %vm564_vm0, %v10826_v45  ;;  %7927 = vmatmul.msk.f32.gmra.mxu3 %vm564_vm0, %v10114_v30  ;;  %v10957_v30 = vld [vmem:[%s15344_s2 + $0x68] sm:$0xff] }
 0x1b2   : > { %15508 = vst [vmem:[#allocation142_spill] sm:$0xff] %v10928_v46 }
 0x1b3   : > { %7947 = vmatmul.msk.f32.gmra.mxu0 %vm564_vm0, %v9552_v33  ;;  %7951 = vmatmul.msk.f32.gmra.mxu1 %vm564_vm0, %v9472_v16  ;;  %v10944_v20 = vpop.f32.mrf.mxu2 }
 0x1b4   : > { %15509 = vst [vmem:[#allocation143_spill] sm:$0xff] %v10944_v20  ;;  %v10946_v47 = vpop.f32.mrf.mxu3 }
 0x1b5   : > { %15510 = vst [vmem:[#allocation144_spill] sm:$0xff] %v10946_v47  ;;  %v11225_v47 = vld [vmem:[%s15222_s5 + $0x78] sm:$0xff] }
 0x1b8   : > { %v10948_v58 = vpop.f32.mrf.mxu0  ;;  %v10950_v29 = vpop.f32.mrf.mxu1  ;;  %7938 = vmatmul.msk.f32.vlgmr.msrb.gmra.mxu2 %vm564_vm0, %v15511_v52  ;;  %v15514_v52 = vld [vmem:[#allocation6_spill] sm:$0xff] }
 0x1b9   : > { %7942 = vmatmul.msk.f32.vlgmr.msrb.gmra.mxu3 %vm564_vm0, %v9570_v38  ;;  %7968 = vmatpush.xpose.msk.msrb.mxu2 %vm564_vm0, %v10803_v8  ;;  %v10980_v38 = vld [vmem:[%s15344_s2 + $0x60] sm:$0xff] }
 0x1ba   : > { %7972 = vmatpush.xpose.msk.msrb.mxu3 %vm564_vm0, %v10803_v8 }
 0x1bb   : > { %7962 = vmatmul.msk.f32.vlgmr.msrb.gmra.mxu0 %vm564_vm0, %v9672_v61  ;;  %7966 = vmatmul.msk.f32.vlgmr.msrb.gmra.mxu1 %vm564_vm0, %v9578_v40  ;;  %v10967_v16 = vpop.f32.mrf.mxu2 }
 0x1bc   : > { %15512 = vst [vmem:[#allocation7_spill] sm:$0xff] %v10967_v16  ;;  %7992 = vmatpush.xpose.msk.msrb.mxu0 %vm564_vm0, %v10957_v30  ;;  %v10973_v33 = vpop.f32.mrf.mxu3  ;;  %7996 = vmatpush.xpose.msk.msrb.mxu1 %vm564_vm0, %v10957_v30 }
 0x1bd   : > { %15513 = vst [vmem:[#allocation145_spill] sm:$0xff] %v10973_v33  ;;  %7969 = vmatpush.xpose.msk.msrb.mxu2 %vm564_vm0, %v10826_v45 }
 0x1be   : > { %7973 = vmatpush.xpose.msk.msrb.mxu3 %vm564_vm0, %v10826_v45 }
 0x1c0   : > { %v10984_v40 = vpop.f32.mrf.mxu0  ;;  %v10986_v61 = vpop.f32.mrf.mxu1  ;;  %7993 = vmatpush.xpose.msk.msrb.mxu0 %vm564_vm0, %v10980_v38  ;;  %7939 = vmatmul.msk.f32.gmra.mxu2 %vm564_vm0, %v15514_v52  ;;  %v9195_v52 = vld [vmem:[%s9431_s27 + $0x38] sm:$0xff] }
 0x1c1   : > { %7997 = vmatpush.xpose.msk.msrb.mxu1 %vm564_vm0, %v10980_v38  ;;  %7943 = vmatmul.msk.f32.gmra.mxu3 %vm564_vm0, %v9542_v31 }
 0x1c3   : > { %7963 = vmatmul.msk.f32.gmra.mxu0 %vm564_vm0, %v9656_v55  ;;  %7967 = vmatmul.msk.f32.gmra.mxu1 %vm564_vm0, %v9556_v35  ;;  %v11002_v26 = vpop.f32.mrf.mxu2 }
 0x1c4   : > { %15515 = vst [vmem:[#allocation6_spill] sm:$0xff] %v11002_v26  ;;  %v11004_v46 = vpop.f32.mrf.mxu3 }
 0x1c5   : > { %15516 = vst [vmem:[#allocation146_spill] sm:$0xff] %v11004_v46  ;;  %v9199_v46 = vld [vmem:[%s9431_s27 + $0x78] sm:$0xff] }
 0x1c8   : > { %v11006_v63 = vpop.f32.mrf.mxu0  ;;  %v11008_v39 = vpop.f32.mrf.mxu1  ;;  %7954 = vmatmul.msk.f32.vlgmr.msra.gmra.mxu2 %vm564_vm0, %v9491_v21 }
 0x1c9   : > { %7958 = vmatmul.msk.f32.vlgmr.msra.gmra.mxu3 %vm564_vm0, %v9668_v60  ;;  %7984 = vmatpush.xpose.msk.msra.mxu2 %vm564_vm0, %v10803_v8 }
 0x1ca   : > { %7988 = vmatpush.xpose.msk.msra.mxu3 %vm564_vm0, %v10803_v8 }
 0x1cb   : > { %7978 = vmatmul.msk.f32.vlgmr.msra.gmra.mxu0 %vm564_vm0, %v9740_v17  ;;  %7982 = vmatmul.msk.f32.vlgmr.msra.gmra.mxu1 %vm564_vm0, %v9676_v62  ;;  %v11020_v31 = vpop.f32.mrf.mxu2 }
 0x1cc   : > { %8008 = vmatpush.xpose.msk.msra.mxu0 %vm564_vm0, %v10957_v30  ;;  %v11026_v21 = vpop.f32.mrf.mxu3  ;;  %8012 = vmatpush.xpose.msk.msra.mxu1 %vm564_vm0, %v10957_v30 }
 0x1cd   : > { %7985 = vmatpush.xpose.msk.msra.mxu2 %vm564_vm0, %v10826_v45 }
 0x1ce   : > { %7989 = vmatpush.xpose.msk.msra.mxu3 %vm564_vm0, %v10826_v45  ;;  %v9194_v45 = vld [vmem:[%s9431_s27 + $0x28] sm:$0xff] }
 0x1d0   : > { %v11032_v35 = vpop.f32.mrf.mxu0  ;;  %v11034_v55 = vpop.f32.mrf.mxu1  ;;  %8009 = vmatpush.xpose.msk.msra.mxu0 %vm564_vm0, %v10980_v38  ;;  %7955 = vmatmul.msk.f32.gmra.mxu2 %vm564_vm0, %v9476_v18  ;;  %v9192_v18 = vld [vmem:[%s9431_s27 + $0x20] sm:$0xff] }
 0x1d1   : > { %15517 = vst [vmem:[#allocation147_spill] sm:$0xff] %v11032_v35  ;;  %8013 = vmatpush.xpose.msk.msra.mxu1 %vm564_vm0, %v10980_v38  ;;  %7959 = vmatmul.msk.f32.gmra.mxu3 %vm564_vm0, %v9648_v53  ;;  %v9193_v53 = vld [vmem:[%s9431_s27 + $0x30] sm:$0xff] }
 0x1d2   : > { %15518 = vst [vmem:[#allocation148_spill] sm:$0xff] %v11034_v55 }
 0x1d3   : > { %7979 = vmatmul.msk.f32.gmra.mxu0 %vm564_vm0, %v9732_v12  ;;  %7983 = vmatmul.msk.f32.gmra.mxu1 %vm564_vm0, %v9660_v57  ;;  %v11050_v60 = vpop.f32.mrf.mxu2 }
 0x1d4   : > { %v11052_v62 = vpop.f32.mrf.mxu3 }
 0x1d8   : > { %v11054_v17 = vpop.f32.mrf.mxu0  ;;  %v11056_v8 = vpop.f32.mrf.mxu1  ;;  %7970 = vmatmul.msk.f32.vlgmr.msrb.gmra.mxu2 %vm564_vm0, %v9582_v41 }
 0x1d9   : > { %15519 = vst [vmem:[#allocation149_spill] sm:$0xff] %v11054_v17  ;;  %7974 = vmatmul.msk.f32.vlgmr.msrb.gmra.mxu3 %vm564_vm0, %v9736_v15  ;;  %8000 = vmatpush.xpose.msk.msrb.mxu2 %vm564_vm0, %v10957_v30  ;;  %v11278_v17 = vld [vmem:[%s15222_s5 + $0x60] sm:$0xff] }
 0x1da   : > { %15520 = vst [vmem:[#allocation150_spill] sm:$0xff] %v11056_v8  ;;  %8004 = vmatpush.xpose.msk.msrb.mxu3 %vm564_vm0, %v10957_v30 }
 0x1db   : > { %7994 = vmatmul.msk.f32.vlgmr.msrb.gmra.mxu0 %vm564_vm0, %v9192_v18  ;;  %7998 = vmatmul.msk.f32.vlgmr.msrb.gmra.mxu1 %vm564_vm0, %v9193_v53  ;;  %v11068_v57 = vpop.f32.mrf.mxu2  ;;  %15545 = vst [vmem:[#allocation163_spill] sm:$0xff] %v11278_v17 }
 0x1dc   : > { %8024 = vmatpush.xpose.msk.msrb.mxu0 %vm564_vm0, %v10957_v30  ;;  %v11074_v41 = vpop.f32.mrf.mxu3  ;;  %8028 = vmatpush.xpose.msk.msrb.mxu1 %vm564_vm0, %v10957_v30 }
 0x1dd   : > { %8001 = vmatpush.xpose.msk.msrb.mxu2 %vm564_vm0, %v10980_v38 }
 0x1de   : > { %8005 = vmatpush.xpose.msk.msrb.mxu3 %vm564_vm0, %v10980_v38 }
 0x1e0   : > { %v11080_v12 = vpop.f32.mrf.mxu0  ;;  %v11082_v15 = vpop.f32.mrf.mxu1  ;;  %8025 = vmatpush.xpose.msk.msrb.mxu0 %vm564_vm0, %v10980_v38  ;;  %7971 = vmatmul.msk.f32.gmra.mxu2 %vm564_vm0, %v9560_v37 }
 0x1e1   : > { %15521 = vst [vmem:[#allocation151_spill] sm:$0xff] %v11080_v12  ;;  %8029 = vmatpush.xpose.msk.msrb.mxu1 %vm564_vm0, %v10980_v38  ;;  %7975 = vmatmul.msk.f32.gmra.mxu3 %vm564_vm0, %v9724_v6  ;;  %v9196_v6 = vld [vmem:[%s9431_s27 + $0x60] sm:$0xff] }
 0x1e2   : > { %15522 = vst [vmem:[#allocation152_spill] sm:$0xff] %v11082_v15 }
 0x1e3   : > { %7995 = vmatmul.msk.f32.gmra.mxu0 %vm564_vm0, %v9194_v45  ;;  %7999 = vmatmul.msk.f32.gmra.mxu1 %vm564_vm0, %v9195_v52  ;;  %v11098_v18 = vpop.f32.mrf.mxu2  ;;  %v9197_v45 = vld [vmem:[%s9431_s27 + $0x70] sm:$0xff] }
 0x1e4   : > { %v11100_v53 = vpop.f32.mrf.mxu3 }
 0x1e8   : > { %v11102_v11 = vpop.f32.mrf.mxu0  ;;  %v11104_v37 = vpop.f32.mrf.mxu1  ;;  %7986 = vmatmul.msk.f32.vlgmr.msra.gmra.mxu2 %vm564_vm0, %v15523_v27 }
 0x1e9   : > { %7990 = vmatmul.msk.f32.vlgmr.msra.gmra.mxu3 %vm564_vm0, %v10352_v5  ;;  %8016 = vmatpush.xpose.msk.msra.mxu2 %vm564_vm0, %v10957_v30 }
 0x1ea   : > { %8020 = vmatpush.xpose.msk.msra.mxu3 %vm564_vm0, %v10957_v30 }
 0x1eb   : > { %8010 = vmatmul.msk.f32.vlgmr.msra.gmra.mxu0 %vm564_vm0, %v9196_v6  ;;  %8014 = vmatmul.msk.f32.vlgmr.msra.gmra.mxu1 %vm564_vm0, %v9197_v45  ;;  %v11116_v52 = vpop.f32.mrf.mxu2  ;;  %v15524_v45 = vld [vmem:[#allocation15_spill] sm:$0xff] }
 0x1ec   : > { %8040 = vmatpush.xpose.msk.msra.mxu0 %vm564_vm0, %v10957_v30  ;;  %v11122_v5 = vpop.f32.mrf.mxu3  ;;  %8044 = vmatpush.xpose.msk.msra.mxu1 %vm564_vm0, %v10957_v30 }
 0x1ed   : > { %8017 = vmatpush.xpose.msk.msra.mxu2 %vm564_vm0, %v10980_v38 }
 0x1ee   : > { %8021 = vmatpush.xpose.msk.msra.mxu3 %vm564_vm0, %v10980_v38 }
 0x1f0   : > { %v11128_v27 = vpop.f32.mrf.mxu0  ;;  %v11130_v6 = vpop.f32.mrf.mxu1  ;;  %8041 = vmatpush.xpose.msk.msra.mxu0 %vm564_vm0, %v10980_v38  ;;  %7987 = vmatmul.msk.f32.gmra.mxu2 %vm564_vm0, %v15524_v45 }
 0x1f1   : > { %8045 = vmatpush.xpose.msk.msra.mxu1 %vm564_vm0, %v10980_v38  ;;  %7991 = vmatmul.msk.f32.gmra.mxu3 %vm564_vm0, %v10336_v36  ;;  %v9200_v36 = vld [vmem:[%s9431_s27 + $0xa0] sm:$0xff] }
 0x1f3   : > { %8011 = vmatmul.msk.f32.gmra.mxu0 %vm564_vm0, %v9198_v7  ;;  %8015 = vmatmul.msk.f32.gmra.mxu1 %vm564_vm0, %v9199_v46  ;;  %v11146_v26 = vpop.f32.mrf.mxu2  ;;  %v9201_v7 = vld [vmem:[%s9431_s27 + $0xb0] sm:$0xff] }
 0x1f4   : > { %v11148_v33 = vpop.f32.mrf.mxu3 }
 0x1f8   : > { %v11150_v16 = vpop.f32.mrf.mxu0  ;;  %v11152_v45 = vpop.f32.mrf.mxu1  ;;  %8002 = vmatmul.msk.f32.vlgmr.msrb.gmra.mxu2 %vm564_vm0, %v10622_v59 }
 0x1f9   : > { %8006 = vmatmul.msk.f32.vlgmr.msrb.gmra.mxu3 %vm564_vm0, %v10627_v24  ;;  %8032 = vmatpush.xpose.msk.msrb.mxu2 %vm564_vm0, %v10957_v30 }
 0x1fa   : > { %8036 = vmatpush.xpose.msk.msrb.mxu3 %vm564_vm0, %v10957_v30  ;;  %v9202_v30 = vld [vmem:[%s9431_s27 + $0xa8] sm:$0xff] }
 0x1fb   : > { %8026 = vmatmul.msk.f32.vlgmr.msrb.gmra.mxu0 %vm564_vm0, %v9200_v36  ;;  %8030 = vmatmul.msk.f32.vlgmr.msrb.gmra.mxu1 %vm564_vm0, %v9201_v7  ;;  %v11164_v46 = vpop.f32.mrf.mxu2  ;;  %v15527_v36 = vld [vmem:[#allocation111_spill] sm:$0xff]  ;;  %v15528_v7 = vld [vmem:[#allocation112_spill] sm:$0xff] }
 0x1fc   : > { %15525 = vst [vmem:[#allocation16_spill] sm:$0xff] %v11164_v46  ;;  %v11168_v59 = vpop.f32.mrf.mxu3  ;;  %8068 = vmatpush.xpose.msk.msrb.mxu0 %vm4114_vm3, %v11225_v47  ;;  %8078 = vmatpush.xpose.msk.msrb.mxu1 %vm4114_vm3, %v11225_v47 }
 0x1fd   : > { %15526 = vst [vmem:[#allocation15_spill] sm:$0xff] %v11168_v59  ;;  %8033 = vmatpush.xpose.msk.msrb.mxu2 %vm564_vm0, %v10980_v38  ;;  %v9203_v59 = vld [vmem:[%s9431_s27 + $0xb8] sm:$0xff] }
 0x1fe   : > { %8037 = vmatpush.xpose.msk.msrb.mxu3 %vm564_vm0, %v10980_v38 }
 0x200   : > { %v11172_v24 = vpop.f32.mrf.mxu0  ;;  %v11174_v15 = vpop.f32.mrf.mxu1  ;;  %8003 = vmatmul.msk.f32.gmra.mxu2 %vm564_vm0, %v15527_v36  ;;  %v9204_v36 = vld [vmem:[%s9431_s27 + $0xe0] sm:$0xff] }
 0x201   : > { %8007 = vmatmul.msk.f32.gmra.mxu3 %vm564_vm0, %v15528_v7  ;;  %v15531_v7 = vld [vmem:[#allocation69_spill] sm:$0xff] }
 0x203   : > { %8027 = vmatmul.msk.f32.gmra.mxu0 %vm564_vm0, %v9202_v30  ;;  %8031 = vmatmul.msk.f32.gmra.mxu1 %vm564_vm0, %v9203_v59  ;;  %v11186_v46 = vpop.f32.mrf.mxu2 }
 0x204   : > { %15529 = vst [vmem:[#allocation111_spill] sm:$0xff] %v11186_v46  ;;  %v11188_v12 = vpop.f32.mrf.mxu3 }
 0x205   : > { %15530 = vst [vmem:[#allocation112_spill] sm:$0xff] %v11188_v12 }
 0x208   : > { %v11190_v8 = vpop.f32.mrf.mxu0  ;;  %v11192_v38 = vpop.f32.mrf.mxu1  ;;  %8018 = vmatmul.msk.f32.vlgmr.msra.gmra.mxu2 %vm564_vm0, %v10684_v22  ;;  %v9205_v22 = vld [vmem:[%s9431_s27 + $0xe8] sm:$0xff] }
 0x209   : > { %8022 = vmatmul.msk.f32.vlgmr.msra.gmra.mxu3 %vm564_vm0, %v10689_v32  ;;  %v15534_v32 = vld [vmem:[#allocation70_spill] sm:$0xff]  ;;  %8048 = vmatpush.xpose.msk.msra.mxu2 %vm4114_vm3, %v11225_v47 }
 0x20a   : > { %8058 = vmatpush.xpose.msk.msra.mxu3 %vm4114_vm3, %v11225_v47 }
 0x20b   : > { %8042 = vmatmul.msk.f32.vlgmr.msra.gmra.mxu0 %vm564_vm0, %v9204_v36  ;;  %8046 = vmatmul.msk.f32.vlgmr.msra.gmra.mxu1 %vm564_vm0, %v15531_v7  ;;  %v11202_v59 = vpop.f32.mrf.mxu2 }
 0x20c   : > { %v11204_v30 = vpop.f32.mrf.mxu3 }
 0x210   : > { %v11206_v12 = vpop.f32.mrf.mxu0  ;;  %v11208_v46 = vpop.f32.mrf.mxu1  ;;  %8019 = vmatmul.msk.f32.gmra.mxu2 %vm564_vm0, %v10719_v51 }
 0x211   : > { %15532 = vst [vmem:[#allocation69_spill] sm:$0xff] %v11206_v12  ;;  %8023 = vmatmul.msk.f32.gmra.mxu3 %vm564_vm0, %v10726_v4  ;;  %v11240_v4 = vld [vmem:[%s15222_s5 + $0x70] sm:$0xff] }
 0x212   : > { %15533 = vst [vmem:[#allocation153_spill] sm:$0xff] %v11208_v46  ;;  %8049 = vmatpush.xpose.msk.msra.mxu2 %vm4114_vm3, %v11240_v4  ;;  %8059 = vmatpush.xpose.msk.msra.mxu3 %vm4114_vm3, %v11240_v4  ;;  %v15575_v46 = vld [vmem:[#allocation19_spill] sm:$0xff] }
 0x213   : > { %8043 = vmatmul.msk.f32.gmra.mxu0 %vm564_vm0, %v9205_v22  ;;  %8047 = vmatmul.msk.f32.gmra.mxu1 %vm564_vm0, %v15534_v32  ;;  %v11218_v36 = vpop.f32.mrf.mxu2  ;;  %15539 = vst [vmem:[#allocation157_spill] sm:$0xff] %v11240_v4  ;;  %v9206_v22 = vld [vmem:[%s9431_s27 + $0xd0] sm:$0xff] }
 0x214   : > { %15535 = vst [vmem:[#allocation70_spill] sm:$0xff] %v11218_v36  ;;  %v11220_v7 = vpop.f32.mrf.mxu3  ;;  %8069 = vmatpush.xpose.msk.msrb.mxu0 %vm4114_vm3, %v11240_v4  ;;  %8079 = vmatpush.xpose.msk.msrb.mxu1 %vm4114_vm3, %v11240_v4  ;;  %v15571_v36 = vld [vmem:[#allocation26_spill] sm:$0xff] }
 0x215   : > { %15536 = vst [vmem:[#allocation154_spill] sm:$0xff] %v11220_v7  ;;  %v2557_v0 = vadd.f32 %v11026_v21, %v15571_v36  ;;  %v15576_v21 = vld [vmem:[#allocation61_spill] sm:$0xff] }
 0x216   : > { %v2872_v36 = vadd.f32 %v11128_v27, %v15576_v21  ;;  %v15581_v27 = vld [vmem:[#allocation77_spill] sm:$0xff] }
 0x217   : > { %v15586_v21 = vld [vmem:[#allocation65_spill] sm:$0xff] }
 0x218   : > { %v11227_v51 = vpop.f32.mrf.mxu0  ;;  %v11229_v20 = vpop.f32.mrf.mxu1  ;;  %8034 = vmatmul.msk.f32.vlgmr.msrb.gmra.mxu2 %vm564_vm0, %v10742_v2 }
 0x219   : > { %15537 = vst [vmem:[#allocation155_spill] sm:$0xff] %v11227_v51  ;;  %8038 = vmatmul.msk.f32.vlgmr.msrb.gmra.mxu3 %vm564_vm0, %v9206_v22  ;;  %v11263_v22 = vld [vmem:[%s15222_s5 + $0x68] sm:$0xff] }
 0x21a   : > { %15538 = vst [vmem:[#allocation156_spill] sm:$0xff] %v11229_v20  ;;  %8050 = vmatpush.xpose.msk.msra.mxu2 %vm4114_vm3, %v11263_v22  ;;  %8060 = vmatpush.xpose.msk.msra.mxu3 %vm4114_vm3, %v11263_v22 }
 0x21b   : > { %v11248_v32 = vpop.f32.mrf.mxu2  ;;  %15542 = vst [vmem:[#allocation160_spill] sm:$0xff] %v11263_v22  ;;  %8070 = vmatpush.xpose.msk.msrb.mxu0 %vm4114_vm3, %v11263_v22  ;;  %8080 = vmatpush.xpose.msk.msrb.mxu1 %vm4114_vm3, %v11263_v22 }
 0x21c   : > { %15540 = vst [vmem:[#allocation158_spill] sm:$0xff] %v11248_v32  ;;  %v11254_v2 = vpop.f32.mrf.mxu3  ;;  %v15570_v32 = vld [vmem:[#allocation25_spill] sm:$0xff] }
 0x21d   : > { %15541 = vst [vmem:[#allocation159_spill] sm:$0xff] %v11254_v2  ;;  %v2534_v7 = vadd.f32 %v11020_v31, %v15570_v32 }
 0x21e   : > { %8051 = vmatpush.xpose.msk.msra.mxu2 %vm4114_vm3, %v11278_v17  ;;  %8061 = vmatpush.xpose.msk.msra.mxu3 %vm4114_vm3, %v11278_v17 }
 0x21f   : > { %8071 = vmatpush.xpose.msk.msrb.mxu0 %vm4114_vm3, %v11278_v17  ;;  %8081 = vmatpush.xpose.msk.msrb.mxu1 %vm4114_vm3, %v11278_v17 }
 0x220   : > { %v11265_v20 = vpop.f32.mrf.mxu0  ;;  %v11267_v51 = vpop.f32.mrf.mxu1  ;;  %8035 = vmatmul.msk.f32.gmra.mxu2 %vm564_vm0, %v10775_v9 }
 0x221   : > { %15543 = vst [vmem:[#allocation161_spill] sm:$0xff] %v11265_v20  ;;  %8039 = vmatmul.msk.f32.gmra.mxu3 %vm564_vm0, %v10782_v49  ;;  %v11301_v49 = vld [vmem:[%s15222_s5 + $0x58] sm:$0xff] }
 0x222   : > { %15544 = vst [vmem:[#allocation162_spill] sm:$0xff] %v11267_v51  ;;  %8052 = vmatpush.xpose.msk.msra.mxu2 %vm4114_vm3, %v11301_v49  ;;  %8062 = vmatpush.xpose.msk.msra.mxu3 %vm4114_vm3, %v11301_v49 }
 0x223   : > { %v11286_v51 = vpop.f32.mrf.mxu2  ;;  %15548 = vst [vmem:[#allocation166_spill] sm:$0xff] %v11301_v49  ;;  %8072 = vmatpush.xpose.msk.msrb.mxu0 %vm4114_vm3, %v11301_v49  ;;  %8082 = vmatpush.xpose.msk.msrb.mxu1 %vm4114_vm3, %v11301_v49 }
 0x224   : > { %15546 = vst [vmem:[#allocation164_spill] sm:$0xff] %v11286_v51  ;;  %v11292_v9 = vpop.f32.mrf.mxu3  ;;  %v11335_v51 = vld [vmem:[%s15222_s5 + $0x48] sm:$0xff] }
 0x225   : > { %15547 = vst [vmem:[#allocation165_spill] sm:$0xff] %v11292_v9  ;;  %v11314_v9 = vld [vmem:[%s15222_s5 + $0x50] sm:$0xff] }
 0x226   : > { %15551 = vst [vmem:[#allocation169_spill] sm:$0xff] %v11314_v9  ;;  %8053 = vmatpush.xpose.msk.msra.mxu2 %vm4114_vm3, %v11314_v9  ;;  %8063 = vmatpush.xpose.msk.msra.mxu3 %vm4114_vm3, %v11314_v9 }
 0x227   : > { %8073 = vmatpush.xpose.msk.msrb.mxu0 %vm4114_vm3, %v11314_v9  ;;  %8083 = vmatpush.xpose.msk.msrb.mxu1 %vm4114_vm3, %v11314_v9  ;;  %15554 = vst [vmem:[#allocation172_spill] sm:$0xff] %v11335_v51 }
 0x228   : > { %v11303_v20 = vpop.f32.mrf.mxu0  ;;  %v11305_v44 = vpop.f32.mrf.mxu1 }
 0x229   : > { %15549 = vst [vmem:[#allocation167_spill] sm:$0xff] %v11303_v20  ;;  %v15574_v20 = vld [vmem:[#allocation17_spill] sm:$0xff] }
 0x22a   : > { %15550 = vst [vmem:[#allocation168_spill] sm:$0xff] %v11305_v44  ;;  %8054 = vmatpush.xpose.msk.msra.mxu2 %vm4114_vm3, %v11335_v51  ;;  %8064 = vmatpush.xpose.msk.msra.mxu3 %vm4114_vm3, %v11335_v51 }
 0x22b   : > { %v11320_v55 = vpop.f32.mrf.mxu2  ;;  %8074 = vmatpush.xpose.msk.msrb.mxu0 %vm4114_vm3, %v11335_v51  ;;  %8084 = vmatpush.xpose.msk.msrb.mxu1 %vm4114_vm3, %v11335_v51 }
 0x22c   : > { %15552 = vst [vmem:[#allocation170_spill] sm:$0xff] %v11320_v55  ;;  %v11326_v25 = vpop.f32.mrf.mxu3 }
 0x22d   : > { %15553 = vst [vmem:[#allocation171_spill] sm:$0xff] %v11326_v25  ;;  %v11348_v25 = vld [vmem:[%s15222_s5 + $0x40] sm:$0xff] }
 0x22e   : > { %15557 = vst [vmem:[#allocation175_spill] sm:$0xff] %v11348_v25  ;;  %8055 = vmatpush.xpose.msk.msra.mxu2 %vm4114_vm3, %v11348_v25  ;;  %8065 = vmatpush.xpose.msk.msra.mxu3 %vm4114_vm3, %v11348_v25 }
 0x22f   : > { %8075 = vmatpush.xpose.msk.msrb.mxu0 %vm4114_vm3, %v11348_v25  ;;  %8085 = vmatpush.xpose.msk.msrb.mxu1 %vm4114_vm3, %v11348_v25 }
 0x230   : > { %v11337_v55 = vpop.f32.mrf.mxu0  ;;  %v11339_v35 = vpop.f32.mrf.mxu1 }
 0x231   : > { %15555 = vst [vmem:[#allocation173_spill] sm:$0xff] %v11337_v55 }
 0x232   : > { %15556 = vst [vmem:[#allocation174_spill] sm:$0xff] %v11339_v35  ;;  %8088 = vmatpush.xpose.msk.msrb.mxu2 %vm4114_vm3, %v11225_v47  ;;  %8098 = vmatpush.xpose.msk.msrb.mxu3 %vm4114_vm3, %v11225_v47 }
 0x233   : > { %v11354_v42 = vpop.f32.mrf.mxu2  ;;  %8108 = vmatpush.xpose.msk.msra.mxu0 %vm4114_vm3, %v11225_v47  ;;  %8118 = vmatpush.xpose.msk.msra.mxu1 %vm4114_vm3, %v11225_v47 }
 0x234   : > { %15558 = vst [vmem:[#allocation176_spill] sm:$0xff] %v11354_v42  ;;  %v11360_v1 = vpop.f32.mrf.mxu3 }
 0x235   : > { %15559 = vst [vmem:[#allocation177_spill] sm:$0xff] %v11360_v1 }
 0x236   : > { %8089 = vmatpush.xpose.msk.msrb.mxu2 %vm4114_vm3, %v11240_v4  ;;  %8099 = vmatpush.xpose.msk.msrb.mxu3 %vm4114_vm3, %v11240_v4 }
 0x237   : > { %8109 = vmatpush.xpose.msk.msra.mxu0 %vm4114_vm3, %v11240_v4  ;;  %8119 = vmatpush.xpose.msk.msra.mxu1 %vm4114_vm3, %v11240_v4 }
 0x238   : > { %v11374_v42 = vpop.f32.mrf.mxu0  ;;  %v11376_v1 = vpop.f32.mrf.mxu1 }
 0x239   : > { %15560 = vst [vmem:[#allocation178_spill] sm:$0xff] %v11374_v42 }
 0x23a   : > { %15561 = vst [vmem:[#allocation179_spill] sm:$0xff] %v11376_v1  ;;  %8090 = vmatpush.xpose.msk.msrb.mxu2 %vm4114_vm3, %v11263_v22  ;;  %8100 = vmatpush.xpose.msk.msrb.mxu3 %vm4114_vm3, %v11263_v22 }
 0x23b   : > { %v3196_v2 = vpop.f32.mrf.mxu2  ;;  %8110 = vmatpush.xpose.msk.msra.mxu0 %vm4114_vm3, %v11263_v22  ;;  %8120 = vmatpush.xpose.msk.msra.mxu1 %vm4114_vm3, %v11263_v22 }
 0x23c   : > { %v3219_v34 = vpop.f32.mrf.mxu3 }
 0x23d   : > { %v3220_v44 = vadd.f32 %v3219_v34, %v15573_v3  ;;  %v15578_v34 = vld [vmem:[#allocation29_spill] sm:$0xff] }
 0x23e   : > { %8091 = vmatpush.xpose.msk.msrb.mxu2 %vm4114_vm3, %v11278_v17  ;;  %8101 = vmatpush.xpose.msk.msrb.mxu3 %vm4114_vm3, %v11278_v17 }
 0x23f   : > { %8111 = vmatpush.xpose.msk.msra.mxu0 %vm4114_vm3, %v11278_v17  ;;  %8121 = vmatpush.xpose.msk.msra.mxu1 %vm4114_vm3, %v11278_v17  ;;  %v15572_v17 = vld [vmem:[#allocation73_spill] sm:$0xff] }
 0x240   : > { %v11394_v1 = vpop.f32.mrf.mxu0  ;;  %v11396_v42 = vpop.f32.mrf.mxu1 }
 0x241   : > { %15562 = vst [vmem:[#allocation180_spill] sm:$0xff] %v11394_v1 }
 0x242   : > { %15563 = vst [vmem:[#allocation181_spill] sm:$0xff] %v11396_v42  ;;  %8092 = vmatpush.xpose.msk.msrb.mxu2 %vm4114_vm3, %v11301_v49  ;;  %8102 = vmatpush.xpose.msk.msrb.mxu3 %vm4114_vm3, %v11301_v49 }
 0x243   : > { %v3199_v50 = vpop.f32.mrf.mxu2  ;;  %8112 = vmatpush.xpose.msk.msra.mxu0 %vm4114_vm3, %v11301_v49  ;;  %8122 = vmatpush.xpose.msk.msra.mxu1 %vm4114_vm3, %v11301_v49 }
 0x244   : > { %v3222_v43 = vpop.f32.mrf.mxu3 }
 0x246   : > { %8093 = vmatpush.xpose.msk.msrb.mxu2 %vm4114_vm3, %v11314_v9  ;;  %8103 = vmatpush.xpose.msk.msrb.mxu3 %vm4114_vm3, %v11314_v9 }
 0x247   : > { %8113 = vmatpush.xpose.msk.msra.mxu0 %vm4114_vm3, %v11314_v9  ;;  %8123 = vmatpush.xpose.msk.msra.mxu1 %vm4114_vm3, %v11314_v9 }
 0x248   : > { %v11414_v42 = vpop.f32.mrf.mxu0  ;;  %v11416_v1 = vpop.f32.mrf.mxu1 }
 0x249   : > { %15564 = vst [vmem:[#allocation182_spill] sm:$0xff] %v11414_v42 }
 0x24a   : > { %15565 = vst [vmem:[#allocation183_spill] sm:$0xff] %v11416_v1  ;;  %8094 = vmatpush.xpose.msk.msrb.mxu2 %vm4114_vm3, %v11335_v51  ;;  %8104 = vmatpush.xpose.msk.msrb.mxu3 %vm4114_vm3, %v11335_v51 }
 0x24b   : > { %v3288_v35 = vpop.f32.mrf.mxu2  ;;  %8114 = vmatpush.xpose.msk.msra.mxu0 %vm4114_vm3, %v11335_v51  ;;  %8124 = vmatpush.xpose.msk.msra.mxu1 %vm4114_vm3, %v11335_v51  ;;  %v15568_v51 = vld [vmem:[#allocation57_spill] sm:$0xff] }
 0x24c   : > { %v3311_v55 = vpop.f32.mrf.mxu3 }
 0x24e   : > { %8095 = vmatpush.xpose.msk.msrb.mxu2 %vm4114_vm3, %v11348_v25  ;;  %8105 = vmatpush.xpose.msk.msrb.mxu3 %vm4114_vm3, %v11348_v25 }
 0x24f   : > { %8115 = vmatpush.xpose.msk.msra.mxu0 %vm4114_vm3, %v11348_v25  ;;  %8125 = vmatpush.xpose.msk.msra.mxu1 %vm4114_vm3, %v11348_v25  ;;  %v3197_v25 = vadd.f32 %v3196_v2, %v15572_v17  ;;  %v15577_v17 = vld [vmem:[#allocation62_spill] sm:$0xff]  ;;  %v15584_v2 = vld [vmem:[#allocation20_spill] sm:$0xff] }
 0x250   : > { %v11434_v1 = vpop.f32.mrf.mxu0  ;;  %v11436_v42 = vpop.f32.mrf.mxu1  ;;  %v2895_v3 = vadd.f32 %v11130_v6, %v15577_v17  ;;  %v15582_v6 = vld [vmem:[#allocation78_spill] sm:$0xff] }
 0x251   : > { %15566 = vst [vmem:[#allocation184_spill] sm:$0xff] %v11434_v1  ;;  %v2869_v1 = vadd.f32 %v11102_v11, %v15568_v51  ;;  %v15587_v17 = vld [vmem:[#allocation66_spill] sm:$0xff] }
 0x252   : > { %15567 = vst [vmem:[#allocation185_spill] sm:$0xff] %v11436_v42  ;;  %v15569_v42 = vld [vmem:[#allocation58_spill] sm:$0xff] }
 0x253   : > { %v11446_v9 = vpop.f32.mrf.mxu2  ;;  %v2892_v49 = vadd.f32 %v11104_v37, %v15569_v42  ;;  %v3833_v11 = vadd.f32 %v2869_v1, %v2534_v7  ;;  %v3223_v7 = vadd.f32 %v3222_v43, %v15582_v6  ;;  %v15593_v6 = vld [vmem:[#allocation82_spill] sm:$0xff] }
 0x254   : > { %v11448_v19 = vpop.f32.mrf.mxu3 }
 0x255   : > { %v3835_v51 = vadd.f32 %v2892_v49, %v2557_v0 }
 0x258   : > { %v3524_v13 = vpop.f32.mrf.mxu0  ;;  %v3547_v54 = vpop.f32.mrf.mxu1 }
 0x259   : > { %v3525_v22 = vadd.f32 %v3524_v13, %v15574_v20  ;;  %v3548_v4 = vadd.f32 %v3547_v54, %v15575_v46  ;;  %v2537_v13 = vadd.f32 %v11050_v60, %v15578_v34  ;;  %v15579_v54 = vld [vmem:[#allocation30_spill] sm:$0xff]  ;;  %v3200_v46 = vadd.f32 %v3199_v50, %v15581_v27  ;;  %v15588_v34 = vld [vmem:[#allocation23_spill] sm:$0xff]  ;;  %v15592_v27 = vld [vmem:[#allocation81_spill] sm:$0xff] }
 0x25a   : > { %v2560_v0 = vadd.f32 %v11052_v62, %v15579_v54  ;;  %v15589_v54 = vld [vmem:[#allocation24_spill] sm:$0xff] }
 0x25b   : > { %v3861_v12 = vadd.f32 %v3525_v22, %v3197_v25  ;;  %v3863_v42 = vadd.f32 %v3548_v4, %v3220_v44  ;;  %v11462_v37 = vpop.f32.mrf.mxu2  ;;  %v11478_v25 = vld [vmem:[%s15580_s3] ss:$0 sm:$0xff]  ;;  %v15583_v4 = vld [vmem:[#allocation18_spill] sm:$0xff]  ;;  %v3834_v62 = vadd.f32 %v2872_v36, %v2537_v13  ;;  %v2961_v36 = vadd.f32 %v11150_v16, %v15586_v21 }
 0x25c   : > { %v11464_v28 = vpop.f32.mrf.mxu3  ;;  %v3836_v49 = vadd.f32 %v2895_v3, %v2560_v0  ;;  %v2984_v3 = vadd.f32 %v11152_v45, %v15587_v17  ;;  %v2626_v13 = vadd.f32 %v11068_v57, %v15588_v34  ;;  %v2649_v0 = vadd.f32 %v11074_v41, %v15589_v54  ;;  %v15597_v21 = vld [vmem:[#allocation34_spill] sm:$0xff] }
 0x25d   : > { %v3889_v31 = vadd.f32 %v3861_v12, %v3833_v11  ;;  %v3891_v32 = vadd.f32 %v3863_v42, %v3835_v51  ;;  %v11522_v17 = vadd.f32 %v10950_v29, %v15597_v21  ;;  %v15602_v29 = vld [vmem:[#allocation38_spill] sm:$0xff] }
 0x25f   : > { %v3917_v1 = vadd.f32 %v3889_v31, %v10737_v48  ;;  %v3919_v44 = vadd.f32 %v3891_v32, %v10739_v10  ;;  %v11489_v10 = vld [vmem:[%s15585_s4] ss:$0 sm:$0xff] }
 0x260   : > { %v3527_v20 = vpop.f32.mrf.mxu0  ;;  %v3550_v12 = vpop.f32.mrf.mxu1 }
 0x261   : > { %v3528_v60 = vadd.f32 %v3527_v20, %v15583_v4  ;;  %v3551_v22 = vadd.f32 %v3550_v12, %v15584_v2  ;;  %v3948_v51 = vmul.f32 %v11478_v25, %v3917_v1  ;;  %v3950_v42 = vmul.f32 %v11478_v25, %v3919_v44  ;;  %v15590_v1 = vld [vmem:[#allocation120_spill] sm:$0xff]  ;;  %v15591_v20 = vld [vmem:[#allocation121_spill] sm:$0xff] }
 0x263   : > { %v3862_v48 = vadd.f32 %v3528_v60, %v3200_v46  ;;  %v3864_v11 = vadd.f32 %v3551_v22, %v3223_v7  ;;  %v11492_v50 = vpop.f32.mrf.mxu2  ;;  %v3289_v46 = vadd.f32 %v3288_v35, %v15592_v27  ;;  %v3312_v7 = vadd.f32 %v3311_v55, %v15593_v6  ;;  %v15594_v22 = vld [vmem:[#allocation22_spill] sm:$0xff]  ;;  %v15603_v27 = vld [vmem:[#allocation27_spill] sm:$0xff] }
 0x264   : > { %v11494_v32 = vpop.f32.mrf.mxu3  ;;  %v3979_v4 = vadd.f32 %v11489_v10, %v3948_v51  ;;  %v3981_v16 = vadd.f32 %v11489_v10, %v3950_v42  ;;  %v15604_v6 = vld [vmem:[#allocation71_spill] sm:$0xff] }
 0x265   : > { %v3890_v43 = vadd.f32 %v3862_v48, %v3834_v62  ;;  %v3892_v31 = vadd.f32 %v3864_v11, %v3836_v49  ;;  %v15595_v62 = vld [vmem:[#allocation115_spill] sm:$0xff]  ;;  %v3841_v48 = vadd.f32 %v2961_v36, %v2626_v13  ;;  %v3843_v11 = vadd.f32 %v2984_v3, %v2649_v0 }
 0x266   : > { %v11524_v34 = vmax.f32 %v3979_v4, 0.0  ;;  %v11526_v54 = vmax.f32 %v3981_v16, 0.0  ;;  %v15605_v4 = vld [vmem:[#allocation72_spill] sm:$0xff] }
 0x267   : > { %v3918_v44 = vadd.f32 %v3890_v43, %v15590_v1  ;;  %v3920_v12 = vadd.f32 %v3892_v31, %v15591_v20  ;;  %v15596_v31 = vld [vmem:[#allocation33_spill] sm:$0xff]  ;;  %v2987_v16 = vadd.f32 %v11174_v15, %v15605_v4  ;;  %v15617_v4 = vld [vmem:[#allocation35_spill] sm:$0xff] }
 0x268   : > { %v3616_v60 = vpop.f32.mrf.mxu0  ;;  %v3639_v45 = vpop.f32.mrf.mxu1  ;;  %v11518_v42 = vadd.f32 %v10948_v58, %v15596_v31  ;;  %15598 = vst [vmem:[#allocation57_spill] sm:$0xff] %v11524_v34  ;;  %v15601_v58 = vld [vmem:[#allocation37_spill] sm:$0xff] }
 0x269   : > { %v3949_v2 = vmul.f32 %v11478_v25, %v3918_v44  ;;  %v3951_v57 = vmul.f32 %v11478_v25, %v3920_v12  ;;  %v3617_v41 = vadd.f32 %v3616_v60, %v15594_v22  ;;  %v3640_v49 = vadd.f32 %v3639_v45, %v15595_v62  ;;  %v15608_v62 = vld [vmem:[#allocation85_spill] sm:$0xff] }
 0x26a   : > { %v11538_v20 = vadd.f32 %v10984_v40, %v15601_v58  ;;  %v11542_v12 = vadd.f32 %v10986_v61, %v15602_v29  ;;  %v3292_v15 = vadd.f32 %v11446_v9, %v15608_v62  ;;  %v15623_v62 = vld [vmem:[#allocation48_spill] sm:$0xff] }
 0x26b   : > { %v3980_v35 = vadd.f32 %v11489_v10, %v3949_v2  ;;  %v3982_v55 = vadd.f32 %v11489_v10, %v3951_v57  ;;  %v3869_v43 = vadd.f32 %v3617_v41, %v3289_v46  ;;  %v3871_v51 = vadd.f32 %v3640_v49, %v3312_v7  ;;  %v11528_v36 = vpop.f32.mrf.mxu2  ;;  %v15607_v2 = vld [vmem:[#allocation28_spill] sm:$0xff] }
 0x26c   : > { %v11534_v44 = vpop.f32.mrf.mxu3  ;;  %v2629_v46 = vadd.f32 %v11098_v18, %v15603_v27  ;;  %v2964_v7 = vadd.f32 %v11172_v24, %v15604_v6  ;;  %v2652_v61 = vadd.f32 %v11100_v53, %v15607_v2  ;;  %v4111_v41 = vrot.slane %v11524_v34, 1  ;;  %v15616_v6 = vld [vmem:[#allocation32_spill] sm:$0xff]  ;;  %v15619_v2 = vld [vmem:[#allocation75_spill] sm:$0xff] }
 0x26d   : > { %v11530_v3 = vmax.f32 %v3980_v35, 0.0  ;;  %v11532_v13 = vmax.f32 %v3982_v55, 0.0  ;;  %v3897_v0 = vadd.f32 %v3869_v43, %v3841_v48  ;;  %v3899_v1 = vadd.f32 %v3871_v51, %v3843_v11  ;;  %15600 = vst [vmem:[#allocation25_spill] sm:$0xff] %v11534_v44  ;;  %v15610_v48 = vld [vmem:[#allocation21_spill] sm:$0xff]  ;;  %v15611_v35 = vld [vmem:[#allocation118_spill] sm:$0xff]  ;;  %v15725_v34 = vld [vmem:[#allocation144_spill] sm:$0xff] }
 0x26e   : > { %v4168_v24 = vrot.slane %v11526_v54, 1  ;;  %v15612_v43 = vld [vmem:[#allocation41_spill] sm:$0xff]  ;;  %v3842_v9 = vadd.f32 %v2964_v7, %v2629_v46  ;;  %v3844_v21 = vadd.f32 %v2987_v16, %v2652_v61  ;;  %v2741_v7 = vadd.f32 %v11122_v5, %v15616_v6 }
 0x26f   : > { %15599 = vst [vmem:[#allocation58_spill] sm:$0xff] %v11530_v3  ;;  %v3925_v60 = vadd.f32 %v3897_v0, %v10794_v14  ;;  %v4112_v45 = vrot.slane %v11530_v3, 1  ;;  %v11553_v40 = vrot.slane %v11532_v13, 1  ;;  %v3927_v57 = vadd.f32 %v3899_v1, %v10796_v23  ;;  %v15609_v14 = vld [vmem:[#allocation86_spill] sm:$0xff] }
 0x270   : > { %v3619_v22 = vpop.f32.mrf.mxu0  ;;  %v3642_v18 = vpop.f32.mrf.mxu1  ;;  %v3315_v49 = vadd.f32 %v11448_v19, %v15609_v14  ;;  %v11568_v53 = vadd.f32 %v11006_v63, %v15612_v43  ;;  %v15614_v1 = vld [vmem:[#allocation42_spill] sm:$0xff]  ;;  %v15615_v63 = vld [vmem:[#allocation31_spill] sm:$0xff]  ;;  %v3053_v61 = vadd.f32 %v11190_v8, %v15619_v2  ;;  %v15626_v8 = vld [vmem:[#allocation69_spill] sm:$0xff] }
 0x271   : > { %15606 = vst [vmem:[#allocation26_spill] sm:$0xff] %v11553_v40  ;;  %v3620_v11 = vadd.f32 %v3619_v22, %v15610_v48  ;;  %v3643_v55 = vadd.f32 %v3642_v18, %v15611_v35  ;;  %v3956_v23 = vmul.f32 %v11478_v25, %v3925_v60  ;;  %v4113_v51 = vsel %vm560_vm1, %v4111_v41, %v4112_v45  ;;  %v15621_v18 = vld [vmem:[#allocation47_spill] sm:$0xff]  ;;  %v15628_v43 = vld [vmem:[#allocation90_spill] sm:$0xff] }
 0x272   : > { %v11574_v31 = vsel %vm560_vm1, %v4168_v24, %v11553_v40  ;;  %8056 = vmatmul.msk.f32.vlgmr.msra.gmra.mxu2 %vm4114_vm3, %v4113_v51  ;;  %v11579_v58 = vadd.f32 %v11008_v39, %v15614_v1  ;;  %v2718_v29 = vadd.f32 %v11116_v52, %v15615_v63  ;;  %v3958_v27 = vmul.f32 %v11478_v25, %v3927_v57  ;;  %v15620_v57 = vld [vmem:[#allocation76_spill] sm:$0xff]  ;;  %v15629_v51 = vld [vmem:[#allocation157_spill] sm:$0xff] }
 0x273   : > { %15613 = vst [vmem:[#allocation73_spill] sm:$0xff] %v11574_v31  ;;  %v3870_v0 = vadd.f32 %v3620_v11, %v3292_v15  ;;  %v3872_v19 = vadd.f32 %v3643_v55, %v3315_v49  ;;  %8066 = vmatmul.msk.f32.vlgmr.msra.gmra.mxu3 %vm4114_vm3, %v11574_v31  ;;  %8128 = vmatpush.xpose.msk.msra.mxu2 %vm4114_vm3, %v11225_v47  ;;  %v11588_v46 = vpop.f32.mrf.mxu2  ;;  %v15622_v24 = vld [vmem:[#allocation36_spill] sm:$0xff]  ;;  %v15624_v49 = vld [vmem:[#allocation126_spill] sm:$0xff]  ;;  %v15625_v11 = vld [vmem:[#allocation79_spill] sm:$0xff] }
 0x274   : > { %v2721_v39 = vadd.f32 %v11146_v26, %v15617_v4  ;;  %8138 = vmatpush.xpose.msk.msra.mxu3 %vm4114_vm3, %v11225_v47  ;;  %v11596_v52 = vpop.f32.mrf.mxu3  ;;  %v3076_v22 = vadd.f32 %v11192_v38, %v15620_v57  ;;  %v2915_v41 = vadd.f32 %v11202_v59, %v15621_v18  ;;  %v3987_v5 = vadd.f32 %v11489_v10, %v3956_v23  ;;  %v15627_v55 = vld [vmem:[#allocation89_spill] sm:$0xff]  ;;  %v15633_v18 = vld [vmem:[#allocation80_spill] sm:$0xff] }
 0x275   : > { %v3898_v16 = vadd.f32 %v3870_v0, %v3842_v9  ;;  %v3900_v60 = vadd.f32 %v3872_v19, %v3844_v21  ;;  %15618 = vst [vmem:[#allocation74_spill] sm:$0xff] %v11596_v52  ;;  %v2744_v26 = vadd.f32 %v11148_v33, %v15622_v24  ;;  %v2938_v15 = vadd.f32 %v11204_v30, %v15623_v62  ;;  %v15630_v21 = vld [vmem:[#allocation14_spill] sm:$0xff]  ;;  %v15634_v24 = vld [vmem:[#allocation153_spill] sm:$0xff] }
 0x276   : > { %v3056_v35 = vadd.f32 %v15626_v8, %v15625_v11  ;;  %v3381_v38 = vadd.f32 %v11462_v37, %v15627_v55  ;;  %v3404_v59 = vadd.f32 %v11464_v28, %v15628_v43  ;;  %v3989_v23 = vadd.f32 %v11489_v10, %v3958_v27  ;;  %v15631_v37 = vld [vmem:[#allocation119_spill] sm:$0xff] }
 0x277   : > { %v3926_v14 = vadd.f32 %v3898_v16, %v10830_v56  ;;  %v3928_v48 = vadd.f32 %v3900_v60, %v15624_v49  ;;  %8129 = vmatpush.xpose.msk.msra.mxu2 %vm4114_vm3, %v15629_v51  ;;  %v3849_v1 = vadd.f32 %v3053_v61, %v2718_v29  ;;  %v3851_v28 = vadd.f32 %v3076_v22, %v2741_v7  ;;  %v15642_v49 = vld [vmem:[#allocation168_spill] sm:$0xff]  ;;  %v15643_v11 = vld [vmem:[#allocation103_spill] sm:$0xff] }
 0x278   : > { %v3708_v33 = vpop.f32.mrf.mxu0  ;;  %v3731_v30 = vpop.f32.mrf.mxu1  ;;  %8139 = vmatpush.xpose.msk.msra.mxu3 %vm4114_vm3, %v15629_v51  ;;  %v3837_v63 = vadd.f32 %v2915_v41, %v11518_v42  ;;  %v11627_v27 = vmax.f32 %v3987_v5, 0.0  ;;  %v3839_v2 = vadd.f32 %v2938_v15, %v11522_v17  ;;  %v3850_v57 = vadd.f32 %v3056_v35, %v2721_v39  ;;  %v15636_v42 = vld [vmem:[#allocation160_spill] sm:$0xff]  ;;  %v15639_v39 = vld [vmem:[#allocation91_spill] sm:$0xff] }
 0x279   : > { %v3957_v56 = vmul.f32 %v11478_v25, %v3926_v14  ;;  %v3959_v9 = vmul.f32 %v11478_v25, %v3928_v48  ;;  %v3709_v0 = vadd.f32 %v3708_v33, %v15630_v21  ;;  %v3732_v19 = vadd.f32 %v3731_v30, %v15631_v37  ;;  %v15640_v5 = vld [vmem:[#allocation167_spill] sm:$0xff]  ;;  %v15641_v14 = vld [vmem:[#allocation92_spill] sm:$0xff]  ;;  %v15648_v30 = vld [vmem:[#allocation129_spill] sm:$0xff] }
 0x27a   : > { %15632 = vst [vmem:[#allocation17_spill] sm:$0xff] %v11627_v27  ;;  %8057 = vmatmul.msk.f32.gmra.mxu2 %vm4114_vm3, %v4112_v45  ;;  %v3079_v62 = vadd.f32 %v15634_v24, %v15633_v18  ;;  %v11635_v29 = vmax.f32 %v3989_v23, 0.0  ;;  %v3243_v15 = vadd.f32 %v15640_v5, %v15639_v39  ;;  %v3266_v48 = vadd.f32 %v15642_v49, %v15641_v14  ;;  %v15644_v35 = vld [vmem:[#allocation104_spill] sm:$0xff]  ;;  %v15653_v18 = vld [vmem:[#allocation123_spill] sm:$0xff]  ;;  %v15657_v5 = vld [vmem:[#allocation70_spill] sm:$0xff] }
 0x27b   : > { %v3988_v6 = vadd.f32 %v11489_v10, %v3957_v56  ;;  %v3990_v4 = vadd.f32 %v11489_v10, %v3959_v9  ;;  %v3877_v16 = vadd.f32 %v3709_v0, %v3381_v38  ;;  %v3879_v60 = vadd.f32 %v3732_v19, %v3404_v59  ;;  %8067 = vmatmul.msk.f32.gmra.mxu3 %vm4114_vm3, %v11553_v40  ;;  %v3570_v7 = vpop.f32.mrf.mxu2  ;;  %v15645_v38 = vld [vmem:[#allocation93_spill] sm:$0xff]  ;;  %v15649_v0 = vld [vmem:[#allocation163_spill] sm:$0xff] }
 0x27c   : > { %15635 = vst [vmem:[#allocation19_spill] sm:$0xff] %v11635_v29  ;;  %8130 = vmatpush.xpose.msk.msra.mxu2 %vm4114_vm3, %v15636_v42  ;;  %8140 = vmatpush.xpose.msk.msra.mxu3 %vm4114_vm3, %v15636_v42  ;;  %v3593_v17 = vpop.f32.mrf.mxu3  ;;  %v3571_v8 = vadd.f32 %v3570_v7, %v15643_v11  ;;  %v3384_v43 = vadd.f32 %v11492_v50, %v15645_v38  ;;  %v4264_v59 = vrot.slane %v11627_v27, 1  ;;  %v15650_v50 = vld [vmem:[#allocation94_spill] sm:$0xff] }
 0x27d   : > { %v11641_v61 = vmax.f32 %v3988_v6, 0.0  ;;  %v11643_v22 = vmax.f32 %v3990_v4, 0.0  ;;  %v3905_v45 = vadd.f32 %v3877_v16, %v3849_v1  ;;  %v3907_v41 = vadd.f32 %v3879_v60, %v3851_v28  ;;  %v15651_v6 = vld [vmem:[#allocation130_spill] sm:$0xff] }
 0x27e   : > { %v3594_v55 = vadd.f32 %v3593_v17, %v15644_v35  ;;  %v3865_v9 = vadd.f32 %v3571_v8, %v3243_v15  ;;  %v4296_v1 = vrot.slane %v11635_v29, 1  ;;  %v3407_v28 = vadd.f32 %v11494_v32, %v15650_v50  ;;  %v15652_v16 = vld [vmem:[#allocation122_spill] sm:$0xff]  ;;  %v15656_v32 = vld [vmem:[#allocation51_spill] sm:$0xff] }
 0x27f   : > { %15637 = vst [vmem:[#allocation61_spill] sm:$0xff] %v11641_v61  ;;  %v11657_v23 = vrot.slane %v11641_v61, 1  ;;  %v11660_v33 = vrot.slane %v11643_v22, 1  ;;  %v3933_v56 = vadd.f32 %v3905_v45, %v15648_v30  ;;  %v3935_v4 = vadd.f32 %v3907_v41, %v15651_v6  ;;  %v15661_v11 = vld [vmem:[#allocation158_spill] sm:$0xff]  ;;  %v15668_v6 = vld [vmem:[#allocation105_spill] sm:$0xff] }
 0x280   : > { %15638 = vst [vmem:[#allocation62_spill] sm:$0xff] %v11643_v22  ;;  %v3867_v21 = vadd.f32 %v3594_v55, %v3266_v48  ;;  %8131 = vmatpush.xpose.msk.msra.mxu2 %vm4114_vm3, %v15649_v0  ;;  %v3711_v37 = vpop.f32.mrf.mxu0  ;;  %v3734_v19 = vpop.f32.mrf.mxu1  ;;  %8141 = vmatpush.xpose.msk.msra.mxu3 %vm4114_vm3, %v15649_v0  ;;  %v3852_v7 = vadd.f32 %v3079_v62, %v2744_v26  ;;  %v15658_v48 = vld [vmem:[#allocation52_spill] sm:$0xff]  ;;  %v15659_v26 = vld [vmem:[#allocation154_spill] sm:$0xff]  ;;  %v15660_v62 = vld [vmem:[#allocation55_spill] sm:$0xff] }
 0x281   : > { %15646 = vst [vmem:[#allocation29_spill] sm:$0xff] %v11657_v23  ;;  %v3712_v60 = vadd.f32 %v3711_v37, %v15652_v16  ;;  %v3735_v24 = vadd.f32 %v3734_v19, %v15653_v18  ;;  %v3893_v45 = vadd.f32 %v3865_v9, %v3837_v63  ;;  %v11675_v17 = vsel %vm560_vm1, %v4264_v59, %v11657_v23  ;;  %v15662_v55 = vld [vmem:[#allocation166_spill] sm:$0xff]  ;;  %v15664_v37 = vld [vmem:[#allocation95_spill] sm:$0xff]  ;;  %v15665_v19 = vld [vmem:[#allocation173_spill] sm:$0xff] }
 0x282   : > { %15647 = vst [vmem:[#allocation30_spill] sm:$0xff] %v11660_v33  ;;  %v11679_v39 = vsel %vm560_vm1, %v4296_v1, %v11660_v33  ;;  %v2918_v41 = vadd.f32 %v15657_v5, %v15656_v32  ;;  %v3895_v15 = vadd.f32 %v3867_v21, %v3839_v2  ;;  %8096 = vmatmul.msk.f32.vlgmr.msrb.gmra.mxu2 %vm4114_vm3, %v11675_v17  ;;  %v15666_v1 = vld [vmem:[#allocation96_spill] sm:$0xff]  ;;  %v15667_v50 = vld [vmem:[#allocation174_spill] sm:$0xff] }
 0x283   : > { %15654 = vst [vmem:[#allocation77_spill] sm:$0xff] %v11675_v17  ;;  %v3878_v14 = vadd.f32 %v3712_v60, %v3384_v43  ;;  %v3880_v49 = vadd.f32 %v3735_v24, %v3407_v28  ;;  %v2941_v63 = vadd.f32 %v15659_v26, %v15658_v48  ;;  %v3007_v8 = vadd.f32 %v15661_v11, %v15660_v62  ;;  %v3573_v2 = vpop.f32.mrf.mxu2  ;;  %v15663_v43 = vld [vmem:[#allocation131_spill] sm:$0xff]  ;;  %v15669_v60 = vld [vmem:[#allocation106_spill] sm:$0xff]  ;;  %v15670_v24 = vld [vmem:[#allocation132_spill] sm:$0xff] }
 0x284   : > { %15655 = vst [vmem:[#allocation78_spill] sm:$0xff] %v11679_v39  ;;  %v3964_v35 = vmul.f32 %v11478_v25, %v3933_v56  ;;  %8106 = vmatmul.msk.f32.vlgmr.msrb.gmra.mxu3 %vm4114_vm3, %v11679_v39  ;;  %8132 = vmatpush.xpose.msk.msra.mxu2 %vm4114_vm3, %v15662_v55  ;;  %v3966_v38 = vmul.f32 %v11478_v25, %v3935_v4  ;;  %v3596_v21 = vpop.f32.mrf.mxu3  ;;  %v15672_v32 = vld [vmem:[#allocation134_spill] sm:$0xff]  ;;  %v15673_v62 = vld [vmem:[#allocation169_spill] sm:$0xff] }
 0x285   : > { %v3921_v59 = vadd.f32 %v3893_v45, %v15663_v43  ;;  %v3906_v30 = vadd.f32 %v3878_v14, %v3850_v57  ;;  %v3908_v9 = vadd.f32 %v3880_v49, %v3852_v7  ;;  %8142 = vmatpush.xpose.msk.msra.mxu3 %vm4114_vm3, %v15662_v55  ;;  %v3246_v56 = vadd.f32 %v15665_v19, %v15664_v37  ;;  %v15671_v57 = vld [vmem:[#allocation133_spill] sm:$0xff] }
 0x286   : > { %v3269_v28 = vadd.f32 %v15667_v50, %v15666_v1  ;;  %v3574_v16 = vadd.f32 %v3573_v2, %v15668_v6  ;;  %v3597_v18 = vadd.f32 %v3596_v21, %v15669_v60  ;;  %v3838_v4 = vadd.f32 %v2918_v41, %v11538_v20  ;;  %v15677_v21 = vld [vmem:[#allocation178_spill] sm:$0xff]  ;;  %v15679_v1 = vld [vmem:[#allocation179_spill] sm:$0xff]  ;;  %v15682_v6 = vld [vmem:[#allocation136_spill] sm:$0xff] }
 0x287   : > { %v3923_v45 = vadd.f32 %v3895_v15, %v15670_v24  ;;  %v3934_v7 = vadd.f32 %v3906_v30, %v15671_v57  ;;  %v3936_v5 = vadd.f32 %v3908_v9, %v15672_v32  ;;  %v3840_v14 = vadd.f32 %v2941_v63, %v11542_v12  ;;  %v15674_v15 = vld [vmem:[#allocation56_spill] sm:$0xff]  ;;  %v15675_v63 = vld [vmem:[#allocation159_spill] sm:$0xff] }
 0x288   : > { %v3995_v49 = vadd.f32 %v11489_v10, %v3964_v35  ;;  %v3866_v48 = vadd.f32 %v3574_v16, %v3246_v56  ;;  %v3868_v26 = vadd.f32 %v3597_v18, %v3269_v28  ;;  %8133 = vmatpush.xpose.msk.msra.mxu2 %vm4114_vm3, %v15673_v62  ;;  %v3997_v11 = vadd.f32 %v11489_v10, %v3966_v38  ;;  %v15676_v9 = vld [vmem:[#allocation99_spill] sm:$0xff]  ;;  %v15678_v56 = vld [vmem:[#allocation100_spill] sm:$0xff] }
 0x289   : > { %v3952_v2 = vmul.f32 %v11478_v25, %v3921_v59  ;;  %v3965_v20 = vmul.f32 %v11478_v25, %v3934_v7  ;;  %v3967_v41 = vmul.f32 %v11478_v25, %v3936_v5  ;;  %8143 = vmatpush.xpose.msk.msra.mxu3 %vm4114_vm3, %v15673_v62  ;;  %v3845_v12 = vadd.f32 %v3007_v8, %v11568_v53  ;;  %v15681_v50 = vld [vmem:[#allocation135_spill] sm:$0xff]  ;;  %v15683_v60 = vld [vmem:[#allocation172_spill] sm:$0xff] }
 0x28a   : > { %v3030_v35 = vadd.f32 %v15675_v63, %v15674_v15  ;;  %v3894_v43 = vadd.f32 %v3866_v48, %v3838_v4  ;;  %v3896_v30 = vadd.f32 %v3868_v26, %v3840_v14  ;;  %v3335_v37 = vadd.f32 %v15677_v21, %v15676_v9  ;;  %8097 = vmatmul.msk.f32.gmra.mxu2 %vm4114_vm3, %v11657_v23  ;;  %v15687_v14 = vld [vmem:[#allocation107_spill] sm:$0xff]  ;;  %v15688_v48 = vld [vmem:[#allocation108_spill] sm:$0xff] }
 0x28b   : > { %v3954_v38 = vmul.f32 %v11478_v25, %v3923_v45  ;;  %v3996_v59 = vadd.f32 %v11489_v10, %v3965_v20  ;;  %v3998_v19 = vadd.f32 %v11489_v10, %v3967_v41  ;;  %v3358_v53 = vadd.f32 %v15679_v1, %v15678_v56  ;;  %v3662_v18 = vpop.f32.mrf.mxu2  ;;  %v15691_v21 = vld [vmem:[#allocation175_spill] sm:$0xff]  ;;  %v15692_v56 = vld [vmem:[#allocation45_spill] sm:$0xff] }
 0x28c   : > { %v11730_v8 = vmax.f32 %v3995_v49, 0.0  ;;  %v3922_v28 = vadd.f32 %v3894_v43, %v15681_v50  ;;  %v3924_v16 = vadd.f32 %v3896_v30, %v15682_v6  ;;  %8107 = vmatmul.msk.f32.gmra.mxu3 %vm4114_vm3, %v11660_v33  ;;  %8134 = vmatpush.xpose.msk.msra.mxu2 %vm4114_vm3, %v15683_v60  ;;  %v11738_v4 = vmax.f32 %v3997_v11, 0.0  ;;  %v3685_v7 = vpop.f32.mrf.mxu3  ;;  %v11754_v11 = vld [vmem:[%s15222_s5 + $0xf8] sm:$0xff]  ;;  %v15693_v1 = vld [vmem:[#allocation147_spill] sm:$0xff] }
 0x28d   : > { %v3983_v24 = vadd.f32 %v11489_v10, %v3952_v2  ;;  %v11741_v45 = vmax.f32 %v3996_v59, 0.0  ;;  %v11743_v57 = vmax.f32 %v3998_v19, 0.0  ;;  %8144 = vmatpush.xpose.msk.msra.mxu3 %vm4114_vm3, %v15683_v60  ;;  %v3663_v49 = vadd.f32 %v3662_v18, %v15687_v14  ;;  %v11789_v6 = vld [vmem:[%s15222_s5 + $0xf0] sm:$0xff] }
 0x28e   : > { %15680 = vst [vmem:[#allocation18_spill] sm:$0xff] %v11730_v8  ;;  %v3953_v32 = vmul.f32 %v11478_v25, %v3922_v28  ;;  %v3955_v5 = vmul.f32 %v11478_v25, %v3924_v16  ;;  %v3686_v26 = vadd.f32 %v3685_v7, %v15688_v48  ;;  %v3847_v2 = vadd.f32 %v3030_v35, %v11579_v58  ;;  %v15694_v16 = vld [vmem:[#allocation59_spill] sm:$0xff]  ;;  %v15695_v18 = vld [vmem:[#allocation164_spill] sm:$0xff] }
 0x28f   : > { %15684 = vst [vmem:[#allocation20_spill] sm:$0xff] %v11738_v4  ;;  %v3985_v20 = vadd.f32 %v11489_v10, %v3954_v38  ;;  %v11759_v41 = vrot.slane %v11741_v45, 1  ;;  %v11762_v15 = vrot.slane %v11743_v57, 1  ;;  %v3873_v30 = vadd.f32 %v3663_v49, %v3335_v37  ;;  %v15699_v49 = vld [vmem:[#allocation46_spill] sm:$0xff]  ;;  %v15700_v48 = vld [vmem:[#allocation148_spill] sm:$0xff] }
 0x290   : > { %15685 = vst [vmem:[#allocation65_spill] sm:$0xff] %v11741_v45  ;;  %v3984_v63 = vadd.f32 %v11489_v10, %v3953_v32  ;;  %v3986_v43 = vadd.f32 %v11489_v10, %v3955_v5  ;;  %v3875_v9 = vadd.f32 %v3686_v26, %v3358_v53  ;;  %8135 = vmatpush.xpose.msk.msra.mxu2 %vm4114_vm3, %v15691_v21  ;;  %v4392_v58 = vrot.slane %v11730_v8, 1 }
 0x291   : > { %15686 = vst [vmem:[#allocation66_spill] sm:$0xff] %v11743_v57  ;;  %8145 = vmatpush.xpose.msk.msra.mxu3 %vm4114_vm3, %v15691_v21  ;;  %v4424_v35 = vrot.slane %v11738_v4, 1  ;;  %v11774_v38 = vmax.f32 %v3983_v24, 0.0  ;;  %v3901_v19 = vadd.f32 %v3873_v30, %v3845_v12  ;;  %v2675_v53 = vadd.f32 %v15693_v1, %v15692_v56  ;;  %v15696_v12 = vld [vmem:[#allocation139_spill] sm:$0xff]  ;;  %v15704_v30 = vld [vmem:[#allocation180_spill] sm:$0xff]  ;;  %v15706_v56 = vld [vmem:[#allocation109_spill] sm:$0xff] }
 0x292   : > { %15689 = vst [vmem:[#allocation23_spill] sm:$0xff] %v11759_v41  ;;  %v11776_v59 = vmax.f32 %v3984_v63, 0.0  ;;  %v3903_v37 = vadd.f32 %v3875_v9, %v3847_v2  ;;  %v11782_v50 = vmax.f32 %v3985_v20, 0.0  ;;  %v11784_v28 = vmax.f32 %v3986_v43, 0.0  ;;  %v15701_v2 = vld [vmem:[#allocation60_spill] sm:$0xff]  ;;  %v15702_v20 = vld [vmem:[#allocation165_spill] sm:$0xff] }
 0x293   : > { %15690 = vst [vmem:[#allocation24_spill] sm:$0xff] %v11762_v15  ;;  %v3010_v24 = vadd.f32 %v15695_v18, %v15694_v16  ;;  %v3929_v7 = vadd.f32 %v3901_v19, %v15696_v12  ;;  %v11796_v32 = vsel %vm560_vm1, %v4392_v58, %v11759_v41  ;;  %v11800_v5 = vsel %vm560_vm1, %v4424_v35, %v11762_v15  ;;  %v3665_v14 = vpop.f32.mrf.mxu2  ;;  %v15703_v43 = vld [vmem:[#allocation8_spill] sm:$0xff]  ;;  %v15708_v12 = vld [vmem:[#allocation9_spill] sm:$0xff] }
 0x294   : > { %8168 = vmatpush.xpose.msk.msrb.mxu2 %vm4114_vm3, %v11754_v11  ;;  %15697 = vst [vmem:[#allocation120_spill] sm:$0xff] %v11796_v32  ;;  %v2698_v26 = vadd.f32 %v15700_v48, %v15699_v49  ;;  %v3033_v63 = vadd.f32 %v15702_v20, %v15701_v2  ;;  %v3338_v9 = vadd.f32 %v15704_v30, %v15703_v43  ;;  %v3688_v58 = vpop.f32.mrf.mxu3  ;;  %v15705_v19 = vld [vmem:[#allocation140_spill] sm:$0xff]  ;;  %v4200_v16 = vrot.slane %v11774_v38, 1  ;;  %v15709_v49 = vld [vmem:[#allocation181_spill] sm:$0xff]  ;;  %v15710_v2 = vld [vmem:[#allocation110_spill] sm:$0xff] }
 0x295   : > { %8178 = vmatpush.xpose.msk.msrb.mxu3 %vm4114_vm3, %v11754_v11  ;;  %15698 = vst [vmem:[#allocation121_spill] sm:$0xff] %v11800_v5  ;;  %8136 = vmatmul.msk.f32.vlgmr.msra.gmra.mxu2 %vm4114_vm3, %v11796_v32  ;;  %v3931_v35 = vadd.f32 %v3903_v37, %v15705_v19  ;;  %v3666_v1 = vadd.f32 %v3665_v14, %v15706_v56  ;;  %v11820_v18 = vrot.slane %v11776_v59, 1  ;;  %v11828_v37 = vld [vmem:[%s15222_s5 + $0xe8] sm:$0xff]  ;;  %v4232_v43 = vrot.slane %v11782_v50, 1  ;;  %v15750_v32 = vld [vmem:[#allocation117_spill] sm:$0xff] }
 0x296   : > { %8146 = vmatmul.msk.f32.vlgmr.msra.gmra.mxu3 %vm4114_vm3, %v11800_v5  ;;  %v3361_v48 = vadd.f32 %v15709_v49, %v15708_v12  ;;  %v3689_v20 = vadd.f32 %v3688_v58, %v15710_v2  ;;  %v11832_v30 = vrot.slane %v11784_v28, 1  ;;  %v3846_v14 = vadd.f32 %v3010_v24, %v2675_v53  ;;  %v15714_v53 = vld [vmem:[#allocation49_spill] sm:$0xff]  ;;  %v15747_v5 = vld [vmem:[#allocation116_spill] sm:$0xff] }
 0x297   : > { %15707 = vst [vmem:[#allocation81_spill] sm:$0xff] %v11820_v18  ;;  %v3960_v19 = vmul.f32 %v11478_v25, %v3929_v7  ;;  %v3874_v56 = vadd.f32 %v3666_v1, %v3338_v9  ;;  %v11837_v40 = vsel %vm560_vm1, %v4200_v16, %v11820_v18  ;;  %v3848_v12 = vadd.f32 %v3033_v63, %v2698_v26  ;;  %v15715_v24 = vld [vmem:[#allocation149_spill] sm:$0xff]  ;;  %v15716_v26 = vld [vmem:[#allocation63_spill] sm:$0xff]  ;;  %v15717_v63 = vld [vmem:[#allocation170_spill] sm:$0xff] }
 0x298   : > { %8169 = vmatpush.xpose.msk.msrb.mxu2 %vm4114_vm3, %v11789_v6  ;;  %15711 = vst [vmem:[#allocation82_spill] sm:$0xff] %v11832_v30  ;;  %v3876_v58 = vadd.f32 %v3689_v20, %v3361_v48  ;;  %8076 = vmatmul.msk.f32.vlgmr.msrb.gmra.mxu0 %vm4114_vm3, %v11837_v40  ;;  %v11843_v49 = vsel %vm560_vm1, %v4232_v43, %v11832_v30  ;;  %v15718_v16 = vld [vmem:[#allocation64_spill] sm:$0xff]  ;;  %v15719_v48 = vld [vmem:[#allocation171_spill] sm:$0xff]  ;;  %v15720_v43 = vld [vmem:[#allocation10_spill] sm:$0xff] }
 0x299   : > { %8179 = vmatpush.xpose.msk.msrb.mxu3 %vm4114_vm3, %v11789_v6  ;;  %15712 = vst [vmem:[#allocation22_spill] sm:$0xff] %v11837_v40  ;;  %v3962_v2 = vmul.f32 %v11478_v25, %v3931_v35  ;;  %v3902_v31 = vadd.f32 %v3874_v56, %v3846_v14  ;;  %v2764_v7 = vadd.f32 %v15715_v24, %v15714_v53  ;;  %v11861_v35 = vld [vmem:[%s15222_s5 + $0xe0] sm:$0xff] }
 0x29a   : > { %15713 = vst [vmem:[#allocation115_spill] sm:$0xff] %v11843_v49  ;;  %v3099_v9 = vadd.f32 %v15717_v63, %v15716_v26  ;;  %v3904_v1 = vadd.f32 %v3876_v58, %v3848_v12  ;;  %8086 = vmatmul.msk.f32.vlgmr.msrb.gmra.mxu1 %vm4114_vm3, %v11843_v49  ;;  %8148 = vmatpush.xpose.msk.msrb.mxu0 %vm4114_vm3, %v11225_v47  ;;  %v15721_v14 = vld [vmem:[#allocation182_spill] sm:$0xff]  ;;  %v15722_v12 = vld [vmem:[#allocation143_spill] sm:$0xff]  ;;  %v15723_v26 = vld [vmem:[#allocation12_spill] sm:$0xff] }
 0x29b   : > { %v3122_v20 = vadd.f32 %v15719_v48, %v15718_v16  ;;  %v3427_v56 = vadd.f32 %v15721_v14, %v15720_v43  ;;  %v3991_v53 = vadd.f32 %v11489_v10, %v3960_v19  ;;  %v3930_v58 = vadd.f32 %v3902_v31, %v15722_v12  ;;  %8158 = vmatpush.xpose.msk.msrb.mxu1 %vm4114_vm3, %v11225_v47  ;;  %v3754_v24 = vpop.f32.mrf.mxu2  ;;  %v15724_v63 = vld [vmem:[#allocation183_spill] sm:$0xff]  ;;  %v15726_v16 = vld [vmem:[#allocation113_spill] sm:$0xff]  ;;  %v15727_v47 = vld [vmem:[#allocation114_spill] sm:$0xff] }
 0x29c   : > { %8170 = vmatpush.xpose.msk.msrb.mxu2 %vm4114_vm3, %v11828_v37  ;;  %v3450_v3 = vadd.f32 %v15724_v63, %v15723_v26  ;;  %v3932_v44 = vadd.f32 %v3904_v1, %v15725_v34  ;;  %v3755_v48 = vadd.f32 %v3754_v24, %v15726_v16  ;;  %v3777_v19 = vpop.f32.mrf.mxu3  ;;  %v3993_v31 = vadd.f32 %v11489_v10, %v3962_v2  ;;  %v15728_v1 = vld [vmem:[#allocation50_spill] sm:$0xff]  ;;  %v11894_v2 = vld [vmem:[%s15222_s5 + $0xd8] sm:$0xff] }
 0x29d   : > { %8180 = vmatpush.xpose.msk.msrb.mxu3 %vm4114_vm3, %v11828_v37  ;;  %8137 = vmatmul.msk.f32.gmra.mxu2 %vm4114_vm3, %v11759_v41  ;;  %v3961_v43 = vmul.f32 %v11478_v25, %v3930_v58  ;;  %v3778_v34 = vadd.f32 %v3777_v19, %v15727_v47  ;;  %v15729_v14 = vld [vmem:[#allocation150_spill] sm:$0xff]  ;;  %v3853_v58 = vadd.f32 %v3099_v9, %v2764_v7  ;;  %v11896_v63 = vmax.f32 %v3991_v53, 0.0  ;;  %v15733_v7 = vld [vmem:[#allocation53_spill] sm:$0xff]  ;;  %v15735_v9 = vld [vmem:[#allocation67_spill] sm:$0xff] }
 0x29e   : > { %8147 = vmatmul.msk.f32.gmra.mxu3 %vm4114_vm3, %v11762_v15  ;;  %v2787_v12 = vadd.f32 %v15729_v14, %v15728_v1  ;;  %v3963_v26 = vmul.f32 %v11478_v25, %v3932_v44  ;;  %8149 = vmatpush.xpose.msk.msrb.mxu0 %vm4114_vm3, %v15629_v51  ;;  %v3881_v24 = vadd.f32 %v3755_v48, %v3427_v56  ;;  %v11904_v56 = vmax.f32 %v3993_v31, 0.0  ;;  %v11925_v31 = vld [vmem:[%s15222_s5 + $0xd0] sm:$0xff]  ;;  %v15738_v14 = vld [vmem:[#allocation54_spill] sm:$0xff]  ;;  %v15746_v15 = vld [vmem:[#allocation185_spill] sm:$0xff] }
 0x29f   : > { %15730 = vst [vmem:[#allocation33_spill] sm:$0xff] %v11896_v63  ;;  %v3992_v16 = vadd.f32 %v11489_v10, %v3961_v43  ;;  %8159 = vmatpush.xpose.msk.msrb.mxu1 %vm4114_vm3, %v15629_v51  ;;  %v3883_v19 = vadd.f32 %v3778_v34, %v3450_v3  ;;  %v15734_v51 = vld [vmem:[#allocation151_spill] sm:$0xff] }
 0x2a0   : > { %8171 = vmatpush.xpose.msk.msrb.mxu2 %vm4114_vm3, %v11861_v35  ;;  %v3855_v47 = vadd.f32 %v3122_v20, %v2787_v12  ;;  %v3994_v44 = vadd.f32 %v11489_v10, %v3963_v26  ;;  %8077 = vmatmul.msk.f32.gmra.mxu0 %vm4114_vm3, %v11820_v18  ;;  %15731 = vst [vmem:[#allocation34_spill] sm:$0xff] %v11904_v56  ;;  %v15736_v20 = vld [vmem:[#allocation176_spill] sm:$0xff] }
 0x2a1   : > { %8181 = vmatpush.xpose.msk.msrb.mxu3 %vm4114_vm3, %v11861_v35  ;;  %v11906_v48 = vmax.f32 %v3992_v16, 0.0  ;;  %v3909_v1 = vadd.f32 %v3881_v24, %v3853_v58  ;;  %v2767_v3 = vadd.f32 %v15734_v51, %v15733_v7  ;;  %v3102_v53 = vadd.f32 %v15736_v20, %v15735_v9  ;;  %v15739_v12 = vld [vmem:[#allocation152_spill] sm:$0xff]  ;;  %v15741_v58 = vld [vmem:[#allocation177_spill] sm:$0xff]  ;;  %v15743_v7 = vld [vmem:[#allocation11_spill] sm:$0xff] }
 0x2a2   : > { %v11916_v43 = vmax.f32 %v3994_v44, 0.0  ;;  %v3911_v34 = vadd.f32 %v3883_v19, %v3855_v47  ;;  %8087 = vmatmul.msk.f32.gmra.mxu1 %vm4114_vm3, %v11832_v30  ;;  %8150 = vmatpush.xpose.msk.msrb.mxu0 %vm4114_vm3, %v15636_v42  ;;  %v2790_v26 = vadd.f32 %v15739_v12, %v15738_v14  ;;  %v15740_v24 = vld [vmem:[#allocation68_spill] sm:$0xff]  ;;  %v4328_v47 = vrot.slane %v11896_v63, 1  ;;  %v15745_v20 = vld [vmem:[#allocation13_spill] sm:$0xff] }
 0x2a3   : > { %15732 = vst [vmem:[#allocation37_spill] sm:$0xff] %v11906_v48  ;;  %v3125_v16 = vadd.f32 %v15741_v58, %v15740_v24  ;;  %8160 = vmatpush.xpose.msk.msrb.mxu1 %vm4114_vm3, %v15636_v42  ;;  %v3757_v19 = vpop.f32.mrf.mxu2  ;;  %v11935_v44 = vrot.slane %v11906_v48, 1  ;;  %v15744_v51 = vld [vmem:[#allocation184_spill] sm:$0xff]  ;;  %v3453_v41 = vadd.f32 %v15746_v15, %v15745_v20  ;;  %v15749_v58 = vld [vmem:[#allocation7_spill] sm:$0xff]  ;;  %v4360_v15 = vrot.slane %v11904_v56, 1 }
 0x2a4   : > { %8172 = vmatpush.xpose.msk.msrb.mxu2 %vm4114_vm3, %v11894_v2  ;;  %15737 = vst [vmem:[#allocation38_spill] sm:$0xff] %v11916_v43  ;;  %v3430_v9 = vadd.f32 %v15744_v51, %v15743_v7  ;;  %v3758_v14 = vadd.f32 %v3757_v19, %v15747_v5  ;;  %v3780_v12 = vpop.f32.mrf.mxu3  ;;  %v11943_v24 = vrot.slane %v11916_v43, 1  ;;  %v3937_v42 = vadd.f32 %v3909_v1, %v15749_v58  ;;  %v15752_v19 = vld [vmem:[#allocation145_spill] sm:$0xff]  ;;  %v11962_v20 = vld [vmem:[%s15222_s5 + $0xc8] sm:$0xff] }
 0x2a5   : > { %8182 = vmatpush.xpose.msk.msrb.mxu3 %vm4114_vm3, %v11894_v2  ;;  %15742 = vst [vmem:[#allocation27_spill] sm:$0xff] %v11935_v44  ;;  %v3781_v52 = vadd.f32 %v3780_v12, %v15750_v32  ;;  %v11953_v7 = vsel %vm560_vm1, %v4328_v47, %v11935_v44  ;;  %v3854_v5 = vadd.f32 %v3102_v53, %v2767_v3 }
 0x2a6   : > { %15748 = vst [vmem:[#allocation71_spill] sm:$0xff] %v11943_v24  ;;  %v3939_v51 = vadd.f32 %v3911_v34, %v15752_v19  ;;  %8151 = vmatpush.xpose.msk.msrb.mxu0 %vm4114_vm3, %v15649_v0  ;;  %v3882_v1 = vadd.f32 %v3758_v14, %v3430_v9  ;;  %v3856_v58 = vadd.f32 %v3125_v16, %v2790_v26  ;;  %v11986_v26 = vld [vmem:[%s15222_s5 + $0xc0] sm:$0xff] }
 0x2a7   : > { %15751 = vst [vmem:[#allocation72_spill] sm:$0xff] %v11953_v7  ;;  %8161 = vmatpush.xpose.msk.msrb.mxu1 %vm4114_vm3, %v15649_v0  ;;  %v3884_v32 = vadd.f32 %v3781_v52, %v3453_v41  ;;  %v11968_v47 = vsel %vm560_vm1, %v4360_v15, %v11943_v24  ;;  %v3968_v53 = vmul.f32 %v11478_v25, %v3937_v42  ;;  %v15754_v52 = vld [vmem:[#allocation6_spill] sm:$0xff] }
 0x2a8   : > { %8173 = vmatpush.xpose.msk.msrb.mxu2 %vm4114_vm3, %v11925_v31  ;;  %15753 = vst [vmem:[#allocation28_spill] sm:$0xff] %v11968_v47  ;;  %v3910_v3 = vadd.f32 %v3882_v1, %v3854_v5  ;;  %8116 = vmatmul.msk.f32.vlgmr.msra.gmra.mxu0 %vm4114_vm3, %v11953_v7  ;;  %v3970_v0 = vmul.f32 %v11478_v25, %v3939_v51  ;;  %v15755_v16 = vld [vmem:[#allocation146_spill] sm:$0xff] }
 0x2a9   : > { %8183 = vmatpush.xpose.msk.msrb.mxu3 %vm4114_vm3, %v11925_v31  ;;  %v3912_v34 = vadd.f32 %v3884_v32, %v3856_v58  ;;  %v3999_v12 = vadd.f32 %v11489_v10, %v3968_v53  ;;  %v12207_v53 = vld [vmem:[%s15222_s5 + $0x170] sm:$0xff] }
 0x2aa   : > { %v3938_v41 = vadd.f32 %v3910_v3, %v15754_v52  ;;  %8126 = vmatmul.msk.f32.vlgmr.msra.gmra.mxu1 %vm4114_vm3, %v11968_v47  ;;  %8152 = vmatpush.xpose.msk.msrb.mxu0 %vm4114_vm3, %v15662_v55  ;;  %v4001_v15 = vadd.f32 %v11489_v10, %v3970_v0  ;;  %v12237_v0 = vld [vmem:[%s15222_s5 + $0x160] sm:$0xff]  ;;  %v3800_v52 = vpop.f32.mrf.mxu0 }
 0x2ab   : > { %v3940_v9 = vadd.f32 %v3912_v34, %v15755_v16  ;;  %8162 = vmatpush.xpose.msk.msrb.mxu1 %vm4114_vm3, %v15662_v55  ;;  %v12015_v19 = vmax.f32 %v3999_v12, 0.0  ;;  %v12222_v34 = vld [vmem:[%s15222_s5 + $0x168] sm:$0xff] }
 0x2ac   : > { %8174 = vmatpush.xpose.msk.msrb.mxu2 %vm4114_vm3, %v11962_v20  ;;  %v3969_v14 = vmul.f32 %v11478_v25, %v3938_v41  ;;  %v15764_v41 = vld [vmem:[#allocation124_spill] sm:$0xff]  ;;  %v15766_v12 = vld [vmem:[#allocation155_spill] sm:$0xff] }
 0x2ad   : > { %8184 = vmatpush.xpose.msk.msrb.mxu3 %vm4114_vm3, %v11962_v20  ;;  %v3971_v42 = vmul.f32 %v11478_v25, %v3940_v9  ;;  %15757 = vst [vmem:[#allocation86_spill] sm:$0xff] %v12015_v19  ;;  %v4456_v58 = vrot.slane %v12015_v19, 1  ;;  %v3801_v16 = vadd.f32 %v3800_v52, %v15764_v41  ;;  %v12272_v9 = vld [vmem:[%s15222_s5 + $0x150] sm:$0xff] }
 0x2ae   : > { %v4000_v5 = vadd.f32 %v11489_v10, %v3969_v14  ;;  %8153 = vmatpush.xpose.msk.msrb.mxu0 %vm4114_vm3, %v15673_v62  ;;  %v15765_v14 = vld [vmem:[#allocation83_spill] sm:$0xff] }
 0x2af   : > { %v4002_v55 = vadd.f32 %v11489_v10, %v3971_v42  ;;  %8163 = vmatpush.xpose.msk.msrb.mxu1 %vm4114_vm3, %v15673_v62  ;;  %v12021_v10 = vmax.f32 %v4001_v15, 0.0  ;;  %v3145_v42 = vadd.f32 %v15766_v12, %v15765_v14  ;;  %v12309_v12 = vld [vmem:[%s15222_s5 + $0x140] sm:$0xff] }
 0x2b0   : > { %8175 = vmatpush.xpose.msk.msrb.mxu2 %vm4114_vm3, %v11986_v26  ;;  %v12009_v25 = vmax.f32 %v4000_v5, 0.0  ;;  %8117 = vmatmul.msk.f32.gmra.mxu0 %vm4114_vm3, %v11935_v44  ;;  %v15768_v5 = vld [vmem:[#allocation39_spill] sm:$0xff] }
 0x2b1   : > { %8185 = vmatpush.xpose.msk.msrb.mxu3 %vm4114_vm3, %v11986_v26  ;;  %v12017_v51 = vmax.f32 %v4002_v55, 0.0  ;;  %15759 = vst [vmem:[#allocation118_spill] sm:$0xff] %v12021_v10  ;;  %v4488_v32 = vrot.slane %v12021_v10, 1  ;;  %v15769_v55 = vld [vmem:[#allocation16_spill] sm:$0xff] }
 0x2b2   : > { %15756 = vst [vmem:[#allocation85_spill] sm:$0xff] %v12009_v25  ;;  %8127 = vmatmul.msk.f32.gmra.mxu1 %vm4114_vm3, %v11943_v24  ;;  %8154 = vmatpush.xpose.msk.msrb.mxu0 %vm4114_vm3, %v15683_v60  ;;  %v12032_v62 = vrot.slane %v12009_v25, 1  ;;  %v3803_v52 = vpop.f32.mrf.mxu0 }
 0x2b3   : > { %8176 = vmatmul.msk.f32.vlgmr.msrb.gmra.mxu2 %vm4114_vm3, %v11526_v54  ;;  %15758 = vst [vmem:[#allocation21_spill] sm:$0xff] %v12017_v51  ;;  %8164 = vmatpush.xpose.msk.msrb.mxu1 %vm4114_vm3, %v15683_v60  ;;  %v12037_v1 = vrot.slane %v12017_v51, 1 }
 0x2b4   : > { %8208 = vmatpush.xpose.msk.msra.mxu2 %vm4114_vm3, %v11754_v11  ;;  %8186 = vmatmul.msk.f32.vlgmr.msrb.gmra.mxu3 %vm4114_vm3, %v11774_v38  ;;  %15760 = vst [vmem:[#allocation41_spill] sm:$0xff] %v12032_v62  ;;  %v12049_v60 = vsel %vm560_vm1, %v4456_v58, %v12032_v62  ;;  %v2810_v58 = vadd.f32 %v15769_v55, %v15768_v5  ;;  %v12318_v55 = vrot.slane %v11532_v13, 2 }
 0x2b5   : > { %8218 = vmatpush.xpose.msk.msra.mxu3 %vm4114_vm3, %v11754_v11  ;;  %15761 = vst [vmem:[#allocation42_spill] sm:$0xff] %v12037_v1  ;;  %v12057_v3 = vsel %vm560_vm1, %v4488_v32, %v12037_v1 }
 0x2b6   : > { %8155 = vmatpush.xpose.msk.msrb.mxu0 %vm4114_vm3, %v15691_v21  ;;  %15762 = vst [vmem:[#allocation31_spill] sm:$0xff] %v12049_v60 }
 0x2b7   : > { %8165 = vmatpush.xpose.msk.msrb.mxu1 %vm4114_vm3, %v15691_v21  ;;  %15763 = vst [vmem:[#allocation32_spill] sm:$0xff] %v12057_v3  ;;  %v12188_v21 = vld [vmem:[%s15222_s5 + $0x178] sm:$0xff] }
 0x2b8   : > { %8209 = vmatpush.xpose.msk.msra.mxu2 %vm4114_vm3, %v11789_v6  ;;  %15774 = vst [vmem:[#allocation35_spill] sm:$0xff] %v12318_v55 }
 0x2b9   : > { %8219 = vmatpush.xpose.msk.msra.mxu3 %vm4114_vm3, %v11789_v6  ;;  %8156 = vmatmul.msk.f32.vlgmr.msrb.gmra.mxu0 %vm4114_vm3, %v12049_v60 }
 0x2ba   : > { %8188 = vmatpush.xpose.msk.msra.mxu0 %vm4114_vm3, %v11754_v11  ;;  %8166 = vmatmul.msk.f32.vlgmr.msrb.gmra.mxu1 %vm4114_vm3, %v12057_v3 }
 0x2bb   : > { %8198 = vmatpush.xpose.msk.msra.mxu1 %vm4114_vm3, %v11754_v11  ;;  %8177 = vmatmul.msk.f32.gmra.mxu2 %vm4114_vm3, %v11532_v13 }
 0x2bc   : > { %8210 = vmatpush.xpose.msk.msra.mxu2 %vm4114_vm3, %v11828_v37  ;;  %8187 = vmatmul.msk.f32.gmra.mxu3 %vm4114_vm3, %v11776_v59 }
 0x2bd   : > { %8220 = vmatpush.xpose.msk.msra.mxu3 %vm4114_vm3, %v11828_v37 }
 0x2be   : > { %8189 = vmatpush.xpose.msk.msra.mxu0 %vm4114_vm3, %v11789_v6 }
 0x2bf   : > { %8199 = vmatpush.xpose.msk.msra.mxu1 %vm4114_vm3, %v11789_v6 }
 0x2c0   : > { %8211 = vmatpush.xpose.msk.msra.mxu2 %vm4114_vm3, %v11861_v35 }
 0x2c1   : > { %8221 = vmatpush.xpose.msk.msra.mxu3 %vm4114_vm3, %v11861_v35  ;;  %8157 = vmatmul.msk.f32.gmra.mxu0 %vm4114_vm3, %v12032_v62 }
 0x2c2   : > { %8190 = vmatpush.xpose.msk.msra.mxu0 %vm4114_vm3, %v11828_v37  ;;  %8167 = vmatmul.msk.f32.gmra.mxu1 %vm4114_vm3, %v12037_v1 }
 0x2c3   : > { %8200 = vmatpush.xpose.msk.msra.mxu1 %vm4114_vm3, %v11828_v37 }
 0x2c4   : > { %8212 = vmatpush.xpose.msk.msra.mxu2 %vm4114_vm3, %v11894_v2 }
 0x2c5   : > { %8222 = vmatpush.xpose.msk.msra.mxu3 %vm4114_vm3, %v11894_v2 }
 0x2c6   : > { %8191 = vmatpush.xpose.msk.msra.mxu0 %vm4114_vm3, %v11861_v35 }
 0x2c7   : > { %8201 = vmatpush.xpose.msk.msra.mxu1 %vm4114_vm3, %v11861_v35 }
 0x2c8   : > { %8213 = vmatpush.xpose.msk.msra.mxu2 %vm4114_vm3, %v11925_v31 }
 0x2c9   : > { %8223 = vmatpush.xpose.msk.msra.mxu3 %vm4114_vm3, %v11925_v31 }
 0x2ca   : > { %8192 = vmatpush.xpose.msk.msra.mxu0 %vm4114_vm3, %v11894_v2 }
 0x2cb   : > { %8202 = vmatpush.xpose.msk.msra.mxu1 %vm4114_vm3, %v11894_v2 }
 0x2cc   : > { %8214 = vmatpush.xpose.msk.msra.mxu2 %vm4114_vm3, %v11962_v20 }
 0x2cd   : > { %8224 = vmatpush.xpose.msk.msra.mxu3 %vm4114_vm3, %v11962_v20 }
 0x2ce   : > { %8193 = vmatpush.xpose.msk.msra.mxu0 %vm4114_vm3, %v11925_v31 }
 0x2cf   : > { %8203 = vmatpush.xpose.msk.msra.mxu1 %vm4114_vm3, %v11925_v31 }
 0x2d0   : > { %8215 = vmatpush.xpose.msk.msra.mxu2 %vm4114_vm3, %v11986_v26 }
 0x2d1   : > { %8225 = vmatpush.xpose.msk.msra.mxu3 %vm4114_vm3, %v11986_v26 }
 0x2d2   : > { %8194 = vmatpush.xpose.msk.msra.mxu0 %vm4114_vm3, %v11962_v20 }
 0x2d3   : > { %8216 = vmatmul.msk.f32.vlgmr.msra.gmra.mxu2 %vm4114_vm3, %v11635_v29  ;;  %8204 = vmatpush.xpose.msk.msra.mxu1 %vm4114_vm3, %v11962_v20 }
 0x2d4   : > { %8248 = vmatpush.xpose.msk.msrb.mxu2 %vm4114_vm3, %v11754_v11  ;;  %8226 = vmatmul.msk.f32.vlgmr.msra.gmra.mxu3 %vm4114_vm3, %v11896_v63 }
 0x2d5   : > { %8258 = vmatpush.xpose.msk.msrb.mxu3 %vm4114_vm3, %v11754_v11 }
 0x2d6   : > { %8195 = vmatpush.xpose.msk.msra.mxu0 %vm4114_vm3, %v11986_v26 }
 0x2d7   : > { %8205 = vmatpush.xpose.msk.msra.mxu1 %vm4114_vm3, %v11986_v26 }
 0x2d8   : > { %8249 = vmatpush.xpose.msk.msrb.mxu2 %vm4114_vm3, %v11789_v6 }
 0x2d9   : > { %8259 = vmatpush.xpose.msk.msrb.mxu3 %vm4114_vm3, %v11789_v6  ;;  %8196 = vmatmul.msk.f32.vlgmr.msra.gmra.mxu0 %vm4114_vm3, %v11782_v50 }
 0x2da   : > { %8228 = vmatpush.xpose.msk.msrb.mxu0 %vm4114_vm3, %v11754_v11  ;;  %8206 = vmatmul.msk.f32.vlgmr.msra.gmra.mxu1 %vm4114_vm3, %v11627_v27 }
 0x2db   : > { %8238 = vmatpush.xpose.msk.msrb.mxu1 %vm4114_vm3, %v11754_v11  ;;  %8217 = vmatmul.msk.f32.gmra.mxu2 %vm4114_vm3, %v11643_v22 }
 0x2dc   : > { %8250 = vmatpush.xpose.msk.msrb.mxu2 %vm4114_vm3, %v11828_v37  ;;  %8227 = vmatmul.msk.f32.gmra.mxu3 %vm4114_vm3, %v11906_v48 }
 0x2dd   : > { %8260 = vmatpush.xpose.msk.msrb.mxu3 %vm4114_vm3, %v11828_v37 }
 0x2de   : > { %8229 = vmatpush.xpose.msk.msrb.mxu0 %vm4114_vm3, %v11789_v6 }
 0x2df   : > { %8239 = vmatpush.xpose.msk.msrb.mxu1 %vm4114_vm3, %v11789_v6 }
 0x2e0   : > { %8251 = vmatpush.xpose.msk.msrb.mxu2 %vm4114_vm3, %v11861_v35 }
 0x2e1   : > { %8261 = vmatpush.xpose.msk.msrb.mxu3 %vm4114_vm3, %v11861_v35  ;;  %8197 = vmatmul.msk.f32.gmra.mxu0 %vm4114_vm3, %v11784_v28 }
 0x2e2   : > { %8230 = vmatpush.xpose.msk.msrb.mxu0 %vm4114_vm3, %v11828_v37  ;;  %8207 = vmatmul.msk.f32.gmra.mxu1 %vm4114_vm3, %v11641_v61 }
 0x2e3   : > { %8240 = vmatpush.xpose.msk.msrb.mxu1 %vm4114_vm3, %v11828_v37 }
 0x2e4   : > { %8252 = vmatpush.xpose.msk.msrb.mxu2 %vm4114_vm3, %v11894_v2 }
 0x2e5   : > { %8262 = vmatpush.xpose.msk.msrb.mxu3 %vm4114_vm3, %v11894_v2 }
 0x2e6   : > { %8231 = vmatpush.xpose.msk.msrb.mxu0 %vm4114_vm3, %v11861_v35 }
 0x2e7   : > { %8241 = vmatpush.xpose.msk.msrb.mxu1 %vm4114_vm3, %v11861_v35 }
 0x2e8   : > { %8253 = vmatpush.xpose.msk.msrb.mxu2 %vm4114_vm3, %v11925_v31 }
 0x2e9   : > { %8263 = vmatpush.xpose.msk.msrb.mxu3 %vm4114_vm3, %v11925_v31 }
 0x2ea   : > { %8232 = vmatpush.xpose.msk.msrb.mxu0 %vm4114_vm3, %v11894_v2 }
 0x2eb   : > { %8242 = vmatpush.xpose.msk.msrb.mxu1 %vm4114_vm3, %v11894_v2 }
 0x2ec   : > { %8254 = vmatpush.xpose.msk.msrb.mxu2 %vm4114_vm3, %v11962_v20 }
 0x2ed   : > { %8264 = vmatpush.xpose.msk.msrb.mxu3 %vm4114_vm3, %v11962_v20 }
 0x2ee   : > { %8233 = vmatpush.xpose.msk.msrb.mxu0 %vm4114_vm3, %v11925_v31 }
 0x2ef   : > { %8243 = vmatpush.xpose.msk.msrb.mxu1 %vm4114_vm3, %v11925_v31 }
 0x2f0   : > { %8255 = vmatpush.xpose.msk.msrb.mxu2 %vm4114_vm3, %v11986_v26 }
 0x2f1   : > { %8265 = vmatpush.xpose.msk.msrb.mxu3 %vm4114_vm3, %v11986_v26 }
 0x2f2   : > { %8234 = vmatpush.xpose.msk.msrb.mxu0 %vm4114_vm3, %v11962_v20 }
 0x2f3   : > { %8256 = vmatmul.msk.f32.vlgmr.msrb.gmra.mxu2 %vm4114_vm3, %v11738_v4  ;;  %8244 = vmatpush.xpose.msk.msrb.mxu1 %vm4114_vm3, %v11962_v20 }
 0x2f4   : > { %8288 = vmatpush.xpose.msk.msra.mxu2 %vm4114_vm3, %v12188_v21  ;;  %8266 = vmatmul.msk.f32.vlgmr.msrb.gmra.mxu3 %vm4114_vm3, %v12015_v19 }
 0x2f5   : > { %8298 = vmatpush.xpose.msk.msra.mxu3 %vm4114_vm3, %v12188_v21 }
 0x2f6   : > { %8235 = vmatpush.xpose.msk.msrb.mxu0 %vm4114_vm3, %v11986_v26 }
 0x2f7   : > { %8245 = vmatpush.xpose.msk.msrb.mxu1 %vm4114_vm3, %v11986_v26 }
 0x2f8   : > { %8289 = vmatpush.xpose.msk.msra.mxu2 %vm4114_vm3, %v12207_v53 }
 0x2f9   : > { %8299 = vmatpush.xpose.msk.msra.mxu3 %vm4114_vm3, %v12207_v53  ;;  %8236 = vmatmul.msk.f32.vlgmr.msrb.gmra.mxu0 %vm4114_vm3, %v11904_v56 }
 0x2fa   : > { %8268 = vmatpush.xpose.msk.msra.mxu0 %vm4114_vm3, %v11754_v11  ;;  %8246 = vmatmul.msk.f32.vlgmr.msrb.gmra.mxu1 %vm4114_vm3, %v11730_v8 }
 0x2fb   : > { %8278 = vmatpush.xpose.msk.msra.mxu1 %vm4114_vm3, %v11754_v11  ;;  %8257 = vmatmul.msk.f32.gmra.mxu2 %vm4114_vm3, %v11743_v57  ;;  %v12258_v11 = vld [vmem:[%s15222_s5 + $0x158] sm:$0xff] }
 0x2fc   : > { %8290 = vmatpush.xpose.msk.msra.mxu2 %vm4114_vm3, %v12222_v34  ;;  %8267 = vmatmul.msk.f32.gmra.mxu3 %vm4114_vm3, %v12009_v25 }
 0x2fd   : > { %8300 = vmatpush.xpose.msk.msra.mxu3 %vm4114_vm3, %v12222_v34 }
 0x2fe   : > { %8269 = vmatpush.xpose.msk.msra.mxu0 %vm4114_vm3, %v11789_v6 }
 0x2ff   : > { %8279 = vmatpush.xpose.msk.msra.mxu1 %vm4114_vm3, %v11789_v6  ;;  %v15767_v6 = vld [vmem:[#allocation97_spill] sm:$0xff] }
 0x300   : > { %8291 = vmatpush.xpose.msk.msra.mxu2 %vm4114_vm3, %v12237_v0  ;;  %v3473_v15 = vadd.f32 %v11528_v36, %v15767_v6  ;;  %v12295_v36 = vld [vmem:[%s15222_s5 + $0x148] sm:$0xff]  ;;  %v15772_v6 = vld [vmem:[#allocation161_spill] sm:$0xff] }
 0x301   : > { %8301 = vmatpush.xpose.msk.msra.mxu3 %vm4114_vm3, %v12237_v0  ;;  %8237 = vmatmul.msk.f32.gmra.mxu0 %vm4114_vm3, %v11916_v43 }
 0x302   : > { %8270 = vmatpush.xpose.msk.msra.mxu0 %vm4114_vm3, %v11828_v37  ;;  %v3885_v32 = vadd.f32 %v3801_v16, %v3473_v15  ;;  %8247 = vmatmul.msk.f32.gmra.mxu1 %vm4114_vm3, %v11741_v45  ;;  %v15770_v16 = vld [vmem:[#allocation127_spill] sm:$0xff]  ;;  %v15773_v15 = vld [vmem:[#allocation101_spill] sm:$0xff] }
 0x303   : > { %8280 = vmatpush.xpose.msk.msra.mxu1 %vm4114_vm3, %v11828_v37  ;;  %v3857_v37 = vadd.f32 %v3145_v42, %v2810_v58  ;;  %v3804_v14 = vadd.f32 %v3803_v52, %v15770_v16  ;;  %v15771_v42 = vld [vmem:[#allocation87_spill] sm:$0xff]  ;;  %v3476_v5 = vadd.f32 %v11588_v46, %v15773_v15  ;;  %v12321_v58 = vrot.slane %v11776_v59, 2  ;;  %v15777_v16 = vld [vmem:[#allocation137_spill] sm:$0xff] }
 0x304   : > { %8292 = vmatpush.xpose.msk.msra.mxu2 %vm4114_vm3, %v12258_v11  ;;  %v15776_v52 = vld [vmem:[#allocation111_spill] sm:$0xff]  ;;  %v4868_v46 = vrot.slane %v11526_v54, 2  ;;  %v15779_v15 = vld [vmem:[#allocation141_spill] sm:$0xff] }
 0x305   : > { %8302 = vmatpush.xpose.msk.msra.mxu3 %vm4114_vm3, %v12258_v11  ;;  %v3913_v41 = vadd.f32 %v3885_v32, %v3857_v37  ;;  %v15775_v32 = vld [vmem:[#allocation43_spill] sm:$0xff]  ;;  %v3886_v62 = vadd.f32 %v3804_v14, %v3476_v5 }
 0x306   : > { %8271 = vmatpush.xpose.msk.msra.mxu0 %vm4114_vm3, %v11861_v35  ;;  %v2813_v37 = vadd.f32 %v15776_v52, %v15775_v32 }
 0x307   : > { %8281 = vmatpush.xpose.msk.msra.mxu1 %vm4114_vm3, %v11861_v35  ;;  %v3148_v35 = vadd.f32 %v15772_v6, %v15771_v42  ;;  %v3941_v1 = vadd.f32 %v3913_v41, %v15777_v16  ;;  %v12340_v41 = vsel %vm1400_vm2, %v4868_v46, %v12318_v55  ;;  %v12439_v16 = vrot.slane %v11906_v48, 2 }
 0x308   : > { %8293 = vmatpush.xpose.msk.msra.mxu2 %vm4114_vm3, %v12272_v9  ;;  %15778 = vst [vmem:[#allocation75_spill] sm:$0xff] %v12340_v41  ;;  %v5012_v46 = vrot.slane %v11635_v29, 2  ;;  %v12608_v48 = vrot.slane %v11741_v45, 2 }
 0x309   : > { %8303 = vmatpush.xpose.msk.msra.mxu3 %vm4114_vm3, %v12272_v9  ;;  %v3858_v42 = vadd.f32 %v3148_v35, %v2813_v37  ;;  %v12436_v37 = vrot.slane %v11643_v22, 2 }
 0x30a   : > { %8272 = vmatpush.xpose.msk.msra.mxu0 %vm4114_vm3, %v11894_v2 }
 0x30b   : > { %8282 = vmatpush.xpose.msk.msra.mxu1 %vm4114_vm3, %v11894_v2  ;;  %v4922_v2 = vrot.slane %v11774_v38, 2  ;;  %v3914_v35 = vadd.f32 %v3886_v62, %v3858_v42  ;;  %v12455_v42 = vsel %vm1400_vm2, %v5012_v46, %v12436_v37  ;;  %v12548_v46 = vrot.slane %v11743_v57, 2  ;;  %v12623_v57 = vld [vmem:[%s15222_s5 + $0x1e0] sm:$0xff] }
 0x30c   : > { %8294 = vmatpush.xpose.msk.msra.mxu2 %vm4114_vm3, %v12295_v36 }
 0x30d   : > { %8304 = vmatpush.xpose.msk.msra.mxu3 %vm4114_vm3, %v12295_v36  ;;  %v12348_v14 = vsel %vm1400_vm2, %v4922_v2, %v12321_v58  ;;  %v3942_v5 = vadd.f32 %v3914_v35, %v15779_v15  ;;  %v5042_v2 = vrot.slane %v11896_v63, 2  ;;  %v12476_v35 = vrot.slane %v11784_v28, 2 }
 0x30e   : > { %8273 = vmatpush.xpose.msk.msra.mxu0 %vm4114_vm3, %v11925_v31  ;;  %v4952_v15 = vrot.slane %v11782_v50, 2  ;;  %v5072_v63 = vrot.slane %v11904_v56, 2 }
 0x30f   : > { %8283 = vmatpush.xpose.msk.msra.mxu1 %vm4114_vm3, %v11925_v31  ;;  %v12353_v31 = vld [vmem:[%s15580_s3] ss:$0 sm:$0xff] }
 0x310   : > { %8295 = vmatpush.xpose.msk.msra.mxu2 %vm4114_vm3, %v12309_v12  ;;  %v3972_v6 = vmul.f32 %v12353_v31, %v3941_v1  ;;  %v12369_v1 = vld [vmem:[%s15585_s4] ss:$0 sm:$0xff]  ;;  %v3973_v32 = vmul.f32 %v12353_v31, %v3942_v5  ;;  %v4982_v5 = vrot.slane %v11627_v27, 2  ;;  %s9225_s4 = scalar_lea.hbm %s9224_s23, 1 }
 0x311   : > { %8305 = vmatpush.xpose.msk.msra.mxu3 %vm4114_vm3, %v12309_v12  ;;  %p9226_p11 = scmp.ne.s32.totalorder %s9224_s23, %s9225_s4  ;;  %p9231_p1 = scmp.lt.s32.totalorder %s9229_s16, %s9225_s4 }
 0x312   : > { %8274 = vmatpush.xpose.msk.msra.mxu0 %vm4114_vm3, %v11962_v20  ;;  %v4003_v62 = vadd.f32 %v12369_v1, %v3972_v6  ;;  %v12463_v6 = vsel %vm1400_vm2, %v5042_v2, %v12439_v16  ;;  %v12553_v2 = vld [vmem:[%s15222_s5 + $0x1f8] sm:$0xff] }
 0x313   : > { %8296 = vmatmul.msk.f32.vlgmr.msra.gmra.mxu2 %vm4114_vm3, %v12340_v41  ;;  %8284 = vmatpush.xpose.msk.msra.mxu1 %vm4114_vm3, %v11962_v20  ;;  %p9227_p12 = pnand %p9226_p11, %p9391_p5  ;;  %p9232_p2 = por %p9231_p1, %p9230_p0 }
 0x314   : > { %8328 = vmatpush.xpose.msk.msrb.mxu2 %vm4114_vm3, %v12188_v21  ;;  %8306 = vmatmul.msk.f32.vlgmr.msra.gmra.mxu3 %vm4114_vm3, %v12348_v14  ;;  %v12383_v20 = vmax.f32 %v4003_v62, 0.0  ;;  %v12481_v62 = vrot.slane %v11641_v61, 2 }
 0x315   : > { %8338 = vmatpush.xpose.msk.msrb.mxu3 %vm4114_vm3, %v12188_v21  ;;  %p9228_p13 = pneg %p9227_p12 }
 0x316   : > { %8275 = vmatpush.xpose.msk.msra.mxu0 %vm4114_vm3, %v11986_v26  ;;  %15780 = vst [vmem:[#allocation76_spill] sm:$0xff] %v12383_v20 }
 0x317   : > { %8285 = vmatpush.xpose.msk.msra.mxu1 %vm4114_vm3, %v11986_v26  ;;  %v4004_v26 = vadd.f32 %v12369_v1, %v3973_v32  ;;  %v12499_v32 = vsel %vm1400_vm2, %v4952_v15, %v12476_v35  ;;  %v12556_v15 = vrot.slane %v12009_v25, 2  ;;  %p9233_p3 = pnand %p9232_p2, %p9228_p13 }
 0x318   : > { %8329 = vmatpush.xpose.msk.msrb.mxu2 %vm4114_vm3, %v12207_v53 }
 0x319   : > { %8339 = vmatpush.xpose.msk.msrb.mxu3 %vm4114_vm3, %v12207_v53  ;;  %8276 = vmatmul.msk.f32.vlgmr.msra.gmra.mxu0 %vm4114_vm3, %v12021_v10  ;;  %v12413_v52 = vmax.f32 %v4004_v26, 0.0  ;;  %v12507_v26 = vsel %vm1400_vm2, %v4982_v5, %v12481_v62  ;;  %v5132_v5 = vrot.slane %v11738_v4, 2  ;;  %v15792_v4 = vld [vmem:[#allocation112_spill] sm:$0xff] }
 0x31a   : > { %8308 = vmatpush.xpose.msk.msrb.mxu0 %vm4114_vm3, %v12188_v21  ;;  %8286 = vmatmul.msk.f32.vlgmr.msra.gmra.mxu1 %vm4114_vm3, %v12383_v20 }
 0x31b   : > { %8318 = vmatpush.xpose.msk.msrb.mxu1 %vm4114_vm3, %v12188_v21  ;;  %8297 = vmatmul.msk.f32.gmra.mxu2 %vm4114_vm3, %v12318_v55  ;;  %15781 = vst [vmem:[#allocation47_spill] sm:$0xff] %v12413_v52  ;;  %v5162_v55 = vrot.slane %v12015_v19, 2  ;;  %v12572_v25 = vsel %vm1400_vm2, %v5132_v5, %v12548_v46  ;;  %v12585_v19 = vld [vmem:[%s15222_s5 + $0x1f0] sm:$0xff]  ;;  %v12603_v5 = vrot.slane %v11916_v43, 2  ;;  %v5102_v43 = vrot.slane %v11730_v8, 2  ;;  %v15793_v8 = vld [vmem:[#allocation121_spill] sm:$0xff] }
 0x31c   : > { %8330 = vmatpush.xpose.msk.msrb.mxu2 %vm4114_vm3, %v12222_v34  ;;  %8307 = vmatmul.msk.f32.gmra.mxu3 %vm4114_vm3, %v12321_v58 }
 0x31d   : > { %8340 = vmatpush.xpose.msk.msrb.mxu3 %vm4114_vm3, %v12222_v34  ;;  %v12580_v41 = vsel %vm1400_vm2, %v5162_v55, %v12556_v15  ;;  %v12600_v55 = vld [vmem:[%s15222_s5 + $0x1e8] sm:$0xff]  ;;  %v12631_v56 = vsel %vm1400_vm2, %v5072_v63, %v12603_v5  ;;  %v12639_v45 = vsel %vm1400_vm2, %v5102_v43, %v12608_v48  ;;  %v12652_v63 = vld [vmem:[%s15222_s5 + $0x1d8] sm:$0xff]  ;;  %v12665_v43 = vld [vmem:[%s15222_s5 + $0x1d0] sm:$0xff] }
 0x31e   : > { %8309 = vmatpush.xpose.msk.msrb.mxu0 %vm4114_vm3, %v12207_v53 }
 0x31f   : > { %8319 = vmatpush.xpose.msk.msrb.mxu1 %vm4114_vm3, %v12207_v53 }
 0x320   : > { %8331 = vmatpush.xpose.msk.msrb.mxu2 %vm4114_vm3, %v12237_v0 }
 0x321   : > { %8341 = vmatpush.xpose.msk.msrb.mxu3 %vm4114_vm3, %v12237_v0  ;;  %8277 = vmatmul.msk.f32.gmra.mxu0 %vm4114_vm3, %v12017_v51 }
 0x322   : > { %8310 = vmatpush.xpose.msk.msrb.mxu0 %vm4114_vm3, %v12222_v34  ;;  %8287 = vmatmul.msk.f32.gmra.mxu1 %vm4114_vm3, %v12413_v52 }
 0x323   : > { %8320 = vmatpush.xpose.msk.msrb.mxu1 %vm4114_vm3, %v12222_v34 }
 0x324   : > { %8332 = vmatpush.xpose.msk.msrb.mxu2 %vm4114_vm3, %v12258_v11 }
 0x325   : > { %8342 = vmatpush.xpose.msk.msrb.mxu3 %vm4114_vm3, %v12258_v11 }
 0x326   : > { %8311 = vmatpush.xpose.msk.msrb.mxu0 %vm4114_vm3, %v12237_v0 }
 0x327   : > { %8321 = vmatpush.xpose.msk.msrb.mxu1 %vm4114_vm3, %v12237_v0 }
 0x328   : > { %8333 = vmatpush.xpose.msk.msrb.mxu2 %vm4114_vm3, %v12272_v9 }
 0x329   : > { %8343 = vmatpush.xpose.msk.msrb.mxu3 %vm4114_vm3, %v12272_v9 }
 0x32a   : > { %8312 = vmatpush.xpose.msk.msrb.mxu0 %vm4114_vm3, %v12258_v11 }
 0x32b   : > { %8322 = vmatpush.xpose.msk.msrb.mxu1 %vm4114_vm3, %v12258_v11 }
 0x32c   : > { %8334 = vmatpush.xpose.msk.msrb.mxu2 %vm4114_vm3, %v12295_v36 }
 0x32d   : > { %8344 = vmatpush.xpose.msk.msrb.mxu3 %vm4114_vm3, %v12295_v36 }
 0x32e   : > { %8313 = vmatpush.xpose.msk.msrb.mxu0 %vm4114_vm3, %v12272_v9 }
 0x32f   : > { %8323 = vmatpush.xpose.msk.msrb.mxu1 %vm4114_vm3, %v12272_v9 }
 0x330   : > { %8335 = vmatpush.xpose.msk.msrb.mxu2 %vm4114_vm3, %v12309_v12 }
 0x331   : > { %8345 = vmatpush.xpose.msk.msrb.mxu3 %vm4114_vm3, %v12309_v12 }
 0x332   : > { %8314 = vmatpush.xpose.msk.msrb.mxu0 %vm4114_vm3, %v12295_v36 }
 0x333   : > { %8336 = vmatmul.msk.f32.vlgmr.msrb.gmra.mxu2 %vm4114_vm3, %v12455_v42  ;;  %8324 = vmatpush.xpose.msk.msrb.mxu1 %vm4114_vm3, %v12295_v36 }
 0x334   : > { %8368 = vmatpush.xpose.msk.msra.mxu2 %vm4114_vm3, %v12188_v21  ;;  %8346 = vmatmul.msk.f32.vlgmr.msrb.gmra.mxu3 %vm4114_vm3, %v12463_v6 }
 0x335   : > { %8378 = vmatpush.xpose.msk.msra.mxu3 %vm4114_vm3, %v12188_v21 }
 0x336   : > { %8315 = vmatpush.xpose.msk.msrb.mxu0 %vm4114_vm3, %v12309_v12 }
 0x337   : > { %8325 = vmatpush.xpose.msk.msrb.mxu1 %vm4114_vm3, %v12309_v12 }
 0x338   : > { %8369 = vmatpush.xpose.msk.msra.mxu2 %vm4114_vm3, %v12207_v53 }
 0x339   : > { %8379 = vmatpush.xpose.msk.msra.mxu3 %vm4114_vm3, %v12207_v53  ;;  %8316 = vmatmul.msk.f32.vlgmr.msrb.gmra.mxu0 %vm4114_vm3, %v12499_v32 }
 0x33a   : > { %8348 = vmatpush.xpose.msk.msra.mxu0 %vm4114_vm3, %v12188_v21  ;;  %8326 = vmatmul.msk.f32.vlgmr.msrb.gmra.mxu1 %vm4114_vm3, %v12507_v26 }
 0x33b   : > { %8358 = vmatpush.xpose.msk.msra.mxu1 %vm4114_vm3, %v12188_v21  ;;  %8337 = vmatmul.msk.f32.gmra.mxu2 %vm4114_vm3, %v12436_v37 }
 0x33c   : > { %8370 = vmatpush.xpose.msk.msra.mxu2 %vm4114_vm3, %v12222_v34  ;;  %8347 = vmatmul.msk.f32.gmra.mxu3 %vm4114_vm3, %v12439_v16 }
 0x33d   : > { %8380 = vmatpush.xpose.msk.msra.mxu3 %vm4114_vm3, %v12222_v34 }
 0x33e   : > { %8349 = vmatpush.xpose.msk.msra.mxu0 %vm4114_vm3, %v12207_v53 }
 0x33f   : > { %8359 = vmatpush.xpose.msk.msra.mxu1 %vm4114_vm3, %v12207_v53 }
 0x340   : > { %8371 = vmatpush.xpose.msk.msra.mxu2 %vm4114_vm3, %v12237_v0 }
 0x341   : > { %8381 = vmatpush.xpose.msk.msra.mxu3 %vm4114_vm3, %v12237_v0  ;;  %8317 = vmatmul.msk.f32.gmra.mxu0 %vm4114_vm3, %v12476_v35 }
 0x342   : > { %8350 = vmatpush.xpose.msk.msra.mxu0 %vm4114_vm3, %v12222_v34  ;;  %8327 = vmatmul.msk.f32.gmra.mxu1 %vm4114_vm3, %v12481_v62 }
 0x343   : > { %8360 = vmatpush.xpose.msk.msra.mxu1 %vm4114_vm3, %v12222_v34 }
 0x344   : > { %8372 = vmatpush.xpose.msk.msra.mxu2 %vm4114_vm3, %v12258_v11 }
 0x345   : > { %8382 = vmatpush.xpose.msk.msra.mxu3 %vm4114_vm3, %v12258_v11 }
 0x346   : > { %8351 = vmatpush.xpose.msk.msra.mxu0 %vm4114_vm3, %v12237_v0 }
 0x347   : > { %8361 = vmatpush.xpose.msk.msra.mxu1 %vm4114_vm3, %v12237_v0 }
 0x348   : > { %8373 = vmatpush.xpose.msk.msra.mxu2 %vm4114_vm3, %v12272_v9 }
 0x349   : > { %8383 = vmatpush.xpose.msk.msra.mxu3 %vm4114_vm3, %v12272_v9 }
 0x34a   : > { %8352 = vmatpush.xpose.msk.msra.mxu0 %vm4114_vm3, %v12258_v11 }
 0x34b   : > { %8362 = vmatpush.xpose.msk.msra.mxu1 %vm4114_vm3, %v12258_v11 }
 0x34c   : > { %8374 = vmatpush.xpose.msk.msra.mxu2 %vm4114_vm3, %v12295_v36 }
 0x34d   : > { %8384 = vmatpush.xpose.msk.msra.mxu3 %vm4114_vm3, %v12295_v36 }
 0x34e   : > { %8353 = vmatpush.xpose.msk.msra.mxu0 %vm4114_vm3, %v12272_v9 }
 0x34f   : > { %8363 = vmatpush.xpose.msk.msra.mxu1 %vm4114_vm3, %v12272_v9 }
 0x350   : > { %8375 = vmatpush.xpose.msk.msra.mxu2 %vm4114_vm3, %v12309_v12 }
 0x351   : > { %8385 = vmatpush.xpose.msk.msra.mxu3 %vm4114_vm3, %v12309_v12 }
 0x352   : > { %8354 = vmatpush.xpose.msk.msra.mxu0 %vm4114_vm3, %v12295_v36 }
 0x353   : > { %8376 = vmatmul.msk.f32.vlgmr.msra.gmra.mxu2 %vm4114_vm3, %v12572_v25  ;;  %8364 = vmatpush.xpose.msk.msra.mxu1 %vm4114_vm3, %v12295_v36 }
 0x354   : > { %8408 = vmatpush.xpose.msk.msrb.mxu2 %vm4114_vm3, %v12553_v2  ;;  %8386 = vmatmul.msk.f32.vlgmr.msra.gmra.mxu3 %vm4114_vm3, %v12580_v41 }
 0x355   : > { %8418 = vmatpush.xpose.msk.msrb.mxu3 %vm4114_vm3, %v12553_v2 }
 0x356   : > { %8355 = vmatpush.xpose.msk.msra.mxu0 %vm4114_vm3, %v12309_v12 }
 0x357   : > { %8365 = vmatpush.xpose.msk.msra.mxu1 %vm4114_vm3, %v12309_v12 }
 0x358   : > { %8409 = vmatpush.xpose.msk.msrb.mxu2 %vm4114_vm3, %v12585_v19 }
 0x359   : > { %8419 = vmatpush.xpose.msk.msrb.mxu3 %vm4114_vm3, %v12585_v19  ;;  %8356 = vmatmul.msk.f32.vlgmr.msra.gmra.mxu0 %vm4114_vm3, %v12631_v56 }
 0x35a   : > { %8388 = vmatpush.xpose.msk.msrb.mxu0 %vm4114_vm3, %v12188_v21  ;;  %8366 = vmatmul.msk.f32.vlgmr.msra.gmra.mxu1 %vm4114_vm3, %v12639_v45 }
 0x35b   : > { %8398 = vmatpush.xpose.msk.msrb.mxu1 %vm4114_vm3, %v12188_v21  ;;  %8377 = vmatmul.msk.f32.gmra.mxu2 %vm4114_vm3, %v12548_v46  ;;  %v12682_v21 = vld [vmem:[%s15222_s5 + $0x1c8] sm:$0xff] }
 0x35c   : > { %8410 = vmatpush.xpose.msk.msrb.mxu2 %vm4114_vm3, %v12600_v55  ;;  %8387 = vmatmul.msk.f32.gmra.mxu3 %vm4114_vm3, %v12556_v15 }
 0x35d   : > { %8420 = vmatpush.xpose.msk.msrb.mxu3 %vm4114_vm3, %v12600_v55 }
 0x35e   : > { %8389 = vmatpush.xpose.msk.msrb.mxu0 %vm4114_vm3, %v12207_v53 }
 0x35f   : > { %8399 = vmatpush.xpose.msk.msrb.mxu1 %vm4114_vm3, %v12207_v53  ;;  %v12695_v53 = vld [vmem:[%s15222_s5 + $0x1c0] sm:$0xff] }
 0x360   : > { %8411 = vmatpush.xpose.msk.msrb.mxu2 %vm4114_vm3, %v12623_v57 }
 0x361   : > { %8421 = vmatpush.xpose.msk.msrb.mxu3 %vm4114_vm3, %v12623_v57  ;;  %8357 = vmatmul.msk.f32.gmra.mxu0 %vm4114_vm3, %v12603_v5 }
 0x362   : > { %8390 = vmatpush.xpose.msk.msrb.mxu0 %vm4114_vm3, %v12222_v34  ;;  %8367 = vmatmul.msk.f32.gmra.mxu1 %vm4114_vm3, %v12608_v48 }
 0x363   : > { %8400 = vmatpush.xpose.msk.msrb.mxu1 %vm4114_vm3, %v12222_v34  ;;  %v12724_v34 = vrot.slane %v12017_v51, 2  ;;  %v15790_v51 = vld [vmem:[#allocation120_spill] sm:$0xff] }
 0x364   : > { %8412 = vmatpush.xpose.msk.msrb.mxu2 %vm4114_vm3, %v12652_v63 }
 0x365   : > { %8422 = vmatpush.xpose.msk.msrb.mxu3 %vm4114_vm3, %v12652_v63 }
 0x366   : > { %8391 = vmatpush.xpose.msk.msrb.mxu0 %vm4114_vm3, %v12237_v0 }
 0x367   : > { %8401 = vmatpush.xpose.msk.msrb.mxu1 %vm4114_vm3, %v12237_v0  ;;  %v12729_v0 = vrot.slane %v12413_v52, 2 }
 0x368   : > { %8413 = vmatpush.xpose.msk.msrb.mxu2 %vm4114_vm3, %v12665_v43 }
 0x369   : > { %8423 = vmatpush.xpose.msk.msrb.mxu3 %vm4114_vm3, %v12665_v43 }
 0x36a   : > { %8392 = vmatpush.xpose.msk.msrb.mxu0 %vm4114_vm3, %v12258_v11 }
 0x36b   : > { %8402 = vmatpush.xpose.msk.msrb.mxu1 %vm4114_vm3, %v12258_v11  ;;  %v5192_v11 = vrot.slane %v12021_v10, 2  ;;  %v15791_v10 = vld [vmem:[#allocation44_spill] sm:$0xff] }
 0x36c   : > { %8414 = vmatpush.xpose.msk.msrb.mxu2 %vm4114_vm3, %v12682_v21 }
 0x36d   : > { %8424 = vmatpush.xpose.msk.msrb.mxu3 %vm4114_vm3, %v12682_v21 }
 0x36e   : > { %8393 = vmatpush.xpose.msk.msrb.mxu0 %vm4114_vm3, %v12272_v9 }
 0x36f   : > { %8403 = vmatpush.xpose.msk.msrb.mxu1 %vm4114_vm3, %v12272_v9  ;;  %v5222_v9 = vrot.slane %v12383_v20, 2 }
 0x370   : > { %8415 = vmatpush.xpose.msk.msrb.mxu2 %vm4114_vm3, %v12695_v53 }
 0x371   : > { %8425 = vmatpush.xpose.msk.msrb.mxu3 %vm4114_vm3, %v12695_v53 }
 0x372   : > { %8394 = vmatpush.xpose.msk.msrb.mxu0 %vm4114_vm3, %v12295_v36 }
 0x373   : > { %8416 = vmatmul.msk.f32.vlgmr.msrb.gmra.mxu2 %vm4114_vm3, %v11837_v40  ;;  %8404 = vmatpush.xpose.msk.msrb.mxu1 %vm4114_vm3, %v12295_v36  ;;  %v12747_v36 = vsel %vm1400_vm2, %v5192_v11, %v12724_v34  ;;  %v3827_v11 = vpop.f32.mrf.mxu1  ;;  %v15789_v40 = vld [vmem:[#allocation42_spill] sm:$0xff] }
 0x374   : > { %8448 = vmatpush.xpose.msk.msra.mxu2 %vm4114_vm3, %v12553_v2  ;;  %8426 = vmatmul.msk.f32.vlgmr.msrb.gmra.mxu3 %vm4114_vm3, %v11843_v49  ;;  %v15784_v49 = vld [vmem:[#allocation88_spill] sm:$0xff] }
 0x375   : > { %8458 = vmatpush.xpose.msk.msra.mxu3 %vm4114_vm3, %v12553_v2 }
 0x376   : > { %8395 = vmatpush.xpose.msk.msrb.mxu0 %vm4114_vm3, %v12309_v12 }
 0x377   : > { %8405 = vmatpush.xpose.msk.msrb.mxu1 %vm4114_vm3, %v12309_v12  ;;  %v12755_v12 = vsel %vm1400_vm2, %v5222_v9, %v12729_v0  ;;  %v12878_v9 = vld [vmem:[%s15222_s5 + $0x238] sm:$0xff] }
 0x378   : > { %8449 = vmatpush.xpose.msk.msra.mxu2 %vm4114_vm3, %v12585_v19 }
 0x379   : > { %8459 = vmatpush.xpose.msk.msra.mxu3 %vm4114_vm3, %v12585_v19  ;;  %8396 = vmatmul.msk.f32.vlgmr.msrb.gmra.mxu0 %vm4114_vm3, %v12747_v36 }
 0x37a   : > { %8428 = vmatpush.xpose.msk.msra.mxu0 %vm4114_vm3, %v12553_v2  ;;  %8406 = vmatmul.msk.f32.vlgmr.msrb.gmra.mxu1 %vm4114_vm3, %v12755_v12 }
 0x37b   : > { %8438 = vmatpush.xpose.msk.msra.mxu1 %vm4114_vm3, %v12553_v2  ;;  %8417 = vmatmul.msk.f32.gmra.mxu2 %vm4114_vm3, %v11820_v18 }
 0x37c   : > { %8450 = vmatpush.xpose.msk.msra.mxu2 %vm4114_vm3, %v12600_v55  ;;  %8427 = vmatmul.msk.f32.gmra.mxu3 %vm4114_vm3, %v11832_v30  ;;  %v12928_v30 = vld [vmem:[%s15222_s5 + $0x220] sm:$0xff] }
 0x37d   : > { %8460 = vmatpush.xpose.msk.msra.mxu3 %vm4114_vm3, %v12600_v55 }
 0x37e   : > { %8429 = vmatpush.xpose.msk.msra.mxu0 %vm4114_vm3, %v12585_v19 }
 0x37f   : > { %8439 = vmatpush.xpose.msk.msra.mxu1 %vm4114_vm3, %v12585_v19 }
 0x380   : > { %8451 = vmatpush.xpose.msk.msra.mxu2 %vm4114_vm3, %v12623_v57 }
 0x381   : > { %8461 = vmatpush.xpose.msk.msra.mxu3 %vm4114_vm3, %v12623_v57  ;;  %8397 = vmatmul.msk.f32.gmra.mxu0 %vm4114_vm3, %v12724_v34 }
 0x382   : > { %8430 = vmatpush.xpose.msk.msra.mxu0 %vm4114_vm3, %v12600_v55  ;;  %8407 = vmatmul.msk.f32.gmra.mxu1 %vm4114_vm3, %v12729_v0 }
 0x383   : > { %8440 = vmatpush.xpose.msk.msra.mxu1 %vm4114_vm3, %v12600_v55 }
 0x384   : > { %8452 = vmatpush.xpose.msk.msra.mxu2 %vm4114_vm3, %v12652_v63 }
 0x385   : > { %8462 = vmatpush.xpose.msk.msra.mxu3 %vm4114_vm3, %v12652_v63 }
 0x386   : > { %8431 = vmatpush.xpose.msk.msra.mxu0 %vm4114_vm3, %v12623_v57 }
 0x387   : > { %8441 = vmatpush.xpose.msk.msra.mxu1 %vm4114_vm3, %v12623_v57 }
 0x388   : > { %8453 = vmatpush.xpose.msk.msra.mxu2 %vm4114_vm3, %v12665_v43 }
 0x389   : > { %8463 = vmatpush.xpose.msk.msra.mxu3 %vm4114_vm3, %v12665_v43 }
 0x38a   : > { %8432 = vmatpush.xpose.msk.msra.mxu0 %vm4114_vm3, %v12652_v63 }
 0x38b   : > { %8442 = vmatpush.xpose.msk.msra.mxu1 %vm4114_vm3, %v12652_v63 }
 0x38c   : > { %8454 = vmatpush.xpose.msk.msra.mxu2 %vm4114_vm3, %v12682_v21 }
 0x38d   : > { %8464 = vmatpush.xpose.msk.msra.mxu3 %vm4114_vm3, %v12682_v21 }
 0x38e   : > { %8433 = vmatpush.xpose.msk.msra.mxu0 %vm4114_vm3, %v12665_v43 }
 0x38f   : > { %8443 = vmatpush.xpose.msk.msra.mxu1 %vm4114_vm3, %v12665_v43 }
 0x390   : > { %8455 = vmatpush.xpose.msk.msra.mxu2 %vm4114_vm3, %v12695_v53 }
 0x391   : > { %8465 = vmatpush.xpose.msk.msra.mxu3 %vm4114_vm3, %v12695_v53 }
 0x392   : > { %8434 = vmatpush.xpose.msk.msra.mxu0 %vm4114_vm3, %v12682_v21 }
 0x393   : > { %8456 = vmatmul.msk.f32.vlgmr.msra.gmra.mxu2 %vm4114_vm3, %v11953_v7  ;;  %8444 = vmatpush.xpose.msk.msra.mxu1 %vm4114_vm3, %v12682_v21 }
 0x394   : > { %8488 = vmatpush.xpose.msk.msrb.mxu2 %vm4114_vm3, %v12553_v2  ;;  %8466 = vmatmul.msk.f32.vlgmr.msra.gmra.mxu3 %vm4114_vm3, %v11968_v47  ;;  %v12912_v47 = vld [vmem:[%s15222_s5 + $0x228] sm:$0xff] }
 0x395   : > { %8498 = vmatpush.xpose.msk.msrb.mxu3 %vm4114_vm3, %v12553_v2 }
 0x396   : > { %8435 = vmatpush.xpose.msk.msra.mxu0 %vm4114_vm3, %v12695_v53 }
 0x397   : > { %8445 = vmatpush.xpose.msk.msra.mxu1 %vm4114_vm3, %v12695_v53 }
 0x398   : > { %8489 = vmatpush.xpose.msk.msrb.mxu2 %vm4114_vm3, %v12585_v19 }
 0x399   : > { %8499 = vmatpush.xpose.msk.msrb.mxu3 %vm4114_vm3, %v12585_v19  ;;  %8436 = vmatmul.msk.f32.vlgmr.msra.gmra.mxu0 %vm4114_vm3, %v11675_v17  ;;  %v15783_v17 = vld [vmem:[#allocation41_spill] sm:$0xff] }
 0x39a   : > { %8468 = vmatpush.xpose.msk.msrb.mxu0 %vm4114_vm3, %v12553_v2  ;;  %8446 = vmatmul.msk.f32.vlgmr.msra.gmra.mxu1 %vm4114_vm3, %v11679_v39  ;;  %v15788_v39 = vld [vmem:[#allocation125_spill] sm:$0xff] }
 0x39b   : > { %8478 = vmatpush.xpose.msk.msrb.mxu1 %vm4114_vm3, %v12553_v2  ;;  %8457 = vmatmul.msk.f32.gmra.mxu2 %vm4114_vm3, %v11935_v44  ;;  %v15785_v44 = vld [vmem:[#allocation162_spill] sm:$0xff]  ;;  %v3828_v18 = vadd.f32 %v3827_v11, %v15788_v39  ;;  %v15797_v39 = vld [vmem:[#allocation25_spill] sm:$0xff] }
 0x39c   : > { %8490 = vmatpush.xpose.msk.msrb.mxu2 %vm4114_vm3, %v12600_v55  ;;  %8467 = vmatmul.msk.f32.gmra.mxu3 %vm4114_vm3, %v11943_v24  ;;  %v12897_v24 = vld [vmem:[%s15222_s5 + $0x230] sm:$0xff] }
 0x39d   : > { %8500 = vmatpush.xpose.msk.msrb.mxu3 %vm4114_vm3, %v12600_v55 }
 0x39e   : > { %8469 = vmatpush.xpose.msk.msrb.mxu0 %vm4114_vm3, %v12585_v19 }
 0x39f   : > { %8479 = vmatpush.xpose.msk.msrb.mxu1 %vm4114_vm3, %v12585_v19 }
 0x3a0   : > { %8491 = vmatpush.xpose.msk.msrb.mxu2 %vm4114_vm3, %v12623_v57 }
 0x3a1   : > { %8501 = vmatpush.xpose.msk.msrb.mxu3 %vm4114_vm3, %v12623_v57  ;;  %8437 = vmatmul.msk.f32.gmra.mxu0 %vm4114_vm3, %v11657_v23 }
 0x3a2   : > { %8470 = vmatpush.xpose.msk.msrb.mxu0 %vm4114_vm3, %v12600_v55  ;;  %8447 = vmatmul.msk.f32.gmra.mxu1 %vm4114_vm3, %v11660_v33  ;;  %v15787_v33 = vld [vmem:[#allocation74_spill] sm:$0xff] }
 0x3a3   : > { %8480 = vmatpush.xpose.msk.msrb.mxu1 %vm4114_vm3, %v12600_v55 }
 0x3a4   : > { %8492 = vmatpush.xpose.msk.msrb.mxu2 %vm4114_vm3, %v12652_v63 }
 0x3a5   : > { %8502 = vmatpush.xpose.msk.msrb.mxu3 %vm4114_vm3, %v12652_v63 }
 0x3a6   : > { %8471 = vmatpush.xpose.msk.msrb.mxu0 %vm4114_vm3, %v12623_v57 }
 0x3a7   : > { %8481 = vmatpush.xpose.msk.msrb.mxu1 %vm4114_vm3, %v12623_v57 }
 0x3a8   : > { %8493 = vmatpush.xpose.msk.msrb.mxu2 %vm4114_vm3, %v12665_v43 }
 0x3a9   : > { %8503 = vmatpush.xpose.msk.msrb.mxu3 %vm4114_vm3, %v12665_v43 }
 0x3aa   : > { %8472 = vmatpush.xpose.msk.msrb.mxu0 %vm4114_vm3, %v12652_v63 }
 0x3ab   : > { %8482 = vmatpush.xpose.msk.msrb.mxu1 %vm4114_vm3, %v12652_v63 }
 0x3ac   : > { %8494 = vmatpush.xpose.msk.msrb.mxu2 %vm4114_vm3, %v12682_v21 }
 0x3ad   : > { %8504 = vmatpush.xpose.msk.msrb.mxu3 %vm4114_vm3, %v12682_v21 }
 0x3ae   : > { %8473 = vmatpush.xpose.msk.msrb.mxu0 %vm4114_vm3, %v12665_v43 }
 0x3af   : > { %8483 = vmatpush.xpose.msk.msrb.mxu1 %vm4114_vm3, %v12665_v43 }
 0x3b0   : > { %8495 = vmatpush.xpose.msk.msrb.mxu2 %vm4114_vm3, %v12695_v53 }
 0x3b1   : > { %8505 = vmatpush.xpose.msk.msrb.mxu3 %vm4114_vm3, %v12695_v53 }
 0x3b2   : > { %8474 = vmatpush.xpose.msk.msrb.mxu0 %vm4114_vm3, %v12682_v21 }
 0x3b3   : > { %8496 = vmatmul.msk.f32.vlgmr.msrb.gmra.mxu2 %vm4114_vm3, %v12049_v60  ;;  %8484 = vmatpush.xpose.msk.msrb.mxu1 %vm4114_vm3, %v12682_v21  ;;  %v3830_v60 = vpop.f32.mrf.mxu1 }
 0x3b4   : > { %8528 = vmatpush.xpose.msk.msra.mxu2 %vm4114_vm3, %v12878_v9  ;;  %8506 = vmatmul.msk.f32.vlgmr.msrb.gmra.mxu3 %vm4114_vm3, %v12057_v3  ;;  %v15782_v3 = vld [vmem:[#allocation128_spill] sm:$0xff] }
 0x3b5   : > { %8538 = vmatpush.xpose.msk.msra.mxu3 %vm4114_vm3, %v12878_v9  ;;  %v3831_v23 = vadd.f32 %v3830_v60, %v15782_v3  ;;  %v3171_v60 = vadd.f32 %v15785_v44, %v15784_v49  ;;  %v15786_v3 = vld [vmem:[#allocation102_spill] sm:$0xff]  ;;  %v15794_v49 = vld [vmem:[#allocation84_spill] sm:$0xff] }
 0x3b6   : > { %8475 = vmatpush.xpose.msk.msrb.mxu0 %vm4114_vm3, %v12695_v53  ;;  %v3499_v7 = vadd.f32 %v15787_v33, %v15786_v3  ;;  %v15795_v44 = vld [vmem:[#allocation156_spill] sm:$0xff]  ;;  %v15796_v3 = vld [vmem:[#allocation98_spill] sm:$0xff] }
 0x3b7   : > { %8485 = vmatpush.xpose.msk.msrb.mxu1 %vm4114_vm3, %v12695_v53  ;;  %v3168_v33 = vadd.f32 %v15795_v44, %v15794_v49  ;;  %v3496_v11 = vadd.f32 %v15797_v39, %v15796_v3  ;;  %v15799_v49 = vld [vmem:[#allocation40_spill] sm:$0xff]  ;;  %v15800_v44 = vld [vmem:[#allocation15_spill] sm:$0xff]  ;;  %v12968_v39 = vpop.f32.mrf.mxu3 }
 0x3b8   : > { %8529 = vmatpush.xpose.msk.msra.mxu2 %vm4114_vm3, %v12897_v24  ;;  %v2833_v3 = vadd.f32 %v15800_v44, %v15799_v49  ;;  %15801 = vst [vmem:[#allocation48_spill] sm:$0xff] %v12968_v39 }
 0x3b9   : > { %8539 = vmatpush.xpose.msk.msra.mxu3 %vm4114_vm3, %v12897_v24  ;;  %8476 = vmatmul.msk.f32.vlgmr.msrb.gmra.mxu0 %vm4114_vm3, %v15790_v51 }
 0x3ba   : > { %8508 = vmatpush.xpose.msk.msra.mxu0 %vm4114_vm3, %v12553_v2  ;;  %8486 = vmatmul.msk.f32.vlgmr.msrb.gmra.mxu1 %vm4114_vm3, %v15793_v8 }
 0x3bb   : > { %8518 = vmatpush.xpose.msk.msra.mxu1 %vm4114_vm3, %v12553_v2  ;;  %8497 = vmatmul.msk.f32.gmra.mxu2 %vm4114_vm3, %v15783_v17  ;;  %v2836_v2 = vadd.f32 %v15792_v4, %v15791_v10  ;;  %v3888_v17 = vadd.f32 %v3831_v23, %v3499_v7  ;;  %v12960_v4 = vld [vmem:[%s15222_s5 + $0x218] sm:$0xff]  ;;  %v12962_v10 = vpop.f32.mrf.mxu2  ;;  %v3887_v7 = vadd.f32 %v3828_v18, %v3496_v11 }
 0x3bc   : > { %8530 = vmatpush.xpose.msk.msra.mxu2 %vm4114_vm3, %v12912_v47  ;;  %8507 = vmatmul.msk.f32.gmra.mxu3 %vm4114_vm3, %v15789_v40  ;;  %15798 = vst [vmem:[#allocation36_spill] sm:$0xff] %v12962_v10  ;;  %v3859_v40 = vadd.f32 %v3168_v33, %v2833_v3 }
 0x3bd   : > { %8540 = vmatpush.xpose.msk.msra.mxu3 %vm4114_vm3, %v12912_v47  ;;  %v3860_v23 = vadd.f32 %v3171_v60, %v2836_v2  ;;  %v15802_v60 = vld [vmem:[#allocation23_spill] sm:$0xff]  ;;  %v15803_v2 = vld [vmem:[#allocation24_spill] sm:$0xff] }
 0x3be   : > { %8509 = vmatpush.xpose.msk.msra.mxu0 %vm4114_vm3, %v12585_v19  ;;  %v3915_v18 = vadd.f32 %v3887_v7, %v3859_v40  ;;  %v12997_v40 = vld [vmem:[%s15222_s5 + $0x208] sm:$0xff] }
 0x3bf   : > { %8519 = vmatpush.xpose.msk.msra.mxu1 %vm4114_vm3, %v12585_v19  ;;  %v3916_v51 = vadd.f32 %v3888_v17, %v3860_v23  ;;  %v12979_v19 = vld [vmem:[%s15222_s5 + $0x210] sm:$0xff]  ;;  %v15804_v17 = vld [vmem:[#allocation142_spill] sm:$0xff]  ;;  %v13007_v44 = vpop.f32.mrf.mxu3 }
 0x3c0   : > { %8531 = vmatpush.xpose.msk.msra.mxu2 %vm4114_vm3, %v12928_v30 }
 0x3c1   : > { %8541 = vmatpush.xpose.msk.msra.mxu3 %vm4114_vm3, %v12928_v30  ;;  %8477 = vmatmul.msk.f32.gmra.mxu0 %vm4114_vm3, %v15802_v60  ;;  %v3944_v33 = vadd.f32 %v3916_v51, %v15804_v17 }
 0x3c2   : > { %8510 = vmatpush.xpose.msk.msra.mxu0 %vm4114_vm3, %v12600_v55  ;;  %8487 = vmatmul.msk.f32.gmra.mxu1 %vm4114_vm3, %v15803_v2 }
 0x3c3   : > { %8520 = vmatpush.xpose.msk.msra.mxu1 %vm4114_vm3, %v12600_v55  ;;  %v15805_v55 = vld [vmem:[#allocation138_spill] sm:$0xff]  ;;  %v13002_v49 = vpop.f32.mrf.mxu2  ;;  %v3975_v51 = vmul.f32 %v12353_v31, %v3944_v33 }
 0x3c4   : > { %8532 = vmatpush.xpose.msk.msra.mxu2 %vm4114_vm3, %v12960_v4  ;;  %v3943_v11 = vadd.f32 %v3915_v18, %v15805_v55  ;;  %v13056_v18 = vrot.slane %v12413_v52, 1 }
 0x3c5   : > { %8542 = vmatpush.xpose.msk.msra.mxu3 %vm4114_vm3, %v12960_v4  ;;  %v4006_v23 = vadd.f32 %v12369_v1, %v3975_v51 }
 0x3c6   : > { %8511 = vmatpush.xpose.msk.msra.mxu0 %vm4114_vm3, %v12623_v57  ;;  %v3974_v3 = vmul.f32 %v12353_v31, %v3943_v11  ;;  %15808 = vst [vmem:[#allocation69_spill] sm:$0xff] %v13056_v18 }
 0x3c7   : > { %8521 = vmatpush.xpose.msk.msra.mxu1 %vm4114_vm3, %v12623_v57  ;;  %v13016_v57 = vld [vmem:[%s15222_s5 + $0x200] sm:$0xff]  ;;  %v13039_v31 = vmax.f32 %v4006_v23, 0.0  ;;  %v13051_v7 = vpop.f32.mrf.mxu3  ;;  %v13107_v23 = vpop.f32.mrf.mxu1 }
 0x3c8   : > { %8533 = vmatpush.xpose.msk.msra.mxu2 %vm4114_vm3, %v12979_v19  ;;  %15811 = vst [vmem:[#allocation157_spill] sm:$0xff] %v13107_v23 }
 0x3c9   : > { %8543 = vmatpush.xpose.msk.msra.mxu3 %vm4114_vm3, %v12979_v19  ;;  %15806 = vst [vmem:[#allocation126_spill] sm:$0xff] %v13039_v31  ;;  %v5539_v17 = vrot.slane %v13039_v31, 1 }
 0x3ca   : > { %8512 = vmatpush.xpose.msk.msra.mxu0 %vm4114_vm3, %v12652_v63 }
 0x3cb   : > { %8522 = vmatpush.xpose.msk.msra.mxu1 %vm4114_vm3, %v12652_v63  ;;  %v4005_v63 = vadd.f32 %v12369_v1, %v3974_v3  ;;  %v13103_v3 = vpop.f32.mrf.mxu0 }
 0x3cc   : > { %8534 = vmatpush.xpose.msk.msra.mxu2 %vm4114_vm3, %v12997_v40  ;;  %15810 = vst [vmem:[#allocation90_spill] sm:$0xff] %v13103_v3 }
 0x3cd   : > { %8544 = vmatpush.xpose.msk.msra.mxu3 %vm4114_vm3, %v12997_v40  ;;  %v13049_v1 = vmax.f32 %v4005_v63, 0.0 }
 0x3ce   : > { %8513 = vmatpush.xpose.msk.msra.mxu0 %vm4114_vm3, %v12665_v43 }
 0x3cf   : > { %8523 = vmatpush.xpose.msk.msra.mxu1 %vm4114_vm3, %v12665_v43  ;;  %v13043_v43 = vpop.f32.mrf.mxu2  ;;  %15807 = vst [vmem:[#allocation79_spill] sm:$0xff] %v13049_v1  ;;  %v5538_v33 = vrot.slane %v13049_v1, 1  ;;  %v13095_v51 = vpop.f32.mrf.mxu3 }
 0x3d0   : > { %8535 = vmatpush.xpose.msk.msra.mxu2 %vm4114_vm3, %v13016_v57 }
 0x3d1   : > { %8545 = vmatpush.xpose.msk.msra.mxu3 %vm4114_vm3, %v13016_v57  ;;  %v5540_v55 = vsel %vm560_vm1, %v5538_v33, %v5539_v17  ;;  %v13136_v33 = vpop.f32.mrf.mxu1 }
 0x3d2   : > { %8514 = vmatpush.xpose.msk.msra.mxu0 %vm4114_vm3, %v12682_v21  ;;  %15815 = vst [vmem:[#allocation153_spill] sm:$0xff] %v13136_v33 }
 0x3d3   : > { %8536 = vmatmul.msk.f32.vlgmr.msra.gmra.mxu2 %vm4114_vm3, %v12348_v14  ;;  %8524 = vmatpush.xpose.msk.msra.mxu1 %vm4114_vm3, %v12682_v21  ;;  %v5506_v21 = vrot.slane %v12383_v20, 1 }
 0x3d4   : > { %8568 = vmatpush.xpose.msk.msrb.mxu2 %vm4114_vm3, %v12878_v9  ;;  %8546 = vmatmul.msk.f32.vlgmr.msra.gmra.mxu3 %vm4114_vm3, %v12499_v32 }
 0x3d5   : > { %8578 = vmatpush.xpose.msk.msrb.mxu3 %vm4114_vm3, %v12878_v9 }
 0x3d6   : > { %8515 = vmatpush.xpose.msk.msra.mxu0 %vm4114_vm3, %v12695_v53 }
 0x3d7   : > { %8525 = vmatpush.xpose.msk.msra.mxu1 %vm4114_vm3, %v12695_v53  ;;  %v13077_v53 = vsel %vm560_vm1, %v5506_v21, %v13056_v18  ;;  %v13091_v11 = vpop.f32.mrf.mxu2  ;;  %v13124_v21 = vpop.f32.mrf.mxu3 }
 0x3d8   : > { %8569 = vmatpush.xpose.msk.msrb.mxu2 %vm4114_vm3, %v12897_v24  ;;  %15809 = vst [vmem:[#allocation89_spill] sm:$0xff] %v13077_v53 }
 0x3d9   : > { %8579 = vmatpush.xpose.msk.msrb.mxu3 %vm4114_vm3, %v12897_v24  ;;  %8516 = vmatmul.msk.f32.vlgmr.msra.gmra.mxu0 %vm4114_vm3, %v13077_v53  ;;  %15813 = vst [vmem:[#allocation119_spill] sm:$0xff] %v13124_v21  ;;  %v13172_v39 = vpop.f32.mrf.mxu1 }
 0x3da   : > { %8548 = vmatpush.xpose.msk.msrb.mxu0 %vm4114_vm3, %v12878_v9  ;;  %8526 = vmatmul.msk.f32.vlgmr.msra.gmra.mxu1 %vm4114_vm3, %v5540_v55  ;;  %15819 = vst [vmem:[#allocation92_spill] sm:$0xff] %v13172_v39  ;;  %v13281_v39 = vld [vmem:[%s15222_s5 + $0x28] sm:$0xff] }
 0x3db   : > { %8558 = vmatpush.xpose.msk.msrb.mxu1 %vm4114_vm3, %v12878_v9  ;;  %8537 = vmatmul.msk.f32.gmra.mxu2 %vm4114_vm3, %v12321_v58 }
 0x3dc   : > { %8570 = vmatpush.xpose.msk.msrb.mxu2 %vm4114_vm3, %v12912_v47  ;;  %8547 = vmatmul.msk.f32.gmra.mxu3 %vm4114_vm3, %v12476_v35 }
 0x3dd   : > { %8580 = vmatpush.xpose.msk.msrb.mxu3 %vm4114_vm3, %v12912_v47 }
 0x3de   : > { %8549 = vmatpush.xpose.msk.msrb.mxu0 %vm4114_vm3, %v12897_v24 }
 0x3df   : > { %8559 = vmatpush.xpose.msk.msrb.mxu1 %vm4114_vm3, %v12897_v24  ;;  %v13120_v63 = vpop.f32.mrf.mxu2  ;;  %v13160_v23 = vpop.f32.mrf.mxu3 }
 0x3e0   : > { %8571 = vmatpush.xpose.msk.msrb.mxu2 %vm4114_vm3, %v12928_v30  ;;  %15812 = vst [vmem:[#allocation14_spill] sm:$0xff] %v13120_v63  ;;  %v13300_v63 = vld [vmem:[%s15222_s5 + $0x20] sm:$0xff] }
 0x3e1   : > { %8581 = vmatpush.xpose.msk.msrb.mxu3 %vm4114_vm3, %v12928_v30  ;;  %8517 = vmatmul.msk.f32.gmra.mxu0 %vm4114_vm3, %v13056_v18  ;;  %15817 = vst [vmem:[#allocation91_spill] sm:$0xff] %v13160_v23 }
 0x3e2   : > { %8550 = vmatpush.xpose.msk.msrb.mxu0 %vm4114_vm3, %v12912_v47  ;;  %8527 = vmatmul.msk.f32.gmra.mxu1 %vm4114_vm3, %v5539_v17  ;;  %v13132_v17 = vpop.f32.mrf.mxu0 }
 0x3e3   : > { %8560 = vmatpush.xpose.msk.msrb.mxu1 %vm4114_vm3, %v12912_v47  ;;  %15814 = vst [vmem:[#allocation80_spill] sm:$0xff] %v13132_v17  ;;  %v13342_v17 = vld [vmem:[%s15222_s5 + $0x10] sm:$0xff] }
 0x3e4   : > { %8572 = vmatpush.xpose.msk.msrb.mxu2 %vm4114_vm3, %v12960_v4 }
 0x3e5   : > { %8582 = vmatpush.xpose.msk.msrb.mxu3 %vm4114_vm3, %v12960_v4 }
 0x3e6   : > { %8551 = vmatpush.xpose.msk.msrb.mxu0 %vm4114_vm3, %v12928_v30 }
 0x3e7   : > { %8561 = vmatpush.xpose.msk.msrb.mxu1 %vm4114_vm3, %v12928_v30  ;;  %v13154_v55 = vpop.f32.mrf.mxu2  ;;  %v13192_v52 = vpop.f32.mrf.mxu3 }
 0x3e8   : > { %8573 = vmatpush.xpose.msk.msrb.mxu2 %vm4114_vm3, %v12979_v19  ;;  %15816 = vst [vmem:[#allocation160_spill] sm:$0xff] %v13154_v55 }
 0x3e9   : > { %8583 = vmatpush.xpose.msk.msrb.mxu3 %vm4114_vm3, %v12979_v19  ;;  %15821 = vst [vmem:[#allocation103_spill] sm:$0xff] %v13192_v52  ;;  %v13210_v52 = vpop.f32.mrf.mxu1 }
 0x3ea   : > { %8552 = vmatpush.xpose.msk.msrb.mxu0 %vm4114_vm3, %v12960_v4  ;;  %v13166_v3 = vpop.f32.mrf.mxu0  ;;  %15823 = vst [vmem:[#allocation93_spill] sm:$0xff] %v13210_v52 }
 0x3eb   : > { %8562 = vmatpush.xpose.msk.msrb.mxu1 %vm4114_vm3, %v12960_v4  ;;  %15818 = vst [vmem:[#allocation167_spill] sm:$0xff] %v13166_v3 }
 0x3ec   : > { %8574 = vmatpush.xpose.msk.msrb.mxu2 %vm4114_vm3, %v12997_v40 }
 0x3ed   : > { %8584 = vmatpush.xpose.msk.msrb.mxu3 %vm4114_vm3, %v12997_v40 }
 0x3ee   : > { %8553 = vmatpush.xpose.msk.msrb.mxu0 %vm4114_vm3, %v12979_v19 }
 0x3ef   : > { %8563 = vmatpush.xpose.msk.msrb.mxu1 %vm4114_vm3, %v12979_v19  ;;  %v13186_v10 = vpop.f32.mrf.mxu2  ;;  %v13226_v52 = vpop.f32.mrf.mxu3 }
 0x3f0   : > { %8575 = vmatpush.xpose.msk.msrb.mxu2 %vm4114_vm3, %v13016_v57  ;;  %15820 = vst [vmem:[#allocation168_spill] sm:$0xff] %v13186_v10 }
 0x3f1   : > { %8585 = vmatpush.xpose.msk.msrb.mxu3 %vm4114_vm3, %v13016_v57  ;;  %v13245_v55 = vpop.f32.mrf.mxu1 }
 0x3f2   : > { %8554 = vmatpush.xpose.msk.msrb.mxu0 %vm4114_vm3, %v12997_v40  ;;  %v13206_v10 = vpop.f32.mrf.mxu0  ;;  %15825 = vst [vmem:[#allocation163_spill] sm:$0xff] %v13245_v55  ;;  %v13266_v55 = vld [vmem:[%s15222_s5 + $0x30] sm:$0xff] }
 0x3f3   : > { %8576 = vmatmul.msk.f32.vlgmr.msrb.gmra.mxu2 %vm4114_vm3, %v12463_v6  ;;  %8564 = vmatpush.xpose.msk.msrb.mxu1 %vm4114_vm3, %v12997_v40  ;;  %15822 = vst [vmem:[#allocation104_spill] sm:$0xff] %v13206_v10  ;;  %v13239_v10 = vld [vmem:[%s15222_s5 + $0x38] sm:$0xff] }
 0x3f4   : > { %8608 = vmatpush.xpose.msk.msra.mxu2 %vm4114_vm3, %v12878_v9  ;;  %8586 = vmatmul.msk.f32.vlgmr.msrb.gmra.mxu3 %vm4114_vm3, %v12631_v56 }
 0x3f5   : > { %8618 = vmatpush.xpose.msk.msra.mxu3 %vm4114_vm3, %v12878_v9 }
 0x3f6   : > { %8555 = vmatpush.xpose.msk.msrb.mxu0 %vm4114_vm3, %v13016_v57 }
 0x3f7   : > { %8565 = vmatpush.xpose.msk.msrb.mxu1 %vm4114_vm3, %v13016_v57  ;;  %v13222_v20 = vpop.f32.mrf.mxu2 }
 0x3f8   : > { %8609 = vmatpush.xpose.msk.msra.mxu2 %vm4114_vm3, %v12897_v24 }
 0x3f9   : > { %8619 = vmatpush.xpose.msk.msra.mxu3 %vm4114_vm3, %v12897_v24  ;;  %8556 = vmatmul.msk.f32.vlgmr.msrb.gmra.mxu0 %vm4114_vm3, %v12507_v26  ;;  %v13291_v21 = vpop.f32.mrf.mxu1 }
 0x3fa   : > { %8588 = vmatpush.xpose.msk.msra.mxu0 %vm4114_vm3, %v12878_v9  ;;  %8566 = vmatmul.msk.f32.vlgmr.msrb.gmra.mxu1 %vm4114_vm3, %v12455_v42  ;;  %v13241_v23 = vpop.f32.mrf.mxu0  ;;  %15827 = vst [vmem:[#allocation130_spill] sm:$0xff] %v13291_v21 }
 0x3fb   : > { %8598 = vmatpush.xpose.msk.msra.mxu1 %vm4114_vm3, %v12878_v9  ;;  %8577 = vmatmul.msk.f32.gmra.mxu2 %vm4114_vm3, %v12439_v16  ;;  %15824 = vst [vmem:[#allocation129_spill] sm:$0xff] %v13241_v23  ;;  %v13257_v23 = vpop.f32.mrf.mxu3 }
 0x3fc   : > { %8610 = vmatpush.xpose.msk.msra.mxu2 %vm4114_vm3, %v12912_v47  ;;  %8587 = vmatmul.msk.f32.gmra.mxu3 %vm4114_vm3, %v12603_v5 }
 0x3fd   : > { %8620 = vmatpush.xpose.msk.msra.mxu3 %vm4114_vm3, %v12912_v47 }
 0x3fe   : > { %8589 = vmatpush.xpose.msk.msra.mxu0 %vm4114_vm3, %v12897_v24 }
 0x3ff   : > { %8599 = vmatpush.xpose.msk.msra.mxu1 %vm4114_vm3, %v12897_v24  ;;  %v13251_v18 = vpop.f32.mrf.mxu2 }
 0x400   : > { %8611 = vmatpush.xpose.msk.msra.mxu2 %vm4114_vm3, %v12928_v30 }
 0x401   : > { %8621 = vmatpush.xpose.msk.msra.mxu3 %vm4114_vm3, %v12928_v30  ;;  %8557 = vmatmul.msk.f32.gmra.mxu0 %vm4114_vm3, %v12481_v62  ;;  %v13333_v33 = vpop.f32.mrf.mxu1 }
 0x402   : > { %8590 = vmatpush.xpose.msk.msra.mxu0 %vm4114_vm3, %v12912_v47  ;;  %8567 = vmatmul.msk.f32.gmra.mxu1 %vm4114_vm3, %v12436_v37  ;;  %v13285_v3 = vpop.f32.mrf.mxu0  ;;  %15830 = vst [vmem:[#allocation51_spill] sm:$0xff] %v13333_v33  ;;  %v13376_v33 = vld [vmem:[%s15222_s5] sm:$0xff] }
 0x403   : > { %8600 = vmatpush.xpose.msk.msra.mxu1 %vm4114_vm3, %v12912_v47  ;;  %15826 = vst [vmem:[#allocation94_spill] sm:$0xff] %v13285_v3  ;;  %v13308_v21 = vpop.f32.mrf.mxu3 }
 0x404   : > { %8612 = vmatpush.xpose.msk.msra.mxu2 %vm4114_vm3, %v12960_v4  ;;  %15828 = vst [vmem:[#allocation122_spill] sm:$0xff] %v13308_v21 }
 0x405   : > { %8622 = vmatpush.xpose.msk.msra.mxu3 %vm4114_vm3, %v12960_v4 }
 0x406   : > { %8591 = vmatpush.xpose.msk.msra.mxu0 %vm4114_vm3, %v12928_v30 }
 0x407   : > { %8601 = vmatpush.xpose.msk.msra.mxu1 %vm4114_vm3, %v12928_v30  ;;  %v13302_v3 = vpop.f32.mrf.mxu2 }
 0x408   : > { %8613 = vmatpush.xpose.msk.msra.mxu2 %vm4114_vm3, %v12979_v19 }
 0x409   : > { %8623 = vmatpush.xpose.msk.msra.mxu3 %vm4114_vm3, %v12979_v19 }
 0x40a   : > { %8592 = vmatpush.xpose.msk.msra.mxu0 %vm4114_vm3, %v12960_v4  ;;  %v13329_v53 = vpop.f32.mrf.mxu0 }
 0x40b   : > { %8602 = vmatpush.xpose.msk.msra.mxu1 %vm4114_vm3, %v12960_v4  ;;  %15829 = vst [vmem:[#allocation123_spill] sm:$0xff] %v13329_v53 }
 0x40c   : > { %8614 = vmatpush.xpose.msk.msra.mxu2 %vm4114_vm3, %v12997_v40 }
 0x40d   : > { %8624 = vmatpush.xpose.msk.msra.mxu3 %vm4114_vm3, %v12997_v40 }
 0x40e   : > { %8593 = vmatpush.xpose.msk.msra.mxu0 %vm4114_vm3, %v12979_v19 }
 0x40f   : > { %8603 = vmatpush.xpose.msk.msra.mxu1 %vm4114_vm3, %v12979_v19  ;;  %v13344_v21 = vpop.f32.mrf.mxu2 }
 0x410   : > { %8615 = vmatpush.xpose.msk.msra.mxu2 %vm4114_vm3, %v13016_v57  ;;  %15831 = vst [vmem:[#allocation70_spill] sm:$0xff] %v13344_v21 }
 0x411   : > { %8625 = vmatpush.xpose.msk.msra.mxu3 %vm4114_vm3, %v13016_v57 }
 0x412   : > { %8594 = vmatpush.xpose.msk.msra.mxu0 %vm4114_vm3, %v12997_v40  ;;  %v13378_v53 = vpop.f32.mrf.mxu0 }
 0x413   : > { %8616 = vmatmul.msk.f32.vlgmr.msra.gmra.mxu2 %vm4114_vm3, %v12580_v41  ;;  %8604 = vmatpush.xpose.msk.msra.mxu1 %vm4114_vm3, %v12997_v40 }
 0x414   : > { %8648 = vmatpush.xpose.msk.msrb.mxu2 %vm4114_vm3, %v13239_v10  ;;  %8626 = vmatmul.msk.f32.vlgmr.msra.gmra.mxu3 %vm4114_vm3, %v12747_v36 }
 0x415   : > { %8658 = vmatpush.xpose.msk.msrb.mxu3 %vm4114_vm3, %v13239_v10 }
 0x416   : > { %8595 = vmatpush.xpose.msk.msra.mxu0 %vm4114_vm3, %v13016_v57 }
 0x417   : > { %8605 = vmatpush.xpose.msk.msra.mxu1 %vm4114_vm3, %v13016_v57 }
 0x418   : > { %8649 = vmatpush.xpose.msk.msrb.mxu2 %vm4114_vm3, %v13266_v55 }
 0x419   : > { %8659 = vmatpush.xpose.msk.msrb.mxu3 %vm4114_vm3, %v13266_v55  ;;  %8596 = vmatmul.msk.f32.vlgmr.msra.gmra.mxu0 %vm4114_vm3, %v12639_v45 }
 0x41a   : > { %8628 = vmatpush.xpose.msk.msrb.mxu0 %vm4114_vm3, %v12878_v9  ;;  %8606 = vmatmul.msk.f32.vlgmr.msra.gmra.mxu1 %vm4114_vm3, %v12572_v25 }
 0x41b   : > { %8638 = vmatpush.xpose.msk.msrb.mxu1 %vm4114_vm3, %v12878_v9  ;;  %8617 = vmatmul.msk.f32.gmra.mxu2 %vm4114_vm3, %v12556_v15  ;;  %v13325_v9 = vld [vmem:[%s15222_s5 + $0x18] sm:$0xff] }
 0x41c   : > { %8650 = vmatpush.xpose.msk.msrb.mxu2 %vm4114_vm3, %v13281_v39  ;;  %8627 = vmatmul.msk.f32.gmra.mxu3 %vm4114_vm3, %v12724_v34 }
 0x41d   : > { %8660 = vmatpush.xpose.msk.msrb.mxu3 %vm4114_vm3, %v13281_v39 }
 0x41e   : > { %8629 = vmatpush.xpose.msk.msrb.mxu0 %vm4114_vm3, %v12897_v24 }
 0x41f   : > { %8639 = vmatpush.xpose.msk.msrb.mxu1 %vm4114_vm3, %v12897_v24  ;;  %v13348_v24 = vpop.f32.mrf.mxu3 }
 0x420   : > { %8651 = vmatpush.xpose.msk.msrb.mxu2 %vm4114_vm3, %v13300_v63  ;;  %15832 = vst [vmem:[#allocation52_spill] sm:$0xff] %v13348_v24  ;;  %v13384_v24 = vpop.f32.mrf.mxu2 }
 0x421   : > { %8661 = vmatpush.xpose.msk.msrb.mxu3 %vm4114_vm3, %v13300_v63  ;;  %8597 = vmatmul.msk.f32.gmra.mxu0 %vm4114_vm3, %v12608_v48  ;;  %15834 = vst [vmem:[#allocation55_spill] sm:$0xff] %v13384_v24 }
 0x422   : > { %8630 = vmatpush.xpose.msk.msrb.mxu0 %vm4114_vm3, %v12912_v47  ;;  %8607 = vmatmul.msk.f32.gmra.mxu1 %vm4114_vm3, %v12548_v46 }
 0x423   : > { %8640 = vmatpush.xpose.msk.msrb.mxu1 %vm4114_vm3, %v12912_v47  ;;  %v13363_v47 = vld [vmem:[%s15222_s5 + $0x8] sm:$0xff] }
 0x424   : > { %8652 = vmatpush.xpose.msk.msrb.mxu2 %vm4114_vm3, %v13325_v9 }
 0x425   : > { %8662 = vmatpush.xpose.msk.msrb.mxu3 %vm4114_vm3, %v13325_v9 }
 0x426   : > { %8631 = vmatpush.xpose.msk.msrb.mxu0 %vm4114_vm3, %v12928_v30 }
 0x427   : > { %8641 = vmatpush.xpose.msk.msrb.mxu1 %vm4114_vm3, %v12928_v30  ;;  %v13382_v30 = vpop.f32.mrf.mxu1  ;;  %v13388_v21 = vpop.f32.mrf.mxu3 }
 0x428   : > { %8653 = vmatpush.xpose.msk.msrb.mxu2 %vm4114_vm3, %v13342_v17  ;;  %15833 = vst [vmem:[#allocation154_spill] sm:$0xff] %v13382_v30  ;;  %v13416_v24 = vpop.f32.mrf.mxu2 }
 0x429   : > { %8663 = vmatpush.xpose.msk.msrb.mxu3 %vm4114_vm3, %v13342_v17  ;;  %15835 = vst [vmem:[#allocation158_spill] sm:$0xff] %v13388_v21  ;;  %v13406_v21 = vpop.f32.mrf.mxu0 }
 0x42a   : > { %8632 = vmatpush.xpose.msk.msrb.mxu0 %vm4114_vm3, %v12960_v4  ;;  %15837 = vst [vmem:[#allocation166_spill] sm:$0xff] %v13416_v24 }
 0x42b   : > { %8642 = vmatpush.xpose.msk.msrb.mxu1 %vm4114_vm3, %v12960_v4  ;;  %v15836_v4 = vld [vmem:[#allocation57_spill] sm:$0xff] }
 0x42c   : > { %8654 = vmatpush.xpose.msk.msrb.mxu2 %vm4114_vm3, %v13363_v47 }
 0x42d   : > { %8664 = vmatpush.xpose.msk.msrb.mxu3 %vm4114_vm3, %v13363_v47 }
 0x42e   : > { %8633 = vmatpush.xpose.msk.msrb.mxu0 %vm4114_vm3, %v12979_v19 }
 0x42f   : > { %8643 = vmatpush.xpose.msk.msrb.mxu1 %vm4114_vm3, %v12979_v19  ;;  %v13412_v19 = vpop.f32.mrf.mxu1  ;;  %v13418_v30 = vpop.f32.mrf.mxu3 }
 0x430   : > { %8655 = vmatpush.xpose.msk.msrb.mxu2 %vm4114_vm3, %v13376_v33  ;;  %15838 = vst [vmem:[#allocation131_spill] sm:$0xff] %v13418_v30  ;;  %v15839_v30 = vld [vmem:[#allocation58_spill] sm:$0xff] }
 0x431   : > { %8665 = vmatpush.xpose.msk.msrb.mxu3 %vm4114_vm3, %v13376_v33  ;;  %v13448_v24 = vpop.f32.mrf.mxu0 }
 0x432   : > { %8634 = vmatpush.xpose.msk.msrb.mxu0 %vm4114_vm3, %v12997_v40 }
 0x433   : > { %8656 = vmatmul.msk.f32.vlgmr.msrb.gmra.mxu2 %vm4114_vm3, %v15836_v4  ;;  %8644 = vmatpush.xpose.msk.msrb.mxu1 %vm4114_vm3, %v12997_v40  ;;  %v5845_v40 = vrot.slane %v13049_v1, 2 }
 0x434   : > { %8688 = vmatpush.xpose.msk.msra.mxu2 %vm4114_vm3, %v13239_v10  ;;  %8666 = vmatmul.msk.f32.vlgmr.msrb.gmra.mxu3 %vm4114_vm3, %v11526_v54  ;;  %v5846_v54 = vrot.slane %v13039_v31, 2 }
 0x435   : > { %8698 = vmatpush.xpose.msk.msra.mxu3 %vm4114_vm3, %v13239_v10 }
 0x436   : > { %8635 = vmatpush.xpose.msk.msrb.mxu0 %vm4114_vm3, %v13016_v57 }
 0x437   : > { %8645 = vmatpush.xpose.msk.msrb.mxu1 %vm4114_vm3, %v13016_v57  ;;  %v5847_v57 = vsel %vm1400_vm2, %v5845_v40, %v5846_v54  ;;  %v13458_v40 = vpop.f32.mrf.mxu3 }
 0x438   : > { %8689 = vmatpush.xpose.msk.msra.mxu2 %vm4114_vm3, %v13266_v55  ;;  %15841 = vst [vmem:[#allocation173_spill] sm:$0xff] %v13458_v40 }
 0x439   : > { %8699 = vmatpush.xpose.msk.msra.mxu3 %vm4114_vm3, %v13266_v55  ;;  %8636 = vmatmul.msk.f32.vlgmr.msrb.gmra.mxu0 %vm4114_vm3, %v12755_v12  ;;  %v13454_v12 = vpop.f32.mrf.mxu2 }
 0x43a   : > { %8668 = vmatpush.xpose.msk.msra.mxu0 %vm4114_vm3, %v13239_v10  ;;  %8646 = vmatmul.msk.f32.vlgmr.msrb.gmra.mxu1 %vm4114_vm3, %v5847_v57  ;;  %15840 = vst [vmem:[#allocation95_spill] sm:$0xff] %v13454_v12  ;;  %v13475_v57 = vpop.f32.mrf.mxu0 }
 0x43b   : > { %8678 = vmatpush.xpose.msk.msra.mxu1 %vm4114_vm3, %v13239_v10  ;;  %8657 = vmatmul.msk.f32.gmra.mxu2 %vm4114_vm3, %v15839_v30  ;;  %15842 = vst [vmem:[#allocation96_spill] sm:$0xff] %v13475_v57  ;;  %v15870_v57 = vld [vmem:[#allocation33_spill] sm:$0xff] }
 0x43c   : > { %8690 = vmatpush.xpose.msk.msra.mxu2 %vm4114_vm3, %v13281_v39  ;;  %8667 = vmatmul.msk.f32.gmra.mxu3 %vm4114_vm3, %v11532_v13  ;;  %v13452_v13 = vpop.f32.mrf.mxu1 }
 0x43d   : > { %8700 = vmatpush.xpose.msk.msra.mxu3 %vm4114_vm3, %v13281_v39 }
 0x43e   : > { %8669 = vmatpush.xpose.msk.msra.mxu0 %vm4114_vm3, %v13266_v55 }
 0x43f   : > { %8679 = vmatpush.xpose.msk.msra.mxu1 %vm4114_vm3, %v13266_v55 }
 0x440   : > { %8691 = vmatpush.xpose.msk.msra.mxu2 %vm4114_vm3, %v13300_v63 }
 0x441   : > { %8701 = vmatpush.xpose.msk.msra.mxu3 %vm4114_vm3, %v13300_v63  ;;  %8637 = vmatmul.msk.f32.gmra.mxu0 %vm4114_vm3, %v12729_v0  ;;  %v13481_v12 = vpop.f32.mrf.mxu2  ;;  %v13485_v0 = vpop.f32.mrf.mxu3 }
 0x442   : > { %8670 = vmatpush.xpose.msk.msra.mxu0 %vm4114_vm3, %v13281_v39  ;;  %8647 = vmatmul.msk.f32.gmra.mxu1 %vm4114_vm3, %v5846_v54  ;;  %15844 = vst [vmem:[#allocation105_spill] sm:$0xff] %v13481_v12  ;;  %v13507_v54 = vpop.f32.mrf.mxu0 }
 0x443   : > { %8680 = vmatpush.xpose.msk.msra.mxu1 %vm4114_vm3, %v13281_v39  ;;  %15845 = vst [vmem:[#allocation106_spill] sm:$0xff] %v13485_v0 }
 0x444   : > { %8692 = vmatpush.xpose.msk.msra.mxu2 %vm4114_vm3, %v13325_v9  ;;  %v13479_v40 = vpop.f32.mrf.mxu1  ;;  %15846 = vst [vmem:[#allocation132_spill] sm:$0xff] %v13507_v54  ;;  %v13627_v54 = vld [vmem:[%s15222_s5 + $0xb0] sm:$0xff] }
 0x445   : > { %8702 = vmatpush.xpose.msk.msra.mxu3 %vm4114_vm3, %v13325_v9  ;;  %15843 = vst [vmem:[#allocation174_spill] sm:$0xff] %v13479_v40  ;;  %v15869_v40 = vld [vmem:[#allocation66_spill] sm:$0xff] }
 0x446   : > { %8671 = vmatpush.xpose.msk.msra.mxu0 %vm4114_vm3, %v13300_v63 }
 0x447   : > { %8681 = vmatpush.xpose.msk.msra.mxu1 %vm4114_vm3, %v13300_v63 }
 0x448   : > { %8693 = vmatpush.xpose.msk.msra.mxu2 %vm4114_vm3, %v13342_v17 }
 0x449   : > { %8703 = vmatpush.xpose.msk.msra.mxu3 %vm4114_vm3, %v13342_v17  ;;  %v13515_v12 = vpop.f32.mrf.mxu2  ;;  %v13521_v31 = vpop.f32.mrf.mxu3 }
 0x44a   : > { %8672 = vmatpush.xpose.msk.msra.mxu0 %vm4114_vm3, %v13325_v9  ;;  %15848 = vst [vmem:[#allocation134_spill] sm:$0xff] %v13515_v12  ;;  %v13535_v12 = vpop.f32.mrf.mxu0 }
 0x44b   : > { %8682 = vmatpush.xpose.msk.msra.mxu1 %vm4114_vm3, %v13325_v9  ;;  %15849 = vst [vmem:[#allocation169_spill] sm:$0xff] %v13521_v31 }
 0x44c   : > { %8694 = vmatpush.xpose.msk.msra.mxu2 %vm4114_vm3, %v13363_v47  ;;  %v13511_v0 = vpop.f32.mrf.mxu1  ;;  %15850 = vst [vmem:[#allocation56_spill] sm:$0xff] %v13535_v12 }
 0x44d   : > { %8704 = vmatpush.xpose.msk.msra.mxu3 %vm4114_vm3, %v13363_v47  ;;  %15847 = vst [vmem:[#allocation133_spill] sm:$0xff] %v13511_v0 }
 0x44e   : > { %8673 = vmatpush.xpose.msk.msra.mxu0 %vm4114_vm3, %v13342_v17 }
 0x44f   : > { %8683 = vmatpush.xpose.msk.msra.mxu1 %vm4114_vm3, %v13342_v17 }
 0x450   : > { %8695 = vmatpush.xpose.msk.msra.mxu2 %vm4114_vm3, %v13376_v33 }
 0x451   : > { %8705 = vmatpush.xpose.msk.msra.mxu3 %vm4114_vm3, %v13376_v33  ;;  %v13547_v1 = vpop.f32.mrf.mxu2  ;;  %v13553_v12 = vpop.f32.mrf.mxu3 }
 0x452   : > { %8674 = vmatpush.xpose.msk.msra.mxu0 %vm4114_vm3, %v13363_v47  ;;  %15852 = vst [vmem:[#allocation99_spill] sm:$0xff] %v13547_v1 }
 0x453   : > { %8696 = vmatmul.msk.f32.vlgmr.msra.gmra.mxu2 %vm4114_vm3, %v11627_v27  ;;  %8684 = vmatpush.xpose.msk.msra.mxu1 %vm4114_vm3, %v13363_v47  ;;  %15853 = vst [vmem:[#allocation178_spill] sm:$0xff] %v13553_v12  ;;  %v13571_v12 = vpop.f32.mrf.mxu0 }
 0x454   : > { %8728 = vmatpush.xpose.msk.msrb.mxu2 %vm4114_vm3, %v13239_v10  ;;  %8706 = vmatmul.msk.f32.vlgmr.msra.gmra.mxu3 %vm4114_vm3, %v11635_v29  ;;  %v13541_v31 = vpop.f32.mrf.mxu1  ;;  %15854 = vst [vmem:[#allocation100_spill] sm:$0xff] %v13571_v12  ;;  %v15871_v29 = vld [vmem:[#allocation34_spill] sm:$0xff] }
 0x455   : > { %8738 = vmatpush.xpose.msk.msrb.mxu3 %vm4114_vm3, %v13239_v10  ;;  %15851 = vst [vmem:[#allocation159_spill] sm:$0xff] %v13541_v31 }
 0x456   : > { %8675 = vmatpush.xpose.msk.msra.mxu0 %vm4114_vm3, %v13376_v33 }
 0x457   : > { %8685 = vmatpush.xpose.msk.msra.mxu1 %vm4114_vm3, %v13376_v33 }
 0x458   : > { %8729 = vmatpush.xpose.msk.msrb.mxu2 %vm4114_vm3, %v13266_v55 }
 0x459   : > { %8739 = vmatpush.xpose.msk.msrb.mxu3 %vm4114_vm3, %v13266_v55  ;;  %8676 = vmatmul.msk.f32.vlgmr.msra.gmra.mxu0 %vm4114_vm3, %v11774_v38  ;;  %v13583_v31 = vpop.f32.mrf.mxu2  ;;  %v13587_v12 = vpop.f32.mrf.mxu3 }
 0x45a   : > { %8708 = vmatpush.xpose.msk.msrb.mxu0 %vm4114_vm3, %v13239_v10  ;;  %8686 = vmatmul.msk.f32.vlgmr.msra.gmra.mxu1 %vm4114_vm3, %v11782_v50  ;;  %15856 = vst [vmem:[#allocation135_spill] sm:$0xff] %v13583_v31  ;;  %v13600_v31 = vld [vmem:[%s15222_s5 + $0xb8] sm:$0xff] }
 0x45b   : > { %8718 = vmatpush.xpose.msk.msrb.mxu1 %vm4114_vm3, %v13239_v10  ;;  %8697 = vmatmul.msk.f32.gmra.mxu2 %vm4114_vm3, %v11641_v61  ;;  %15857 = vst [vmem:[#allocation136_spill] sm:$0xff] %v13587_v12  ;;  %v15867_v61 = vld [vmem:[#allocation65_spill] sm:$0xff] }
 0x45c   : > { %8730 = vmatpush.xpose.msk.msrb.mxu2 %vm4114_vm3, %v13281_v39  ;;  %8707 = vmatmul.msk.f32.gmra.mxu3 %vm4114_vm3, %v11643_v22  ;;  %v13577_v1 = vpop.f32.mrf.mxu1  ;;  %v13661_v22 = vld [vmem:[%s15222_s5 + $0xa0] sm:$0xff] }
 0x45d   : > { %8740 = vmatpush.xpose.msk.msrb.mxu3 %vm4114_vm3, %v13281_v39  ;;  %15855 = vst [vmem:[#allocation179_spill] sm:$0xff] %v13577_v1  ;;  %v13602_v1 = vpop.f32.mrf.mxu0 }
 0x45e   : > { %8709 = vmatpush.xpose.msk.msrb.mxu0 %vm4114_vm3, %v13266_v55  ;;  %15858 = vst [vmem:[#allocation172_spill] sm:$0xff] %v13602_v1 }
 0x45f   : > { %8719 = vmatpush.xpose.msk.msrb.mxu1 %vm4114_vm3, %v13266_v55 }
 0x460   : > { %8731 = vmatpush.xpose.msk.msrb.mxu2 %vm4114_vm3, %v13300_v63 }
 0x461   : > { %8741 = vmatpush.xpose.msk.msrb.mxu3 %vm4114_vm3, %v13300_v63  ;;  %8677 = vmatmul.msk.f32.gmra.mxu0 %vm4114_vm3, %v11776_v59  ;;  %v13612_v0 = vpop.f32.mrf.mxu2  ;;  %v13618_v1 = vpop.f32.mrf.mxu3 }
 0x462   : > { %8710 = vmatpush.xpose.msk.msrb.mxu0 %vm4114_vm3, %v13281_v39  ;;  %8687 = vmatmul.msk.f32.gmra.mxu1 %vm4114_vm3, %v11784_v28  ;;  %15860 = vst [vmem:[#allocation108_spill] sm:$0xff] %v13612_v0  ;;  %v15863_v0 = vld [vmem:[#allocation20_spill] sm:$0xff] }
 0x463   : > { %8720 = vmatpush.xpose.msk.msrb.mxu1 %vm4114_vm3, %v13281_v39  ;;  %15861 = vst [vmem:[#allocation175_spill] sm:$0xff] %v13618_v1  ;;  %v13642_v1 = vld [vmem:[%s15222_s5 + $0xa8] sm:$0xff] }
 0x464   : > { %8732 = vmatpush.xpose.msk.msrb.mxu2 %vm4114_vm3, %v13325_v9  ;;  %v13606_v12 = vpop.f32.mrf.mxu1 }
 0x465   : > { %8742 = vmatpush.xpose.msk.msrb.mxu3 %vm4114_vm3, %v13325_v9  ;;  %15859 = vst [vmem:[#allocation107_spill] sm:$0xff] %v13606_v12  ;;  %v15862_v12 = vld [vmem:[#allocation18_spill] sm:$0xff] }
 0x466   : > { %8711 = vmatpush.xpose.msk.msrb.mxu0 %vm4114_vm3, %v13300_v63 }
 0x467   : > { %8721 = vmatpush.xpose.msk.msrb.mxu1 %vm4114_vm3, %v13300_v63 }
 0x468   : > { %8733 = vmatpush.xpose.msk.msrb.mxu2 %vm4114_vm3, %v13342_v17 }
 0x469   : > { %8743 = vmatpush.xpose.msk.msrb.mxu3 %vm4114_vm3, %v13342_v17 }
 0x46a   : > { %8712 = vmatpush.xpose.msk.msrb.mxu0 %vm4114_vm3, %v13325_v9 }
 0x46b   : > { %8722 = vmatpush.xpose.msk.msrb.mxu1 %vm4114_vm3, %v13325_v9 }
 0x46c   : > { %8734 = vmatpush.xpose.msk.msrb.mxu2 %vm4114_vm3, %v13363_v47 }
 0x46d   : > { %8744 = vmatpush.xpose.msk.msrb.mxu3 %vm4114_vm3, %v13363_v47 }
 0x46e   : > { %8713 = vmatpush.xpose.msk.msrb.mxu0 %vm4114_vm3, %v13342_v17 }
 0x46f   : > { %8723 = vmatpush.xpose.msk.msrb.mxu1 %vm4114_vm3, %v13342_v17 }
 0x470   : > { %8735 = vmatpush.xpose.msk.msrb.mxu2 %vm4114_vm3, %v13376_v33 }
 0x471   : > { %8745 = vmatpush.xpose.msk.msrb.mxu3 %vm4114_vm3, %v13376_v33 }
 0x472   : > { %8714 = vmatpush.xpose.msk.msrb.mxu0 %vm4114_vm3, %v13363_v47 }
 0x473   : > { %8736 = vmatmul.msk.f32.vlgmr.msrb.gmra.mxu2 %vm4114_vm3, %v15862_v12  ;;  %8724 = vmatpush.xpose.msk.msrb.mxu1 %vm4114_vm3, %v13363_v47  ;;  %v13652_v12 = vpop.f32.mrf.mxu1 }
 0x474   : > { %8768 = vmatpush.xpose.msk.msra.mxu2 %vm4114_vm3, %v13600_v31  ;;  %8746 = vmatmul.msk.f32.vlgmr.msrb.gmra.mxu3 %vm4114_vm3, %v15863_v0  ;;  %v13646_v0 = vpop.f32.mrf.mxu0  ;;  %15865 = vst [vmem:[#allocation147_spill] sm:$0xff] %v13652_v12  ;;  %v13669_v12 = vpop.f32.mrf.mxu3 }
 0x475   : > { %8778 = vmatpush.xpose.msk.msra.mxu3 %vm4114_vm3, %v13600_v31  ;;  %15864 = vst [vmem:[#allocation45_spill] sm:$0xff] %v13646_v0  ;;  %v13663_v0 = vpop.f32.mrf.mxu2 }
 0x476   : > { %8715 = vmatpush.xpose.msk.msrb.mxu0 %vm4114_vm3, %v13376_v33  ;;  %15866 = vst [vmem:[#allocation59_spill] sm:$0xff] %v13663_v0 }
 0x477   : > { %8725 = vmatpush.xpose.msk.msrb.mxu1 %vm4114_vm3, %v13376_v33  ;;  %15868 = vst [vmem:[#allocation164_spill] sm:$0xff] %v13669_v12 }
 0x478   : > { %8769 = vmatpush.xpose.msk.msra.mxu2 %vm4114_vm3, %v13627_v54 }
 0x479   : > { %8779 = vmatpush.xpose.msk.msra.mxu3 %vm4114_vm3, %v13627_v54  ;;  %8716 = vmatmul.msk.f32.vlgmr.msrb.gmra.mxu0 %vm4114_vm3, %v15870_v57 }
 0x47a   : > { %8748 = vmatpush.xpose.msk.msra.mxu0 %vm4114_vm3, %v13239_v10  ;;  %8726 = vmatmul.msk.f32.vlgmr.msrb.gmra.mxu1 %vm4114_vm3, %v15871_v29 }
 0x47b   : > { %8758 = vmatpush.xpose.msk.msra.mxu1 %vm4114_vm3, %v13239_v10  ;;  %8737 = vmatmul.msk.f32.gmra.mxu2 %vm4114_vm3, %v15867_v61  ;;  %v13686_v10 = vld [vmem:[%s15222_s5 + $0x98] sm:$0xff]  ;;  %v13694_v0 = vpop.f32.mrf.mxu1 }
 0x47c   : > { %8770 = vmatpush.xpose.msk.msra.mxu2 %vm4114_vm3, %v13642_v1  ;;  %8747 = vmatmul.msk.f32.gmra.mxu3 %vm4114_vm3, %v15869_v40  ;;  %v13690_v12 = vpop.f32.mrf.mxu0  ;;  %15873 = vst [vmem:[#allocation46_spill] sm:$0xff] %v13694_v0  ;;  %v13703_v40 = vld [vmem:[%s15222_s5 + $0x90] sm:$0xff]  ;;  %v15877_v0 = vld [vmem:[#allocation38_spill] sm:$0xff] }
 0x47d   : > { %8780 = vmatpush.xpose.msk.msra.mxu3 %vm4114_vm3, %v13642_v1  ;;  %15872 = vst [vmem:[#allocation139_spill] sm:$0xff] %v13690_v12  ;;  %v13705_v61 = vpop.f32.mrf.mxu2  ;;  %v15876_v12 = vld [vmem:[#allocation37_spill] sm:$0xff] }
 0x47e   : > { %8749 = vmatpush.xpose.msk.msra.mxu0 %vm4114_vm3, %v13266_v55  ;;  %15874 = vst [vmem:[#allocation148_spill] sm:$0xff] %v13705_v61 }
 0x47f   : > { %8759 = vmatpush.xpose.msk.msra.mxu1 %vm4114_vm3, %v13266_v55  ;;  %v13709_v55 = vpop.f32.mrf.mxu3 }
 0x480   : > { %8771 = vmatpush.xpose.msk.msra.mxu2 %vm4114_vm3, %v13661_v22  ;;  %15875 = vst [vmem:[#allocation60_spill] sm:$0xff] %v13709_v55  ;;  %v13737_v55 = vld [vmem:[%s15222_s5 + $0x80] sm:$0xff] }
 0x481   : > { %8781 = vmatpush.xpose.msk.msra.mxu3 %vm4114_vm3, %v13661_v22  ;;  %8717 = vmatmul.msk.f32.gmra.mxu0 %vm4114_vm3, %v15876_v12  ;;  %v6179_v12 = vrot.slane %v15836_v4, 2 }
 0x482   : > { %8750 = vmatpush.xpose.msk.msra.mxu0 %vm4114_vm3, %v13281_v39  ;;  %8727 = vmatmul.msk.f32.gmra.mxu1 %vm4114_vm3, %v15877_v0 }
 0x483   : > { %8760 = vmatpush.xpose.msk.msra.mxu1 %vm4114_vm3, %v13281_v39  ;;  %v13724_v39 = vld [vmem:[%s15222_s5 + $0x88] sm:$0xff]  ;;  %v13744_v27 = vpop.f32.mrf.mxu1 }
 0x484   : > { %8772 = vmatpush.xpose.msk.msra.mxu2 %vm4114_vm3, %v13686_v10  ;;  %v13739_v61 = vpop.f32.mrf.mxu0  ;;  %15879 = vst [vmem:[#allocation8_spill] sm:$0xff] %v13744_v27 }
 0x485   : > { %8782 = vmatpush.xpose.msk.msra.mxu3 %vm4114_vm3, %v13686_v10  ;;  %15878 = vst [vmem:[#allocation165_spill] sm:$0xff] %v13739_v61  ;;  %v13746_v0 = vpop.f32.mrf.mxu2 }
 0x486   : > { %8751 = vmatpush.xpose.msk.msra.mxu0 %vm4114_vm3, %v13300_v63  ;;  %15880 = vst [vmem:[#allocation180_spill] sm:$0xff] %v13746_v0 }
 0x487   : > { %8761 = vmatpush.xpose.msk.msra.mxu1 %vm4114_vm3, %v13300_v63  ;;  %v6180_v63 = vrot.slane %v15839_v30, 2  ;;  %v13751_v29 = vpop.f32.mrf.mxu3  ;;  %v15882_v30 = vld [vmem:[#allocation75_spill] sm:$0xff] }
 0x488   : > { %8773 = vmatpush.xpose.msk.msra.mxu2 %vm4114_vm3, %v13703_v40  ;;  %15881 = vst [vmem:[#allocation140_spill] sm:$0xff] %v13751_v29 }
 0x489   : > { %8783 = vmatpush.xpose.msk.msra.mxu3 %vm4114_vm3, %v13703_v40 }
 0x48a   : > { %8752 = vmatpush.xpose.msk.msra.mxu0 %vm4114_vm3, %v13325_v9 }
 0x48b   : > { %8762 = vmatpush.xpose.msk.msra.mxu1 %vm4114_vm3, %v13325_v9  ;;  %v6181_v9 = vsel %vm1400_vm2, %v6179_v12, %v6180_v63 }
 0x48c   : > { %8774 = vmatpush.xpose.msk.msra.mxu2 %vm4114_vm3, %v13724_v39  ;;  %v13769_v4 = vpop.f32.mrf.mxu0 }
 0x48d   : > { %8784 = vmatpush.xpose.msk.msra.mxu3 %vm4114_vm3, %v13724_v39  ;;  %15883 = vst [vmem:[#allocation109_spill] sm:$0xff] %v13769_v4  ;;  %v13779_v12 = vpop.f32.mrf.mxu2 }
 0x48e   : > { %8753 = vmatpush.xpose.msk.msra.mxu0 %vm4114_vm3, %v13342_v17  ;;  %15885 = vst [vmem:[#allocation181_spill] sm:$0xff] %v13779_v12  ;;  %v15895_v12 = vld [vmem:[#allocation21_spill] sm:$0xff] }
 0x48f   : > { %8763 = vmatpush.xpose.msk.msra.mxu1 %vm4114_vm3, %v13342_v17  ;;  %v13775_v17 = vpop.f32.mrf.mxu1 }
 0x490   : > { %8775 = vmatpush.xpose.msk.msra.mxu2 %vm4114_vm3, %v13737_v55  ;;  %15884 = vst [vmem:[#allocation9_spill] sm:$0xff] %v13775_v17 }
 0x491   : > { %8785 = vmatpush.xpose.msk.msra.mxu3 %vm4114_vm3, %v13737_v55 }
 0x492   : > { %8754 = vmatpush.xpose.msk.msra.mxu0 %vm4114_vm3, %v13363_v47 }
 0x493   : > { %8776 = vmatmul.msk.f32.vlgmr.msra.gmra.mxu2 %vm4114_vm3, %v6181_v9  ;;  %8764 = vmatpush.xpose.msk.msra.mxu1 %vm4114_vm3, %v13363_v47  ;;  %v13781_v9 = vpop.f32.mrf.mxu3  ;;  %v15887_v47 = vld [vmem:[#allocation35_spill] sm:$0xff] }
 0x494   : > { %8808 = vmatpush.xpose.msk.msrb.mxu2 %vm4114_vm3, %v13600_v31  ;;  %8786 = vmatmul.msk.f32.vlgmr.msra.gmra.mxu3 %vm4114_vm3, %v15882_v30  ;;  %15886 = vst [vmem:[#allocation110_spill] sm:$0xff] %v13781_v9  ;;  %v15888_v30 = vld [vmem:[#allocation86_spill] sm:$0xff]  ;;  %v13808_v27 = vpop.f32.mrf.mxu0  ;;  %v15894_v9 = vld [vmem:[#allocation85_spill] sm:$0xff] }
 0x495   : > { %8818 = vmatpush.xpose.msk.msrb.mxu3 %vm4114_vm3, %v13600_v31  ;;  %15890 = vst [vmem:[#allocation49_spill] sm:$0xff] %v13808_v27 }
 0x496   : > { %8755 = vmatpush.xpose.msk.msra.mxu0 %vm4114_vm3, %v13376_v33 }
 0x497   : > { %8765 = vmatpush.xpose.msk.msra.mxu1 %vm4114_vm3, %v13376_v33  ;;  %v15889_v33 = vld [vmem:[#allocation118_spill] sm:$0xff] }
 0x498   : > { %8809 = vmatpush.xpose.msk.msrb.mxu2 %vm4114_vm3, %v13627_v54 }
 0x499   : > { %8819 = vmatpush.xpose.msk.msrb.mxu3 %vm4114_vm3, %v13627_v54  ;;  %8756 = vmatmul.msk.f32.vlgmr.msra.gmra.mxu0 %vm4114_vm3, %v15888_v30 }
 0x49a   : > { %8788 = vmatpush.xpose.msk.msrb.mxu0 %vm4114_vm3, %v13600_v31  ;;  %8766 = vmatmul.msk.f32.vlgmr.msra.gmra.mxu1 %vm4114_vm3, %v15889_v33 }
 0x49b   : > { %8798 = vmatpush.xpose.msk.msrb.mxu1 %vm4114_vm3, %v13600_v31  ;;  %8777 = vmatmul.msk.f32.gmra.mxu2 %vm4114_vm3, %v6180_v63  ;;  %v13812_v63 = vpop.f32.mrf.mxu1  ;;  %v13818_v61 = vpop.f32.mrf.mxu3 }
 0x49c   : > { %8810 = vmatpush.xpose.msk.msrb.mxu2 %vm4114_vm3, %v13642_v1  ;;  %8787 = vmatmul.msk.f32.gmra.mxu3 %vm4114_vm3, %v15887_v47  ;;  %15891 = vst [vmem:[#allocation149_spill] sm:$0xff] %v13812_v63  ;;  %v13814_v47 = vpop.f32.mrf.mxu2 }
 0x49d   : > { %8820 = vmatpush.xpose.msk.msrb.mxu3 %vm4114_vm3, %v13642_v1  ;;  %15892 = vst [vmem:[#allocation63_spill] sm:$0xff] %v13814_v47 }
 0x49e   : > { %8789 = vmatpush.xpose.msk.msrb.mxu0 %vm4114_vm3, %v13627_v54  ;;  %15893 = vst [vmem:[#allocation170_spill] sm:$0xff] %v13818_v61  ;;  %v13836_v61 = vpop.f32.mrf.mxu0 }
 0x49f   : > { %8799 = vmatpush.xpose.msk.msrb.mxu1 %vm4114_vm3, %v13627_v54  ;;  %15896 = vst [vmem:[#allocation64_spill] sm:$0xff] %v13836_v61 }
 0x4a0   : > { %8811 = vmatpush.xpose.msk.msrb.mxu2 %vm4114_vm3, %v13661_v22 }
 0x4a1   : > { %8821 = vmatpush.xpose.msk.msrb.mxu3 %vm4114_vm3, %v13661_v22  ;;  %8757 = vmatmul.msk.f32.gmra.mxu0 %vm4114_vm3, %v15894_v9 }
 0x4a2   : > { %8790 = vmatpush.xpose.msk.msrb.mxu0 %vm4114_vm3, %v13642_v1  ;;  %8767 = vmatmul.msk.f32.gmra.mxu1 %vm4114_vm3, %v15895_v12 }
 0x4a3   : > { %8800 = vmatpush.xpose.msk.msrb.mxu1 %vm4114_vm3, %v13642_v1  ;;  %v13840_v47 = vpop.f32.mrf.mxu1  ;;  %v13846_v27 = vpop.f32.mrf.mxu3 }
 0x4a4   : > { %8812 = vmatpush.xpose.msk.msrb.mxu2 %vm4114_vm3, %v13686_v10  ;;  %15897 = vst [vmem:[#allocation171_spill] sm:$0xff] %v13840_v47  ;;  %v13842_v63 = vpop.f32.mrf.mxu2 }
 0x4a5   : > { %8822 = vmatpush.xpose.msk.msrb.mxu3 %vm4114_vm3, %v13686_v10  ;;  %15898 = vst [vmem:[#allocation10_spill] sm:$0xff] %v13846_v27 }
 0x4a6   : > { %8791 = vmatpush.xpose.msk.msrb.mxu0 %vm4114_vm3, %v13661_v22  ;;  %v13868_v47 = vpop.f32.mrf.mxu0 }
 0x4a7   : > { %8801 = vmatpush.xpose.msk.msrb.mxu1 %vm4114_vm3, %v13661_v22  ;;  %15899 = vst [vmem:[#allocation182_spill] sm:$0xff] %v13868_v47  ;;  %v13988_v47 = vld [vmem:[%s15222_s5 + $0x130] sm:$0xff] }
 0x4a8   : > { %8813 = vmatpush.xpose.msk.msrb.mxu2 %vm4114_vm3, %v13703_v40 }
 0x4a9   : > { %8823 = vmatpush.xpose.msk.msrb.mxu3 %vm4114_vm3, %v13703_v40 }
 0x4aa   : > { %8792 = vmatpush.xpose.msk.msrb.mxu0 %vm4114_vm3, %v13686_v10 }
 0x4ab   : > { %8802 = vmatpush.xpose.msk.msrb.mxu1 %vm4114_vm3, %v13686_v10  ;;  %v13872_v61 = vpop.f32.mrf.mxu1  ;;  %v13882_v0 = vpop.f32.mrf.mxu3 }
 0x4ac   : > { %8814 = vmatpush.xpose.msk.msrb.mxu2 %vm4114_vm3, %v13724_v39  ;;  %15900 = vst [vmem:[#allocation143_spill] sm:$0xff] %v13872_v61  ;;  %v13876_v29 = vpop.f32.mrf.mxu2 }
 0x4ad   : > { %8824 = vmatpush.xpose.msk.msrb.mxu3 %vm4114_vm3, %v13724_v39  ;;  %15901 = vst [vmem:[#allocation12_spill] sm:$0xff] %v13876_v29 }
 0x4ae   : > { %8793 = vmatpush.xpose.msk.msrb.mxu0 %vm4114_vm3, %v13703_v40  ;;  %15902 = vst [vmem:[#allocation183_spill] sm:$0xff] %v13882_v0 }
 0x4af   : > { %8803 = vmatpush.xpose.msk.msrb.mxu1 %vm4114_vm3, %v13703_v40 }
 0x4b0   : > { %8815 = vmatpush.xpose.msk.msrb.mxu2 %vm4114_vm3, %v13737_v55 }
 0x4b1   : > { %8825 = vmatpush.xpose.msk.msrb.mxu3 %vm4114_vm3, %v13737_v55 }
 0x4b2   : > { %8794 = vmatpush.xpose.msk.msrb.mxu0 %vm4114_vm3, %v13724_v39 }
 0x4b3   : > { %8816 = vmatmul.msk.f32.vlgmr.msrb.gmra.mxu2 %vm4114_vm3, %v12507_v26  ;;  %8804 = vmatpush.xpose.msk.msrb.mxu1 %vm4114_vm3, %v13724_v39  ;;  %v13902_v26 = vpop.f32.mrf.mxu1 }
 0x4b4   : > { %8848 = vmatpush.xpose.msk.msra.mxu2 %vm4114_vm3, %v13600_v31  ;;  %8826 = vmatmul.msk.f32.vlgmr.msrb.gmra.mxu3 %vm4114_vm3, %v12455_v42  ;;  %v13896_v42 = vpop.f32.mrf.mxu0  ;;  %15904 = vst [vmem:[#allocation113_spill] sm:$0xff] %v13902_v26  ;;  %v13908_v61 = vpop.f32.mrf.mxu2 }
 0x4b5   : > { %8858 = vmatpush.xpose.msk.msra.mxu3 %vm4114_vm3, %v13600_v31  ;;  %15903 = vst [vmem:[#allocation144_spill] sm:$0xff] %v13896_v42  ;;  %v13914_v42 = vpop.f32.mrf.mxu3 }
 0x4b6   : > { %8795 = vmatpush.xpose.msk.msrb.mxu0 %vm4114_vm3, %v13737_v55  ;;  %15905 = vst [vmem:[#allocation114_spill] sm:$0xff] %v13908_v61  ;;  %v15938_v61 = vld [vmem:[#allocation77_spill] sm:$0xff] }
 0x4b7   : > { %8805 = vmatpush.xpose.msk.msrb.mxu1 %vm4114_vm3, %v13737_v55  ;;  %15906 = vst [vmem:[#allocation50_spill] sm:$0xff] %v13914_v42  ;;  %v15937_v42 = vld [vmem:[#allocation115_spill] sm:$0xff] }
 0x4b8   : > { %8849 = vmatpush.xpose.msk.msra.mxu2 %vm4114_vm3, %v13627_v54 }
 0x4b9   : > { %8859 = vmatpush.xpose.msk.msra.mxu3 %vm4114_vm3, %v13627_v54  ;;  %8796 = vmatmul.msk.f32.vlgmr.msrb.gmra.mxu0 %vm4114_vm3, %v12348_v14 }
 0x4ba   : > { %8828 = vmatpush.xpose.msk.msra.mxu0 %vm4114_vm3, %v13600_v31  ;;  %8806 = vmatmul.msk.f32.vlgmr.msrb.gmra.mxu1 %vm4114_vm3, %v12499_v32 }
 0x4bb   : > { %8838 = vmatpush.xpose.msk.msra.mxu1 %vm4114_vm3, %v13600_v31  ;;  %8817 = vmatmul.msk.f32.gmra.mxu2 %vm4114_vm3, %v12481_v62 }
 0x4bc   : > { %8850 = vmatpush.xpose.msk.msra.mxu2 %vm4114_vm3, %v13642_v1  ;;  %8827 = vmatmul.msk.f32.gmra.mxu3 %vm4114_vm3, %v12436_v37  ;;  %v13932_v14 = vpop.f32.mrf.mxu0  ;;  %v13938_v37 = vpop.f32.mrf.mxu1 }
 0x4bd   : > { %8860 = vmatpush.xpose.msk.msra.mxu3 %vm4114_vm3, %v13642_v1  ;;  %15907 = vst [vmem:[#allocation150_spill] sm:$0xff] %v13932_v14  ;;  %v13944_v62 = vpop.f32.mrf.mxu2 }
 0x4be   : > { %8829 = vmatpush.xpose.msk.msra.mxu0 %vm4114_vm3, %v13627_v54  ;;  %15908 = vst [vmem:[#allocation53_spill] sm:$0xff] %v13938_v37 }
 0x4bf   : > { %8839 = vmatpush.xpose.msk.msra.mxu1 %vm4114_vm3, %v13627_v54  ;;  %15909 = vst [vmem:[#allocation151_spill] sm:$0xff] %v13944_v62 }
 0x4c0   : > { %8851 = vmatpush.xpose.msk.msra.mxu2 %vm4114_vm3, %v13661_v22 }
 0x4c1   : > { %8861 = vmatpush.xpose.msk.msra.mxu3 %vm4114_vm3, %v13661_v22  ;;  %8797 = vmatmul.msk.f32.gmra.mxu0 %vm4114_vm3, %v12321_v58  ;;  %v13948_v58 = vpop.f32.mrf.mxu3 }
 0x4c2   : > { %8830 = vmatpush.xpose.msk.msra.mxu0 %vm4114_vm3, %v13642_v1  ;;  %8807 = vmatmul.msk.f32.gmra.mxu1 %vm4114_vm3, %v12476_v35  ;;  %15910 = vst [vmem:[#allocation67_spill] sm:$0xff] %v13948_v58  ;;  %v13961_v35 = vld [vmem:[%s15222_s5 + $0x138] sm:$0xff] }
 0x4c3   : > { %8840 = vmatpush.xpose.msk.msra.mxu1 %vm4114_vm3, %v13642_v1 }
 0x4c4   : > { %8852 = vmatpush.xpose.msk.msra.mxu2 %vm4114_vm3, %v13686_v10  ;;  %v13963_v32 = vpop.f32.mrf.mxu0  ;;  %v13967_v37 = vpop.f32.mrf.mxu1 }
 0x4c5   : > { %8862 = vmatpush.xpose.msk.msra.mxu3 %vm4114_vm3, %v13686_v10  ;;  %15911 = vst [vmem:[#allocation176_spill] sm:$0xff] %v13963_v32  ;;  %v13973_v14 = vpop.f32.mrf.mxu2  ;;  %v15936_v32 = vld [vmem:[#allocation27_spill] sm:$0xff] }
 0x4c6   : > { %8831 = vmatpush.xpose.msk.msra.mxu0 %vm4114_vm3, %v13661_v22  ;;  %15912 = vst [vmem:[#allocation54_spill] sm:$0xff] %v13967_v37 }
 0x4c7   : > { %8841 = vmatpush.xpose.msk.msra.mxu1 %vm4114_vm3, %v13661_v22  ;;  %15913 = vst [vmem:[#allocation152_spill] sm:$0xff] %v13973_v14  ;;  %v14022_v14 = vld [vmem:[%s15222_s5 + $0x120] sm:$0xff] }
 0x4c8   : > { %8853 = vmatpush.xpose.msk.msra.mxu2 %vm4114_vm3, %v13703_v40 }
 0x4c9   : > { %8863 = vmatpush.xpose.msk.msra.mxu3 %vm4114_vm3, %v13703_v40  ;;  %v13979_v26 = vpop.f32.mrf.mxu3 }
 0x4ca   : > { %8832 = vmatpush.xpose.msk.msra.mxu0 %vm4114_vm3, %v13686_v10  ;;  %15914 = vst [vmem:[#allocation68_spill] sm:$0xff] %v13979_v26 }
 0x4cb   : > { %8842 = vmatpush.xpose.msk.msra.mxu1 %vm4114_vm3, %v13686_v10 }
 0x4cc   : > { %8854 = vmatpush.xpose.msk.msra.mxu2 %vm4114_vm3, %v13724_v39  ;;  %v14013_v26 = vpop.f32.mrf.mxu1 }
 0x4cd   : > { %8864 = vmatpush.xpose.msk.msra.mxu3 %vm4114_vm3, %v13724_v39  ;;  %15916 = vst [vmem:[#allocation11_spill] sm:$0xff] %v14013_v26 }
 0x4ce   : > { %8833 = vmatpush.xpose.msk.msra.mxu0 %vm4114_vm3, %v13703_v40 }
 0x4cf   : > { %8843 = vmatpush.xpose.msk.msra.mxu1 %vm4114_vm3, %v13703_v40 }
 0x4d0   : > { %8855 = vmatpush.xpose.msk.msra.mxu2 %vm4114_vm3, %v13737_v55 }
 0x4d1   : > { %8865 = vmatpush.xpose.msk.msra.mxu3 %vm4114_vm3, %v13737_v55  ;;  %v14030_v26 = vpop.f32.mrf.mxu3 }
 0x4d2   : > { %8834 = vmatpush.xpose.msk.msra.mxu0 %vm4114_vm3, %v13724_v39  ;;  %15918 = vst [vmem:[#allocation13_spill] sm:$0xff] %v14030_v26 }
 0x4d3   : > { %8856 = vmatmul.msk.f32.vlgmr.msra.gmra.mxu2 %vm4114_vm3, %v12639_v45  ;;  %8844 = vmatpush.xpose.msk.msra.mxu1 %vm4114_vm3, %v13724_v39  ;;  %v14003_v45 = vld [vmem:[%s15222_s5 + $0x128] sm:$0xff] }
 0x4d4   : > { %8888 = vmatpush.xpose.msk.msrb.mxu2 %vm4114_vm3, %v13961_v35  ;;  %8866 = vmatmul.msk.f32.vlgmr.msra.gmra.mxu3 %vm4114_vm3, %v12572_v25  ;;  %v14007_v25 = vpop.f32.mrf.mxu0 }
 0x4d5   : > { %8898 = vmatpush.xpose.msk.msrb.mxu3 %vm4114_vm3, %v13961_v35  ;;  %15915 = vst [vmem:[#allocation177_spill] sm:$0xff] %v14007_v25  ;;  %v14024_v25 = vpop.f32.mrf.mxu2 }
 0x4d6   : > { %8835 = vmatpush.xpose.msk.msra.mxu0 %vm4114_vm3, %v13737_v55  ;;  %15917 = vst [vmem:[#allocation184_spill] sm:$0xff] %v14024_v25 }
 0x4d7   : > { %8845 = vmatpush.xpose.msk.msra.mxu1 %vm4114_vm3, %v13737_v55 }
 0x4d8   : > { %8889 = vmatpush.xpose.msk.msrb.mxu2 %vm4114_vm3, %v13988_v47 }
 0x4d9   : > { %8899 = vmatpush.xpose.msk.msrb.mxu3 %vm4114_vm3, %v13988_v47  ;;  %8836 = vmatmul.msk.f32.vlgmr.msra.gmra.mxu0 %vm4114_vm3, %v12463_v6 }
 0x4da   : > { %8868 = vmatpush.xpose.msk.msrb.mxu0 %vm4114_vm3, %v13600_v31  ;;  %8846 = vmatmul.msk.f32.vlgmr.msra.gmra.mxu1 %vm4114_vm3, %v12631_v56  ;;  %v14055_v56 = vpop.f32.mrf.mxu1 }
 0x4db   : > { %8878 = vmatpush.xpose.msk.msrb.mxu1 %vm4114_vm3, %v13600_v31  ;;  %8857 = vmatmul.msk.f32.gmra.mxu2 %vm4114_vm3, %v12608_v48  ;;  %v14047_v48 = vld [vmem:[%s15222_s5 + $0x118] sm:$0xff]  ;;  %15920 = vst [vmem:[#allocation116_spill] sm:$0xff] %v14055_v56 }
 0x4dc   : > { %8890 = vmatpush.xpose.msk.msrb.mxu2 %vm4114_vm3, %v14003_v45  ;;  %8867 = vmatmul.msk.f32.gmra.mxu3 %vm4114_vm3, %v12548_v46  ;;  %v14051_v6 = vpop.f32.mrf.mxu0  ;;  %v14064_v46 = vld [vmem:[%s15222_s5 + $0x110] sm:$0xff] }
 0x4dd   : > { %8900 = vmatpush.xpose.msk.msrb.mxu3 %vm4114_vm3, %v14003_v45  ;;  %15919 = vst [vmem:[#allocation185_spill] sm:$0xff] %v14051_v6  ;;  %v14066_v31 = vpop.f32.mrf.mxu2 }
 0x4de   : > { %8869 = vmatpush.xpose.msk.msrb.mxu0 %vm4114_vm3, %v13627_v54 }
 0x4df   : > { %8879 = vmatpush.xpose.msk.msrb.mxu1 %vm4114_vm3, %v13627_v54  ;;  %v14070_v54 = vpop.f32.mrf.mxu3 }
 0x4e0   : > { %8891 = vmatpush.xpose.msk.msrb.mxu2 %vm4114_vm3, %v14022_v14 }
 0x4e1   : > { %8901 = vmatpush.xpose.msk.msrb.mxu3 %vm4114_vm3, %v14022_v14  ;;  %8837 = vmatmul.msk.f32.gmra.mxu0 %vm4114_vm3, %v12439_v16  ;;  %v14098_v16 = vld [vmem:[%s15222_s5 + $0x100] sm:$0xff] }
 0x4e2   : > { %8870 = vmatpush.xpose.msk.msrb.mxu0 %vm4114_vm3, %v13642_v1  ;;  %8847 = vmatmul.msk.f32.gmra.mxu1 %vm4114_vm3, %v12603_v5 }
 0x4e3   : > { %8880 = vmatpush.xpose.msk.msrb.mxu1 %vm4114_vm3, %v13642_v1  ;;  %v14085_v1 = vld [vmem:[%s15222_s5 + $0x108] sm:$0xff] }
 0x4e4   : > { %8892 = vmatpush.xpose.msk.msrb.mxu2 %vm4114_vm3, %v14047_v48  ;;  %v14100_v5 = vpop.f32.mrf.mxu0 }
 0x4e5   : > { %8902 = vmatpush.xpose.msk.msrb.mxu3 %vm4114_vm3, %v14047_v48  ;;  %15921 = vst [vmem:[#allocation7_spill] sm:$0xff] %v14100_v5  ;;  %v14106_v26 = vpop.f32.mrf.mxu2 }
 0x4e6   : > { %8871 = vmatpush.xpose.msk.msrb.mxu0 %vm4114_vm3, %v13661_v22 }
 0x4e7   : > { %8881 = vmatpush.xpose.msk.msrb.mxu1 %vm4114_vm3, %v13661_v22  ;;  %v14104_v22 = vpop.f32.mrf.mxu1  ;;  %v14110_v25 = vpop.f32.mrf.mxu3 }
 0x4e8   : > { %8893 = vmatpush.xpose.msk.msrb.mxu2 %vm4114_vm3, %v14064_v46  ;;  %15922 = vst [vmem:[#allocation117_spill] sm:$0xff] %v14104_v22  ;;  %v15924_v22 = vld [vmem:[#allocation22_spill] sm:$0xff]  ;;  %v5947_v0 = vadd.f32 %v14110_v25, %v13007_v44 }
 0x4e9   : > { %8903 = vmatpush.xpose.msk.msrb.mxu3 %vm4114_vm3, %v14064_v46  ;;  %v14384_v25 = vld [vmem:[%s15222_s5 + $0x1a0] sm:$0xff] }
 0x4ea   : > { %8872 = vmatpush.xpose.msk.msrb.mxu0 %vm4114_vm3, %v13686_v10 }
 0x4eb   : > { %8882 = vmatpush.xpose.msk.msrb.mxu1 %vm4114_vm3, %v13686_v10  ;;  %v15923_v10 = vld [vmem:[#allocation73_spill] sm:$0xff] }
 0x4ec   : > { %8894 = vmatpush.xpose.msk.msrb.mxu2 %vm4114_vm3, %v14085_v1  ;;  %v14128_v5 = vpop.f32.mrf.mxu0 }
 0x4ed   : > { %8904 = vmatpush.xpose.msk.msrb.mxu3 %vm4114_vm3, %v14085_v1  ;;  %15925 = vst [vmem:[#allocation145_spill] sm:$0xff] %v14128_v5  ;;  %v15934_v5 = vld [vmem:[#allocation72_spill] sm:$0xff] }
 0x4ee   : > { %8873 = vmatpush.xpose.msk.msrb.mxu0 %vm4114_vm3, %v13703_v40 }
 0x4ef   : > { %8883 = vmatpush.xpose.msk.msrb.mxu1 %vm4114_vm3, %v13703_v40  ;;  %v14134_v40 = vpop.f32.mrf.mxu1  ;;  %v14140_v56 = vpop.f32.mrf.mxu3 }
 0x4f0   : > { %8895 = vmatpush.xpose.msk.msrb.mxu2 %vm4114_vm3, %v14098_v16  ;;  %15926 = vst [vmem:[#allocation6_spill] sm:$0xff] %v14134_v40 }
 0x4f1   : > { %8905 = vmatpush.xpose.msk.msrb.mxu3 %vm4114_vm3, %v14098_v16 }
 0x4f2   : > { %8874 = vmatpush.xpose.msk.msrb.mxu0 %vm4114_vm3, %v13724_v39 }
 0x4f3   : > { %8896 = vmatmul.msk.f32.vlgmr.msrb.gmra.mxu2 %vm4114_vm3, %v15923_v10  ;;  %8884 = vmatpush.xpose.msk.msrb.mxu1 %vm4114_vm3, %v13724_v39  ;;  %v14138_v10 = vpop.f32.mrf.mxu2  ;;  %v15927_v39 = vld [vmem:[#allocation26_spill] sm:$0xff] }
 0x4f4   : > { %8928 = vmatpush.xpose.msk.msra.mxu2 %vm4114_vm3, %v13961_v35  ;;  %8906 = vmatmul.msk.f32.vlgmr.msrb.gmra.mxu3 %vm4114_vm3, %v15924_v22  ;;  %v15928_v22 = vld [vmem:[#allocation81_spill] sm:$0xff] }
 0x4f5   : > { %8938 = vmatpush.xpose.msk.msra.mxu3 %vm4114_vm3, %v13961_v35 }
 0x4f6   : > { %8875 = vmatpush.xpose.msk.msrb.mxu0 %vm4114_vm3, %v13737_v55 }
 0x4f7   : > { %8885 = vmatpush.xpose.msk.msrb.mxu1 %vm4114_vm3, %v13737_v55  ;;  %v14168_v55 = vpop.f32.mrf.mxu0 }
 0x4f8   : > { %8929 = vmatpush.xpose.msk.msra.mxu2 %vm4114_vm3, %v13988_v47  ;;  %15929 = vst [vmem:[#allocation146_spill] sm:$0xff] %v14168_v55  ;;  %v15933_v55 = vld [vmem:[#allocation78_spill] sm:$0xff] }
 0x4f9   : > { %8939 = vmatpush.xpose.msk.msra.mxu3 %vm4114_vm3, %v13988_v47  ;;  %8876 = vmatmul.msk.f32.vlgmr.msrb.gmra.mxu0 %vm4114_vm3, %v12580_v41 }
 0x4fa   : > { %8908 = vmatpush.xpose.msk.msra.mxu0 %vm4114_vm3, %v13961_v35  ;;  %8886 = vmatmul.msk.f32.vlgmr.msrb.gmra.mxu1 %vm4114_vm3, %v12747_v36  ;;  %v14178_v36 = vpop.f32.mrf.mxu3 }
 0x4fb   : > { %8918 = vmatpush.xpose.msk.msra.mxu1 %vm4114_vm3, %v13961_v35  ;;  %8897 = vmatmul.msk.f32.gmra.mxu2 %vm4114_vm3, %v15927_v39  ;;  %v14172_v39 = vpop.f32.mrf.mxu1  ;;  %v14174_v41 = vpop.f32.mrf.mxu2 }
 0x4fc   : > { %8930 = vmatpush.xpose.msk.msra.mxu2 %vm4114_vm3, %v14003_v45  ;;  %8907 = vmatmul.msk.f32.gmra.mxu3 %vm4114_vm3, %v15928_v22  ;;  %15930 = vst [vmem:[#allocation124_spill] sm:$0xff] %v14172_v39 }
 0x4fd   : > { %8940 = vmatpush.xpose.msk.msra.mxu3 %vm4114_vm3, %v14003_v45 }
 0x4fe   : > { %8909 = vmatpush.xpose.msk.msra.mxu0 %vm4114_vm3, %v13988_v47 }
 0x4ff   : > { %8919 = vmatpush.xpose.msk.msra.mxu1 %vm4114_vm3, %v13988_v47  ;;  %v14196_v22 = vpop.f32.mrf.mxu0 }
 0x500   : > { %8931 = vmatpush.xpose.msk.msra.mxu2 %vm4114_vm3, %v14022_v14  ;;  %15931 = vst [vmem:[#allocation83_spill] sm:$0xff] %v14196_v22 }
 0x501   : > { %8941 = vmatpush.xpose.msk.msra.mxu3 %vm4114_vm3, %v14022_v14  ;;  %8877 = vmatmul.msk.f32.gmra.mxu0 %vm4114_vm3, %v12556_v15 }
 0x502   : > { %8910 = vmatpush.xpose.msk.msra.mxu0 %vm4114_vm3, %v14003_v45  ;;  %8887 = vmatmul.msk.f32.gmra.mxu1 %vm4114_vm3, %v12724_v34  ;;  %v14206_v34 = vpop.f32.mrf.mxu3 }
 0x503   : > { %8920 = vmatpush.xpose.msk.msra.mxu1 %vm4114_vm3, %v14003_v45  ;;  %v14200_v39 = vpop.f32.mrf.mxu1  ;;  %v14202_v15 = vpop.f32.mrf.mxu2 }
 0x504   : > { %8932 = vmatpush.xpose.msk.msra.mxu2 %vm4114_vm3, %v14047_v48  ;;  %15932 = vst [vmem:[#allocation155_spill] sm:$0xff] %v14200_v39 }
 0x505   : > { %8942 = vmatpush.xpose.msk.msra.mxu3 %vm4114_vm3, %v14047_v48 }
 0x506   : > { %8911 = vmatpush.xpose.msk.msra.mxu0 %vm4114_vm3, %v14022_v14 }
 0x507   : > { %8921 = vmatpush.xpose.msk.msra.mxu1 %vm4114_vm3, %v14022_v14  ;;  %v14228_v40 = vpop.f32.mrf.mxu0 }
 0x508   : > { %8933 = vmatpush.xpose.msk.msra.mxu2 %vm4114_vm3, %v14064_v46 }
 0x509   : > { %8943 = vmatpush.xpose.msk.msra.mxu3 %vm4114_vm3, %v14064_v46 }
 0x50a   : > { %8912 = vmatpush.xpose.msk.msra.mxu0 %vm4114_vm3, %v14047_v48  ;;  %v14242_v62 = vpop.f32.mrf.mxu3 }
 0x50b   : > { %8922 = vmatpush.xpose.msk.msra.mxu1 %vm4114_vm3, %v14047_v48  ;;  %v14232_v6 = vpop.f32.mrf.mxu1  ;;  %v14236_v58 = vpop.f32.mrf.mxu2 }
 0x50c   : > { %8934 = vmatpush.xpose.msk.msra.mxu2 %vm4114_vm3, %v14085_v1 }
 0x50d   : > { %8944 = vmatpush.xpose.msk.msra.mxu3 %vm4114_vm3, %v14085_v1 }
 0x50e   : > { %8913 = vmatpush.xpose.msk.msra.mxu0 %vm4114_vm3, %v14064_v46 }
 0x50f   : > { %8923 = vmatpush.xpose.msk.msra.mxu1 %vm4114_vm3, %v14064_v46 }
 0x510   : > { %8935 = vmatpush.xpose.msk.msra.mxu2 %vm4114_vm3, %v14098_v16 }
 0x511   : > { %8945 = vmatpush.xpose.msk.msra.mxu3 %vm4114_vm3, %v14098_v16 }
 0x512   : > { %8914 = vmatpush.xpose.msk.msra.mxu0 %vm4114_vm3, %v14085_v1 }
 0x513   : > { %8936 = vmatmul.msk.f32.vlgmr.msra.gmra.mxu2 %vm4114_vm3, %v15933_v55  ;;  %8924 = vmatpush.xpose.msk.msra.mxu1 %vm4114_vm3, %v14085_v1  ;;  %v15935_v55 = vld [vmem:[#allocation30_spill] sm:$0xff]  ;;  %v14262_v37 = vpop.f32.mrf.mxu1 }
 0x514   : > { %8968 = vmatpush.xpose.msk.msrb.mxu2 %vm4114_vm3, %v13961_v35  ;;  %8946 = vmatmul.msk.f32.vlgmr.msra.gmra.mxu3 %vm4114_vm3, %v15934_v5  ;;  %v14256_v5 = vpop.f32.mrf.mxu0 }
 0x515   : > { %8978 = vmatpush.xpose.msk.msrb.mxu3 %vm4114_vm3, %v13961_v35 }
 0x516   : > { %8915 = vmatpush.xpose.msk.msra.mxu0 %vm4114_vm3, %v14098_v16  ;;  %v14272_v17 = vpop.f32.mrf.mxu2 }
 0x517   : > { %8925 = vmatpush.xpose.msk.msra.mxu1 %vm4114_vm3, %v14098_v16 }
 0x518   : > { %8969 = vmatpush.xpose.msk.msrb.mxu2 %vm4114_vm3, %v13988_v47 }
 0x519   : > { %8979 = vmatpush.xpose.msk.msrb.mxu3 %vm4114_vm3, %v13988_v47  ;;  %8916 = vmatmul.msk.f32.vlgmr.msra.gmra.mxu0 %vm4114_vm3, %v15937_v42 }
 0x51a   : > { %8948 = vmatpush.xpose.msk.msrb.mxu0 %vm4114_vm3, %v13961_v35  ;;  %8926 = vmatmul.msk.f32.vlgmr.msra.gmra.mxu1 %vm4114_vm3, %v15938_v61  ;;  %v15939_v61 = vld [vmem:[#allocation82_spill] sm:$0xff] }
 0x51b   : > { %8958 = vmatpush.xpose.msk.msrb.mxu1 %vm4114_vm3, %v13961_v35  ;;  %8937 = vmatmul.msk.f32.gmra.mxu2 %vm4114_vm3, %v15935_v55  ;;  %v14278_v55 = vpop.f32.mrf.mxu3  ;;  %v14298_v39 = vpop.f32.mrf.mxu1 }
 0x51c   : > { %8970 = vmatpush.xpose.msk.msrb.mxu2 %vm4114_vm3, %v14003_v45  ;;  %8947 = vmatmul.msk.f32.gmra.mxu3 %vm4114_vm3, %v15936_v32  ;;  %v14292_v42 = vpop.f32.mrf.mxu0  ;;  %v15940_v32 = vld [vmem:[#allocation29_spill] sm:$0xff] }
 0x51d   : > { %8980 = vmatpush.xpose.msk.msrb.mxu3 %vm4114_vm3, %v14003_v45 }
 0x51e   : > { %8949 = vmatpush.xpose.msk.msrb.mxu0 %vm4114_vm3, %v13988_v47  ;;  %v6230_v4 = vpop.f32.mrf.mxu2 }
 0x51f   : > { %8959 = vmatpush.xpose.msk.msrb.mxu1 %vm4114_vm3, %v13988_v47 }
 0x520   : > { %8971 = vmatpush.xpose.msk.msrb.mxu2 %vm4114_vm3, %v14022_v14 }
 0x521   : > { %8981 = vmatpush.xpose.msk.msrb.mxu3 %vm4114_vm3, %v14022_v14  ;;  %8917 = vmatmul.msk.f32.gmra.mxu0 %vm4114_vm3, %v15939_v61  ;;  %v5924_v61 = vadd.f32 %v14106_v26, %v13002_v49 }
 0x522   : > { %8950 = vmatpush.xpose.msk.msrb.mxu0 %vm4114_vm3, %v14003_v45  ;;  %8927 = vmatmul.msk.f32.gmra.mxu1 %vm4114_vm3, %v15940_v32  ;;  %v6231_v32 = vadd.f32 %v6230_v4, %v13222_v20  ;;  %v14327_v20 = vld [vmem:[%s15222_s5 + $0x1b8] sm:$0xff] }
 0x523   : > { %8960 = vmatpush.xpose.msk.msrb.mxu1 %vm4114_vm3, %v14003_v45  ;;  %v6253_v22 = vpop.f32.mrf.mxu3  ;;  %v14333_v44 = vpop.f32.mrf.mxu1 }
 0x524   : > { %8972 = vmatpush.xpose.msk.msrb.mxu2 %vm4114_vm3, %v14047_v48  ;;  %v6254_v29 = vadd.f32 %v6253_v22, %v13226_v52  ;;  %v14314_v27 = vadd.f32 %v6231_v32, %v5924_v61  ;;  %v14329_v52 = vpop.f32.mrf.mxu0  ;;  %v15944_v22 = vld [vmem:[#allocation41_spill] sm:$0xff]  ;;  %v15945_v61 = vld [vmem:[#allocation28_spill] sm:$0xff] }
 0x525   : > { %8982 = vmatpush.xpose.msk.msrb.mxu3 %vm4114_vm3, %v14047_v48  ;;  %v15946_v32 = vld [vmem:[#allocation120_spill] sm:$0xff] }
 0x526   : > { %8951 = vmatpush.xpose.msk.msrb.mxu0 %vm4114_vm3, %v14022_v14  ;;  %15941 = vst [vmem:[#allocation97_spill] sm:$0xff] %v14314_v27  ;;  %v14318_v49 = vadd.f32 %v6254_v29, %v5947_v0  ;;  %v14350_v29 = vld [vmem:[%s15222_s5 + $0x1b0] sm:$0xff] }
 0x527   : > { %8961 = vmatpush.xpose.msk.msrb.mxu1 %vm4114_vm3, %v14022_v14  ;;  %v15943_v0 = vld [vmem:[#allocation31_spill] sm:$0xff] }
 0x528   : > { %8973 = vmatpush.xpose.msk.msrb.mxu2 %vm4114_vm3, %v14064_v46  ;;  %15942 = vst [vmem:[#allocation39_spill] sm:$0xff] %v14318_v49  ;;  %v6013_v49 = vadd.f32 %v14138_v10, %v13043_v43 }
 0x529   : > { %8983 = vmatpush.xpose.msk.msrb.mxu3 %vm4114_vm3, %v14064_v46 }
 0x52a   : > { %8952 = vmatpush.xpose.msk.msrb.mxu0 %vm4114_vm3, %v14047_v48 }
 0x52b   : > { %8962 = vmatpush.xpose.msk.msrb.mxu1 %vm4114_vm3, %v14047_v48  ;;  %v14375_v26 = vpop.f32.mrf.mxu1 }
 0x52c   : > { %8974 = vmatpush.xpose.msk.msrb.mxu2 %vm4114_vm3, %v14085_v1  ;;  %v14369_v4 = vpop.f32.mrf.mxu0 }
 0x52d   : > { %8984 = vmatpush.xpose.msk.msrb.mxu3 %vm4114_vm3, %v14085_v1 }
 0x52e   : > { %8953 = vmatpush.xpose.msk.msrb.mxu0 %vm4114_vm3, %v14064_v46 }
 0x52f   : > { %8963 = vmatpush.xpose.msk.msrb.mxu1 %vm4114_vm3, %v14064_v46 }
 0x530   : > { %8975 = vmatpush.xpose.msk.msrb.mxu2 %vm4114_vm3, %v14098_v16 }
 0x531   : > { %8985 = vmatpush.xpose.msk.msrb.mxu3 %vm4114_vm3, %v14098_v16 }
 0x532   : > { %8954 = vmatpush.xpose.msk.msrb.mxu0 %vm4114_vm3, %v14085_v1 }
 0x533   : > { %8976 = vmatmul.msk.f32.vlgmr.msrb.gmra.mxu2 %vm4114_vm3, %v15793_v8  ;;  %8964 = vmatpush.xpose.msk.msrb.mxu1 %vm4114_vm3, %v14085_v1  ;;  %v14365_v8 = vld [vmem:[%s15222_s5 + $0x1a8] sm:$0xff] }
 0x534   : > { %9008 = vmatpush.xpose.msk.msra.mxu2 %vm4114_vm3, %v14327_v20  ;;  %8986 = vmatmul.msk.f32.vlgmr.msrb.gmra.mxu3 %vm4114_vm3, %v15943_v0 }
 0x535   : > { %9018 = vmatpush.xpose.msk.msra.mxu3 %vm4114_vm3, %v14327_v20 }
 0x536   : > { %8955 = vmatpush.xpose.msk.msrb.mxu0 %vm4114_vm3, %v14098_v16  ;;  %v6319_v0 = vpop.f32.mrf.mxu2  ;;  %v14421_v27 = vpop.f32.mrf.mxu0 }
 0x537   : > { %8965 = vmatpush.xpose.msk.msrb.mxu1 %vm4114_vm3, %v14098_v16 }
 0x538   : > { %9009 = vmatpush.xpose.msk.msra.mxu2 %vm4114_vm3, %v14350_v29 }
 0x539   : > { %9019 = vmatpush.xpose.msk.msra.mxu3 %vm4114_vm3, %v14350_v29  ;;  %8956 = vmatmul.msk.f32.vlgmr.msrb.gmra.mxu0 %vm4114_vm3, %v15945_v61  ;;  %v6036_v61 = vadd.f32 %v14140_v56, %v13051_v7  ;;  %v14427_v7 = vpop.f32.mrf.mxu1  ;;  %v6016_v56 = vadd.f32 %v14174_v41, %v13091_v11  ;;  %v14475_v41 = vld [vmem:[%s15222_s5 + $0x180] sm:$0xff] }
 0x53a   : > { %8988 = vmatpush.xpose.msk.msra.mxu0 %vm4114_vm3, %v13961_v35  ;;  %8966 = vmatmul.msk.f32.vlgmr.msrb.gmra.mxu1 %vm4114_vm3, %v15946_v32 }
 0x53b   : > { %8998 = vmatpush.xpose.msk.msra.mxu1 %vm4114_vm3, %v13961_v35  ;;  %8977 = vmatmul.msk.f32.gmra.mxu2 %vm4114_vm3, %v15803_v2  ;;  %v14407_v2 = vld [vmem:[%s15222_s5 + $0x198] sm:$0xff]  ;;  %v6320_v35 = vadd.f32 %v6319_v0, %v13251_v18  ;;  %v14432_v18 = vld [vmem:[%s15222_s5 + $0x190] sm:$0xff]  ;;  %v6039_v0 = vadd.f32 %v14178_v36, %v13095_v51 }
 0x53c   : > { %9010 = vmatpush.xpose.msk.msra.mxu2 %vm4114_vm3, %v14365_v8  ;;  %8987 = vmatmul.msk.f32.gmra.mxu3 %vm4114_vm3, %v15944_v22  ;;  %v6342_v22 = vpop.f32.mrf.mxu3  ;;  %v15950_v36 = vld [vmem:[#allocation153_spill] sm:$0xff] }
 0x53d   : > { %9020 = vmatpush.xpose.msk.msra.mxu3 %vm4114_vm3, %v14365_v8  ;;  %v6343_v43 = vadd.f32 %v6342_v22, %v13257_v23  ;;  %v14415_v10 = vadd.f32 %v6320_v35, %v6013_v49  ;;  %v15947_v23 = vld [vmem:[#allocation71_spill] sm:$0xff]  ;;  %v15948_v35 = vld [vmem:[#allocation122_spill] sm:$0xff] }
 0x53e   : > { %8989 = vmatpush.xpose.msk.msra.mxu0 %vm4114_vm3, %v13988_v47 }
 0x53f   : > { %8999 = vmatpush.xpose.msk.msra.mxu1 %vm4114_vm3, %v13988_v47  ;;  %v14419_v32 = vadd.f32 %v6343_v43, %v6036_v61  ;;  %v14449_v47 = vld [vmem:[%s15222_s5 + $0x188] sm:$0xff]  ;;  %v6276_v43 = vpop.f32.mrf.mxu0 }
 0x540   : > { %9011 = vmatpush.xpose.msk.msra.mxu2 %vm4114_vm3, %v14384_v25  ;;  %v6277_v51 = vadd.f32 %v6276_v43, %v13378_v53 }
 0x541   : > { %9021 = vmatpush.xpose.msk.msra.mxu3 %vm4114_vm3, %v14384_v25  ;;  %8957 = vmatmul.msk.f32.gmra.mxu0 %vm4114_vm3, %v15947_v23  ;;  %v15949_v23 = vld [vmem:[#allocation80_spill] sm:$0xff] }
 0x542   : > { %8990 = vmatpush.xpose.msk.msra.mxu0 %vm4114_vm3, %v14003_v45  ;;  %8967 = vmatmul.msk.f32.gmra.mxu1 %vm4114_vm3, %v15802_v60  ;;  %v5970_v11 = vadd.f32 %v14228_v40, %v15949_v23  ;;  %v15951_v40 = vld [vmem:[#allocation154_spill] sm:$0xff]  ;;  %v15958_v23 = vld [vmem:[#allocation167_spill] sm:$0xff] }
 0x543   : > { %9000 = vmatpush.xpose.msk.msra.mxu1 %vm4114_vm3, %v14003_v45  ;;  %v6322_v45 = vpop.f32.mrf.mxu2 }
 0x544   : > { %9012 = vmatpush.xpose.msk.msra.mxu2 %vm4114_vm3, %v14407_v2  ;;  %v6323_v60 = vadd.f32 %v6322_v45, %v13302_v3  ;;  %v6345_v49 = vpop.f32.mrf.mxu3  ;;  %v6299_v3 = vpop.f32.mrf.mxu1  ;;  %v5993_v45 = vadd.f32 %v14232_v6, %v15950_v36 }
 0x545   : > { %9022 = vmatpush.xpose.msk.msra.mxu3 %vm4114_vm3, %v14407_v2  ;;  %v6346_v22 = vadd.f32 %v6345_v49, %v15948_v35 }
 0x546   : > { %8991 = vmatpush.xpose.msk.msra.mxu0 %vm4114_vm3, %v14022_v14  ;;  %v14461_v61 = vadd.f32 %v6323_v60, %v6016_v56  ;;  %v6300_v56 = vadd.f32 %v6299_v3, %v15951_v40  ;;  %v14482_v60 = vadd.f32 %v6277_v51, %v5970_v11  ;;  %v6059_v11 = vadd.f32 %v14256_v5, %v15958_v23  ;;  %v15959_v3 = vld [vmem:[#allocation92_spill] sm:$0xff]  ;;  %v15960_v40 = vld [vmem:[#allocation42_spill] sm:$0xff]  ;;  %v15967_v23 = vld [vmem:[#allocation93_spill] sm:$0xff] }
 0x547   : > { %9001 = vmatpush.xpose.msk.msra.mxu1 %vm4114_vm3, %v14022_v14  ;;  %v14467_v14 = vadd.f32 %v6346_v22, %v6039_v0  ;;  %v15957_v0 = vld [vmem:[#allocation52_spill] sm:$0xff]  ;;  %v6082_v36 = vadd.f32 %v14262_v37, %v15959_v3  ;;  %v15972_v3 = vld [vmem:[#allocation19_spill] sm:$0xff] }
 0x548   : > { %9013 = vmatpush.xpose.msk.msra.mxu2 %vm4114_vm3, %v14432_v18  ;;  %v14484_v49 = vadd.f32 %v6300_v56, %v5993_v45  ;;  %v15961_v56 = vld [vmem:[#allocation69_spill] sm:$0xff] }
 0x549   : > { %9023 = vmatpush.xpose.msk.msra.mxu3 %vm4114_vm3, %v14432_v18 }
 0x54a   : > { %8992 = vmatpush.xpose.msk.msra.mxu0 %vm4114_vm3, %v14047_v48 }
 0x54b   : > { %9002 = vmatpush.xpose.msk.msra.mxu1 %vm4114_vm3, %v14047_v48  ;;  %v15954_v48 = vld [vmem:[#allocation14_spill] sm:$0xff] }
 0x54c   : > { %9014 = vmatpush.xpose.msk.msra.mxu2 %vm4114_vm3, %v14449_v47  ;;  %v6105_v6 = vadd.f32 %v14202_v15, %v15954_v48 }
 0x54d   : > { %9024 = vmatpush.xpose.msk.msra.mxu3 %vm4114_vm3, %v14449_v47 }
 0x54e   : > { %8993 = vmatpush.xpose.msk.msra.mxu0 %vm4114_vm3, %v14064_v46 }
 0x54f   : > { %9003 = vmatpush.xpose.msk.msra.mxu1 %vm4114_vm3, %v14064_v46 }
 0x550   : > { %9015 = vmatpush.xpose.msk.msra.mxu2 %vm4114_vm3, %v14475_v41 }
 0x551   : > { %9025 = vmatpush.xpose.msk.msra.mxu3 %vm4114_vm3, %v14475_v41 }
 0x552   : > { %8994 = vmatpush.xpose.msk.msra.mxu0 %vm4114_vm3, %v14085_v1 }
 0x553   : > { %9016 = vmatmul.msk.f32.vlgmr.msra.gmra.mxu2 %vm4114_vm3, %v11774_v38  ;;  %9004 = vmatpush.xpose.msk.msra.mxu1 %vm4114_vm3, %v14085_v1  ;;  %v15952_v38 = vld [vmem:[#allocation32_spill] sm:$0xff]  ;;  %v15956_v1 = vld [vmem:[#allocation119_spill] sm:$0xff] }
 0x554   : > { %9048 = vmatpush.xpose.msk.msrb.mxu2 %vm4114_vm3, %v14327_v20  ;;  %9026 = vmatmul.msk.f32.vlgmr.msra.gmra.mxu3 %vm4114_vm3, %v11782_v50  ;;  %v15953_v50 = vld [vmem:[#allocation89_spill] sm:$0xff] }
 0x555   : > { %9058 = vmatpush.xpose.msk.msrb.mxu3 %vm4114_vm3, %v14327_v20 }
 0x556   : > { %8995 = vmatpush.xpose.msk.msra.mxu0 %vm4114_vm3, %v14098_v16  ;;  %v6411_v53 = vpop.f32.mrf.mxu2  ;;  %v6365_v43 = vpop.f32.mrf.mxu0 }
 0x557   : > { %9005 = vmatpush.xpose.msk.msra.mxu1 %vm4114_vm3, %v14098_v16  ;;  %v6434_v46 = vpop.f32.mrf.mxu3  ;;  %v6128_v16 = vadd.f32 %v14206_v34, %v15956_v1  ;;  %v6366_v34 = vadd.f32 %v6365_v43, %v13406_v21  ;;  %v6388_v51 = vpop.f32.mrf.mxu1 }
 0x558   : > { %9049 = vmatpush.xpose.msk.msrb.mxu2 %vm4114_vm3, %v14350_v29  ;;  %v6435_v35 = vadd.f32 %v6434_v46, %v15957_v0  ;;  %v6389_v45 = vadd.f32 %v6388_v51, %v13412_v19  ;;  %v15962_v19 = vld [vmem:[#allocation160_spill] sm:$0xff] }
 0x559   : > { %9059 = vmatpush.xpose.msk.msrb.mxu3 %vm4114_vm3, %v14350_v29  ;;  %8996 = vmatmul.msk.f32.vlgmr.msra.gmra.mxu0 %vm4114_vm3, %v15952_v38  ;;  %v14564_v5 = vadd.f32 %v6366_v34, %v6059_v11  ;;  %v6108_v37 = vadd.f32 %v14236_v58, %v15962_v19  ;;  %v15966_v0 = vld [vmem:[#allocation104_spill] sm:$0xff]  ;;  %v6085_v11 = vadd.f32 %v14298_v39, %v15967_v23  ;;  %v15971_v39 = vld [vmem:[#allocation17_spill] sm:$0xff] }
 0x55a   : > { %9028 = vmatpush.xpose.msk.msrb.mxu0 %vm4114_vm3, %v14327_v20  ;;  %9006 = vmatmul.msk.f32.vlgmr.msra.gmra.mxu1 %vm4114_vm3, %v15953_v50  ;;  %v14548_v15 = vadd.f32 %v6435_v35, %v6128_v16  ;;  %v14568_v38 = vadd.f32 %v6389_v45, %v6082_v36  ;;  %v15963_v50 = vld [vmem:[#allocation55_spill] sm:$0xff]  ;;  %v6062_v58 = vadd.f32 %v14292_v42, %v15966_v0  ;;  %v15973_v45 = vld [vmem:[#allocation129_spill] sm:$0xff]  ;;  %v15980_v0 = vld [vmem:[#allocation132_spill] sm:$0xff] }
 0x55b   : > { %9038 = vmatpush.xpose.msk.msrb.mxu1 %vm4114_vm3, %v14327_v20  ;;  %9017 = vmatmul.msk.f32.gmra.mxu2 %vm4114_vm3, %v11776_v59  ;;  %v15955_v59 = vld [vmem:[#allocation70_spill] sm:$0xff] }
 0x55c   : > { %9050 = vmatpush.xpose.msk.msrb.mxu2 %vm4114_vm3, %v14365_v8  ;;  %9027 = vmatmul.msk.f32.gmra.mxu3 %vm4114_vm3, %v11784_v28  ;;  %v6412_v28 = vadd.f32 %v6411_v53, %v15955_v59 }
 0x55d   : > { %9060 = vmatpush.xpose.msk.msrb.mxu3 %vm4114_vm3, %v14365_v8 }
 0x55e   : > { %9029 = vmatpush.xpose.msk.msrb.mxu0 %vm4114_vm3, %v14350_v29  ;;  %v14544_v22 = vadd.f32 %v6412_v28, %v6105_v6  ;;  %v6414_v21 = vpop.f32.mrf.mxu2  ;;  %v15964_v6 = vld [vmem:[#allocation91_spill] sm:$0xff]  ;;  %v15965_v28 = vld [vmem:[#allocation158_spill] sm:$0xff]  ;;  %v6368_v16 = vpop.f32.mrf.mxu0 }
 0x55f   : > { %9039 = vmatpush.xpose.msk.msrb.mxu1 %vm4114_vm3, %v14350_v29  ;;  %v6415_v53 = vadd.f32 %v6414_v21, %v15963_v50  ;;  %v6437_v48 = vpop.f32.mrf.mxu3  ;;  %v6131_v59 = vadd.f32 %v14242_v62, %v15964_v6  ;;  %v6369_v62 = vadd.f32 %v6368_v16, %v13448_v24  ;;  %v6391_v43 = vpop.f32.mrf.mxu1  ;;  %v15968_v24 = vld [vmem:[#allocation34_spill] sm:$0xff]  ;;  %v15977_v6 = vld [vmem:[#allocation61_spill] sm:$0xff] }
 0x560   : > { %9051 = vmatpush.xpose.msk.msrb.mxu2 %vm4114_vm3, %v14384_v25  ;;  %v6438_v46 = vadd.f32 %v6437_v48, %v15965_v28  ;;  %v6392_v34 = vadd.f32 %v6391_v43, %v13452_v13  ;;  %v15969_v13 = vld [vmem:[#allocation37_spill] sm:$0xff]  ;;  %v15981_v43 = vld [vmem:[#allocation130_spill] sm:$0xff] }
 0x561   : > { %9061 = vmatpush.xpose.msk.msrb.mxu3 %vm4114_vm3, %v14384_v25  ;;  %8997 = vmatmul.msk.f32.gmra.mxu0 %vm4114_vm3, %v15960_v40  ;;  %v14586_v1 = vadd.f32 %v6415_v53, %v6108_v37  ;;  %v14602_v42 = vadd.f32 %v6369_v62, %v6062_v58  ;;  %v6151_v40 = vadd.f32 %v14329_v52, %v15973_v45  ;;  %v15975_v37 = vld [vmem:[#allocation163_spill] sm:$0xff]  ;;  %v15976_v53 = vld [vmem:[#allocation174_spill] sm:$0xff] }
 0x562   : > { %9030 = vmatpush.xpose.msk.msrb.mxu0 %vm4114_vm3, %v14365_v8  ;;  %9007 = vmatmul.msk.f32.gmra.mxu1 %vm4114_vm3, %v15961_v56  ;;  %v14592_v35 = vadd.f32 %v6438_v46, %v6131_v59  ;;  %v14604_v51 = vadd.f32 %v6392_v34, %v6085_v11  ;;  %v15974_v56 = vld [vmem:[#allocation96_spill] sm:$0xff]  ;;  %v6174_v50 = vadd.f32 %v14333_v44, %v15975_v37  ;;  %v15978_v59 = vld [vmem:[#allocation62_spill] sm:$0xff]  ;;  %v15982_v11 = vld [vmem:[#allocation133_spill] sm:$0xff] }
 0x563   : > { %9040 = vmatpush.xpose.msk.msrb.mxu1 %vm4114_vm3, %v14365_v8  ;;  %v15979_v46 = vld [vmem:[#allocation94_spill] sm:$0xff]  ;;  %v6177_v23 = vadd.f32 %v14375_v26, %v15981_v43  ;;  %v15997_v43 = vld [vmem:[#allocation108_spill] sm:$0xff] }
 0x564   : > { %9052 = vmatpush.xpose.msk.msrb.mxu2 %vm4114_vm3, %v14407_v2  ;;  %v6154_v16 = vadd.f32 %v14369_v4, %v15979_v46  ;;  %v15988_v26 = vld [vmem:[#allocation66_spill] sm:$0xff] }
 0x565   : > { %9062 = vmatpush.xpose.msk.msrb.mxu3 %vm4114_vm3, %v14407_v2 }
 0x566   : > { %9031 = vmatpush.xpose.msk.msrb.mxu0 %vm4114_vm3, %v14384_v25 }
 0x567   : > { %9041 = vmatpush.xpose.msk.msrb.mxu1 %vm4114_vm3, %v14384_v25 }
 0x568   : > { %9053 = vmatpush.xpose.msk.msrb.mxu2 %vm4114_vm3, %v14432_v18 }
 0x569   : > { %9063 = vmatpush.xpose.msk.msrb.mxu3 %vm4114_vm3, %v14432_v18 }
 0x56a   : > { %9032 = vmatpush.xpose.msk.msrb.mxu0 %vm4114_vm3, %v14407_v2 }
 0x56b   : > { %9042 = vmatpush.xpose.msk.msrb.mxu1 %vm4114_vm3, %v14407_v2 }
 0x56c   : > { %9054 = vmatpush.xpose.msk.msrb.mxu2 %vm4114_vm3, %v14449_v47 }
 0x56d   : > { %9064 = vmatpush.xpose.msk.msrb.mxu3 %vm4114_vm3, %v14449_v47 }
 0x56e   : > { %9033 = vmatpush.xpose.msk.msrb.mxu0 %vm4114_vm3, %v14432_v18 }
 0x56f   : > { %9043 = vmatpush.xpose.msk.msrb.mxu1 %vm4114_vm3, %v14432_v18 }
 0x570   : > { %9055 = vmatpush.xpose.msk.msrb.mxu2 %vm4114_vm3, %v14475_v41 }
 0x571   : > { %9065 = vmatpush.xpose.msk.msrb.mxu3 %vm4114_vm3, %v14475_v41 }
 0x572   : > { %9034 = vmatpush.xpose.msk.msrb.mxu0 %vm4114_vm3, %v14449_v47 }
 0x573   : > { %9056 = vmatmul.msk.f32.vlgmr.msrb.gmra.mxu2 %vm4114_vm3, %v15870_v57  ;;  %9044 = vmatpush.xpose.msk.msrb.mxu1 %vm4114_vm3, %v14449_v47  ;;  %v15970_v57 = vld [vmem:[#allocation38_spill] sm:$0xff] }
 0x574   : > { %9088 = vmatpush.xpose.msk.msra.mxu2 %vm4114_vm3, %v14327_v20  ;;  %9066 = vmatmul.msk.f32.vlgmr.msrb.gmra.mxu3 %vm4114_vm3, %v15968_v24 }
 0x575   : > { %9098 = vmatpush.xpose.msk.msra.mxu3 %vm4114_vm3, %v14327_v20 }
 0x576   : > { %9035 = vmatpush.xpose.msk.msrb.mxu0 %vm4114_vm3, %v14475_v41  ;;  %v6457_v36 = vpop.f32.mrf.mxu0 }
 0x577   : > { %9045 = vmatpush.xpose.msk.msrb.mxu1 %vm4114_vm3, %v14475_v41  ;;  %v6458_v21 = vadd.f32 %v6457_v36, %v15974_v56  ;;  %v6480_v19 = vpop.f32.mrf.mxu1 }
 0x578   : > { %9089 = vmatpush.xpose.msk.msra.mxu2 %vm4114_vm3, %v14350_v29  ;;  %v6481_v48 = vadd.f32 %v6480_v19, %v15976_v53  ;;  %v15993_v53 = vld [vmem:[#allocation168_spill] sm:$0xff] }
 0x579   : > { %9099 = vmatpush.xpose.msk.msra.mxu3 %vm4114_vm3, %v14350_v29  ;;  %9036 = vmatmul.msk.f32.vlgmr.msrb.gmra.mxu0 %vm4114_vm3, %v15971_v39  ;;  %v14674_v52 = vadd.f32 %v6458_v21, %v6151_v40 }
 0x57a   : > { %9068 = vmatpush.xpose.msk.msra.mxu0 %vm4114_vm3, %v14327_v20  ;;  %9046 = vmatmul.msk.f32.vlgmr.msrb.gmra.mxu1 %vm4114_vm3, %v15972_v3  ;;  %v14678_v28 = vadd.f32 %v6481_v48, %v6174_v50  ;;  %v15992_v3 = vld [vmem:[#allocation126_spill] sm:$0xff]  ;;  %v6228_v48 = vadd.f32 %v14272_v17, %v15993_v53  ;;  %v16000_v17 = vld [vmem:[#allocation175_spill] sm:$0xff] }
 0x57b   : > { %9078 = vmatpush.xpose.msk.msra.mxu1 %vm4114_vm3, %v14327_v20  ;;  %9057 = vmatmul.msk.f32.gmra.mxu2 %vm4114_vm3, %v15969_v13  ;;  %v15989_v13 = vld [vmem:[#allocation76_spill] sm:$0xff] }
 0x57c   : > { %9090 = vmatpush.xpose.msk.msra.mxu2 %vm4114_vm3, %v14365_v8  ;;  %9067 = vmatmul.msk.f32.gmra.mxu3 %vm4114_vm3, %v15970_v57 }
 0x57d   : > { %9100 = vmatpush.xpose.msk.msra.mxu3 %vm4114_vm3, %v14365_v8 }
 0x57e   : > { %9069 = vmatpush.xpose.msk.msra.mxu0 %vm4114_vm3, %v14350_v29  ;;  %v6460_v44 = vpop.f32.mrf.mxu0 }
 0x57f   : > { %9079 = vmatpush.xpose.msk.msra.mxu1 %vm4114_vm3, %v14350_v29  ;;  %v6461_v58 = vadd.f32 %v6460_v44, %v15980_v0  ;;  %v6483_v62 = vpop.f32.mrf.mxu1 }
 0x580   : > { %9091 = vmatpush.xpose.msk.msra.mxu2 %vm4114_vm3, %v14384_v25  ;;  %v6484_v34 = vadd.f32 %v6483_v62, %v15982_v11 }
 0x581   : > { %9101 = vmatpush.xpose.msk.msra.mxu3 %vm4114_vm3, %v14384_v25  ;;  %9037 = vmatmul.msk.f32.gmra.mxu0 %vm4114_vm3, %v15977_v6  ;;  %v14702_v24 = vadd.f32 %v6461_v58, %v6154_v16  ;;  %v15995_v16 = vld [vmem:[#allocation36_spill] sm:$0xff]  ;;  %v15996_v58 = vld [vmem:[#allocation166_spill] sm:$0xff] }
 0x582   : > { %9070 = vmatpush.xpose.msk.msra.mxu0 %vm4114_vm3, %v14365_v8  ;;  %9047 = vmatmul.msk.f32.gmra.mxu1 %vm4114_vm3, %v15978_v59  ;;  %v14704_v4 = vadd.f32 %v6484_v34, %v6177_v23  ;;  %v15994_v59 = vld [vmem:[#allocation103_spill] sm:$0xff]  ;;  %v5921_v0 = vadd.f32 %v14066_v31, %v15995_v16  ;;  %v15998_v34 = vld [vmem:[#allocation48_spill] sm:$0xff]  ;;  %v14821_v31 = vld [vmem:[%s15223_s6] ss:$0 sm:$0xff] }
 0x583   : > { %9080 = vmatpush.xpose.msk.msra.mxu1 %vm4114_vm3, %v14365_v8  ;;  %15983 = vst [vmem:[#allocation16_spill] sm:$0xff] %v14702_v24  ;;  %v6251_v44 = vadd.f32 %v14278_v55, %v15994_v59  ;;  %v16027_v24 = vld [vmem:[#allocation180_spill] sm:$0xff] }
 0x584   : > { %9092 = vmatpush.xpose.msk.msra.mxu2 %vm4114_vm3, %v14407_v2  ;;  %15984 = vst [vmem:[#allocation127_spill] sm:$0xff] %v14704_v4  ;;  %v16026_v4 = vld [vmem:[#allocation134_spill] sm:$0xff] }
 0x585   : > { %9102 = vmatpush.xpose.msk.msra.mxu3 %vm4114_vm3, %v14407_v2 }
 0x586   : > { %9071 = vmatpush.xpose.msk.msra.mxu0 %vm4114_vm3, %v14384_v25 }
 0x587   : > { %9081 = vmatpush.xpose.msk.msra.mxu1 %vm4114_vm3, %v14384_v25 }
 0x588   : > { %9093 = vmatpush.xpose.msk.msra.mxu2 %vm4114_vm3, %v14432_v18 }
 0x589   : > { %9103 = vmatpush.xpose.msk.msra.mxu3 %vm4114_vm3, %v14432_v18 }
 0x58a   : > { %9072 = vmatpush.xpose.msk.msra.mxu0 %vm4114_vm3, %v14407_v2 }
 0x58b   : > { %9082 = vmatpush.xpose.msk.msra.mxu1 %vm4114_vm3, %v14407_v2 }
 0x58c   : > { %9094 = vmatpush.xpose.msk.msra.mxu2 %vm4114_vm3, %v14449_v47 }
 0x58d   : > { %9104 = vmatpush.xpose.msk.msra.mxu3 %vm4114_vm3, %v14449_v47 }
 0x58e   : > { %9073 = vmatpush.xpose.msk.msra.mxu0 %vm4114_vm3, %v14432_v18 }
 0x58f   : > { %9083 = vmatpush.xpose.msk.msra.mxu1 %vm4114_vm3, %v14432_v18 }
 0x590   : > { %9095 = vmatpush.xpose.msk.msra.mxu2 %vm4114_vm3, %v14475_v41 }
 0x591   : > { %9105 = vmatpush.xpose.msk.msra.mxu3 %vm4114_vm3, %v14475_v41 }
 0x592   : > { %9074 = vmatpush.xpose.msk.msra.mxu0 %vm4114_vm3, %v14449_v47 }
 0x593   : > { %9096 = vmatmul.msk.f32.vlgmr.msra.gmra.mxu2 %vm4114_vm3, %v15888_v30  ;;  %9084 = vmatpush.xpose.msk.msra.mxu1 %vm4114_vm3, %v14449_v47  ;;  %v15985_v30 = vld [vmem:[#allocation18_spill] sm:$0xff] }
 0x594   : > { %9106 = vmatmul.msk.f32.vlgmr.msra.gmra.mxu3 %vm4114_vm3, %v15889_v33  ;;  %v15986_v33 = vld [vmem:[#allocation20_spill] sm:$0xff] }
 0x596   : > { %9075 = vmatpush.xpose.msk.msra.mxu0 %vm4114_vm3, %v14475_v41  ;;  %v14786_v36 = vpop.f32.mrf.mxu0 }
 0x597   : > { %9085 = vmatpush.xpose.msk.msra.mxu1 %vm4114_vm3, %v14475_v41  ;;  %v14788_v45 = vpop.f32.mrf.mxu1 }
 0x599   : > { %9076 = vmatmul.msk.f32.vlgmr.msra.gmra.mxu0 %vm4114_vm3, %v15985_v30  ;;  %v5944_v30 = vadd.f32 %v14070_v54, %v15998_v34  ;;  %v14827_v54 = vld [vmem:[%s15224_s7] ss:$0 sm:$0xff] }
 0x59a   : > { %9108 = vmatpush.xpose.msk.msrb.mxu0 %vm4114_vm3, %v14327_v20  ;;  %9086 = vmatmul.msk.f32.vlgmr.msra.gmra.mxu1 %vm4114_vm3, %v15986_v33  ;;  %v15999_v33 = vld [vmem:[#allocation131_spill] sm:$0xff] }
 0x59b   : > { %9118 = vmatpush.xpose.msk.msrb.mxu1 %vm4114_vm3, %v14327_v20  ;;  %9097 = vmatmul.msk.f32.gmra.mxu2 %vm4114_vm3, %v15894_v9  ;;  %v6527_v9 = vpop.f32.mrf.mxu2  ;;  %v6550_v20 = vpop.f32.mrf.mxu3 }
 0x59c   : > { %9107 = vmatmul.msk.f32.gmra.mxu3 %vm4114_vm3, %v15895_v12  ;;  %v15987_v12 = vld [vmem:[#allocation65_spill] sm:$0xff]  ;;  %v6528_v62 = vadd.f32 %v6527_v9, %v15996_v58 }
 0x59e   : > { %9109 = vmatpush.xpose.msk.msrb.mxu0 %vm4114_vm3, %v14350_v29  ;;  %v14794_v56 = vpop.f32.mrf.mxu0 }
 0x59f   : > { %9119 = vmatpush.xpose.msk.msrb.mxu1 %vm4114_vm3, %v14350_v29  ;;  %v14796_v21 = vpop.f32.mrf.mxu1 }
 0x5a1   : > { %9077 = vmatmul.msk.f32.gmra.mxu0 %vm4114_vm3, %v15987_v12  ;;  %v6551_v12 = vadd.f32 %v6550_v20, %v15999_v33  ;;  %v16005_v33 = vld [vmem:[#allocation164_spill] sm:$0xff] }
 0x5a2   : > { %9110 = vmatpush.xpose.msk.msrb.mxu0 %vm4114_vm3, %v14365_v8  ;;  %9087 = vmatmul.msk.f32.gmra.mxu1 %vm4114_vm3, %v15988_v26 }
 0x5a3   : > { %9120 = vmatpush.xpose.msk.msrb.mxu1 %vm4114_vm3, %v14365_v8  ;;  %v6530_v29 = vpop.f32.mrf.mxu2  ;;  %v6553_v8 = vpop.f32.mrf.mxu3 }
 0x5a6   : > { %9111 = vmatpush.xpose.msk.msrb.mxu0 %vm4114_vm3, %v14384_v25 }
 0x5a7   : > { %9121 = vmatpush.xpose.msk.msrb.mxu1 %vm4114_vm3, %v14384_v25 }
 0x5aa   : > { %9112 = vmatpush.xpose.msk.msrb.mxu0 %vm4114_vm3, %v14407_v2 }
 0x5ab   : > { %9122 = vmatpush.xpose.msk.msrb.mxu1 %vm4114_vm3, %v14407_v2  ;;  %v14766_v25 = vpop.f32.mrf.mxu2  ;;  %v14770_v2 = vpop.f32.mrf.mxu3 }
 0x5ae   : > { %9113 = vmatpush.xpose.msk.msrb.mxu0 %vm4114_vm3, %v14432_v18 }
 0x5af   : > { %9123 = vmatpush.xpose.msk.msrb.mxu1 %vm4114_vm3, %v14432_v18  ;;  %v15990_v18 = vld [vmem:[#allocation79_spill] sm:$0xff] }
 0x5b2   : > { %9114 = vmatpush.xpose.msk.msrb.mxu0 %vm4114_vm3, %v14449_v47 }
 0x5b3   : > { %9124 = vmatpush.xpose.msk.msrb.mxu1 %vm4114_vm3, %v14449_v47  ;;  %v14778_v57 = vpop.f32.mrf.mxu2  ;;  %v14780_v39 = vpop.f32.mrf.mxu3  ;;  %v15991_v47 = vld [vmem:[#allocation47_spill] sm:$0xff] }
 0x5b6   : > { %9115 = vmatpush.xpose.msk.msrb.mxu0 %vm4114_vm3, %v14475_v41  ;;  %v14802_v50 = vpop.f32.mrf.mxu0 }
 0x5b7   : > { %9125 = vmatpush.xpose.msk.msrb.mxu1 %vm4114_vm3, %v14475_v41  ;;  %v14806_v6 = vpop.f32.mrf.mxu1 }
 0x5b9   : > { %9116 = vmatmul.msk.f32.vlgmr.msrb.gmra.mxu0 %vm4114_vm3, %v15989_v13  ;;  %v7090_v13 = vadd.f32 %v6228_v48, %v5921_v0  ;;  %v16001_v48 = vld [vmem:[#allocation10_spill] sm:$0xff]  ;;  %v16002_v0 = vld [vmem:[#allocation95_spill] sm:$0xff] }
 0x5ba   : > { %9126 = vmatmul.msk.f32.vlgmr.msrb.gmra.mxu1 %vm4114_vm3, %v15990_v18  ;;  %v6531_v58 = vadd.f32 %v6530_v29, %v16002_v0 }
 0x5bb   : > { %v14790_v41 = vpop.f32.mrf.mxu2  ;;  %v14792_v40 = vpop.f32.mrf.mxu3 }
 0x5be   : > { %v14829_v20 = vpop.f32.mrf.mxu0 }
 0x5c1   : > { %9117 = vmatmul.msk.f32.gmra.mxu0 %vm4114_vm3, %v15991_v47  ;;  %v7092_v47 = vadd.f32 %v6251_v44, %v5944_v30  ;;  %v14832_v44 = vpop.f32.mrf.mxu1 }
 0x5c2   : > { %9127 = vmatmul.msk.f32.gmra.mxu1 %vm4114_vm3, %v15992_v3 }
 0x5c3   : > { %v14798_v19 = vpop.f32.mrf.mxu2  ;;  %v14800_v37 = vpop.f32.mrf.mxu3 }
 0x5d6   : > { %v6827_v46 = vpop.f32.mrf.mxu2 }
 0x5d7   : > { %v6828_v23 = vadd.f32 %v6827_v46, %v15997_v43  ;;  %v6850_v11 = vpop.f32.mrf.mxu3  ;;  %v16003_v43 = vld [vmem:[#allocation59_spill] sm:$0xff]  ;;  %v14851_v0 = vpop.f32.mrf.mxu1 }
 0x5d8   : > { %v6851_v26 = vadd.f32 %v6850_v11, %v16000_v17  ;;  %v16004_v11 = vld [vmem:[#allocation173_spill] sm:$0xff] }
 0x5d9   : > { %v7114_v18 = vadd.f32 %v6828_v23, %v6528_v62  ;;  %v6554_v34 = vadd.f32 %v6553_v8, %v16004_v11  ;;  %v14846_v8 = vpop.f32.mrf.mxu0 }
 0x5da   : > { %v7116_v55 = vadd.f32 %v6851_v26, %v6551_v12 }
 0x5db   : > { %v7138_v3 = vadd.f32 %v7114_v18, %v7090_v13 }
 0x5dc   : > { %v7140_v9 = vadd.f32 %v7116_v55, %v7092_v47  ;;  %v16006_v55 = vld [vmem:[#allocation97_spill] sm:$0xff] }
 0x5dd   : > { %v7162_v53 = vadd.f32 %v7138_v3, %v13842_v63 }
 0x5de   : > { %v7164_v59 = vadd.f32 %v7140_v9, %v16001_v48  ;;  %v6830_v16 = vpop.f32.mrf.mxu2  ;;  %v16007_v9 = vld [vmem:[#allocation39_spill] sm:$0xff] }
 0x5df   : > { %v7189_v46 = vmul.f32 %v14821_v31, %v7162_v53  ;;  %v6831_v63 = vadd.f32 %v6830_v16, %v16003_v43  ;;  %v6853_v23 = vpop.f32.mrf.mxu3 }
 0x5e0   : > { %v7191_v62 = vmul.f32 %v14821_v31, %v7164_v59  ;;  %v6854_v12 = vadd.f32 %v6853_v23, %v16005_v33  ;;  %v16008_v59 = vld [vmem:[#allocation12_spill] sm:$0xff] }
 0x5e1   : > { %v7216_v30 = vadd.f32 %v14827_v54, %v7189_v46  ;;  %v7115_v26 = vadd.f32 %v6831_v63, %v6531_v58  ;;  %v16009_v58 = vld [vmem:[#allocation183_spill] sm:$0xff] }
 0x5e2   : > { %v7218_v17 = vadd.f32 %v14827_v54, %v7191_v62  ;;  %v7117_v18 = vadd.f32 %v6854_v12, %v6554_v34 }
 0x5e3   : > { %v7240_v13 = vmax.f32 %v7216_v30, 0.0  ;;  %v7139_v29 = vadd.f32 %v7115_v26, %v16006_v55  ;;  %v14862_v26 = vpop.f32.mrf.mxu0 }
 0x5e4   : > { %v7242_v47 = vmax.f32 %v7218_v17, 0.0  ;;  %v7141_v53 = vadd.f32 %v7117_v18, %v16007_v9 }
 0x5e5   : > { %v7265_v3 = vsel %vm7264_vm4, %v7240_v13, 0.0  ;;  %v7163_v46 = vadd.f32 %v7139_v29, %v16008_v59  ;;  %v14864_v13 = vpop.f32.mrf.mxu1  ;;  %v16011_v29 = vld [vmem:[#allocation148_spill] sm:$0xff] }
 0x5e6   : > { %v7266_v48 = vsel %vm7264_vm4, %v7242_v47, 0.0  ;;  %v7165_v62 = vadd.f32 %v7141_v53, %v16009_v58  ;;  %v16010_v47 = vld [vmem:[#allocation105_spill] sm:$0xff]  ;;  %v16012_v53 = vld [vmem:[#allocation106_spill] sm:$0xff]  ;;  %v16013_v59 = vld [vmem:[#allocation60_spill] sm:$0xff] }
 0x5e7   : > { %v14849_v16 = vadd.f32 %v7266_v48, %v7265_v3  ;;  %v7190_v43 = vmul.f32 %v14821_v31, %v7163_v46  ;;  %v6620_v55 = vadd.f32 %v14766_v25, %v16010_v47  ;;  %v6643_v48 = vadd.f32 %v14770_v2, %v16012_v53  ;;  %v16014_v58 = vld [vmem:[#allocation123_spill] sm:$0xff]  ;;  %v16019_v2 = vld [vmem:[#allocation109_spill] sm:$0xff] }
 0x5e8   : > { %v7192_v63 = vmul.f32 %v14821_v31, %v7165_v62  ;;  %v6274_v62 = vadd.f32 %v14421_v27, %v16014_v58  ;;  %v16020_v53 = vld [vmem:[#allocation157_spill] sm:$0xff] }
 0x5e9   : > { %v7217_v23 = vadd.f32 %v14827_v54, %v7190_v43 }
 0x5ea   : > { %v7219_v11 = vadd.f32 %v14827_v54, %v7192_v63  ;;  %v16015_v63 = vld [vmem:[#allocation51_spill] sm:$0xff] }
 0x5eb   : > { %v7241_v34 = vmax.f32 %v7217_v23, 0.0  ;;  %v6297_v23 = vadd.f32 %v14427_v7, %v16015_v63  ;;  %v16024_v63 = vld [vmem:[#allocation114_spill] sm:$0xff] }
 0x5ec   : > { %v7243_v30 = vmax.f32 %v7219_v11, 0.0 }
 0x5ed   : > { %v7289_v33 = vsel %vm7288_vm5, %v7241_v34, 0.0 }
 0x5ee   : > { %v7290_v12 = vsel %vm7288_vm5, %v7243_v30, 0.0  ;;  %v16016_v30 = vld [vmem:[#allocation90_spill] sm:$0xff] }
 0x5ef   : > { %v14860_v17 = vadd.f32 %v7290_v12, %v7289_v33  ;;  %v16017_v33 = vld [vmem:[#allocation83_spill] sm:$0xff]  ;;  %v16018_v12 = vld [vmem:[#allocation56_spill] sm:$0xff] }
 0x5f0   : > { %v5967_v25 = vadd.f32 %v16017_v33, %v16016_v30 }
 0x5f2   : > { %v7094_v58 = vadd.f32 %v6274_v62, %v5967_v25  ;;  %v16029_v25 = vld [vmem:[#allocation176_spill] sm:$0xff] }
 0x5f6   : > { %v6919_v18 = vpop.f32.mrf.mxu2  ;;  %v6873_v34 = vpop.f32.mrf.mxu0 }
 0x5f7   : > { %v6920_v3 = vadd.f32 %v6919_v18, %v16011_v29  ;;  %v6942_v9 = vpop.f32.mrf.mxu3  ;;  %v6574_v18 = vadd.f32 %v14786_v36, %v16018_v12  ;;  %v6874_v29 = vadd.f32 %v6873_v34, %v16019_v2 }
 0x5f8   : > { %v6943_v46 = vadd.f32 %v6942_v9, %v16013_v59  ;;  %v6896_v9 = vpop.f32.mrf.mxu1  ;;  %v16021_v59 = vld [vmem:[#allocation155_spill] sm:$0xff] }
 0x5f9   : > { %v7122_v43 = vadd.f32 %v6920_v3, %v6620_v55  ;;  %v5990_v27 = vadd.f32 %v16021_v59, %v16020_v53  ;;  %v16022_v55 = vld [vmem:[#allocation159_spill] sm:$0xff]  ;;  %v7118_v33 = vadd.f32 %v6874_v29, %v6574_v18  ;;  %v6623_v53 = vadd.f32 %v14778_v57, %v16026_v4  ;;  %v16031_v29 = vld [vmem:[#allocation100_spill] sm:$0xff] }
 0x5fa   : > { %v7124_v11 = vadd.f32 %v6943_v46, %v6643_v48  ;;  %v6597_v3 = vadd.f32 %v14788_v45, %v16022_v55  ;;  %v16023_v48 = vld [vmem:[#allocation9_spill] sm:$0xff] }
 0x5fb   : > { %v7146_v47 = vadd.f32 %v7122_v43, %v14415_v10  ;;  %v6897_v46 = vadd.f32 %v6896_v9, %v16023_v48  ;;  %v7096_v36 = vadd.f32 %v6297_v23, %v5990_v27  ;;  %v16025_v10 = vld [vmem:[#allocation50_spill] sm:$0xff]  ;;  %v7142_v34 = vadd.f32 %v7118_v33, %v7094_v58  ;;  %v16030_v23 = vld [vmem:[#allocation140_spill] sm:$0xff] }
 0x5fc   : > { %v7148_v7 = vadd.f32 %v7124_v11, %v14419_v32  ;;  %v16028_v32 = vld [vmem:[#allocation169_spill] sm:$0xff]  ;;  %v6577_v9 = vadd.f32 %v14794_v56, %v16031_v29  ;;  %v16032_v27 = vld [vmem:[#allocation54_spill] sm:$0xff] }
 0x5fd   : > { %v7170_v30 = vadd.f32 %v7146_v47, %v16024_v63  ;;  %v7120_v12 = vadd.f32 %v6897_v46, %v6597_v3  ;;  %v6646_v11 = vadd.f32 %v14780_v39, %v16028_v32  ;;  %v7166_v18 = vadd.f32 %v7142_v34, %v16029_v25  ;;  %v16033_v46 = vld [vmem:[#allocation49_spill] sm:$0xff]  ;;  %v16034_v63 = vld [vmem:[#allocation179_spill] sm:$0xff] }
 0x5fe   : > { %v7172_v43 = vadd.f32 %v7148_v7, %v16025_v10  ;;  %v6922_v2 = vpop.f32.mrf.mxu2  ;;  %v6876_v4 = vpop.f32.mrf.mxu0  ;;  %v16035_v56 = vld [vmem:[#allocation149_spill] sm:$0xff] }
 0x5ff   : > { %v7144_v59 = vadd.f32 %v7120_v12, %v7096_v36  ;;  %v6923_v45 = vadd.f32 %v6922_v2, %v16027_v24  ;;  %v6945_v55 = vpop.f32.mrf.mxu3  ;;  %v7197_v62 = vmul.f32 %v14821_v31, %v7170_v30  ;;  %v7193_v24 = vmul.f32 %v14821_v31, %v7166_v18  ;;  %v16038_v29 = vld [vmem:[#allocation177_spill] sm:$0xff] }
 0x600   : > { %v6946_v47 = vadd.f32 %v6945_v55, %v16030_v23  ;;  %v7199_v57 = vmul.f32 %v14821_v31, %v7172_v43  ;;  %v6877_v39 = vadd.f32 %v6876_v4, %v16033_v46  ;;  %v6899_v58 = vpop.f32.mrf.mxu1  ;;  %v6600_v30 = vadd.f32 %v14796_v21, %v16034_v63 }
 0x601   : > { %v7168_v3 = vadd.f32 %v7144_v59, %v16032_v27  ;;  %v7123_v7 = vadd.f32 %v6923_v45, %v6623_v53  ;;  %v6900_v12 = vadd.f32 %v6899_v58, %v16035_v56  ;;  %v7224_v10 = vadd.f32 %v14827_v54, %v7197_v62  ;;  %v16036_v59 = vld [vmem:[#allocation151_spill] sm:$0xff] }
 0x602   : > { %v7125_v48 = vadd.f32 %v6946_v47, %v6646_v11  ;;  %v7220_v34 = vadd.f32 %v14827_v54, %v7193_v24  ;;  %v7119_v2 = vadd.f32 %v6877_v39, %v6577_v9  ;;  %v7226_v21 = vadd.f32 %v14827_v54, %v7199_v57  ;;  %v16037_v11 = vld [vmem:[#allocation67_spill] sm:$0xff] }
 0x603   : > { %v7195_v33 = vmul.f32 %v14821_v31, %v7168_v3  ;;  %v7147_v36 = vadd.f32 %v7123_v7, %v14461_v61  ;;  %v7121_v55 = vadd.f32 %v6900_v12, %v6600_v30  ;;  %v7248_v23 = vmax.f32 %v7224_v10, 0.0  ;;  %v16039_v3 = vld [vmem:[#allocation11_spill] sm:$0xff] }
 0x604   : > { %v7149_v43 = vadd.f32 %v7125_v48, %v14467_v14  ;;  %v7244_v32 = vmax.f32 %v7220_v34, 0.0  ;;  %v7143_v61 = vadd.f32 %v7119_v2, %v14482_v60  ;;  %v7250_v4 = vmax.f32 %v7226_v21, 0.0 }
 0x605   : > { %v7222_v53 = vadd.f32 %v14827_v54, %v7195_v33  ;;  %v7171_v45 = vadd.f32 %v7147_v36, %v16036_v59  ;;  %v7145_v62 = vadd.f32 %v7121_v55, %v14484_v49  ;;  %v7272_v46 = vsel %vm7264_vm4, %v7248_v23, 0.0  ;;  %v16040_v55 = vld [vmem:[#allocation99_spill] sm:$0xff] }
 0x606   : > { %v7173_v25 = vadd.f32 %v7149_v43, %v16037_v11  ;;  %v7268_v47 = vsel %vm7264_vm4, %v7244_v32, 0.0  ;;  %v7167_v9 = vadd.f32 %v7143_v61, %v16038_v29  ;;  %v7274_v30 = vsel %vm7264_vm4, %v7250_v4, 0.0  ;;  %v16041_v11 = vld [vmem:[#allocation181_spill] sm:$0xff] }
 0x607   : > { %v7246_v18 = vmax.f32 %v7222_v53, 0.0  ;;  %v7198_v14 = vmul.f32 %v14821_v31, %v7171_v45  ;;  %v7269_v27 = vadd.f32 %v7268_v47, %v14849_v16  ;;  %v7169_v7 = vadd.f32 %v7145_v62, %v16039_v3  ;;  %v16043_v47 = vld [vmem:[#allocation110_spill] sm:$0xff] }
 0x608   : > { %v7200_v24 = vmul.f32 %v14821_v31, %v7173_v25  ;;  %v7194_v60 = vmul.f32 %v14821_v31, %v7167_v9  ;;  %v6712_v21 = vadd.f32 %v14790_v41, %v16040_v55  ;;  %v16045_v41 = vld [vmem:[#allocation64_spill] sm:$0xff] }
 0x609   : > { %v7270_v57 = vsel %vm7264_vm4, %v7246_v18, 0.0  ;;  %v7196_v49 = vmul.f32 %v14821_v31, %v7169_v7  ;;  %v7225_v39 = vadd.f32 %v14827_v54, %v7198_v14  ;;  %v16042_v18 = vld [vmem:[#allocation178_spill] sm:$0xff] }
 0x60a   : > { %v7271_v48 = vadd.f32 %v7270_v57, %v7269_v27  ;;  %v7221_v58 = vadd.f32 %v14827_v54, %v7194_v60  ;;  %v7227_v33 = vadd.f32 %v14827_v54, %v7200_v24  ;;  %v6735_v62 = vadd.f32 %v14792_v40, %v16042_v18  ;;  %v16044_v27 = vld [vmem:[#allocation172_spill] sm:$0xff]  ;;  %v16046_v60 = vld [vmem:[#allocation107_spill] sm:$0xff] }
 0x60b   : > { %v7223_v16 = vadd.f32 %v14827_v54, %v7196_v49  ;;  %v7249_v10 = vmax.f32 %v7225_v39, 0.0  ;;  %v6666_v3 = vadd.f32 %v14802_v50, %v16044_v27  ;;  %v16047_v49 = vld [vmem:[#allocation171_spill] sm:$0xff]  ;;  %v16049_v50 = vld [vmem:[#allocation68_spill] sm:$0xff] }
 0x60c   : > { %v7273_v63 = vadd.f32 %v7272_v46, %v7271_v48  ;;  %v7245_v36 = vmax.f32 %v7221_v58, 0.0  ;;  %v7251_v2 = vmax.f32 %v7227_v33, 0.0  ;;  %v6689_v48 = vadd.f32 %v14806_v6, %v16046_v60 }
 0x60d   : > { %v7247_v56 = vmax.f32 %v7223_v16, 0.0  ;;  %v7296_v32 = vsel %vm7288_vm5, %v7249_v10, 0.0  ;;  %v16050_v10 = vld [vmem:[#allocation135_spill] sm:$0xff] }
 0x60e   : > { %v14933_v12 = vadd.f32 %v7274_v30, %v7273_v63  ;;  %v7292_v34 = vsel %vm7288_vm5, %v7245_v36, 0.0  ;;  %v16048_v63 = vld [vmem:[#allocation152_spill] sm:$0xff] }
 0x60f   : > { %v7293_v43 = vadd.f32 %v7292_v34, %v14860_v17  ;;  %v7294_v53 = vsel %vm7288_vm5, %v7247_v56, 0.0  ;;  %v7298_v17 = vsel %vm7288_vm5, %v7251_v2, 0.0  ;;  %v6715_v34 = vadd.f32 %v14798_v19, %v16050_v10  ;;  %v16063_v10 = vld [vmem:[#allocation117_spill] sm:$0xff] }
 0x611   : > { %v7295_v59 = vadd.f32 %v7294_v53, %v7293_v43  ;;  %v16051_v43 = vld [vmem:[#allocation63_spill] sm:$0xff]  ;;  %v16052_v53 = vld [vmem:[#allocation136_spill] sm:$0xff] }
 0x613   : > { %v7297_v23 = vadd.f32 %v7296_v32, %v7295_v59 }
 0x615   : > { %v14949_v24 = vadd.f32 %v7298_v17, %v7297_v23  ;;  %v16058_v17 = vld [vmem:[#allocation147_spill] sm:$0xff] }
 0x616   : > { %v7011_v45 = vpop.f32.mrf.mxu2  ;;  %v6965_v9 = vpop.f32.mrf.mxu0 }
 0x617   : > { %v7012_v25 = vadd.f32 %v7011_v45, %v16041_v11  ;;  %v7034_v61 = vpop.f32.mrf.mxu3  ;;  %v6966_v4 = vadd.f32 %v6965_v9, %v16045_v41  ;;  %v6988_v57 = vpop.f32.mrf.mxu1  ;;  %v16053_v45 = vld [vmem:[#allocation185_spill] sm:$0xff] }
 0x618   : > { %v7035_v14 = vadd.f32 %v7034_v61, %v16043_v47  ;;  %v6989_v46 = vadd.f32 %v6988_v57, %v16047_v49  ;;  %v16055_v11 = vld [vmem:[#allocation45_spill] sm:$0xff]  ;;  %v16057_v47 = vld [vmem:[#allocation182_spill] sm:$0xff] }
 0x619   : > { %v7130_v29 = vadd.f32 %v7012_v25, %v6712_v21  ;;  %v7126_v58 = vadd.f32 %v6966_v4, %v6666_v3  ;;  %v16054_v21 = vld [vmem:[#allocation170_spill] sm:$0xff]  ;;  %v16056_v25 = vld [vmem:[#allocation116_spill] sm:$0xff] }
 0x61a   : > { %v7132_v7 = vadd.f32 %v7035_v14, %v6735_v62  ;;  %v7128_v30 = vadd.f32 %v6989_v46, %v6689_v48  ;;  %v16060_v48 = vld [vmem:[#allocation184_spill] sm:$0xff] }
 0x61b   : > { %v7154_v40 = vadd.f32 %v7130_v29, %v14544_v22  ;;  %v7150_v36 = vadd.f32 %v7126_v58, %v14564_v5  ;;  %v6669_v5 = vadd.f32 %v14829_v20, %v16055_v11  ;;  %v6692_v29 = vadd.f32 %v14832_v44, %v16058_v17  ;;  %v16059_v20 = vld [vmem:[#allocation143_spill] sm:$0xff] }
 0x61c   : > { %v7156_v39 = vadd.f32 %v7132_v7, %v14548_v15  ;;  %v7152_v6 = vadd.f32 %v7128_v30, %v14568_v38  ;;  %v6738_v15 = vadd.f32 %v14800_v37, %v16052_v53 }
 0x61d   : > { %v7178_v16 = vadd.f32 %v7154_v40, %v16048_v63  ;;  %v7174_v55 = vadd.f32 %v7150_v36, %v16053_v45 }
 0x61e   : > { %v7180_v33 = vadd.f32 %v7156_v39, %v16049_v50  ;;  %v7014_v56 = vpop.f32.mrf.mxu2  ;;  %v7176_v61 = vadd.f32 %v7152_v6, %v16056_v25  ;;  %v6968_v18 = vpop.f32.mrf.mxu0  ;;  %v16061_v39 = vld [vmem:[#allocation13_spill] sm:$0xff] }
 0x61f   : > { %v7015_v22 = vadd.f32 %v7014_v56, %v16051_v43  ;;  %v7037_v2 = vpop.f32.mrf.mxu3  ;;  %v7205_v59 = vmul.f32 %v14821_v31, %v7178_v16  ;;  %v7201_v62 = vmul.f32 %v14821_v31, %v7174_v55  ;;  %v6969_v37 = vadd.f32 %v6968_v18, %v16057_v47  ;;  %v6991_v14 = vpop.f32.mrf.mxu1 }
 0x620   : > { %v7038_v32 = vadd.f32 %v7037_v2, %v16054_v21  ;;  %v7207_v38 = vmul.f32 %v14821_v31, %v7180_v33  ;;  %v7203_v9 = vmul.f32 %v14821_v31, %v7176_v61  ;;  %v6992_v3 = vadd.f32 %v6991_v14, %v16059_v20  ;;  %v16062_v33 = vld [vmem:[#allocation7_spill] sm:$0xff] }
 0x621   : > { %v7131_v19 = vadd.f32 %v7015_v22, %v6715_v34  ;;  %v7232_v7 = vadd.f32 %v14827_v54, %v7205_v59  ;;  %v7228_v41 = vadd.f32 %v14827_v54, %v7201_v62  ;;  %v7127_v57 = vadd.f32 %v6969_v37, %v6669_v5  ;;  %v7329_v37 = vld [vmem:[%s15225_s8 + $0x38] sm:$0xff] }
 0x622   : > { %v7133_v23 = vadd.f32 %v7038_v32, %v6738_v15  ;;  %v7230_v60 = vadd.f32 %v14827_v54, %v7203_v9  ;;  %v7129_v49 = vadd.f32 %v6992_v3, %v6692_v29  ;;  %v7234_v44 = vadd.f32 %v14827_v54, %v7207_v38  ;;  %7370 = vmatpush.msrb.mxu3 %v7329_v37  ;;  %v16064_v29 = vld [vmem:[#allocation139_spill] sm:$0xff] }
 0x623   : > { %v7155_v27 = vadd.f32 %v7131_v19, %v14586_v1  ;;  %v7252_v46 = vmax.f32 %v7228_v41, 0.0  ;;  %v7151_v1 = vadd.f32 %v7127_v57, %v14602_v42  ;;  %v7256_v30 = vmax.f32 %v7232_v7, 0.0  ;;  %v7328_v7 = vld [vmem:[%s15225_s8 + $0x30] sm:$0xff]  ;;  %v16066_v41 = vld [vmem:[#allocation46_spill] sm:$0xff]  ;;  %v16067_v57 = vld [vmem:[#allocation113_spill] sm:$0xff] }
 0x624   : > { %v7157_v4 = vadd.f32 %v7133_v23, %v14592_v35  ;;  %v7254_v63 = vmax.f32 %v7230_v60, 0.0  ;;  %v7153_v16 = vadd.f32 %v7129_v49, %v14604_v51  ;;  %v7258_v6 = vmax.f32 %v7234_v44, 0.0  ;;  %7371 = vmatpush.msrb.mxu3 %v7328_v7 }
 0x625   : > { %v7179_v40 = vadd.f32 %v7155_v27, %v16060_v48  ;;  %v7276_v50 = vsel %vm7264_vm4, %v7252_v46, 0.0  ;;  %v7175_v36 = vadd.f32 %v7151_v1, %v16062_v33  ;;  %v7280_v53 = vsel %vm7264_vm4, %v7256_v30, 0.0  ;;  %v7330_v48 = vld [vmem:[%s15226_s9] sm:$0x3]  ;;  %v7325_v46 = vld [vmem:[%s15225_s8 + $0x18] sm:$0xff]  ;;  %v16070_v30 = vld [vmem:[#allocation6_spill] sm:$0xff] }
 0x626   : > { %v7181_v58 = vadd.f32 %v7157_v4, %v16061_v39  ;;  %v7277_v56 = vadd.f32 %v7276_v50, %v14933_v12  ;;  %v7177_v34 = vadd.f32 %v7153_v16, %v16063_v10  ;;  %v7278_v43 = vsel %vm7264_vm4, %v7254_v63, 0.0  ;;  %9128 = vmatpush.msk.msrb.mxu2 %vm7335_vm6, %v7330_v48  ;;  %v7321_v39 = vld [vmem:[%s505_s26] sm:$0x1]  ;;  %v7324_v16 = vld [vmem:[%s15225_s8 + $0x10] sm:$0xff]  ;;  %s496_s26 = sand.u32 1, %s9263_s19  }
 0x627   : > { %v7206_v35 = vmul.f32 %v14821_v31, %v7179_v40  ;;  %v7202_v42 = vmul.f32 %v14821_v31, %v7175_v36  ;;  %v7282_v55 = vsel %vm7264_vm4, %v7258_v6, 0.0  ;;  %v6758_v9 = vadd.f32 %v14846_v8, %v16064_v29  ;;  %v7327_v40 = vld [vmem:[%s15225_s8 + $0x28] sm:$0xff]  ;;  %9129 = vmatmul.msk.f32.vlgmr.msrb.gmra.mxu2 %vm7331_vm7, %v7321_v39  ;;  %v16069_v1 = vld [vmem:[#allocation145_spill] sm:$0xff]  ;;  %v16073_v6 = vld [vmem:[#allocation8_spill] sm:$0xff]  ;;  %s497_s0 = scalar_lea.vmem [#allocation2], %s496_s26  ;;  %s7462_s3 = scalar_lea.sflag [#allocation3], %s496_s26 }
 0x628   : > { %v7208_v22 = vmul.f32 %v14821_v31, %v7181_v58  ;;  %v7279_v2 = vadd.f32 %v7278_v43, %v7277_v56  ;;  %v7204_v51 = vmul.f32 %v14821_v31, %v7177_v34  ;;  %v6781_v4 = vadd.f32 %v14851_v0, %v16066_v41  ;;  %v7326_v0 = vld [vmem:[%s15225_s8 + $0x20] sm:$0xff]  ;;  %7372 = vmatpush.msrb.mxu3 %v7327_v40  ;;  %v7323_v34 = vld [vmem:[%s15225_s8 + $0x8] sm:$0xff]  ;;  %v7396_v29 = vld [vmem:[%s15228_s11 + $0x58] sm:$0xff]  ;;  %s7472_s2 = sshll.u32 %s497_s0, 4  ;;  %s7473_s2 = int_to_ptr.vmem [resolvable:$true] %s7472_s2 }
 0x629   : > { %v7233_v15 = vadd.f32 %v14827_v54, %v7206_v35  ;;  %v7229_v59 = vadd.f32 %v14827_v54, %v7202_v42  ;;  %v16072_v56 = vld [vmem:[#allocation150_spill] sm:$0xff]  ;;  %v6784_v43 = vadd.f32 %v14864_v13, %v16073_v6  ;;  %v16074_v42 = vld [vmem:[#allocation53_spill] sm:$0xff]  ;;  %v7399_v13 = vld [vmem:[%s15228_s11 + $0x70] sm:$0xff] }
 0x62a   : > { %v7281_v45 = vadd.f32 %v7280_v53, %v7279_v2  ;;  %v7231_v12 = vadd.f32 %v14827_v54, %v7204_v51  ;;  %v7235_v21 = vadd.f32 %v14827_v54, %v7208_v22  ;;  %7373 = vmatpush.msrb.mxu3 %v7326_v0  ;;  %v7322_v53 = vld [vmem:[%s15225_s8] sm:$0xff]  ;;  %v7394_v41 = vld [vmem:[%s15228_s11 + $0x48] sm:$0xff]  ;;  %v7391_v40 = vld [vmem:[%s15228_s11 + $0x30] sm:$0xff] }
 0x62b   : > { %v7253_v32 = vmax.f32 %v7229_v59, 0.0  ;;  %v7257_v25 = vmax.f32 %v7233_v15, 0.0  ;;  %v7400_v15 = vld [vmem:[%s15228_s11 + $0x78] sm:$0xff]  ;;  %v7389_v39 = vld [vmem:[%s15228_s11 + $0x20] sm:$0xff]  ;;  %v7433_v6 = vld [vmem:[%s15230_s13 + $0x50] sm:$0xff] }
 0x62c   : > { %v7255_v11 = vmax.f32 %v7231_v12, 0.0  ;;  %v15003_v5 = vadd.f32 %v7282_v55, %v7281_v45  ;;  %v7259_v18 = vmax.f32 %v7235_v21, 0.0  ;;  %7374 = vmatpush.msrb.mxu3 %v7325_v46  ;;  %7402 = vmatpush.msra.mxu0 %v7400_v15  ;;  %v16075_v55 = vld [vmem:[#allocation16_spill] sm:$0xff] }
 0x62d   : > { %v7300_v61 = vsel %vm7288_vm5, %v7253_v32, 0.0  ;;  %v7304_v23 = vsel %vm7288_vm5, %v7257_v25, 0.0  ;;  %v7398_v32 = vld [vmem:[%s15228_s11 + $0x68] sm:$0xff] }
 0x62e   : > { %v7301_v19 = vadd.f32 %v7300_v61, %v14949_v24  ;;  %v7302_v38 = vsel %vm7288_vm5, %v7255_v11, 0.0  ;;  %v7306_v14 = vsel %vm7288_vm5, %v7259_v18, 0.0  ;;  %v16065_v24 = vld [vmem:[#allocation144_spill] sm:$0xff]  ;;  %7375 = vmatpush.msrb.mxu3 %v7324_v16  ;;  %v16076_v25 = vld [vmem:[#allocation127_spill] sm:$0xff]  ;;  %7403 = vmatpush.msra.mxu0 %v7399_v13  ;;  %v16077_v18 = vld [vmem:[#allocation146_spill] sm:$0xff] }
 0x630   : > { %v7303_v62 = vadd.f32 %v7302_v38, %v7301_v19  ;;  %7376 = vmatpush.msrb.mxu3 %v7323_v34  ;;  %7404 = vmatpush.msra.mxu0 %v7398_v32  ;;  %v7434_v34 = vld [vmem:[%s15230_s13 + $0x58] sm:$0xff]  ;;  %v7424_v32 = vld [vmem:[%s15230_s13 + $0x8] sm:$0xff] }
 0x632   : > { %v7305_v47 = vadd.f32 %v7304_v23, %v7303_v62  ;;  %7377 = vmatpush.msrb.mxu3 %v7322_v53  ;;  %v7397_v62 = vld [vmem:[%s15228_s11 + $0x60] sm:$0xff]  ;;  %v7426_v53 = vld [vmem:[%s15230_s13 + $0x18] sm:$0xff] }
 0x633   : > { %7405 = vmatpush.msra.mxu0 %v7397_v62 }
 0x634   : > { %v15016_v3 = vadd.f32 %v7306_v14, %v7305_v47  ;;  %v16078_v47 = vld [vmem:[#allocation124_spill] sm:$0xff] }
 0x635   : > { %7406 = vmatpush.msra.mxu0 %v7396_v29 }
 0x636   : > { %v7057_v17 = vpop.f32.mrf.mxu0 }
 0x637   : > { %v7058_v27 = vadd.f32 %v7057_v17, %v16065_v24  ;;  %v7084_v20 = vpop.f32.mrf.mxu1 }
 0x638   : > { %v7085_v60 = vadd.f32 %v7084_v20, %v16067_v57 }
 0x639   : > { %v7134_v8 = vadd.f32 %v7058_v27, %v6758_v9 }
 0x63a   : > { %v7136_v49 = vadd.f32 %v7085_v60, %v6781_v4 }
 0x63b   : > { %v7158_v44 = vadd.f32 %v7134_v8, %v14674_v52  ;;  %v16071_v52 = vld [vmem:[#allocation165_spill] sm:$0xff] }
 0x63c   : > { %v7160_v58 = vadd.f32 %v7136_v49, %v14678_v28  ;;  %v6761_v33 = vadd.f32 %v14862_v26, %v16071_v52  ;;  %v7386_v52 = vld [vmem:[%s15228_s11 + $0x8] sm:$0xff] }
 0x63d   : > { %v7182_v63 = vadd.f32 %v7158_v44, %v16069_v1 }
 0x63e   : > { %v7184_v50 = vadd.f32 %v7160_v58, %v16070_v30  ;;  %v7060_v35 = vpop.f32.mrf.mxu0 }
 0x63f   : > { %v7209_v36 = vmul.f32 %v14821_v31, %v7182_v63  ;;  %v7061_v10 = vadd.f32 %v7060_v35, %v16072_v56  ;;  %v7087_v28 = vpop.f32.mrf.mxu1  ;;  %v7387_v35 = vld [vmem:[%s15228_s11 + $0x10] sm:$0xff] }
 0x640   : > { %v7211_v22 = vmul.f32 %v14821_v31, %v7184_v50  ;;  %v7088_v2 = vadd.f32 %v7087_v28, %v16074_v42  ;;  %v7388_v50 = vld [vmem:[%s15228_s11 + $0x18] sm:$0xff]  ;;  %v7437_v56 = vld [vmem:[%s15230_s13 + $0x70] sm:$0xff]  ;;  %v7435_v28 = vld [vmem:[%s15230_s13 + $0x60] sm:$0xff] }
 0x641   : > { %v7236_v51 = vadd.f32 %v14827_v54, %v7209_v36  ;;  %v7135_v26 = vadd.f32 %v7061_v10, %v6761_v33  ;;  %v7385_v33 = vld [vmem:[%s15228_s11] sm:$0xff]  ;;  %v7438_v36 = vld [vmem:[%s15230_s13 + $0x78] sm:$0xff]  ;;  %v7436_v10 = vld [vmem:[%s15230_s13 + $0x68] sm:$0xff] }
 0x642   : > { %v7238_v59 = vadd.f32 %v14827_v54, %v7211_v22  ;;  %v7137_v45 = vadd.f32 %v7088_v2, %v6784_v43  ;;  %7440 = vmatpush.msra.mxu1 %v7438_v36  ;;  %v7432_v43 = vld [vmem:[%s15230_s13 + $0x48] sm:$0xff]  ;;  %v7431_v22 = vld [vmem:[%s15230_s13 + $0x40] sm:$0xff]  ;;  %v7430_v42 = vld [vmem:[%s15230_s13 + $0x38] sm:$0xff] }
 0x643   : > { %v7260_v12 = vmax.f32 %v7236_v51, 0.0  ;;  %v7159_v21 = vadd.f32 %v7135_v26, %v16075_v55  ;;  %v7429_v2 = vld [vmem:[%s15230_s13 + $0x30] sm:$0xff]  ;;  %v7428_v51 = vld [vmem:[%s15230_s13 + $0x28] sm:$0xff]  ;;  %v7427_v26 = vld [vmem:[%s15230_s13 + $0x20] sm:$0xff] }
 0x644   : > { %v7262_v11 = vmax.f32 %v7238_v59, 0.0  ;;  %v7161_v61 = vadd.f32 %v7137_v45, %v16076_v25  ;;  %7441 = vmatpush.msra.mxu1 %v7437_v56  ;;  %v7382_v59 = vld [vmem:[%s15227_s10] sm:$0x1] }
 0x645   : > { %v7284_v19 = vsel %vm7264_vm4, %v7260_v12, 0.0  ;;  %v7183_v38 = vadd.f32 %v7159_v21, %v16077_v18  ;;  %v7425_v21 = vld [vmem:[%s15230_s13 + $0x10] sm:$0xff]  ;;  %v7401_v25 = vld [vmem:[%s15229_s12] sm:$0x1] }
 0x646   : > { %v7285_v23 = vadd.f32 %v7284_v19, %v15003_v5  ;;  %v7185_v37 = vadd.f32 %v7161_v61, %v16078_v47  ;;  %v7286_v14 = vsel %vm7264_vm4, %v7262_v11, 0.0  ;;  %v7395_v5 = vld [vmem:[%s15228_s11 + $0x50] sm:$0xff]  ;;  %7442 = vmatpush.msra.mxu1 %v7436_v10  ;;  %v7423_v11 = vld [vmem:[%s15230_s13] sm:$0xff] }
 0x647   : > { %v7210_v17 = vmul.f32 %v14821_v31, %v7183_v38  ;;  %7407 = vmatpush.msra.mxu0 %v7395_v5  ;;  %v7439_v38 = vld [vmem:[%s15231_s14] sm:$0x1] }
 0x648   : > { %v7287_v9 = vadd.f32 %v7286_v14, %v7285_v23  ;;  %v7212_v24 = vmul.f32 %v14821_v31, %v7185_v37  ;;  %v7393_v31 = vld [vmem:[%s15228_s11 + $0x40] sm:$0xff]  ;;  %7443 = vmatpush.msra.mxu1 %v7435_v28 }
 0x649   : > { %v7237_v27 = vadd.f32 %v14827_v54, %v7210_v17  ;;  %7408 = vmatpush.msra.mxu0 %v7394_v41 }
 0x64a   : > { %v7239_v20 = vadd.f32 %v14827_v54, %v7212_v24  ;;  %v7392_v54 = vld [vmem:[%s15228_s11 + $0x38] sm:$0xff]  ;;  %v7312_v0 = vsel %vm7264_vm4, %v7287_v9, 0.0  ;;  %7444 = vmatpush.msra.mxu1 %v7434_v34 }
 0x64b   : > { %v7261_v7 = vmax.f32 %v7237_v27, 0.0  ;;  %7409 = vmatpush.msra.mxu0 %v7393_v31 }
 0x64c   : > { %v7263_v4 = vmax.f32 %v7239_v20, 0.0  ;;  %7445 = vmatpush.msra.mxu1 %v7433_v6 }
 0x64d   : > { %v7308_v57 = vsel %vm7288_vm5, %v7261_v7, 0.0  ;;  %7410 = vmatpush.msra.mxu0 %v7392_v54 }
 0x64e   : > { %v7309_v60 = vadd.f32 %v7308_v57, %v15016_v3  ;;  %v7310_v8 = vsel %vm7288_vm5, %v7263_v4, 0.0  ;;  %v7390_v3 = vld [vmem:[%s15228_s11 + $0x28] sm:$0xff]  ;;  %7446 = vmatpush.msra.mxu1 %v7432_v43 }
 0x64f   : > { %7411 = vmatpush.msra.mxu0 %v7391_v40 }
 0x650   : > { %v7311_v48 = vadd.f32 %v7310_v8, %v7309_v60  ;;  %7447 = vmatpush.msra.mxu1 %v7431_v22 }
 0x651   : > { %7412 = vmatpush.msra.mxu0 %v7390_v3 }
 0x652   : > { %v7313_v49 = vsel %vm7288_vm5, %v7311_v48, 0.0  ;;  %7448 = vmatpush.msra.mxu1 %v7430_v42 }
 0x653   : > { %v7314_v44 = vadd.f32 %v7313_v49, %v7312_v0  ;;  %7413 = vmatpush.msra.mxu0 %v7389_v39 }
 0x654   : > { %7449 = vmatpush.msra.mxu1 %v7429_v2 }
 0x655   : > { %v7315_v46 = vrot.slane %v7314_v44, 4  ;;  %7414 = vmatpush.msra.mxu0 %v7388_v50 }
 0x656   : > { %7450 = vmatpush.msra.mxu1 %v7428_v51 }
 0x657   : > { %v7316_v58 = vadd.f32 %v7315_v46, %v7314_v44  ;;  %7415 = vmatpush.msra.mxu0 %v7387_v35 }
 0x658   : > { %7451 = vmatpush.msra.mxu1 %v7427_v26 }
 0x659   : > { %v7317_v1 = vrot.slane %v7316_v58, 2  ;;  %7416 = vmatpush.msra.mxu0 %v7386_v52 }
 0x65a   : > { %7452 = vmatpush.msra.mxu1 %v7426_v53 }
 0x65b   : > { %v7318_v63 = vadd.f32 %v7317_v1, %v7316_v58  ;;  %7417 = vmatpush.msra.mxu0 %v7385_v33 }
 0x65c   : > { %7453 = vmatpush.msra.mxu1 %v7425_v21 }
 0x65d   : > { %v7319_v16 = vrot.slane %v7318_v63, 1 }
 0x65e   : > { %7454 = vmatpush.msra.mxu1 %v7424_v32 }
 0x65f   : > { %v7320_v30 = vadd.f32 %v7319_v16, %v7318_v63 }
 0x660   : > { %7455 = vmatpush.msra.mxu1 %v7423_v11 }
 0x661   : > { %9130 = vmatmul.msk.f32.vlgmr.msrb.gmra.mxu3 %vm7264_vm4, %v7320_v30 }
 0x6aa   : > { %v7356_v15 = vpop.f32.mrf.mxu2 }
 0x6e4   : > { %v7379_v13 = vpop.f32.mrf.mxu3 }
 0x6e5   : > { %v7380_v45 = vadd.f32 %v7379_v13, %v7356_v15 }
 0x6e7   : > { %v7383_v12 = vadd.f32 %v7382_v59, %v7380_v45 }
 0x6e9   : > { %v7384_v55 = vmax.f32 %v7383_v12, 0.0 }
 0x6eb   : > { %7418 = vmatmul.f32.vlgmr.msra.gmra.mxu0 %v7384_v55 }
 0x768   : > { %v7419_v61 = vpop.f32.mrf.mxu0 }
 0x769   : > { %v7420_v19 = vadd.f32 %v7419_v61, %v7401_v25 }
 0x76b   : > { %v7422_v18 = vmax.f32 %v7420_v19, 0.0 }
 0x76d   : > { %7456 = vmatmul.f32.vlgmr.msra.gmra.mxu1 %v7422_v18 }
 0x7ea   : > { %v7457_v62 = vpop.f32.mrf.mxu1 }
 0x7eb   : > { %v7458_v23 = vadd.f32 %v7457_v62, %v7439_v38 }
 0x7ed   : > { %7460 = vst [vmem:[%s497_s0] sm:$0x1] %v7458_v23 }
 0x7ee   : > { %9236 = shalt.err (!%p9233_p3)
}
 0x7ef   : > { %9134 = dma.vmem_to_hbm [thread:$0]  (%p9391_p5), %s7473_s2, 16, %s7475_s1, %s7462_s3  }
 0x7f0 PF: > { %p9140_p4 = scmp.ge.s32.totalorder %s9271_s21, 2  ;;  %s7486_s26 = sand.u32 1, %s9259_s18  }
 0x7f1   : > { %s7487_s17 = scalar_lea.sflag [#allocation3], %s7486_s26 }
 0x7f2   : > { %p9137_p7 = pnand %p9140_p4, %p9395_p6 }
 0x7f4   : > { %p9138_p8 = pneg %p9137_p7 }
 0x7f6   : > { %9254 = dma.done.wait (%p9138_p8), %s7487_s17, 16  }
 0x7f7   : > { %9256 = vsyncadd (%p9138_p8), %s7487_s17, 4294967280  ;;  %s16079_s4 = sld [smem:[#allocation5_spill]]  ;;  %p25_p9 = scmp.ge.s32.totalorder %s9378_s24, 4  }
 0x7f8   : > { %s16080_s18 = smov %s9263_s19  ;;  %s16081_s19 = smov %s9267_s20 }
 0x7f9   : > { %s16083_s21 = smov %s9378_s24  ;;  %27 = sbr.rel (!%p25_p9) target bundleno = 9 (0x9), region = 118 }
 0x7fd   : > { %s16082_s20 = smov %s16079_s4 }
 0x7fe   :  { %7492 = vsyncpa [#allocation3], 1 }
 0x7ff   :  { %7494 = vsyncpa [#allocation3 + $0x1], 1 }

</bundles_post_ra>
